<compile_context>
chip_gen: v6e
topology: v6e:2x2x1
jax: 0.10.0
libtpu: 0.0.40
codegen_flags: <defaults>
</compile_context>

<pallas_src>
import functools

import jax
import jax.numpy as jnp
from jax.experimental import pallas as pl
from jax.experimental.pallas import tpu as pltpu

EPS = 1e-5  # nn.BatchNorm default eps


def _round_up(x, m):
    return (x + m - 1) // m * m


# ----------------------------------------------------------------------------
# Fused (matmul -> scale/shift (bias+BN) -> optional ReLU) kernel, K-tiled
# ----------------------------------------------------------------------------
def _fused_matmul_kernel(x_ref, w_ref, s_ref, t_ref, o_ref, acc_ref, *, apply_relu):
    @pl.when(pl.program_id(1) == 0)
    def _():
        acc_ref[...] = jnp.zeros_like(acc_ref)

    acc_ref[...] += jnp.dot(x_ref[...], w_ref[...],
                            preferred_element_type=jnp.float32)

    @pl.when(pl.program_id(1) == pl.num_programs(1) - 1)
    def _():
        y = acc_ref[...] * s_ref[...] + t_ref[...]
        if apply_relu:
            y = jnp.maximum(y, 0.0)
        o_ref[...] = y.astype(o_ref.dtype)


def _choose_tm(M):
    if M >= 1024:
        return 256
    if M >= 16:
        return _round_up((M + 1) // 2, 8)   # >= 2 grid steps for megacore
    return 8


def fused_matmul_scale_shift(x, w, scale, shift, *, apply_relu, out_dtype):
    """maybe_relu((x @ w) * scale + shift). x:[M,K] w:[K,N] scale/shift:[N]."""
    M, K = x.shape
    N = w.shape[1]

    tm = _choose_tm(M)
    Mp = _round_up(M, tm)
    Np = _round_up(N, 128)            # lane-dense output (no masked stores)
    if K > 2048:                      # big-K layers (conv4 / fc1): stream K
        tk = 512
        Kp = _round_up(K, tk)
    else:
        tk = K
        Kp = K

    xb = x.astype(jnp.bfloat16)
    wb = w.astype(jnp.bfloat16)
    if (Mp, Kp) != (M, K):
        xb = jnp.pad(xb, ((0, Mp - M), (0, Kp - K)))
    if (Kp, Np) != (K, N):
        wb = jnp.pad(wb, ((0, Kp - K), (0, Np - N)))
    s2 = jnp.pad(scale.astype(jnp.float32), (0, Np - N)).reshape(1, Np)
    t2 = jnp.pad(shift.astype(jnp.float32), (0, Np - N)).reshape(1, Np)

    out = pl.pallas_call(
        functools.partial(_fused_matmul_kernel, apply_relu=apply_relu),
        out_shape=jax.ShapeDtypeStruct((Mp, Np), out_dtype),
        grid_spec=pltpu.PrefetchScalarGridSpec(
            num_scalar_prefetch=0,
            grid=(Mp // tm, Kp // tk),
            in_specs=[
                pl.BlockSpec((tm, tk), lambda i, k: (i, k)),   # activations
                pl.BlockSpec((tk, Np), lambda i, k: (k, 0)),   # weights
                pl.BlockSpec((1, Np), lambda i, k: (0, 0)),    # bn scale
                pl.BlockSpec((1, Np), lambda i, k: (0, 0)),    # bn shift + bias
            ],
            out_specs=pl.BlockSpec((tm, Np), lambda i, k: (i, 0)),
            scratch_shapes=[pltpu.VMEM((tm, Np), jnp.float32)],
        ),
        compiler_params=pltpu.CompilerParams(
            dimension_semantics=("parallel", "arbitrary"),
        ),
    )(xb, wb, s2, t2)
    return out[:M, :N]


# ----------------------------------------------------------------------------
# MaxPool2d(kernel=2, stride=2): one read of x via two BlockSpec views
# ----------------------------------------------------------------------------
def _maxpool_kernel(top_ref, bot_ref, o_ref):
    C = o_ref.shape[-1]
    t = top_ref[...][:, 0]                 # (bm, Wo, 2C)  image rows 2*ho
    b = bot_ref[...][:, 0]                 # (bm, Wo, 2C)  image rows 2*ho+1
    m = jnp.maximum(t, b)
    o_ref[...] = jnp.maximum(m[:, :, :C], m[:, :, C:])   # max over w-pair


def maxpool_2x2(x):
    """x: [N, H, W, C] (H, W even) -> [N, H//2, W//2, C]."""
    N, H, W, C = x.shape
    Ho, Wo = H // 2, W // 2
    R = N * Ho
    xr = x.reshape(R, 2, Wo, 2 * C)        # free reshape of contiguous NHWC
    bm = 8 if R % 8 == 0 else R
    out = pl.pallas_call(
        _maxpool_kernel,
        out_shape=jax.ShapeDtypeStruct((R, Wo, C), x.dtype),
        grid_spec=pltpu.PrefetchScalarGridSpec(
            num_scalar_prefetch=0,
            grid=(R // bm,),
            in_specs=[
                pl.BlockSpec((bm, 1, Wo, 2 * C), lambda i: (i, 0, 0, 0)),
                pl.BlockSpec((bm, 1, Wo, 2 * C), lambda i: (i, 1, 0, 0)),
            ],
            out_specs=pl.BlockSpec((bm, Wo, C), lambda i: (i, 0, 0)),
        ),
        compiler_params=pltpu.CompilerParams(
            dimension_semantics=("parallel",),
        ),
    )(xr, xr)
    return out.reshape(N, Ho, Wo, C)


# ----------------------------------------------------------------------------
# im2col glue (plain JAX, fused under jit) — feature order (ki, kj, cin)
# ----------------------------------------------------------------------------
def im2col_same(x, kh, kw):
    """[N,H,W,C] -> [N*H*W, kh*kw*C] with feature order (ki, kj, cin)."""
    N, H, W, C = x.shape
    ph, pw = kh // 2, kw // 2
    xp = jnp.pad(x, ((0, 0), (ph, ph), (pw, pw), (0, 0)))
    cols = [xp[:, i:i + H, j:j + W, :] for i in range(kh) for j in range(kw)]
    patches = jnp.concatenate(cols, axis=-1)        # [N, H, W, kh*kw*C]
    return patches.reshape(N * H * W, kh * kw * C)


# ----------------------------------------------------------------------------
# Deterministic synthetic parameters (PyTorch layouts, converted on the fly)
# ----------------------------------------------------------------------------
CONV_CFG = [(1, 64, 3), (64, 128, 5), (128, 512, 3), (512, 512, 3)]
FC_CFG = [(512 * 3 * 3, 256), (256, 512), (512, 7)]


def init_params(key):
    keys = iter(jax.random.split(key, 32))

    def nrm(shape, s=0.05):
        return jax.random.normal(next(keys), shape, jnp.float32) * s

    params = {}
    for idx, (cin, cout, k) in enumerate(CONV_CFG, start=1):
        params[f"conv{idx}"] = dict(
            w=nrm((cout, cin, k, k)),          # PyTorch Conv2d weight layout
            b=nrm((cout,)),
            gamma=1.0 + nrm((cout,)),
            beta=nrm((cout,)),
        )
    for idx, (fin, fout) in enumerate(FC_CFG, start=1):
        p = dict(w=nrm((fout, fin)), b=nrm((fout,)))   # PyTorch Linear layout
        if idx < 3:
            p["gamma"] = 1.0 + nrm((fout,))
            p["beta"] = nrm((fout,))
        params[f"fc{idx}"] = p
    return params


# ----------------------------------------------------------------------------
# Full forward pass (eval mode)
# ----------------------------------------------------------------------------
@jax.jit
def fer_cnn_forward(x_nchw, params):
    inv_std = 1.0 / jnp.sqrt(1.0 + EPS)            # eval BN: mean=0, var=1
    x = jnp.transpose(x_nchw, (0, 2, 3, 1)).astype(jnp.bfloat16)   # -> NHWC

    # conv blocks: conv -> bn -> relu -> maxpool -> dropout(identity in eval)
    for idx, (_, cout, k) in enumerate(CONV_CFG, start=1):
        p = params[f"conv{idx}"]
        N, H, W, _ = x.shape
        patches = im2col_same(x, k, k)                          # [N*H*W, k*k*Cin]
        w2d = p["w"].transpose(2, 3, 1, 0).reshape(-1, cout)    # [(ki,kj,cin), Cout]
        scale = p["gamma"] * inv_std
        shift = p["b"] * scale + p["beta"]
        y = fused_matmul_scale_shift(patches, w2d, scale, shift,
                                     apply_relu=True, out_dtype=jnp.bfloat16)
        x = maxpool_2x2(y.reshape(N, H, W, cout))

    # PyTorch x.view(-1, 512*3*3) flattens in NCHW order
    N = x.shape[0]
    flat = jnp.transpose(x, (0, 3, 1, 2)).reshape(N, 512 * 3 * 3)

    # fc1 -> bn -> relu
    p = params["fc1"]
    scale = p["gamma"] * inv_std
    shift = p["b"] * scale + p["beta"]
    h = fused_matmul_scale_shift(flat, p["w"].T, scale, shift,
                                 apply_relu=True, out_dtype=jnp.bfloat16)
    # fc2 -> bn -> relu
    p = params["fc2"]
    scale = p["gamma"] * inv_std
    shift = p["b"] * scale + p["beta"]
    h = fused_matmul_scale_shift(h, p["w"].T, scale, shift,
                                 apply_relu=True, out_dtype=jnp.bfloat16)
    # fc3 (logits, no bn / relu)
    p = params["fc3"]
    logits = fused_matmul_scale_shift(
        h, p["w"].T, jnp.ones((7,), jnp.float32), p["b"],
        apply_relu=False, out_dtype=jnp.float32)
    return logits


if __name__ == "__main__":
    key = jax.random.PRNGKey(0)
    pkey, xkey = jax.random.split(key)
    params = init_params(pkey)
    # FER input: 48x48 grayscale, NCHW like PyTorch (4 pools -> 3x3x512 for fc1)
    x = jax.random.normal(xkey, (2, 1, 48, 48), jnp.float32)
    out = fer_cnn_forward(x, params)
    jax.block_until_ready(out)
    assert out.shape == (2, 7) and out.dtype == jnp.float32
    print("KERNEL_OK")
</pallas_src>

<mosaic_0001>
module attributes {stable_mosaic.version = 11 : i64} {
  func.func @_fused_matmul_kernel(%arg0: i32, %arg1: i32, %arg2: memref<256x9xbf16, #tpu.memory_space<vmem>>, %arg3: memref<9x128xbf16, #tpu.memory_space<vmem>>, %arg4: memref<1x128xf32, #tpu.memory_space<vmem>>, %arg5: memref<1x128xf32, #tpu.memory_space<vmem>>, %arg6: memref<256x128xbf16, #tpu.memory_space<vmem>>, %arg7: memref<256x128xf32, #tpu.memory_space<vmem>>) attributes {dimension_semantics = [#tpu.dimension_semantics<parallel>, #tpu.dimension_semantics<arbitrary>], iteration_bounds = array<i64: 18, 1>, scalar_prefetch = 0 : i64, scratch_operands = 1 : i64, tpu.core_type = #tpu.core_type<tc>, window_params = [{transform_indices = @transform_0, window_bounds = array<i64: 256, 9>}, {transform_indices = @transform_1, window_bounds = array<i64: 9, 128>}, {pipeline_mode = #tpu.pipeline_mode<synchronous>, transform_indices = @transform_2, window_bounds = array<i64: 1, 128>}, {pipeline_mode = #tpu.pipeline_mode<synchronous>, transform_indices = @transform_3, window_bounds = array<i64: 1, 128>}, {transform_indices = @transform_4, window_bounds = array<i64: 256, 128>}]} {
    %c0_i32 = arith.constant 0 : i32
    %0 = arith.cmpi eq, %arg1, %c0_i32 : i32
    %1 = arith.extui %0 : i1 to i32
    %c0_i32_0 = arith.constant 0 : i32
    %2 = arith.cmpi ne, %1, %c0_i32_0 : i32
    scf.if %2 {
      %cst_10 = arith.constant 0.000000e+00 : f32
      %12 = vector.broadcast %cst_10 : f32 to vector<256x128xf32>
      %c0_11 = arith.constant 0 : index
      %c0_12 = arith.constant 0 : index
      %13 = vector.load %arg7[%c0_11, %c0_12] : memref<256x128xf32, #tpu.memory_space<vmem>>, vector<256x128xf32>
      tpu.vector_store %arg7[%c0_11, %c0_12], %12 {strides = array<i32>} : memref<256x128xf32, #tpu.memory_space<vmem>>, vector<256x128xf32>,
    } else {
    }
    %c0 = arith.constant 0 : index
    %c0_1 = arith.constant 0 : index
    %3 = vector.load %arg7[%c0, %c0_1] : memref<256x128xf32, #tpu.memory_space<vmem>>, vector<256x128xf32>
    %c0_2 = arith.constant 0 : index
    %c0_3 = arith.constant 0 : index
    %4 = vector.load %arg2[%c0_2, %c0_3] : memref<256x9xbf16, #tpu.memory_space<vmem>>, vector<256x9xbf16>
    %c0_4 = arith.constant 0 : index
    %c0_5 = arith.constant 0 : index
    %5 = vector.load %arg3[%c0_4, %c0_5] : memref<9x128xbf16, #tpu.memory_space<vmem>>, vector<9x128xbf16>
    %cst = arith.constant dense<0.000000e+00> : vector<256x128xf32>
    %6 = tpu.matmul %4, %5, %cst {dimension_numbers = #tpu.dot_dimension_numbers<[1], [0], [0], [1], [0, 0, 1, 1], [], []>} : vector<256x9xbf16>, vector<9x128xbf16>, vector<256x128xf32> -> vector<256x128xf32>
    %7 = arith.addf %3, %6 : vector<256x128xf32>
    %c0_6 = arith.constant 0 : index
    %c0_7 = arith.constant 0 : index
    %8 = vector.load %arg7[%c0_6, %c0_7] : memref<256x128xf32, #tpu.memory_space<vmem>>, vector<256x128xf32>
    tpu.vector_store %arg7[%c0_6, %c0_7], %7 {strides = array<i32>} : memref<256x128xf32, #tpu.memory_space<vmem>>, vector<256x128xf32>,
    %c0_i32_8 = arith.constant 0 : i32
    %9 = arith.cmpi eq, %arg1, %c0_i32_8 : i32
    %10 = arith.extui %9 : i1 to i32
    %c0_i32_9 = arith.constant 0 : i32
    %11 = arith.cmpi ne, %10, %c0_i32_9 : i32
    scf.if %11 {
      %c0_10 = arith.constant 0 : index
      %c0_11 = arith.constant 0 : index
      %12 = vector.load %arg7[%c0_10, %c0_11] : memref<256x128xf32, #tpu.memory_space<vmem>>, vector<256x128xf32>
      %c0_12 = arith.constant 0 : index
      %c0_13 = arith.constant 0 : index
      %13 = vector.load %arg4[%c0_12, %c0_13] : memref<1x128xf32, #tpu.memory_space<vmem>>, vector<1x128xf32>
      %14 = vector.broadcast %13 : vector<1x128xf32> to vector<256x128xf32>
      %15 = arith.mulf %12, %14 : vector<256x128xf32>
      %c0_14 = arith.constant 0 : index
      %c0_15 = arith.constant 0 : index
      %16 = vector.load %arg5[%c0_14, %c0_15] : memref<1x128xf32, #tpu.memory_space<vmem>>, vector<1x128xf32>
      %17 = vector.broadcast %16 : vector<1x128xf32> to vector<256x128xf32>
      %18 = arith.addf %15, %17 : vector<256x128xf32>
      %cst_16 = arith.constant 0.000000e+00 : f32
      %19 = vector.broadcast %cst_16 : f32 to vector<256x128xf32>
      %20 = arith.maximumf %18, %19 : vector<256x128xf32>
      %21 = arith.truncf %20 : vector<256x128xf32> to vector<256x128xbf16>
      %c0_17 = arith.constant 0 : index
      %c0_18 = arith.constant 0 : index
      %22 = vector.load %arg6[%c0_17, %c0_18] : memref<256x128xbf16, #tpu.memory_space<vmem>>, vector<256x128xbf16>
      tpu.vector_store %arg6[%c0_17, %c0_18], %21 {strides = array<i32>} : memref<256x128xbf16, #tpu.memory_space<vmem>>, vector<256x128xbf16>,
    } else {
    }
    return
  }
  func.func @transform_0(%arg0: i32, %arg1: i32) -> (i32, i32) {
    %c0_i32 = arith.constant 0 : i32
    return %arg0, %arg1 : i32, i32
  }
  func.func @transform_1(%arg0: i32, %arg1: i32) -> (i32, i32) {
    %c0_i32 = arith.constant 0 : i32
    %c0_i32_0 = arith.constant 0 : i32
    return %arg1, %c0_i32 : i32, i32
  }
  func.func @transform_2(%arg0: i32, %arg1: i32) -> (i32, i32) {
    %c0_i32 = arith.constant 0 : i32
    %c0_i32_0 = arith.constant 0 : i32
    %c0_i32_1 = arith.constant 0 : i32
    return %c0_i32, %c0_i32_0 : i32, i32
  }
  func.func @transform_3(%arg0: i32, %arg1: i32) -> (i32, i32) {
    %c0_i32 = arith.constant 0 : i32
    %c0_i32_0 = arith.constant 0 : i32
    %c0_i32_1 = arith.constant 0 : i32
    return %c0_i32, %c0_i32_0 : i32, i32
  }
  func.func @transform_4(%arg0: i32, %arg1: i32) -> (i32, i32) {
    %c0_i32 = arith.constant 0 : i32
    %c0_i32_0 = arith.constant 0 : i32
    return %arg0, %c0_i32 : i32, i32
  }
}

module attributes {stable_mosaic.version = 11 : i64} {
  func.func @_maxpool_kernel(%arg0: i32, %arg1: memref<8x1x24x128xbf16, #tpu.memory_space<vmem>>, %arg2: memref<8x1x24x128xbf16, #tpu.memory_space<vmem>>, %arg3: memref<8x24x64xbf16, #tpu.memory_space<vmem>>) attributes {dimension_semantics = [#tpu.dimension_semantics<parallel>], iteration_bounds = array<i64: 6>, scalar_prefetch = 0 : i64, scratch_operands = 0 : i64, tpu.core_type = #tpu.core_type<tc>, window_params = [{transform_indices = @transform_0, window_bounds = array<i64: 8, 1, 24, 128>}, {transform_indices = @transform_1, window_bounds = array<i64: 8, 1, 24, 128>}, {transform_indices = @transform_2, window_bounds = array<i64: 8, 24, 64>}]} {
    %c0 = arith.constant 0 : index
    %c0_0 = arith.constant 0 : index
    %c0_1 = arith.constant 0 : index
    %c0_2 = arith.constant 0 : index
    %0 = vector.load %arg1[%c0, %c0_0, %c0_1, %c0_2] : memref<8x1x24x128xbf16, #tpu.memory_space<vmem>>, vector<8x1x24x128xbf16>
    %1 = vector.shape_cast %0 : vector<8x1x24x128xbf16> to vector<8x24x128xbf16>
    %c0_3 = arith.constant 0 : index
    %c0_4 = arith.constant 0 : index
    %c0_5 = arith.constant 0 : index
    %c0_6 = arith.constant 0 : index
    %2 = vector.load %arg2[%c0_3, %c0_4, %c0_5, %c0_6] : memref<8x1x24x128xbf16, #tpu.memory_space<vmem>>, vector<8x1x24x128xbf16>
    %3 = vector.shape_cast %2 : vector<8x1x24x128xbf16> to vector<8x24x128xbf16>
    %4 = arith.maximumf %1, %3 : vector<8x24x128xbf16>
    %5 = vector.extract_strided_slice %4 {offsets = [0, 0, 0], sizes = [8, 24, 64], strides = [1, 1, 1]} : vector<8x24x128xbf16> to vector<8x24x64xbf16>
    %6 = vector.extract_strided_slice %4 {offsets = [0, 0, 64], sizes = [8, 24, 64], strides = [1, 1, 1]} : vector<8x24x128xbf16> to vector<8x24x64xbf16>
    %7 = arith.maximumf %5, %6 : vector<8x24x64xbf16>
    %c0_7 = arith.constant 0 : index
    %c0_8 = arith.constant 0 : index
    %c0_9 = arith.constant 0 : index
    %8 = vector.load %arg3[%c0_7, %c0_8, %c0_9] : memref<8x24x64xbf16, #tpu.memory_space<vmem>>, vector<8x24x64xbf16>
    tpu.vector_store %arg3[%c0_7, %c0_8, %c0_9], %7 {strides = array<i32>} : memref<8x24x64xbf16, #tpu.memory_space<vmem>>, vector<8x24x64xbf16>,
    return
  }
  func.func @transform_0(%arg0: i32) -> (i32, i32, i32, i32) {
    %c0_i32 = arith.constant 0 : i32
    %c0_i32_0 = arith.constant 0 : i32
    %c0_i32_1 = arith.constant 0 : i32
    %c0_i32_2 = arith.constant 0 : i32
    return %arg0, %c0_i32, %c0_i32_0, %c0_i32_1 : i32, i32, i32, i32
  }
  func.func @transform_1(%arg0: i32) -> (i32, i32, i32, i32) {
    %c1_i32 = arith.constant 1 : i32
    %c0_i32 = arith.constant 0 : i32
    %c0_i32_0 = arith.constant 0 : i32
    %c0_i32_1 = arith.constant 0 : i32
    return %arg0, %c1_i32, %c0_i32, %c0_i32_0 : i32, i32, i32, i32
  }
  func.func @transform_2(%arg0: i32) -> (i32, i32, i32) {
    %c0_i32 = arith.constant 0 : i32
    %c0_i32_0 = arith.constant 0 : i32
    %c0_i32_1 = arith.constant 0 : i32
    return %arg0, %c0_i32, %c0_i32_0 : i32, i32, i32
  }
}

module attributes {stable_mosaic.version = 11 : i64} {
  func.func @_fused_matmul_kernel(%arg0: i32, %arg1: i32, %arg2: memref<256x1600xbf16, #tpu.memory_space<vmem>>, %arg3: memref<1600x128xbf16, #tpu.memory_space<vmem>>, %arg4: memref<1x128xf32, #tpu.memory_space<vmem>>, %arg5: memref<1x128xf32, #tpu.memory_space<vmem>>, %arg6: memref<256x128xbf16, #tpu.memory_space<vmem>>, %arg7: memref<256x128xf32, #tpu.memory_space<vmem>>) attributes {dimension_semantics = [#tpu.dimension_semantics<parallel>, #tpu.dimension_semantics<arbitrary>], iteration_bounds = array<i64: 5, 1>, scalar_prefetch = 0 : i64, scratch_operands = 1 : i64, tpu.core_type = #tpu.core_type<tc>, window_params = [{transform_indices = @transform_0, window_bounds = array<i64: 256, 1600>}, {transform_indices = @transform_1, window_bounds = array<i64: 1600, 128>}, {pipeline_mode = #tpu.pipeline_mode<synchronous>, transform_indices = @transform_2, window_bounds = array<i64: 1, 128>}, {pipeline_mode = #tpu.pipeline_mode<synchronous>, transform_indices = @transform_3, window_bounds = array<i64: 1, 128>}, {transform_indices = @transform_4, window_bounds = array<i64: 256, 128>}]} {
    %c0_i32 = arith.constant 0 : i32
    %0 = arith.cmpi eq, %arg1, %c0_i32 : i32
    %1 = arith.extui %0 : i1 to i32
    %c0_i32_0 = arith.constant 0 : i32
    %2 = arith.cmpi ne, %1, %c0_i32_0 : i32
    scf.if %2 {
      %cst_10 = arith.constant 0.000000e+00 : f32
      %12 = vector.broadcast %cst_10 : f32 to vector<256x128xf32>
      %c0_11 = arith.constant 0 : index
      %c0_12 = arith.constant 0 : index
      %13 = vector.load %arg7[%c0_11, %c0_12] : memref<256x128xf32, #tpu.memory_space<vmem>>, vector<256x128xf32>
      tpu.vector_store %arg7[%c0_11, %c0_12], %12 {strides = array<i32>} : memref<256x128xf32, #tpu.memory_space<vmem>>, vector<256x128xf32>,
    } else {
    }
    %c0 = arith.constant 0 : index
    %c0_1 = arith.constant 0 : index
    %3 = vector.load %arg7[%c0, %c0_1] : memref<256x128xf32, #tpu.memory_space<vmem>>, vector<256x128xf32>
    %c0_2 = arith.constant 0 : index
    %c0_3 = arith.constant 0 : index
    %4 = vector.load %arg2[%c0_2, %c0_3] : memref<256x1600xbf16, #tpu.memory_space<vmem>>, vector<256x1600xbf16>
    %c0_4 = arith.constant 0 : index
    %c0_5 = arith.constant 0 : index
    %5 = vector.load %arg3[%c0_4, %c0_5] : memref<1600x128xbf16, #tpu.memory_space<vmem>>, vector<1600x128xbf16>
    %cst = arith.constant dense<0.000000e+00> : vector<256x128xf32>
    %6 = tpu.matmul %4, %5, %cst {dimension_numbers = #tpu.dot_dimension_numbers<[1], [0], [0], [1], [0, 0, 1, 1], [], []>} : vector<256x1600xbf16>, vector<1600x128xbf16>, vector<256x128xf32> -> vector<256x128xf32>
    %7 = arith.addf %3, %6 : vector<256x128xf32>
    %c0_6 = arith.constant 0 : index
    %c0_7 = arith.constant 0 : index
    %8 = vector.load %arg7[%c0_6, %c0_7] : memref<256x128xf32, #tpu.memory_space<vmem>>, vector<256x128xf32>
    tpu.vector_store %arg7[%c0_6, %c0_7], %7 {strides = array<i32>} : memref<256x128xf32, #tpu.memory_space<vmem>>, vector<256x128xf32>,
    %c0_i32_8 = arith.constant 0 : i32
    %9 = arith.cmpi eq, %arg1, %c0_i32_8 : i32
    %10 = arith.extui %9 : i1 to i32
    %c0_i32_9 = arith.constant 0 : i32
    %11 = arith.cmpi ne, %10, %c0_i32_9 : i32
    scf.if %11 {
      %c0_10 = arith.constant 0 : index
      %c0_11 = arith.constant 0 : index
      %12 = vector.load %arg7[%c0_10, %c0_11] : memref<256x128xf32, #tpu.memory_space<vmem>>, vector<256x128xf32>
      %c0_12 = arith.constant 0 : index
      %c0_13 = arith.constant 0 : index
      %13 = vector.load %arg4[%c0_12, %c0_13] : memref<1x128xf32, #tpu.memory_space<vmem>>, vector<1x128xf32>
      %14 = vector.broadcast %13 : vector<1x128xf32> to vector<256x128xf32>
      %15 = arith.mulf %12, %14 : vector<256x128xf32>
      %c0_14 = arith.constant 0 : index
      %c0_15 = arith.constant 0 : index
      %16 = vector.load %arg5[%c0_14, %c0_15] : memref<1x128xf32, #tpu.memory_space<vmem>>, vector<1x128xf32>
      %17 = vector.broadcast %16 : vector<1x128xf32> to vector<256x128xf32>
      %18 = arith.addf %15, %17 : vector<256x128xf32>
      %cst_16 = arith.constant 0.000000e+00 : f32
      %19 = vector.broadcast %cst_16 : f32 to vector<256x128xf32>
      %20 = arith.maximumf %18, %19 : vector<256x128xf32>
      %21 = arith.truncf %20 : vector<256x128xf32> to vector<256x128xbf16>
      %c0_17 = arith.constant 0 : index
      %c0_18 = arith.constant 0 : index
      %22 = vector.load %arg6[%c0_17, %c0_18] : memref<256x128xbf16, #tpu.memory_space<vmem>>, vector<256x128xbf16>
      tpu.vector_store %arg6[%c0_17, %c0_18], %21 {strides = array<i32>} : memref<256x128xbf16, #tpu.memory_space<vmem>>, vector<256x128xbf16>,
    } else {
    }
    return
  }
  func.func @transform_0(%arg0: i32, %arg1: i32) -> (i32, i32) {
    %c0_i32 = arith.constant 0 : i32
    return %arg0, %arg1 : i32, i32
  }
  func.func @transform_1(%arg0: i32, %arg1: i32) -> (i32, i32) {
    %c0_i32 = arith.constant 0 : i32
    %c0_i32_0 = arith.constant 0 : i32
    return %arg1, %c0_i32 : i32, i32
  }
  func.func @transform_2(%arg0: i32, %arg1: i32) -> (i32, i32) {
    %c0_i32 = arith.constant 0 : i32
    %c0_i32_0 = arith.constant 0 : i32
    %c0_i32_1 = arith.constant 0 : i32
    return %c0_i32, %c0_i32_0 : i32, i32
  }
  func.func @transform_3(%arg0: i32, %arg1: i32) -> (i32, i32) {
    %c0_i32 = arith.constant 0 : i32
    %c0_i32_0 = arith.constant 0 : i32
    %c0_i32_1 = arith.constant 0 : i32
    return %c0_i32, %c0_i32_0 : i32, i32
  }
  func.func @transform_4(%arg0: i32, %arg1: i32) -> (i32, i32) {
    %c0_i32 = arith.constant 0 : i32
    %c0_i32_0 = arith.constant 0 : i32
    return %arg0, %c0_i32 : i32, i32
  }
}

module attributes {stable_mosaic.version = 11 : i64} {
  func.func @_maxpool_kernel(%arg0: i32, %arg1: memref<8x1x12x256xbf16, #tpu.memory_space<vmem>>, %arg2: memref<8x1x12x256xbf16, #tpu.memory_space<vmem>>, %arg3: memref<8x12x128xbf16, #tpu.memory_space<vmem>>) attributes {dimension_semantics = [#tpu.dimension_semantics<parallel>], iteration_bounds = array<i64: 3>, scalar_prefetch = 0 : i64, scratch_operands = 0 : i64, tpu.core_type = #tpu.core_type<tc>, window_params = [{transform_indices = @transform_0, window_bounds = array<i64: 8, 1, 12, 256>}, {transform_indices = @transform_1, window_bounds = array<i64: 8, 1, 12, 256>}, {transform_indices = @transform_2, window_bounds = array<i64: 8, 12, 128>}]} {
    %c0 = arith.constant 0 : index
    %c0_0 = arith.constant 0 : index
    %c0_1 = arith.constant 0 : index
    %c0_2 = arith.constant 0 : index
    %0 = vector.load %arg1[%c0, %c0_0, %c0_1, %c0_2] : memref<8x1x12x256xbf16, #tpu.memory_space<vmem>>, vector<8x1x12x256xbf16>
    %1 = vector.shape_cast %0 : vector<8x1x12x256xbf16> to vector<8x12x256xbf16>
    %c0_3 = arith.constant 0 : index
    %c0_4 = arith.constant 0 : index
    %c0_5 = arith.constant 0 : index
    %c0_6 = arith.constant 0 : index
    %2 = vector.load %arg2[%c0_3, %c0_4, %c0_5, %c0_6] : memref<8x1x12x256xbf16, #tpu.memory_space<vmem>>, vector<8x1x12x256xbf16>
    %3 = vector.shape_cast %2 : vector<8x1x12x256xbf16> to vector<8x12x256xbf16>
    %4 = arith.maximumf %1, %3 : vector<8x12x256xbf16>
    %5 = vector.extract_strided_slice %4 {offsets = [0, 0, 0], sizes = [8, 12, 128], strides = [1, 1, 1]} : vector<8x12x256xbf16> to vector<8x12x128xbf16>
    %6 = vector.extract_strided_slice %4 {offsets = [0, 0, 128], sizes = [8, 12, 128], strides = [1, 1, 1]} : vector<8x12x256xbf16> to vector<8x12x128xbf16>
    %7 = arith.maximumf %5, %6 : vector<8x12x128xbf16>
    %c0_7 = arith.constant 0 : index
    %c0_8 = arith.constant 0 : index
    %c0_9 = arith.constant 0 : index
    %8 = vector.load %arg3[%c0_7, %c0_8, %c0_9] : memref<8x12x128xbf16, #tpu.memory_space<vmem>>, vector<8x12x128xbf16>
    tpu.vector_store %arg3[%c0_7, %c0_8, %c0_9], %7 {strides = array<i32>} : memref<8x12x128xbf16, #tpu.memory_space<vmem>>, vector<8x12x128xbf16>,
    return
  }
  func.func @transform_0(%arg0: i32) -> (i32, i32, i32, i32) {
    %c0_i32 = arith.constant 0 : i32
    %c0_i32_0 = arith.constant 0 : i32
    %c0_i32_1 = arith.constant 0 : i32
    %c0_i32_2 = arith.constant 0 : i32
    return %arg0, %c0_i32, %c0_i32_0, %c0_i32_1 : i32, i32, i32, i32
  }
  func.func @transform_1(%arg0: i32) -> (i32, i32, i32, i32) {
    %c1_i32 = arith.constant 1 : i32
    %c0_i32 = arith.constant 0 : i32
    %c0_i32_0 = arith.constant 0 : i32
    %c0_i32_1 = arith.constant 0 : i32
    return %arg0, %c1_i32, %c0_i32, %c0_i32_0 : i32, i32, i32, i32
  }
  func.func @transform_2(%arg0: i32) -> (i32, i32, i32) {
    %c0_i32 = arith.constant 0 : i32
    %c0_i32_0 = arith.constant 0 : i32
    %c0_i32_1 = arith.constant 0 : i32
    return %arg0, %c0_i32, %c0_i32_0 : i32, i32, i32
  }
}

module attributes {stable_mosaic.version = 11 : i64} {
  func.func @_fused_matmul_kernel(%arg0: i32, %arg1: i32, %arg2: memref<144x1152xbf16, #tpu.memory_space<vmem>>, %arg3: memref<1152x512xbf16, #tpu.memory_space<vmem>>, %arg4: memref<1x512xf32, #tpu.memory_space<vmem>>, %arg5: memref<1x512xf32, #tpu.memory_space<vmem>>, %arg6: memref<144x512xbf16, #tpu.memory_space<vmem>>, %arg7: memref<144x512xf32, #tpu.memory_space<vmem>>) attributes {dimension_semantics = [#tpu.dimension_semantics<parallel>, #tpu.dimension_semantics<arbitrary>], iteration_bounds = array<i64: 2, 1>, scalar_prefetch = 0 : i64, scratch_operands = 1 : i64, tpu.core_type = #tpu.core_type<tc>, window_params = [{transform_indices = @transform_0, window_bounds = array<i64: 144, 1152>}, {transform_indices = @transform_1, window_bounds = array<i64: 1152, 512>}, {pipeline_mode = #tpu.pipeline_mode<synchronous>, transform_indices = @transform_2, window_bounds = array<i64: 1, 512>}, {pipeline_mode = #tpu.pipeline_mode<synchronous>, transform_indices = @transform_3, window_bounds = array<i64: 1, 512>}, {transform_indices = @transform_4, window_bounds = array<i64: 144, 512>}]} {
    %c0_i32 = arith.constant 0 : i32
    %0 = arith.cmpi eq, %arg1, %c0_i32 : i32
    %1 = arith.extui %0 : i1 to i32
    %c0_i32_0 = arith.constant 0 : i32
    %2 = arith.cmpi ne, %1, %c0_i32_0 : i32
    scf.if %2 {
      %cst_10 = arith.constant 0.000000e+00 : f32
      %12 = vector.broadcast %cst_10 : f32 to vector<144x512xf32>
      %c0_11 = arith.constant 0 : index
      %c0_12 = arith.constant 0 : index
      %13 = vector.load %arg7[%c0_11, %c0_12] : memref<144x512xf32, #tpu.memory_space<vmem>>, vector<144x512xf32>
      tpu.vector_store %arg7[%c0_11, %c0_12], %12 {strides = array<i32>} : memref<144x512xf32, #tpu.memory_space<vmem>>, vector<144x512xf32>,
    } else {
    }
    %c0 = arith.constant 0 : index
    %c0_1 = arith.constant 0 : index
    %3 = vector.load %arg7[%c0, %c0_1] : memref<144x512xf32, #tpu.memory_space<vmem>>, vector<144x512xf32>
    %c0_2 = arith.constant 0 : index
    %c0_3 = arith.constant 0 : index
    %4 = vector.load %arg2[%c0_2, %c0_3] : memref<144x1152xbf16, #tpu.memory_space<vmem>>, vector<144x1152xbf16>
    %c0_4 = arith.constant 0 : index
    %c0_5 = arith.constant 0 : index
    %5 = vector.load %arg3[%c0_4, %c0_5] : memref<1152x512xbf16, #tpu.memory_space<vmem>>, vector<1152x512xbf16>
    %cst = arith.constant dense<0.000000e+00> : vector<144x512xf32>
    %6 = tpu.matmul %4, %5, %cst {dimension_numbers = #tpu.dot_dimension_numbers<[1], [0], [0], [1], [0, 0, 1, 1], [], []>} : vector<144x1152xbf16>, vector<1152x512xbf16>, vector<144x512xf32> -> vector<144x512xf32>
    %7 = arith.addf %3, %6 : vector<144x512xf32>
    %c0_6 = arith.constant 0 : index
    %c0_7 = arith.constant 0 : index
    %8 = vector.load %arg7[%c0_6, %c0_7] : memref<144x512xf32, #tpu.memory_space<vmem>>, vector<144x512xf32>
    tpu.vector_store %arg7[%c0_6, %c0_7], %7 {strides = array<i32>} : memref<144x512xf32, #tpu.memory_space<vmem>>, vector<144x512xf32>,
    %c0_i32_8 = arith.constant 0 : i32
    %9 = arith.cmpi eq, %arg1, %c0_i32_8 : i32
    %10 = arith.extui %9 : i1 to i32
    %c0_i32_9 = arith.constant 0 : i32
    %11 = arith.cmpi ne, %10, %c0_i32_9 : i32
    scf.if %11 {
      %c0_10 = arith.constant 0 : index
      %c0_11 = arith.constant 0 : index
      %12 = vector.load %arg7[%c0_10, %c0_11] : memref<144x512xf32, #tpu.memory_space<vmem>>, vector<144x512xf32>
      %c0_12 = arith.constant 0 : index
      %c0_13 = arith.constant 0 : index
      %13 = vector.load %arg4[%c0_12, %c0_13] : memref<1x512xf32, #tpu.memory_space<vmem>>, vector<1x512xf32>
      %14 = vector.broadcast %13 : vector<1x512xf32> to vector<144x512xf32>
      %15 = arith.mulf %12, %14 : vector<144x512xf32>
      %c0_14 = arith.constant 0 : index
      %c0_15 = arith.constant 0 : index
      %16 = vector.load %arg5[%c0_14, %c0_15] : memref<1x512xf32, #tpu.memory_space<vmem>>, vector<1x512xf32>
      %17 = vector.broadcast %16 : vector<1x512xf32> to vector<144x512xf32>
      %18 = arith.addf %15, %17 : vector<144x512xf32>
      %cst_16 = arith.constant 0.000000e+00 : f32
      %19 = vector.broadcast %cst_16 : f32 to vector<144x512xf32>
      %20 = arith.maximumf %18, %19 : vector<144x512xf32>
      %21 = arith.truncf %20 : vector<144x512xf32> to vector<144x512xbf16>
      %c0_17 = arith.constant 0 : index
      %c0_18 = arith.constant 0 : index
      %22 = vector.load %arg6[%c0_17, %c0_18] : memref<144x512xbf16, #tpu.memory_space<vmem>>, vector<144x512xbf16>
      tpu.vector_store %arg6[%c0_17, %c0_18], %21 {strides = array<i32>} : memref<144x512xbf16, #tpu.memory_space<vmem>>, vector<144x512xbf16>,
    } else {
    }
    return
  }
  func.func @transform_0(%arg0: i32, %arg1: i32) -> (i32, i32) {
    %c0_i32 = arith.constant 0 : i32
    return %arg0, %arg1 : i32, i32
  }
  func.func @transform_1(%arg0: i32, %arg1: i32) -> (i32, i32) {
    %c0_i32 = arith.constant 0 : i32
    %c0_i32_0 = arith.constant 0 : i32
    return %arg1, %c0_i32 : i32, i32
  }
  func.func @transform_2(%arg0: i32, %arg1: i32) -> (i32, i32) {
    %c0_i32 = arith.constant 0 : i32
    %c0_i32_0 = arith.constant 0 : i32
    %c0_i32_1 = arith.constant 0 : i32
    return %c0_i32, %c0_i32_0 : i32, i32
  }
  func.func @transform_3(%arg0: i32, %arg1: i32) -> (i32, i32) {
    %c0_i32 = arith.constant 0 : i32
    %c0_i32_0 = arith.constant 0 : i32
    %c0_i32_1 = arith.constant 0 : i32
    return %c0_i32, %c0_i32_0 : i32, i32
  }
  func.func @transform_4(%arg0: i32, %arg1: i32) -> (i32, i32) {
    %c0_i32 = arith.constant 0 : i32
    %c0_i32_0 = arith.constant 0 : i32
    return %arg0, %c0_i32 : i32, i32
  }
}

module attributes {stable_mosaic.version = 11 : i64} {
  func.func @_maxpool_kernel(%arg0: i32, %arg1: memref<12x1x6x1024xbf16, #tpu.memory_space<vmem>>, %arg2: memref<12x1x6x1024xbf16, #tpu.memory_space<vmem>>, %arg3: memref<12x6x512xbf16, #tpu.memory_space<vmem>>) attributes {dimension_semantics = [#tpu.dimension_semantics<parallel>], iteration_bounds = array<i64: 1>, scalar_prefetch = 0 : i64, scratch_operands = 0 : i64, tpu.core_type = #tpu.core_type<tc>, window_params = [{transform_indices = @transform_0, window_bounds = array<i64: 12, 1, 6, 1024>}, {transform_indices = @transform_1, window_bounds = array<i64: 12, 1, 6, 1024>}, {transform_indices = @transform_2, window_bounds = array<i64: 12, 6, 512>}]} {
    %c0 = arith.constant 0 : index
    %c0_0 = arith.constant 0 : index
    %c0_1 = arith.constant 0 : index
    %c0_2 = arith.constant 0 : index
    %0 = vector.load %arg1[%c0, %c0_0, %c0_1, %c0_2] : memref<12x1x6x1024xbf16, #tpu.memory_space<vmem>>, vector<12x1x6x1024xbf16>
    %1 = vector.shape_cast %0 : vector<12x1x6x1024xbf16> to vector<12x6x1024xbf16>
    %c0_3 = arith.constant 0 : index
    %c0_4 = arith.constant 0 : index
    %c0_5 = arith.constant 0 : index
    %c0_6 = arith.constant 0 : index
    %2 = vector.load %arg2[%c0_3, %c0_4, %c0_5, %c0_6] : memref<12x1x6x1024xbf16, #tpu.memory_space<vmem>>, vector<12x1x6x1024xbf16>
    %3 = vector.shape_cast %2 : vector<12x1x6x1024xbf16> to vector<12x6x1024xbf16>
    %4 = arith.maximumf %1, %3 : vector<12x6x1024xbf16>
    %5 = vector.extract_strided_slice %4 {offsets = [0, 0, 0], sizes = [12, 6, 512], strides = [1, 1, 1]} : vector<12x6x1024xbf16> to vector<12x6x512xbf16>
    %6 = vector.extract_strided_slice %4 {offsets = [0, 0, 512], sizes = [12, 6, 512], strides = [1, 1, 1]} : vector<12x6x1024xbf16> to vector<12x6x512xbf16>
    %7 = arith.maximumf %5, %6 : vector<12x6x512xbf16>
    %c0_7 = arith.constant 0 : index
    %c0_8 = arith.constant 0 : index
    %c0_9 = arith.constant 0 : index
    %8 = vector.load %arg3[%c0_7, %c0_8, %c0_9] : memref<12x6x512xbf16, #tpu.memory_space<vmem>>, vector<12x6x512xbf16>
    tpu.vector_store %arg3[%c0_7, %c0_8, %c0_9], %7 {strides = array<i32>} : memref<12x6x512xbf16, #tpu.memory_space<vmem>>, vector<12x6x512xbf16>,
    return
  }
  func.func @transform_0(%arg0: i32) -> (i32, i32, i32, i32) {
    %c0_i32 = arith.constant 0 : i32
    %c0_i32_0 = arith.constant 0 : i32
    %c0_i32_1 = arith.constant 0 : i32
    %c0_i32_2 = arith.constant 0 : i32
    return %arg0, %c0_i32, %c0_i32_0, %c0_i32_1 : i32, i32, i32, i32
  }
  func.func @transform_1(%arg0: i32) -> (i32, i32, i32, i32) {
    %c1_i32 = arith.constant 1 : i32
    %c0_i32 = arith.constant 0 : i32
    %c0_i32_0 = arith.constant 0 : i32
    %c0_i32_1 = arith.constant 0 : i32
    return %arg0, %c1_i32, %c0_i32, %c0_i32_0 : i32, i32, i32, i32
  }
  func.func @transform_2(%arg0: i32) -> (i32, i32, i32) {
    %c0_i32 = arith.constant 0 : i32
    %c0_i32_0 = arith.constant 0 : i32
    %c0_i32_1 = arith.constant 0 : i32
    return %arg0, %c0_i32, %c0_i32_0 : i32, i32, i32
  }
}

module attributes {stable_mosaic.version = 11 : i64} {
  func.func @_fused_matmul_kernel(%arg0: i32, %arg1: i32, %arg2: memref<40x512xbf16, #tpu.memory_space<vmem>>, %arg3: memref<512x512xbf16, #tpu.memory_space<vmem>>, %arg4: memref<1x512xf32, #tpu.memory_space<vmem>>, %arg5: memref<1x512xf32, #tpu.memory_space<vmem>>, %arg6: memref<40x512xbf16, #tpu.memory_space<vmem>>, %arg7: memref<40x512xf32, #tpu.memory_space<vmem>>) attributes {dimension_semantics = [#tpu.dimension_semantics<parallel>, #tpu.dimension_semantics<arbitrary>], iteration_bounds = array<i64: 2, 9>, scalar_prefetch = 0 : i64, scratch_operands = 1 : i64, tpu.core_type = #tpu.core_type<tc>, window_params = [{transform_indices = @transform_0, window_bounds = array<i64: 40, 512>}, {transform_indices = @transform_1, window_bounds = array<i64: 512, 512>}, {pipeline_mode = #tpu.pipeline_mode<synchronous>, transform_indices = @transform_2, window_bounds = array<i64: 1, 512>}, {pipeline_mode = #tpu.pipeline_mode<synchronous>, transform_indices = @transform_3, window_bounds = array<i64: 1, 512>}, {transform_indices = @transform_4, window_bounds = array<i64: 40, 512>}]} {
    %c0_i32 = arith.constant 0 : i32
    %0 = arith.cmpi eq, %arg1, %c0_i32 : i32
    %1 = arith.extui %0 : i1 to i32
    %c0_i32_0 = arith.constant 0 : i32
    %2 = arith.cmpi ne, %1, %c0_i32_0 : i32
    scf.if %2 {
      %cst_9 = arith.constant 0.000000e+00 : f32
      %12 = vector.broadcast %cst_9 : f32 to vector<40x512xf32>
      %c0_10 = arith.constant 0 : index
      %c0_11 = arith.constant 0 : index
      %13 = vector.load %arg7[%c0_10, %c0_11] : memref<40x512xf32, #tpu.memory_space<vmem>>, vector<40x512xf32>
      tpu.vector_store %arg7[%c0_10, %c0_11], %12 {strides = array<i32>} : memref<40x512xf32, #tpu.memory_space<vmem>>, vector<40x512xf32>,
    } else {
    }
    %c0 = arith.constant 0 : index
    %c0_1 = arith.constant 0 : index
    %3 = vector.load %arg7[%c0, %c0_1] : memref<40x512xf32, #tpu.memory_space<vmem>>, vector<40x512xf32>
    %c0_2 = arith.constant 0 : index
    %c0_3 = arith.constant 0 : index
    %4 = vector.load %arg2[%c0_2, %c0_3] : memref<40x512xbf16, #tpu.memory_space<vmem>>, vector<40x512xbf16>
    %c0_4 = arith.constant 0 : index
    %c0_5 = arith.constant 0 : index
    %5 = vector.load %arg3[%c0_4, %c0_5] : memref<512x512xbf16, #tpu.memory_space<vmem>>, vector<512x512xbf16>
    %cst = arith.constant dense<0.000000e+00> : vector<40x512xf32>
    %6 = tpu.matmul %4, %5, %cst {dimension_numbers = #tpu.dot_dimension_numbers<[1], [0], [0], [1], [0, 0, 1, 1], [], []>} : vector<40x512xbf16>, vector<512x512xbf16>, vector<40x512xf32> -> vector<40x512xf32>
    %7 = arith.addf %3, %6 : vector<40x512xf32>
    %c0_6 = arith.constant 0 : index
    %c0_7 = arith.constant 0 : index
    %8 = vector.load %arg7[%c0_6, %c0_7] : memref<40x512xf32, #tpu.memory_space<vmem>>, vector<40x512xf32>
    tpu.vector_store %arg7[%c0_6, %c0_7], %7 {strides = array<i32>} : memref<40x512xf32, #tpu.memory_space<vmem>>, vector<40x512xf32>,
    %c8_i32 = arith.constant 8 : i32
    %9 = arith.cmpi eq, %arg1, %c8_i32 : i32
    %10 = arith.extui %9 : i1 to i32
    %c0_i32_8 = arith.constant 0 : i32
    %11 = arith.cmpi ne, %10, %c0_i32_8 : i32
    scf.if %11 {
      %c0_9 = arith.constant 0 : index
      %c0_10 = arith.constant 0 : index
      %12 = vector.load %arg7[%c0_9, %c0_10] : memref<40x512xf32, #tpu.memory_space<vmem>>, vector<40x512xf32>
      %c0_11 = arith.constant 0 : index
      %c0_12 = arith.constant 0 : index
      %13 = vector.load %arg4[%c0_11, %c0_12] : memref<1x512xf32, #tpu.memory_space<vmem>>, vector<1x512xf32>
      %14 = vector.broadcast %13 : vector<1x512xf32> to vector<40x512xf32>
      %15 = arith.mulf %12, %14 : vector<40x512xf32>
      %c0_13 = arith.constant 0 : index
      %c0_14 = arith.constant 0 : index
      %16 = vector.load %arg5[%c0_13, %c0_14] : memref<1x512xf32, #tpu.memory_space<vmem>>, vector<1x512xf32>
      %17 = vector.broadcast %16 : vector<1x512xf32> to vector<40x512xf32>
      %18 = arith.addf %15, %17 : vector<40x512xf32>
      %cst_15 = arith.constant 0.000000e+00 : f32
      %19 = vector.broadcast %cst_15 : f32 to vector<40x512xf32>
      %20 = arith.maximumf %18, %19 : vector<40x512xf32>
      %21 = arith.truncf %20 : vector<40x512xf32> to vector<40x512xbf16>
      %c0_16 = arith.constant 0 : index
      %c0_17 = arith.constant 0 : index
      %22 = vector.load %arg6[%c0_16, %c0_17] : memref<40x512xbf16, #tpu.memory_space<vmem>>, vector<40x512xbf16>
      tpu.vector_store %arg6[%c0_16, %c0_17], %21 {strides = array<i32>} : memref<40x512xbf16, #tpu.memory_space<vmem>>, vector<40x512xbf16>,
    } else {
    }
    return
  }
  func.func @transform_0(%arg0: i32, %arg1: i32) -> (i32, i32) {
    %c0_i32 = arith.constant 0 : i32
    return %arg0, %arg1 : i32, i32
  }
  func.func @transform_1(%arg0: i32, %arg1: i32) -> (i32, i32) {
    %c0_i32 = arith.constant 0 : i32
    %c0_i32_0 = arith.constant 0 : i32
    return %arg1, %c0_i32 : i32, i32
  }
  func.func @transform_2(%arg0: i32, %arg1: i32) -> (i32, i32) {
    %c0_i32 = arith.constant 0 : i32
    %c0_i32_0 = arith.constant 0 : i32
    %c0_i32_1 = arith.constant 0 : i32
    return %c0_i32, %c0_i32_0 : i32, i32
  }
  func.func @transform_3(%arg0: i32, %arg1: i32) -> (i32, i32) {
    %c0_i32 = arith.constant 0 : i32
    %c0_i32_0 = arith.constant 0 : i32
    %c0_i32_1 = arith.constant 0 : i32
    return %c0_i32, %c0_i32_0 : i32, i32
  }
  func.func @transform_4(%arg0: i32, %arg1: i32) -> (i32, i32) {
    %c0_i32 = arith.constant 0 : i32
    %c0_i32_0 = arith.constant 0 : i32
    return %arg0, %c0_i32 : i32, i32
  }
}

module attributes {stable_mosaic.version = 11 : i64} {
  func.func @_maxpool_kernel(%arg0: i32, %arg1: memref<6x1x3x1024xbf16, #tpu.memory_space<vmem>>, %arg2: memref<6x1x3x1024xbf16, #tpu.memory_space<vmem>>, %arg3: memref<6x3x512xbf16, #tpu.memory_space<vmem>>) attributes {dimension_semantics = [#tpu.dimension_semantics<parallel>], iteration_bounds = array<i64: 1>, scalar_prefetch = 0 : i64, scratch_operands = 0 : i64, tpu.core_type = #tpu.core_type<tc>, window_params = [{transform_indices = @transform_0, window_bounds = array<i64: 6, 1, 3, 1024>}, {transform_indices = @transform_1, window_bounds = array<i64: 6, 1, 3, 1024>}, {transform_indices = @transform_2, window_bounds = array<i64: 6, 3, 512>}]} {
    %c0 = arith.constant 0 : index
    %c0_0 = arith.constant 0 : index
    %c0_1 = arith.constant 0 : index
    %c0_2 = arith.constant 0 : index
    %0 = vector.load %arg1[%c0, %c0_0, %c0_1, %c0_2] : memref<6x1x3x1024xbf16, #tpu.memory_space<vmem>>, vector<6x1x3x1024xbf16>
    %1 = vector.shape_cast %0 : vector<6x1x3x1024xbf16> to vector<6x3x1024xbf16>
    %c0_3 = arith.constant 0 : index
    %c0_4 = arith.constant 0 : index
    %c0_5 = arith.constant 0 : index
    %c0_6 = arith.constant 0 : index
    %2 = vector.load %arg2[%c0_3, %c0_4, %c0_5, %c0_6] : memref<6x1x3x1024xbf16, #tpu.memory_space<vmem>>, vector<6x1x3x1024xbf16>
    %3 = vector.shape_cast %2 : vector<6x1x3x1024xbf16> to vector<6x3x1024xbf16>
    %4 = arith.maximumf %1, %3 : vector<6x3x1024xbf16>
    %5 = vector.extract_strided_slice %4 {offsets = [0, 0, 0], sizes = [6, 3, 512], strides = [1, 1, 1]} : vector<6x3x1024xbf16> to vector<6x3x512xbf16>
    %6 = vector.extract_strided_slice %4 {offsets = [0, 0, 512], sizes = [6, 3, 512], strides = [1, 1, 1]} : vector<6x3x1024xbf16> to vector<6x3x512xbf16>
    %7 = arith.maximumf %5, %6 : vector<6x3x512xbf16>
    %c0_7 = arith.constant 0 : index
    %c0_8 = arith.constant 0 : index
    %c0_9 = arith.constant 0 : index
    %8 = vector.load %arg3[%c0_7, %c0_8, %c0_9] : memref<6x3x512xbf16, #tpu.memory_space<vmem>>, vector<6x3x512xbf16>
    tpu.vector_store %arg3[%c0_7, %c0_8, %c0_9], %7 {strides = array<i32>} : memref<6x3x512xbf16, #tpu.memory_space<vmem>>, vector<6x3x512xbf16>,
    return
  }
  func.func @transform_0(%arg0: i32) -> (i32, i32, i32, i32) {
    %c0_i32 = arith.constant 0 : i32
    %c0_i32_0 = arith.constant 0 : i32
    %c0_i32_1 = arith.constant 0 : i32
    %c0_i32_2 = arith.constant 0 : i32
    return %arg0, %c0_i32, %c0_i32_0, %c0_i32_1 : i32, i32, i32, i32
  }
  func.func @transform_1(%arg0: i32) -> (i32, i32, i32, i32) {
    %c1_i32 = arith.constant 1 : i32
    %c0_i32 = arith.constant 0 : i32
    %c0_i32_0 = arith.constant 0 : i32
    %c0_i32_1 = arith.constant 0 : i32
    return %arg0, %c1_i32, %c0_i32, %c0_i32_0 : i32, i32, i32, i32
  }
  func.func @transform_2(%arg0: i32) -> (i32, i32, i32) {
    %c0_i32 = arith.constant 0 : i32
    %c0_i32_0 = arith.constant 0 : i32
    %c0_i32_1 = arith.constant 0 : i32
    return %arg0, %c0_i32, %c0_i32_0 : i32, i32, i32
  }
}

module attributes {stable_mosaic.version = 11 : i64} {
  func.func @_fused_matmul_kernel(%arg0: i32, %arg1: i32, %arg2: memref<8x512xbf16, #tpu.memory_space<vmem>>, %arg3: memref<512x256xbf16, #tpu.memory_space<vmem>>, %arg4: memref<1x256xf32, #tpu.memory_space<vmem>>, %arg5: memref<1x256xf32, #tpu.memory_space<vmem>>, %arg6: memref<8x256xbf16, #tpu.memory_space<vmem>>, %arg7: memref<8x256xf32, #tpu.memory_space<vmem>>) attributes {dimension_semantics = [#tpu.dimension_semantics<parallel>, #tpu.dimension_semantics<arbitrary>], iteration_bounds = array<i64: 1, 9>, scalar_prefetch = 0 : i64, scratch_operands = 1 : i64, tpu.core_type = #tpu.core_type<tc>, window_params = [{transform_indices = @transform_0, window_bounds = array<i64: 8, 512>}, {transform_indices = @transform_1, window_bounds = array<i64: 512, 256>}, {pipeline_mode = #tpu.pipeline_mode<synchronous>, transform_indices = @transform_2, window_bounds = array<i64: 1, 256>}, {pipeline_mode = #tpu.pipeline_mode<synchronous>, transform_indices = @transform_3, window_bounds = array<i64: 1, 256>}, {transform_indices = @transform_4, window_bounds = array<i64: 8, 256>}]} {
    %c0_i32 = arith.constant 0 : i32
    %0 = arith.cmpi eq, %arg1, %c0_i32 : i32
    %1 = arith.extui %0 : i1 to i32
    %c0_i32_0 = arith.constant 0 : i32
    %2 = arith.cmpi ne, %1, %c0_i32_0 : i32
    scf.if %2 {
      %cst_9 = arith.constant 0.000000e+00 : f32
      %12 = vector.broadcast %cst_9 : f32 to vector<8x256xf32>
      %c0_10 = arith.constant 0 : index
      %c0_11 = arith.constant 0 : index
      %13 = vector.load %arg7[%c0_10, %c0_11] : memref<8x256xf32, #tpu.memory_space<vmem>>, vector<8x256xf32>
      tpu.vector_store %arg7[%c0_10, %c0_11], %12 {strides = array<i32>} : memref<8x256xf32, #tpu.memory_space<vmem>>, vector<8x256xf32>,
    } else {
    }
    %c0 = arith.constant 0 : index
    %c0_1 = arith.constant 0 : index
    %3 = vector.load %arg7[%c0, %c0_1] : memref<8x256xf32, #tpu.memory_space<vmem>>, vector<8x256xf32>
    %c0_2 = arith.constant 0 : index
    %c0_3 = arith.constant 0 : index
    %4 = vector.load %arg2[%c0_2, %c0_3] : memref<8x512xbf16, #tpu.memory_space<vmem>>, vector<8x512xbf16>
    %c0_4 = arith.constant 0 : index
    %c0_5 = arith.constant 0 : index
    %5 = vector.load %arg3[%c0_4, %c0_5] : memref<512x256xbf16, #tpu.memory_space<vmem>>, vector<512x256xbf16>
    %cst = arith.constant dense<0.000000e+00> : vector<8x256xf32>
    %6 = tpu.matmul %4, %5, %cst {dimension_numbers = #tpu.dot_dimension_numbers<[1], [0], [0], [1], [0, 0, 1, 1], [], []>} : vector<8x512xbf16>, vector<512x256xbf16>, vector<8x256xf32> -> vector<8x256xf32>
    %7 = arith.addf %3, %6 : vector<8x256xf32>
    %c0_6 = arith.constant 0 : index
    %c0_7 = arith.constant 0 : index
    %8 = vector.load %arg7[%c0_6, %c0_7] : memref<8x256xf32, #tpu.memory_space<vmem>>, vector<8x256xf32>
    tpu.vector_store %arg7[%c0_6, %c0_7], %7 {strides = array<i32>} : memref<8x256xf32, #tpu.memory_space<vmem>>, vector<8x256xf32>,
    %c8_i32 = arith.constant 8 : i32
    %9 = arith.cmpi eq, %arg1, %c8_i32 : i32
    %10 = arith.extui %9 : i1 to i32
    %c0_i32_8 = arith.constant 0 : i32
    %11 = arith.cmpi ne, %10, %c0_i32_8 : i32
    scf.if %11 {
      %c0_9 = arith.constant 0 : index
      %c0_10 = arith.constant 0 : index
      %12 = vector.load %arg7[%c0_9, %c0_10] : memref<8x256xf32, #tpu.memory_space<vmem>>, vector<8x256xf32>
      %c0_11 = arith.constant 0 : index
      %c0_12 = arith.constant 0 : index
      %13 = vector.load %arg4[%c0_11, %c0_12] : memref<1x256xf32, #tpu.memory_space<vmem>>, vector<1x256xf32>
      %14 = vector.broadcast %13 : vector<1x256xf32> to vector<8x256xf32>
      %15 = arith.mulf %12, %14 : vector<8x256xf32>
      %c0_13 = arith.constant 0 : index
      %c0_14 = arith.constant 0 : index
      %16 = vector.load %arg5[%c0_13, %c0_14] : memref<1x256xf32, #tpu.memory_space<vmem>>, vector<1x256xf32>
      %17 = vector.broadcast %16 : vector<1x256xf32> to vector<8x256xf32>
      %18 = arith.addf %15, %17 : vector<8x256xf32>
      %cst_15 = arith.constant 0.000000e+00 : f32
      %19 = vector.broadcast %cst_15 : f32 to vector<8x256xf32>
      %20 = arith.maximumf %18, %19 : vector<8x256xf32>
      %21 = arith.truncf %20 : vector<8x256xf32> to vector<8x256xbf16>
      %c0_16 = arith.constant 0 : index
      %c0_17 = arith.constant 0 : index
      %22 = vector.load %arg6[%c0_16, %c0_17] : memref<8x256xbf16, #tpu.memory_space<vmem>>, vector<8x256xbf16>
      tpu.vector_store %arg6[%c0_16, %c0_17], %21 {strides = array<i32>} : memref<8x256xbf16, #tpu.memory_space<vmem>>, vector<8x256xbf16>,
    } else {
    }
    return
  }
  func.func @transform_0(%arg0: i32, %arg1: i32) -> (i32, i32) {
    %c0_i32 = arith.constant 0 : i32
    return %arg0, %arg1 : i32, i32
  }
  func.func @transform_1(%arg0: i32, %arg1: i32) -> (i32, i32) {
    %c0_i32 = arith.constant 0 : i32
    %c0_i32_0 = arith.constant 0 : i32
    return %arg1, %c0_i32 : i32, i32
  }
  func.func @transform_2(%arg0: i32, %arg1: i32) -> (i32, i32) {
    %c0_i32 = arith.constant 0 : i32
    %c0_i32_0 = arith.constant 0 : i32
    %c0_i32_1 = arith.constant 0 : i32
    return %c0_i32, %c0_i32_0 : i32, i32
  }
  func.func @transform_3(%arg0: i32, %arg1: i32) -> (i32, i32) {
    %c0_i32 = arith.constant 0 : i32
    %c0_i32_0 = arith.constant 0 : i32
    %c0_i32_1 = arith.constant 0 : i32
    return %c0_i32, %c0_i32_0 : i32, i32
  }
  func.func @transform_4(%arg0: i32, %arg1: i32) -> (i32, i32) {
    %c0_i32 = arith.constant 0 : i32
    %c0_i32_0 = arith.constant 0 : i32
    return %arg0, %c0_i32 : i32, i32
  }
}

module attributes {stable_mosaic.version = 11 : i64} {
  func.func @_fused_matmul_kernel(%arg0: i32, %arg1: i32, %arg2: memref<8x256xbf16, #tpu.memory_space<vmem>>, %arg3: memref<256x512xbf16, #tpu.memory_space<vmem>>, %arg4: memref<1x512xf32, #tpu.memory_space<vmem>>, %arg5: memref<1x512xf32, #tpu.memory_space<vmem>>, %arg6: memref<8x512xbf16, #tpu.memory_space<vmem>>, %arg7: memref<8x512xf32, #tpu.memory_space<vmem>>) attributes {dimension_semantics = [#tpu.dimension_semantics<parallel>, #tpu.dimension_semantics<arbitrary>], iteration_bounds = array<i64: 1, 1>, scalar_prefetch = 0 : i64, scratch_operands = 1 : i64, tpu.core_type = #tpu.core_type<tc>, window_params = [{transform_indices = @transform_0, window_bounds = array<i64: 8, 256>}, {transform_indices = @transform_1, window_bounds = array<i64: 256, 512>}, {pipeline_mode = #tpu.pipeline_mode<synchronous>, transform_indices = @transform_2, window_bounds = array<i64: 1, 512>}, {pipeline_mode = #tpu.pipeline_mode<synchronous>, transform_indices = @transform_3, window_bounds = array<i64: 1, 512>}, {transform_indices = @transform_4, window_bounds = array<i64: 8, 512>}]} {
    %c0_i32 = arith.constant 0 : i32
    %0 = arith.cmpi eq, %arg1, %c0_i32 : i32
    %1 = arith.extui %0 : i1 to i32
    %c0_i32_0 = arith.constant 0 : i32
    %2 = arith.cmpi ne, %1, %c0_i32_0 : i32
    scf.if %2 {
      %cst_10 = arith.constant 0.000000e+00 : f32
      %12 = vector.broadcast %cst_10 : f32 to vector<8x512xf32>
      %c0_11 = arith.constant 0 : index
      %c0_12 = arith.constant 0 : index
      %13 = vector.load %arg7[%c0_11, %c0_12] : memref<8x512xf32, #tpu.memory_space<vmem>>, vector<8x512xf32>
      tpu.vector_store %arg7[%c0_11, %c0_12], %12 {strides = array<i32>} : memref<8x512xf32, #tpu.memory_space<vmem>>, vector<8x512xf32>,
    } else {
    }
    %c0 = arith.constant 0 : index
    %c0_1 = arith.constant 0 : index
    %3 = vector.load %arg7[%c0, %c0_1] : memref<8x512xf32, #tpu.memory_space<vmem>>, vector<8x512xf32>
    %c0_2 = arith.constant 0 : index
    %c0_3 = arith.constant 0 : index
    %4 = vector.load %arg2[%c0_2, %c0_3] : memref<8x256xbf16, #tpu.memory_space<vmem>>, vector<8x256xbf16>
    %c0_4 = arith.constant 0 : index
    %c0_5 = arith.constant 0 : index
    %5 = vector.load %arg3[%c0_4, %c0_5] : memref<256x512xbf16, #tpu.memory_space<vmem>>, vector<256x512xbf16>
    %cst = arith.constant dense<0.000000e+00> : vector<8x512xf32>
    %6 = tpu.matmul %4, %5, %cst {dimension_numbers = #tpu.dot_dimension_numbers<[1], [0], [0], [1], [0, 0, 1, 1], [], []>} : vector<8x256xbf16>, vector<256x512xbf16>, vector<8x512xf32> -> vector<8x512xf32>
    %7 = arith.addf %3, %6 : vector<8x512xf32>
    %c0_6 = arith.constant 0 : index
    %c0_7 = arith.constant 0 : index
    %8 = vector.load %arg7[%c0_6, %c0_7] : memref<8x512xf32, #tpu.memory_space<vmem>>, vector<8x512xf32>
    tpu.vector_store %arg7[%c0_6, %c0_7], %7 {strides = array<i32>} : memref<8x512xf32, #tpu.memory_space<vmem>>, vector<8x512xf32>,
    %c0_i32_8 = arith.constant 0 : i32
    %9 = arith.cmpi eq, %arg1, %c0_i32_8 : i32
    %10 = arith.extui %9 : i1 to i32
    %c0_i32_9 = arith.constant 0 : i32
    %11 = arith.cmpi ne, %10, %c0_i32_9 : i32
    scf.if %11 {
      %c0_10 = arith.constant 0 : index
      %c0_11 = arith.constant 0 : index
      %12 = vector.load %arg7[%c0_10, %c0_11] : memref<8x512xf32, #tpu.memory_space<vmem>>, vector<8x512xf32>
      %c0_12 = arith.constant 0 : index
      %c0_13 = arith.constant 0 : index
      %13 = vector.load %arg4[%c0_12, %c0_13] : memref<1x512xf32, #tpu.memory_space<vmem>>, vector<1x512xf32>
      %14 = vector.broadcast %13 : vector<1x512xf32> to vector<8x512xf32>
      %15 = arith.mulf %12, %14 : vector<8x512xf32>
      %c0_14 = arith.constant 0 : index
      %c0_15 = arith.constant 0 : index
      %16 = vector.load %arg5[%c0_14, %c0_15] : memref<1x512xf32, #tpu.memory_space<vmem>>, vector<1x512xf32>
      %17 = vector.broadcast %16 : vector<1x512xf32> to vector<8x512xf32>
      %18 = arith.addf %15, %17 : vector<8x512xf32>
      %cst_16 = arith.constant 0.000000e+00 : f32
      %19 = vector.broadcast %cst_16 : f32 to vector<8x512xf32>
      %20 = arith.maximumf %18, %19 : vector<8x512xf32>
      %21 = arith.truncf %20 : vector<8x512xf32> to vector<8x512xbf16>
      %c0_17 = arith.constant 0 : index
      %c0_18 = arith.constant 0 : index
      %22 = vector.load %arg6[%c0_17, %c0_18] : memref<8x512xbf16, #tpu.memory_space<vmem>>, vector<8x512xbf16>
      tpu.vector_store %arg6[%c0_17, %c0_18], %21 {strides = array<i32>} : memref<8x512xbf16, #tpu.memory_space<vmem>>, vector<8x512xbf16>,
    } else {
    }
    return
  }
  func.func @transform_0(%arg0: i32, %arg1: i32) -> (i32, i32) {
    %c0_i32 = arith.constant 0 : i32
    return %arg0, %arg1 : i32, i32
  }
  func.func @transform_1(%arg0: i32, %arg1: i32) -> (i32, i32) {
    %c0_i32 = arith.constant 0 : i32
    %c0_i32_0 = arith.constant 0 : i32
    return %arg1, %c0_i32 : i32, i32
  }
  func.func @transform_2(%arg0: i32, %arg1: i32) -> (i32, i32) {
    %c0_i32 = arith.constant 0 : i32
    %c0_i32_0 = arith.constant 0 : i32
    %c0_i32_1 = arith.constant 0 : i32
    return %c0_i32, %c0_i32_0 : i32, i32
  }
  func.func @transform_3(%arg0: i32, %arg1: i32) -> (i32, i32) {
    %c0_i32 = arith.constant 0 : i32
    %c0_i32_0 = arith.constant 0 : i32
    %c0_i32_1 = arith.constant 0 : i32
    return %c0_i32, %c0_i32_0 : i32, i32
  }
  func.func @transform_4(%arg0: i32, %arg1: i32) -> (i32, i32) {
    %c0_i32 = arith.constant 0 : i32
    %c0_i32_0 = arith.constant 0 : i32
    return %arg0, %c0_i32 : i32, i32
  }
}

module attributes {stable_mosaic.version = 11 : i64} {
  func.func @_fused_matmul_kernel(%arg0: i32, %arg1: i32, %arg2: memref<8x512xbf16, #tpu.memory_space<vmem>>, %arg3: memref<512x128xbf16, #tpu.memory_space<vmem>>, %arg4: memref<1x128xf32, #tpu.memory_space<vmem>>, %arg5: memref<1x128xf32, #tpu.memory_space<vmem>>, %arg6: memref<8x128xf32, #tpu.memory_space<vmem>>, %arg7: memref<8x128xf32, #tpu.memory_space<vmem>>) attributes {dimension_semantics = [#tpu.dimension_semantics<parallel>, #tpu.dimension_semantics<arbitrary>], iteration_bounds = array<i64: 1, 1>, scalar_prefetch = 0 : i64, scratch_operands = 1 : i64, tpu.core_type = #tpu.core_type<tc>, window_params = [{transform_indices = @transform_0, window_bounds = array<i64: 8, 512>}, {transform_indices = @transform_1, window_bounds = array<i64: 512, 128>}, {pipeline_mode = #tpu.pipeline_mode<synchronous>, transform_indices = @transform_2, window_bounds = array<i64: 1, 128>}, {pipeline_mode = #tpu.pipeline_mode<synchronous>, transform_indices = @transform_3, window_bounds = array<i64: 1, 128>}, {transform_indices = @transform_4, window_bounds = array<i64: 8, 128>}]} {
    %c0_i32 = arith.constant 0 : i32
    %0 = arith.cmpi eq, %arg1, %c0_i32 : i32
    %1 = arith.extui %0 : i1 to i32
    %c0_i32_0 = arith.constant 0 : i32
    %2 = arith.cmpi ne, %1, %c0_i32_0 : i32
    scf.if %2 {
      %cst_10 = arith.constant 0.000000e+00 : f32
      %12 = vector.broadcast %cst_10 : f32 to vector<8x128xf32>
      %c0_11 = arith.constant 0 : index
      %c0_12 = arith.constant 0 : index
      %13 = vector.load %arg7[%c0_11, %c0_12] : memref<8x128xf32, #tpu.memory_space<vmem>>, vector<8x128xf32>
      tpu.vector_store %arg7[%c0_11, %c0_12], %12 {strides = array<i32>} : memref<8x128xf32, #tpu.memory_space<vmem>>, vector<8x128xf32>,
    } else {
    }
    %c0 = arith.constant 0 : index
    %c0_1 = arith.constant 0 : index
    %3 = vector.load %arg7[%c0, %c0_1] : memref<8x128xf32, #tpu.memory_space<vmem>>, vector<8x128xf32>
    %c0_2 = arith.constant 0 : index
    %c0_3 = arith.constant 0 : index
    %4 = vector.load %arg2[%c0_2, %c0_3] : memref<8x512xbf16, #tpu.memory_space<vmem>>, vector<8x512xbf16>
    %c0_4 = arith.constant 0 : index
    %c0_5 = arith.constant 0 : index
    %5 = vector.load %arg3[%c0_4, %c0_5] : memref<512x128xbf16, #tpu.memory_space<vmem>>, vector<512x128xbf16>
    %cst = arith.constant dense<0.000000e+00> : vector<8x128xf32>
    %6 = tpu.matmul %4, %5, %cst {dimension_numbers = #tpu.dot_dimension_numbers<[1], [0], [0], [1], [0, 0, 1, 1], [], []>} : vector<8x512xbf16>, vector<512x128xbf16>, vector<8x128xf32> -> vector<8x128xf32>
    %7 = arith.addf %3, %6 : vector<8x128xf32>
    %c0_6 = arith.constant 0 : index
    %c0_7 = arith.constant 0 : index
    %8 = vector.load %arg7[%c0_6, %c0_7] : memref<8x128xf32, #tpu.memory_space<vmem>>, vector<8x128xf32>
    tpu.vector_store %arg7[%c0_6, %c0_7], %7 {strides = array<i32>} : memref<8x128xf32, #tpu.memory_space<vmem>>, vector<8x128xf32>,
    %c0_i32_8 = arith.constant 0 : i32
    %9 = arith.cmpi eq, %arg1, %c0_i32_8 : i32
    %10 = arith.extui %9 : i1 to i32
    %c0_i32_9 = arith.constant 0 : i32
    %11 = arith.cmpi ne, %10, %c0_i32_9 : i32
    scf.if %11 {
      %c0_10 = arith.constant 0 : index
      %c0_11 = arith.constant 0 : index
      %12 = vector.load %arg7[%c0_10, %c0_11] : memref<8x128xf32, #tpu.memory_space<vmem>>, vector<8x128xf32>
      %c0_12 = arith.constant 0 : index
      %c0_13 = arith.constant 0 : index
      %13 = vector.load %arg4[%c0_12, %c0_13] : memref<1x128xf32, #tpu.memory_space<vmem>>, vector<1x128xf32>
      %14 = vector.broadcast %13 : vector<1x128xf32> to vector<8x128xf32>
      %15 = arith.mulf %12, %14 : vector<8x128xf32>
      %c0_14 = arith.constant 0 : index
      %c0_15 = arith.constant 0 : index
      %16 = vector.load %arg5[%c0_14, %c0_15] : memref<1x128xf32, #tpu.memory_space<vmem>>, vector<1x128xf32>
      %17 = vector.broadcast %16 : vector<1x128xf32> to vector<8x128xf32>
      %18 = arith.addf %15, %17 : vector<8x128xf32>
      %c0_16 = arith.constant 0 : index
      %c0_17 = arith.constant 0 : index
      %19 = vector.load %arg6[%c0_16, %c0_17] : memref<8x128xf32, #tpu.memory_space<vmem>>, vector<8x128xf32>
      tpu.vector_store %arg6[%c0_16, %c0_17], %18 {strides = array<i32>} : memref<8x128xf32, #tpu.memory_space<vmem>>, vector<8x128xf32>,
    } else {
    }
    return
  }
  func.func @transform_0(%arg0: i32, %arg1: i32) -> (i32, i32) {
    %c0_i32 = arith.constant 0 : i32
    return %arg0, %arg1 : i32, i32
  }
  func.func @transform_1(%arg0: i32, %arg1: i32) -> (i32, i32) {
    %c0_i32 = arith.constant 0 : i32
    %c0_i32_0 = arith.constant 0 : i32
    return %arg1, %c0_i32 : i32, i32
  }
  func.func @transform_2(%arg0: i32, %arg1: i32) -> (i32, i32) {
    %c0_i32 = arith.constant 0 : i32
    %c0_i32_0 = arith.constant 0 : i32
    %c0_i32_1 = arith.constant 0 : i32
    return %c0_i32, %c0_i32_0 : i32, i32
  }
  func.func @transform_3(%arg0: i32, %arg1: i32) -> (i32, i32) {
    %c0_i32 = arith.constant 0 : i32
    %c0_i32_0 = arith.constant 0 : i32
    %c0_i32_1 = arith.constant 0 : i32
    return %c0_i32, %c0_i32_0 : i32, i32
  }
  func.func @transform_4(%arg0: i32, %arg1: i32) -> (i32, i32) {
    %c0_i32 = arith.constant 0 : i32
    %c0_i32_0 = arith.constant 0 : i32
    return %arg0, %c0_i32 : i32, i32
  }
}

</mosaic_0001>

<bundles_post_ra>
// kernel: fer_cnn_forward.11
= control target key start
LH: loop header
LB: loop body
LE: loop exit
PB: predicated region body
PF: predicated region fallthrough
CT: control target
= control target key end

     0   :  { %s1454_s15 = smov 0   ;;  %s1456_s16 = smov 0   ;;  %s1623_s0 = inlined_call_operand.vmem [shape: bf16[4608,9], index: 0, kind: input, shape index: {}]   ;;  %s1624_s1 = inlined_call_operand.vmem [shape: bf16[9,128], index: 1, kind: input, shape index: {}]   ;;  %s1625_s2 = inlined_call_operand.vmem [shape: f32[1,128], index: 2, kind: input, shape index: {}]   ;;  %s1626_s3 = inlined_call_operand.vmem [shape: f32[1,128], index: 3, kind: input, shape index: {}]   ;;  %s1627_s4 = inlined_call_operand.vmem [shape: bf16[4608,128], index: 4, kind: output, shape index: {}]  }
   0x1   :  { %s1458_s17 = smov 0  }
   0x2 LB: > { %s26_s18 = sadd.s32 1, %s1422_s16  ;;  %p1108_p0 = scmp.ge.s32.totalorder %s1426_s17, 1  ;;  %s1426_s17 = sphi %s1458_s17, %s14_s17   ;;  %s1422_s16 = sphi %s1456_s16, %s1629_s16   ;;  %s1418_s15 = sphi %s1454_s15, %s1628_s15  }
   0x3   : > { %p28_p1 = scmp.ge.s32.totalorder %s26_s18, 18  ;;  %p191_p2 = scmp.lt.s32.totalorder %s1426_s17, 19 }
   0x5   : > { %s1631_s18 = smov (%p28_p1, %s26_s18), 0  ;;  %p192_p3 = pnand %p1108_p0, %p191_p2 }
   0x6   : > { %s1109_s21 = sshll.u32 (!%p192_p3), %s1418_s15, 5 }
   0x7   : > { %195 = sbr.rel (%p192_p3) target bundleno = 253 (0xfd), region = 36  ;;  %p226_p4 = scmp.lt.s32.totalorder (!%p192_p3), %s1109_s21, 575 }
   0xc   : > { %v1387_v0 = vld [vmem:[%s1624_s1] sm:$0x1f]   ;;  %vm483_vm0 = vcmask 1043456   ;;  %vm484_vm1 = vcmask 1044480   ;;  %v1428_v1 = vmov 65535   ;;  %s1633_s21 = smov (!%p226_p4, %s1109_s21), 575 }
   0xd   : > { %v485_v2 = vsel %vm483_vm0, 4294967295, %v1428_v1  ;;  %s1110_s22 = sshll.u32 %s1633_s21, 2  ;;  %vm434_vm2 = vcmask 72704   ;;  %v1520_v21 = vld [vmem:[%s1625_s2] ss:$0 sm:$0xff] }
   0xe   : > { %v486_v3 = vsel %vm484_vm1, %v485_v2, 0  ;;  %s1483_s25 = scalar_lea.vmem %s1623_s0, %s1110_s22  ;;  %v1526_v25 = vld [vmem:[%s1626_s3] ss:$0 sm:$0xff]  ;;  %s1548_s6 = scalar_lea.vmem %s1627_s4, %s1110_s22 }
   0xf   : > { %v488_v4 = vand.u32 %v1387_v0, %v486_v3  ;;  %v1388_v5 = vld [vmem:[%s1483_s25] sm:$0xff]   ;;  %v1390_v7 = vld [vmem:[%s1483_s25 + $0x8] sm:$0xff]   ;;  %v1392_v9 = vld [vmem:[%s1483_s25 + $0x10] sm:$0xff]  }
  0x10   : > { %v1389_v6 = vld [vmem:[%s1483_s25 + $0x40] sm:$0xff]   ;;  %1328 = vmatprep.mubr.msk.bf16.mxu0 %vm434_vm2, %v1388_v5  ;;  %v1391_v8 = vld [vmem:[%s1483_s25 + $0x48] sm:$0xff]   ;;  %v1393_v10 = vld [vmem:[%s1483_s25 + $0x50] sm:$0xff]  }
  0x11   : > { %1326 = vmatprep.subr.bf16.mxu0 %v488_v4  ;;  %1360 = vmatprep.subr.bf16.mxu1 %v488_v4  ;;  %v1394_v11 = vld [vmem:[%s1483_s25 + $0x18] sm:$0xff]   ;;  %v1396_v13 = vld [vmem:[%s1483_s25 + $0x20] sm:$0xff]   ;;  %v1398_v15 = vld [vmem:[%s1483_s25 + $0x28] sm:$0xff]  }
  0x12   : > { %1327 = vmatpush3.bf16.msra.mxu0 %v488_v4  ;;  %1361 = vmatpush3.bf16.msra.mxu1 %v488_v4  ;;  %v1395_v12 = vld [vmem:[%s1483_s25 + $0x58] sm:$0xff]   ;;  %v1397_v14 = vld [vmem:[%s1483_s25 + $0x60] sm:$0xff]   ;;  %v1399_v16 = vld [vmem:[%s1483_s25 + $0x68] sm:$0xff]  }
  0x13   : > { %1344 = vmatprep.mubr.msk.bf16.mxu1 %vm434_vm2, %v1389_v6  ;;  %v1400_v17 = vld [vmem:[%s1483_s25 + $0x30] sm:$0xff]   ;;  %v1402_v19 = vld [vmem:[%s1483_s25 + $0x38] sm:$0xff]  }
  0x14   : > { %v1401_v18 = vld [vmem:[%s1483_s25 + $0x70] sm:$0xff]   ;;  %v1403_v20 = vld [vmem:[%s1483_s25 + $0x78] sm:$0xff]  }
  0x15   : > { %1329 = vmatmul.mubr.msk.bf16.vlgmr.msra.gmra.mxu0 %vm434_vm2, %v1390_v7  ;;  %1345 = vmatmul.mubr.msk.bf16.vlgmr.msra.gmra.mxu1 %vm434_vm2, %v1391_v8 }
  0x16   : > { %1332 = vmatprep.mubr.msk.bf16.mxu0 %vm434_vm2, %v1392_v9  ;;  %1348 = vmatprep.mubr.msk.bf16.mxu1 %vm434_vm2, %v1393_v10 }
  0x1d   : > { %1333 = vmatmul.mubr.msk.bf16.gmra.mxu0 %vm434_vm2, %v1394_v11  ;;  %1349 = vmatmul.mubr.msk.bf16.gmra.mxu1 %vm434_vm2, %v1395_v12 }
  0x1e   : > { %1336 = vmatprep.mubr.msk.bf16.mxu0 %vm434_vm2, %v1396_v13  ;;  %1352 = vmatprep.mubr.msk.bf16.mxu1 %vm434_vm2, %v1397_v14 }
  0x25   : > { %1337 = vmatmul.mubr.msk.bf16.gmra.mxu0 %vm434_vm2, %v1398_v15  ;;  %1353 = vmatmul.mubr.msk.bf16.gmra.mxu1 %vm434_vm2, %v1399_v16 }
  0x26   : > { %1340 = vmatprep.mubr.msk.bf16.mxu0 %vm434_vm2, %v1400_v17  ;;  %1356 = vmatprep.mubr.msk.bf16.mxu1 %vm434_vm2, %v1401_v18 }
  0x2d   : > { %1341 = vmatmul.mubr.msk.bf16.gmra.mxu0 %vm434_vm2, %v1402_v19  ;;  %1357 = vmatmul.mubr.msk.bf16.gmra.mxu1 %vm434_vm2, %v1403_v20 }
  0xd5   : > { %v1330_v22 = vpop.f32.mrf.mxu0  ;;  %v1346_v24 = vpop.f32.mrf.mxu1 }
  0xd6   : > { %v759_v23 = vmul.f32 %v1330_v22, %v1520_v21  ;;  %v775_v26 = vmul.f32 %v1346_v24, %v1520_v21 }
  0xd7   : > { %v524_v27 = vpop.f32.mrf.mxu0  ;;  %v588_v29 = vpop.f32.mrf.mxu1 }
  0xd8   : > { %v757_v28 = vmul.f32 %v1520_v21, %v524_v27  ;;  %v773_v30 = vmul.f32 %v1520_v21, %v588_v29  ;;  %v798_v32 = vadd.f32 %v1526_v25, %v759_v23  ;;  %v814_v35 = vadd.f32 %v1526_v25, %v775_v26 }
  0xd9   : > { %v1331_v31 = vpop.f32.mrf.mxu0  ;;  %v1347_v34 = vpop.f32.mrf.mxu1 }
  0xda   : > { %v760_v33 = vmul.f32 %v1331_v31, %v1520_v21  ;;  %v776_v36 = vmul.f32 %v1347_v34, %v1520_v21  ;;  %v796_v38 = vadd.f32 %v1526_v25, %v757_v28  ;;  %v812_v42 = vadd.f32 %v1526_v25, %v773_v30 }
  0xdb   : > { %v527_v37 = vpop.f32.mrf.mxu0  ;;  %v591_v41 = vpop.f32.mrf.mxu1  ;;  %v830_v46 = vmax.f32 %v798_v32, 0.0  ;;  %v846_v51 = vmax.f32 %v814_v35, 0.0 }
  0xdc   : > { %v799_v39 = vadd.f32 %v1526_v25, %v760_v33  ;;  %v758_v40 = vmul.f32 %v1520_v21, %v527_v37  ;;  %v815_v43 = vadd.f32 %v1526_v25, %v776_v36  ;;  %v774_v44 = vmul.f32 %v1520_v21, %v591_v41 }
  0xdd   : > { %v1334_v45 = vpop.f32.mrf.mxu0  ;;  %v1350_v50 = vpop.f32.mrf.mxu1  ;;  %v828_v56 = vmax.f32 %v796_v38, 0.0  ;;  %v844_v61 = vmax.f32 %v812_v42, 0.0 }
  0xde   : > { %v831_v47 = vmax.f32 %v799_v39, 0.0  ;;  %v797_v48 = vadd.f32 %v1526_v25, %v758_v40  ;;  %v763_v49 = vmul.f32 %v1334_v45, %v1520_v21  ;;  %v847_v52 = vmax.f32 %v815_v43, 0.0 }
  0xdf   : > { %v813_v53 = vadd.f32 %v1526_v25, %v774_v44  ;;  %v779_v54 = vmul.f32 %v1350_v50, %v1520_v21  ;;  %v540_v55 = vpop.f32.mrf.mxu0  ;;  %v604_v60 = vpop.f32.mrf.mxu1 }
  0xe0   : > { %v1222_v57 = vpack.c.bf16 %v831_v47, %v830_v46  ;;  %v829_v58 = vmax.f32 %v797_v48, 0.0  ;;  %v761_v59 = vmul.f32 %v1520_v21, %v540_v55  ;;  %v1262_v62 = vpack.c.bf16 %v847_v52, %v846_v51 }
  0xe1   : > { %v845_v63 = vmax.f32 %v813_v53, 0.0  ;;  %v777_v0 = vmul.f32 %v1520_v21, %v604_v60  ;;  %v1335_v1 = vpop.f32.mrf.mxu0  ;;  %v802_v3 = vadd.f32 %v1526_v25, %v763_v49  ;;  %v1351_v5 = vpop.f32.mrf.mxu1  ;;  %v818_v7 = vadd.f32 %v1526_v25, %v779_v54 }
  0xe2   : > { %1294 = vst [vmem:[%s1548_s6 + $0x8] sm:$0xff] %v1222_v57   ;;  %v1217_v2 = vpack.c.bf16 %v829_v58, %v828_v56  ;;  %v764_v4 = vmul.f32 %v1335_v1, %v1520_v21  ;;  %1302 = vst [vmem:[%s1548_s6 + $0x48] sm:$0xff] %v1262_v62   ;;  %v780_v8 = vmul.f32 %v1351_v5, %v1520_v21 }
  0xe3   : > { %v1257_v6 = vpack.c.bf16 %v845_v63, %v844_v61  ;;  %v543_v9 = vpop.f32.mrf.mxu0  ;;  %v800_v10 = vadd.f32 %v1526_v25, %v761_v59  ;;  %v607_v13 = vpop.f32.mrf.mxu1  ;;  %v816_v14 = vadd.f32 %v1526_v25, %v777_v0  ;;  %v834_v18 = vmax.f32 %v802_v3, 0.0 }
  0xe4   : > { %1218 = vst [vmem:[%s1548_s6] sm:$0xff] %v1217_v2   ;;  %v803_v11 = vadd.f32 %v1526_v25, %v764_v4  ;;  %v762_v12 = vmul.f32 %v1520_v21, %v543_v9  ;;  %v819_v15 = vadd.f32 %v1526_v25, %v780_v8  ;;  %v778_v16 = vmul.f32 %v1520_v21, %v607_v13 }
  0xe5   : > { %1301 = vst [vmem:[%s1548_s6 + $0x40] sm:$0xff] %v1257_v6   ;;  %v1338_v17 = vpop.f32.mrf.mxu0  ;;  %v1354_v23 = vpop.f32.mrf.mxu1  ;;  %v850_v24 = vmax.f32 %v818_v7, 0.0  ;;  %v832_v30 = vmax.f32 %v800_v10, 0.0  ;;  %v848_v35 = vmax.f32 %v816_v14, 0.0 }
  0xe6   : > { %v835_v19 = vmax.f32 %v803_v11, 0.0  ;;  %v801_v20 = vadd.f32 %v1526_v25, %v762_v12  ;;  %v767_v22 = vmul.f32 %v1338_v17, %v1520_v21  ;;  %v851_v26 = vmax.f32 %v819_v15, 0.0 }
  0xe7   : > { %v817_v27 = vadd.f32 %v1526_v25, %v778_v16  ;;  %v783_v28 = vmul.f32 %v1354_v23, %v1520_v21  ;;  %v556_v29 = vpop.f32.mrf.mxu0  ;;  %v620_v34 = vpop.f32.mrf.mxu1 }
  0xe8   : > { %v1232_v31 = vpack.c.bf16 %v835_v19, %v834_v18  ;;  %v833_v32 = vmax.f32 %v801_v20, 0.0  ;;  %v765_v33 = vmul.f32 %v1520_v21, %v556_v29  ;;  %v1272_v36 = vpack.c.bf16 %v851_v26, %v850_v24 }
  0xe9   : > { %v849_v37 = vmax.f32 %v817_v27, 0.0  ;;  %v781_v38 = vmul.f32 %v1520_v21, %v620_v34  ;;  %v1339_v39 = vpop.f32.mrf.mxu0  ;;  %v806_v41 = vadd.f32 %v1526_v25, %v767_v22  ;;  %v1355_v43 = vpop.f32.mrf.mxu1  ;;  %v822_v45 = vadd.f32 %v1526_v25, %v783_v28 }
  0xea   : > { %1296 = vst [vmem:[%s1548_s6 + $0x18] sm:$0xff] %v1232_v31   ;;  %v1227_v40 = vpack.c.bf16 %v833_v32, %v832_v30  ;;  %v768_v42 = vmul.f32 %v1339_v39, %v1520_v21  ;;  %1304 = vst [vmem:[%s1548_s6 + $0x58] sm:$0xff] %v1272_v36   ;;  %v784_v46 = vmul.f32 %v1355_v43, %v1520_v21 }
  0xeb   : > { %v1267_v44 = vpack.c.bf16 %v849_v37, %v848_v35  ;;  %v559_v47 = vpop.f32.mrf.mxu0  ;;  %v804_v48 = vadd.f32 %v1526_v25, %v765_v33  ;;  %v623_v51 = vpop.f32.mrf.mxu1  ;;  %v820_v52 = vadd.f32 %v1526_v25, %v781_v38  ;;  %v838_v56 = vmax.f32 %v806_v41, 0.0 }
  0xec   : > { %1295 = vst [vmem:[%s1548_s6 + $0x10] sm:$0xff] %v1227_v40   ;;  %v807_v49 = vadd.f32 %v1526_v25, %v768_v42  ;;  %v766_v50 = vmul.f32 %v1520_v21, %v559_v47  ;;  %v823_v53 = vadd.f32 %v1526_v25, %v784_v46  ;;  %v782_v54 = vmul.f32 %v1520_v21, %v623_v51 }
  0xed   : > { %1303 = vst [vmem:[%s1548_s6 + $0x50] sm:$0xff] %v1267_v44   ;;  %v1342_v55 = vpop.f32.mrf.mxu0  ;;  %v1358_v60 = vpop.f32.mrf.mxu1  ;;  %v854_v61 = vmax.f32 %v822_v45, 0.0  ;;  %v836_v2 = vmax.f32 %v804_v48, 0.0  ;;  %v852_v7 = vmax.f32 %v820_v52, 0.0 }
  0xee   : > { %v839_v57 = vmax.f32 %v807_v49, 0.0  ;;  %v805_v58 = vadd.f32 %v1526_v25, %v766_v50  ;;  %v771_v59 = vmul.f32 %v1342_v55, %v1520_v21  ;;  %v855_v62 = vmax.f32 %v823_v53, 0.0 }
  0xef   : > { %v821_v63 = vadd.f32 %v1526_v25, %v782_v54  ;;  %v787_v0 = vmul.f32 %v1358_v60, %v1520_v21  ;;  %v572_v1 = vpop.f32.mrf.mxu0  ;;  %v636_v6 = vpop.f32.mrf.mxu1 }
  0xf0   : > { %v1242_v3 = vpack.c.bf16 %v839_v57, %v838_v56  ;;  %v837_v4 = vmax.f32 %v805_v58, 0.0  ;;  %v769_v5 = vmul.f32 %v1520_v21, %v572_v1  ;;  %v1282_v8 = vpack.c.bf16 %v855_v62, %v854_v61 }
  0xf1   : > { %v853_v9 = vmax.f32 %v821_v63, 0.0  ;;  %v785_v10 = vmul.f32 %v1520_v21, %v636_v6  ;;  %v1343_v11 = vpop.f32.mrf.mxu0  ;;  %v810_v13 = vadd.f32 %v1526_v25, %v771_v59  ;;  %v1359_v15 = vpop.f32.mrf.mxu1  ;;  %v826_v17 = vadd.f32 %v1526_v25, %v787_v0 }
  0xf2   : > { %1298 = vst [vmem:[%s1548_s6 + $0x28] sm:$0xff] %v1242_v3   ;;  %v1237_v12 = vpack.c.bf16 %v837_v4, %v836_v2  ;;  %v772_v14 = vmul.f32 %v1343_v11, %v1520_v21  ;;  %1306 = vst [vmem:[%s1548_s6 + $0x68] sm:$0xff] %v1282_v8   ;;  %v788_v18 = vmul.f32 %v1359_v15, %v1520_v21 }
  0xf3   : > { %v1277_v16 = vpack.c.bf16 %v853_v9, %v852_v7  ;;  %v575_v19 = vpop.f32.mrf.mxu0  ;;  %v808_v20 = vadd.f32 %v1526_v25, %v769_v5  ;;  %v639_v24 = vpop.f32.mrf.mxu1  ;;  %v824_v26 = vadd.f32 %v1526_v25, %v785_v10  ;;  %v842_v29 = vmax.f32 %v810_v13, 0.0 }
  0xf4   : > { %1297 = vst [vmem:[%s1548_s6 + $0x20] sm:$0xff] %v1237_v12   ;;  %v811_v22 = vadd.f32 %v1526_v25, %v772_v14  ;;  %v770_v23 = vmul.f32 %v1520_v21, %v575_v19  ;;  %v827_v27 = vadd.f32 %v1526_v25, %v788_v18  ;;  %v786_v28 = vmul.f32 %v1520_v21, %v639_v24 }
  0xf5   : > { %1305 = vst [vmem:[%s1548_s6 + $0x60] sm:$0xff] %v1277_v16   ;;  %v858_v32 = vmax.f32 %v826_v17, 0.0  ;;  %v840_v35 = vmax.f32 %v808_v20, 0.0  ;;  %v856_v38 = vmax.f32 %v824_v26, 0.0 }
  0xf6   : > { %v843_v30 = vmax.f32 %v811_v22, 0.0  ;;  %v809_v31 = vadd.f32 %v1526_v25, %v770_v23  ;;  %v859_v33 = vmax.f32 %v827_v27, 0.0  ;;  %v825_v34 = vadd.f32 %v1526_v25, %v786_v28 }
  0xf8   : > { %v1252_v36 = vpack.c.bf16 %v843_v30, %v842_v29  ;;  %v841_v37 = vmax.f32 %v809_v31, 0.0  ;;  %v1292_v39 = vpack.c.bf16 %v859_v33, %v858_v32  ;;  %v857_v40 = vmax.f32 %v825_v34, 0.0 }
  0xfa   : > { %1300 = vst [vmem:[%s1548_s6 + $0x38] sm:$0xff] %v1252_v36   ;;  %v1247_v41 = vpack.c.bf16 %v841_v37, %v840_v35  ;;  %1308 = vst [vmem:[%s1548_s6 + $0x78] sm:$0xff] %v1292_v39   ;;  %v1287_v21 = vpack.c.bf16 %v857_v40, %v856_v38 }
  0xfc   : > { %1299 = vst [vmem:[%s1548_s6 + $0x30] sm:$0xff] %v1247_v41   ;;  %1307 = vst [vmem:[%s1548_s6 + $0x70] sm:$0xff] %v1287_v21  }
  0xfd PF: > { %s14_s17 = sadd.s32 1, %s1426_s17   ;;  %s1628_s15 = smov %s1422_s16 }
  0xfe   : > { %p11_p5 = scmp.ge.s32.totalorder %s14_s17, 20   ;;  %s1629_s16 = smov %s1631_s18 }
 0x100   :  { %13 = sbr.rel (!%p11_p5) target bundleno = 2 (0x2), region = 77 }

// kernel: fer_cnn_forward.12
= control target key start
LH: loop header
LB: loop body
LE: loop exit
PB: predicated region body
PF: predicated region fallthrough
CT: control target
= control target key end

     0   :  { %s852_s9 = smov 0   ;;  %s854_s10 = smov 0   ;;  %s1175_s0 = inlined_call_operand.vmem [shape: bf16[48,2,24,128], index: 0, kind: input, shape index: {}, may-alias: {0,1}]   ;;  %s1176_s1 = inlined_call_operand.vmem [shape: bf16[48,2,24,128], index: 1, kind: input, shape index: {}, may-alias: {0,1}]   ;;  %s1177_s2 = inlined_call_operand.vmem [shape: bf16[48,24,64], index: 2, kind: output, shape index: {}]  }
   0x1   :  { %s856_s11 = smov 0  }
   0x2 LB: > { %s745_s12 = sadd.s32 4294967295, %s834_s11   ;;  %s869_s13 = sadd.s32 1, %s834_s11   ;;  %s834_s11 = sphi %s856_s11, %s1181_s11   ;;  %s830_s10 = sphi %s854_s10, %s1180_s10   ;;  %s826_s9 = sphi %s852_s9, %s1179_s9  }
   0x3   : > { %s16_s14 = ssub.s32 %s834_s11, %s869_s13  ;;  %s19_s15 = sadd.s32 1, %s830_s10 }
   0x4   : > { %p17_p0 = scmp.eq.s32.totalorder %s16_s14, 0  ;;  %p26_p1 = scmp.ne.s32.totalorder %s830_s10, %s826_s9 }
   0x5   : > { %p27_p2 = scmp.eq.s32.totalorder %s834_s11, 0  ;;  %p748_p4 = scmp.ge.s32.totalorder %s834_s11, 6 }
   0x6   : > { %s878_s16 = scalar_select %p17_p0, %s830_s10, %s19_s15  }
   0x7   : > { %p880_p3 = por %p27_p2, %p26_p1  ;;  %104 = sbr.rel (%p748_p4) target bundleno = 38 (0x26), region = 16 }
   0xc   : > { %107 = sbr.rel (!%p880_p3) target bundleno = 25 (0x19), region = 20  ;;  %s109_s18 = sand.u32 (%p880_p3), 1, %s830_s10  }
   0xd   : > { %s783_s19 = smul.u32 (%p880_p3), 192, %s834_s11 }
   0xe   : > { %s782_s20 = smul.u32 (%p880_p3), 96, %s109_s18 }
   0xf   : > { %s892_s23 = scalar_lea.vmem (%p880_p3), %s1175_s0, %s783_s19 }
  0x10   : > { %v132_v0 = vld [vmem:[%s892_s23] sm:$0xff] (%p880_p3)   ;;  %v136_v1 = vld [vmem:[%s892_s23 + $0x8] sm:$0xf] (%p880_p3)  ;;  %v138_v2 = vld [vmem:[%s892_s23 + $0x18] sm:$0xff] (%p880_p3)   ;;  %s111_s24 = scalar_lea.vmem (%p880_p3), [#allocation2], %s782_s20 }
  0x11   : > { %133 = vst [vmem:[%s111_s24] sm:$0xff] %v132_v0   ;;  %137 = vst [vmem:[%s111_s24 + $0x8] sm:$0xf] %v136_v1  ;;  %v142_v3 = vld [vmem:[%s892_s23 + $0x20] sm:$0xf]  ;;  %v144_v4 = vld [vmem:[%s892_s23 + $0x30] sm:$0xff]  }
  0x12   : > { %139 = vst [vmem:[%s111_s24 + $0xc] sm:$0xff] %v138_v2   ;;  %v148_v5 = vld [vmem:[%s892_s23 + $0x38] sm:$0xf]  ;;  %143 = vst [vmem:[%s111_s24 + $0x14] sm:$0xf] %v142_v3  ;;  %v150_v6 = vld [vmem:[%s892_s23 + $0x48] sm:$0xff]  }
  0x13   : > { %145 = vst [vmem:[%s111_s24 + $0x18] sm:$0xff] %v144_v4   ;;  %149 = vst [vmem:[%s111_s24 + $0x20] sm:$0xf] %v148_v5  ;;  %v154_v7 = vld [vmem:[%s892_s23 + $0x50] sm:$0xf]  ;;  %v156_v8 = vld [vmem:[%s892_s23 + $0x60] sm:$0xff]  }
  0x14   : > { %151 = vst [vmem:[%s111_s24 + $0x24] sm:$0xff] %v150_v6   ;;  %155 = vst [vmem:[%s111_s24 + $0x2c] sm:$0xf] %v154_v7  ;;  %v160_v9 = vld [vmem:[%s892_s23 + $0x68] sm:$0xf]  ;;  %v162_v10 = vld [vmem:[%s892_s23 + $0x78] sm:$0xff]  }
  0x15   : > { %157 = vst [vmem:[%s111_s24 + $0x30] sm:$0xff] %v156_v8   ;;  %v166_v11 = vld [vmem:[%s892_s23 + $0x80] sm:$0xf]  ;;  %161 = vst [vmem:[%s111_s24 + $0x38] sm:$0xf] %v160_v9  ;;  %v168_v12 = vld [vmem:[%s892_s23 + $0x90] sm:$0xff]  }
  0x16   : > { %163 = vst [vmem:[%s111_s24 + $0x3c] sm:$0xff] %v162_v10   ;;  %167 = vst [vmem:[%s111_s24 + $0x44] sm:$0xf] %v166_v11  ;;  %v172_v13 = vld [vmem:[%s892_s23 + $0x98] sm:$0xf]  ;;  %v174_v14 = vld [vmem:[%s892_s23 + $0xa8] sm:$0xff]  }
  0x17   : > { %169 = vst [vmem:[%s111_s24 + $0x48] sm:$0xff] %v168_v12   ;;  %173 = vst [vmem:[%s111_s24 + $0x50] sm:$0xf] %v172_v13  ;;  %v178_v15 = vld [vmem:[%s892_s23 + $0xb0] sm:$0xf] }
  0x18   : > { %175 = vst [vmem:[%s111_s24 + $0x54] sm:$0xff] %v174_v14   ;;  %179 = vst [vmem:[%s111_s24 + $0x5c] sm:$0xf] %v178_v15 }
  0x19 PF: > { %251 = sbr.rel (!%p880_p3) target bundleno = 38 (0x26), region = 61  ;;  %s253_s25 = sand.u32 (%p880_p3), 1, %s830_s10  }
  0x1a   : > { %s752_s26 = smul.u32 (%p880_p3), 192, %s834_s11 }
  0x1b   : > { %s784_s27 = smul.u32 (%p880_p3), 96, %s253_s25 }
  0x1c   : > { %s917_s30 = scalar_lea.vmem (%p880_p3), %s1176_s1, %s752_s26 }
  0x1d   : > { %v753_v16 = vld [vmem:[%s917_s30 + $0xc] sm:$0xff] (%p880_p3)   ;;  %v755_v17 = vld [vmem:[%s917_s30 + $0x14] sm:$0xf] (%p880_p3)  ;;  %v756_v18 = vld [vmem:[%s917_s30 + $0x24] sm:$0xff] (%p880_p3)   ;;  %s255_s3 = scalar_lea.vmem (%p880_p3), [#allocation3], %s784_s27 }
  0x1e   : > { %278 = vst [vmem:[%s255_s3] sm:$0xff] %v753_v16   ;;  %282 = vst [vmem:[%s255_s3 + $0x8] sm:$0xf] %v755_v17  ;;  %v758_v19 = vld [vmem:[%s917_s30 + $0x2c] sm:$0xf]  ;;  %v759_v20 = vld [vmem:[%s917_s30 + $0x3c] sm:$0xff]  }
  0x1f   : > { %284 = vst [vmem:[%s255_s3 + $0xc] sm:$0xff] %v756_v18   ;;  %v761_v21 = vld [vmem:[%s917_s30 + $0x44] sm:$0xf]  ;;  %288 = vst [vmem:[%s255_s3 + $0x14] sm:$0xf] %v758_v19  ;;  %v762_v22 = vld [vmem:[%s917_s30 + $0x54] sm:$0xff]  }
  0x20   : > { %290 = vst [vmem:[%s255_s3 + $0x18] sm:$0xff] %v759_v20   ;;  %294 = vst [vmem:[%s255_s3 + $0x20] sm:$0xf] %v761_v21  ;;  %v764_v23 = vld [vmem:[%s917_s30 + $0x5c] sm:$0xf]  ;;  %v765_v24 = vld [vmem:[%s917_s30 + $0x6c] sm:$0xff]  }
  0x21   : > { %296 = vst [vmem:[%s255_s3 + $0x24] sm:$0xff] %v762_v22   ;;  %300 = vst [vmem:[%s255_s3 + $0x2c] sm:$0xf] %v764_v23  ;;  %v767_v25 = vld [vmem:[%s917_s30 + $0x74] sm:$0xf]  ;;  %v768_v26 = vld [vmem:[%s917_s30 + $0x84] sm:$0xff]  }
  0x22   : > { %302 = vst [vmem:[%s255_s3 + $0x30] sm:$0xff] %v765_v24   ;;  %v770_v27 = vld [vmem:[%s917_s30 + $0x8c] sm:$0xf]  ;;  %306 = vst [vmem:[%s255_s3 + $0x38] sm:$0xf] %v767_v25  ;;  %v771_v28 = vld [vmem:[%s917_s30 + $0x9c] sm:$0xff]  }
  0x23   : > { %308 = vst [vmem:[%s255_s3 + $0x3c] sm:$0xff] %v768_v26   ;;  %312 = vst [vmem:[%s255_s3 + $0x44] sm:$0xf] %v770_v27  ;;  %v773_v29 = vld [vmem:[%s917_s30 + $0xa4] sm:$0xf]  ;;  %v774_v30 = vld [vmem:[%s917_s30 + $0xb4] sm:$0xff]  }
  0x24   : > { %314 = vst [vmem:[%s255_s3 + $0x48] sm:$0xff] %v771_v28   ;;  %318 = vst [vmem:[%s255_s3 + $0x50] sm:$0xf] %v773_v29  ;;  %v776_v31 = vld [vmem:[%s917_s30 + $0xbc] sm:$0xf] }
  0x25   : > { %320 = vst [vmem:[%s255_s3 + $0x54] sm:$0xff] %v774_v30   ;;  %324 = vst [vmem:[%s255_s3 + $0x5c] sm:$0xf] %v776_v31 }
  0x26 PF: > { %p777_p5 = scmp.ge.s32.totalorder %s834_s11, 1  ;;  %p395_p6 = scmp.lt.s32.totalorder %s834_s11, 7 }
  0x28   : > { %p396_p7 = pnand %p777_p5, %p395_p6 }
  0x29   : > { %s402_s4 = sand.u32 (!%p396_p7), 1, %s826_s9   ;;  %s836_s8 = smov (!%p396_p7), 64  }
  0x2a   : > { %399 = sbr.rel (%p396_p7) target bundleno = 213 (0xd5), region = 102  ;;  %s778_s9 = sshll.u32 (!%p396_p7), %s745_s12, 3 }
  0x2b   : > { %s785_s5 = smul.u32 (!%p396_p7), 96, %s402_s4  ;;  %p438_p8 = scmp.lt.s32.totalorder (!%p396_p7), %s778_s9, 47 }
  0x2d   : > { %s938_s6 = scalar_lea.vmem (!%p396_p7), [#allocation2], %s785_s5  ;;  %s941_s7 = scalar_lea.vmem (!%p396_p7), [#allocation3], %s785_s5 }
  0x2f   : > { %v446_v32 = vld [vmem:[%s938_s6 + $0x8] sm:$0xf]  ;;  %v444_v34 = vld [vmem:[%s938_s6] sm:$0xf]  ;;  %v447_v37 = vld [vmem:[%s938_s6 + $0xc] sm:$0xf] }
  0x30   : > { %v470_v33 = vld [vmem:[%s941_s7 + $0x8] sm:$0xf]  ;;  %v468_v36 = vld [vmem:[%s941_s7] sm:$0xf]  ;;  %v471_v38 = vld [vmem:[%s941_s7 + $0xc] sm:$0xf] }
  0x31   : > { %v945_v35 = vmax.bf16 %v470_v33, %v446_v32  ;;  %v950_v39 = vmax.bf16 %v468_v36, %v444_v34  ;;  %v445_v40 = vld [vmem:[%s938_s6 + $0x4] sm:$0xf]  ;;  %v956_v42 = vmax.bf16 %v471_v38, %v447_v37  ;;  %v449_v44 = vld [vmem:[%s938_s6 + $0x14] sm:$0xf]  ;;  %v448_v46 = vld [vmem:[%s938_s6 + $0x10] sm:$0xf] }
  0x32   : > { %v469_v41 = vld [vmem:[%s941_s7 + $0x4] sm:$0xf]  ;;  %v473_v45 = vld [vmem:[%s941_s7 + $0x14] sm:$0xf]  ;;  %v472_v47 = vld [vmem:[%s941_s7 + $0x10] sm:$0xf] }
  0x33   : > { %544 = vrot.lane.b32.xlu1 %v945_v35, %s836_s8  ;;  %540 = vrot.lane.b32.xlu0 %v950_v39, %s836_s8  ;;  %v960_v43 = vmax.bf16 %v469_v41, %v445_v40  ;;  %v968_v48 = vmax.bf16 %v473_v45, %v449_v44  ;;  %v972_v49 = vmax.bf16 %v472_v47, %v448_v46  ;;  %v451_v50 = vld [vmem:[%s938_s6 + $0x1c] sm:$0xf]  ;;  %v450_v52 = vld [vmem:[%s938_s6 + $0x18] sm:$0xf]  ;;  %s1183_s9 = smov (!%p438_p8, %s778_s9), 47  ;;  %vm636_vm0 = vcmask 519168  }
  0x34   : > { %v475_v51 = vld [vmem:[%s941_s7 + $0x1c] sm:$0xf]  ;;  %v474_v53 = vld [vmem:[%s941_s7 + $0x18] sm:$0xf]  ;;  %v453_v56 = vld [vmem:[%s938_s6 + $0x24] sm:$0xf] }
  0x35   : > { %v980_v54 = vmax.bf16 %v475_v51, %v451_v50  ;;  %v984_v55 = vmax.bf16 %v474_v53, %v450_v52  ;;  %v477_v57 = vld [vmem:[%s941_s7 + $0x24] sm:$0xf]  ;;  %v452_v58 = vld [vmem:[%s938_s6 + $0x20] sm:$0xf]  ;;  %v455_v62 = vld [vmem:[%s938_s6 + $0x2c] sm:$0xf] }
  0x36   : > { %v476_v59 = vld [vmem:[%s941_s7 + $0x20] sm:$0xf]  ;;  %v992_v60 = vmax.bf16 %v477_v57, %v453_v56  ;;  %v479_v63 = vld [vmem:[%s941_s7 + $0x2c] sm:$0xf]  ;;  %v454_v0 = vld [vmem:[%s938_s6 + $0x28] sm:$0xf] }
  0x37   : > { %546 = vrot.lane.b32.xlu1 %v956_v42, %s836_s8  ;;  %542 = vrot.lane.b32.xlu0 %v960_v43, %s836_s8  ;;  %v996_v61 = vmax.bf16 %v476_v59, %v452_v58  ;;  %v478_v1 = vld [vmem:[%s941_s7 + $0x28] sm:$0xf]  ;;  %v1004_v2 = vmax.bf16 %v479_v63, %v455_v62  ;;  %v457_v4 = vld [vmem:[%s938_s6 + $0x34] sm:$0xf]  ;;  %s786_s14 = smul.u32 12, %s1183_s9 }
  0x38   : > { %v1008_v3 = vmax.bf16 %v478_v1, %v454_v0  ;;  %v481_v5 = vld [vmem:[%s941_s7 + $0x34] sm:$0xf]  ;;  %v456_v6 = vld [vmem:[%s938_s6 + $0x30] sm:$0xf]  ;;  %v459_v10 = vld [vmem:[%s938_s6 + $0x3c] sm:$0xf] }
  0x39   : > { %v480_v7 = vld [vmem:[%s941_s7 + $0x30] sm:$0xf]  ;;  %v1016_v8 = vmax.bf16 %v481_v5, %v457_v4  ;;  %v483_v11 = vld [vmem:[%s941_s7 + $0x3c] sm:$0xf]  ;;  %v458_v12 = vld [vmem:[%s938_s6 + $0x38] sm:$0xf]  ;;  %s1091_s18 = scalar_lea.vmem %s1177_s2, %s786_s14 }
  0x3a   : > { %v1020_v9 = vmax.bf16 %v480_v7, %v456_v6  ;;  %v482_v13 = vld [vmem:[%s941_s7 + $0x38] sm:$0xf]  ;;  %v1028_v14 = vmax.bf16 %v483_v11, %v459_v10  ;;  %v461_v16 = vld [vmem:[%s938_s6 + $0x44] sm:$0xf]  ;;  %v460_v18 = vld [vmem:[%s938_s6 + $0x40] sm:$0xf] }
  0x3b   : > { %550 = vrot.lane.b32.xlu1 %v968_v48, %s836_s8  ;;  %548 = vrot.lane.b32.xlu0 %v972_v49, %s836_s8  ;;  %v1032_v15 = vmax.bf16 %v482_v13, %v458_v12  ;;  %v485_v17 = vld [vmem:[%s941_s7 + $0x44] sm:$0xf]  ;;  %v484_v19 = vld [vmem:[%s941_s7 + $0x40] sm:$0xf] }
  0x3c   : > { %v1040_v20 = vmax.bf16 %v485_v17, %v461_v16  ;;  %v1044_v21 = vmax.bf16 %v484_v19, %v460_v18  ;;  %v463_v22 = vld [vmem:[%s938_s6 + $0x4c] sm:$0xf]  ;;  %v462_v24 = vld [vmem:[%s938_s6 + $0x48] sm:$0xf]  ;;  %v465_v28 = vld [vmem:[%s938_s6 + $0x54] sm:$0xf] }
  0x3d   : > { %v487_v23 = vld [vmem:[%s941_s7 + $0x4c] sm:$0xf]  ;;  %v486_v25 = vld [vmem:[%s941_s7 + $0x48] sm:$0xf]  ;;  %v489_v29 = vld [vmem:[%s941_s7 + $0x54] sm:$0xf] }
  0x3e   : > { %v1052_v26 = vmax.bf16 %v487_v23, %v463_v22  ;;  %v1056_v27 = vmax.bf16 %v486_v25, %v462_v24  ;;  %v464_v30 = vld [vmem:[%s938_s6 + $0x50] sm:$0xf]  ;;  %v1064_v32 = vmax.bf16 %v489_v29, %v465_v28  ;;  %v467_v34 = vld [vmem:[%s938_s6 + $0x5c] sm:$0xf]  ;;  %v466_v37 = vld [vmem:[%s938_s6 + $0x58] sm:$0xf] }
  0x3f   : > { %554 = vrot.lane.b32.xlu1 %v980_v54, %s836_s8  ;;  %552 = vrot.lane.b32.xlu0 %v984_v55, %s836_s8  ;;  %v488_v31 = vld [vmem:[%s941_s7 + $0x50] sm:$0xf]  ;;  %v491_v36 = vld [vmem:[%s941_s7 + $0x5c] sm:$0xf] }
  0x40   : > { %v1068_v33 = vmax.bf16 %v488_v31, %v464_v30  ;;  %v490_v38 = vld [vmem:[%s941_s7 + $0x58] sm:$0xf]  ;;  %v1076_v40 = vmax.bf16 %v491_v36, %v467_v34 }
  0x41   : > { %v1080_v41 = vmax.bf16 %v490_v38, %v466_v37 }
  0x43   : > { %558 = vrot.lane.b32.xlu1 %v992_v60, %s836_s8  ;;  %556 = vrot.lane.b32.xlu0 %v996_v61, %s836_s8 }
  0x47   : > { %562 = vrot.lane.b32.xlu1 %v1004_v2, %s836_s8  ;;  %560 = vrot.lane.b32.xlu0 %v1008_v3, %s836_s8 }
  0x4b   : > { %566 = vrot.lane.b32.xlu1 %v1016_v8, %s836_s8  ;;  %564 = vrot.lane.b32.xlu0 %v1020_v9, %s836_s8 }
  0x4f   : > { %570 = vrot.lane.b32.xlu1 %v1028_v14, %s836_s8  ;;  %568 = vrot.lane.b32.xlu0 %v1032_v15, %s836_s8 }
  0x53   : > { %574 = vrot.lane.b32.xlu1 %v1040_v20, %s836_s8  ;;  %572 = vrot.lane.b32.xlu0 %v1044_v21, %s836_s8 }
  0x57   : > { %578 = vrot.lane.b32.xlu1 %v1052_v26, %s836_s8  ;;  %576 = vrot.lane.b32.xlu0 %v1056_v27, %s836_s8 }
  0x5b   : > { %582 = vrot.lane.b32.xlu1 %v1064_v32, %s836_s8  ;;  %580 = vrot.lane.b32.xlu0 %v1068_v33, %s836_s8 }
  0x5f   : > { %586 = vrot.lane.b32.xlu1 %v1076_v40, %s836_s8  ;;  %584 = vrot.lane.b32.xlu0 %v1080_v41, %s836_s8 }
  0xa5   : > { %v545_v44 = vpop.permute.xlu1 %544  ;;  %v541_v46 = vpop.permute.xlu0 %540 }
  0xa6   : > { %v614_v45 = vmax.bf16 %v545_v44, %v945_v35  ;;  %v612_v47 = vmax.bf16 %v541_v46, %v950_v39 }
  0xa8   : > { %639 = vst.msk [vmem:[%s1091_s18 + $0x8] sm:$0xf] %vm636_vm0, %v614_v45  ;;  %637 = vst.msk [vmem:[%s1091_s18] sm:$0xf] %vm636_vm0, %v612_v47 }
  0xa9   : > { %v547_v50 = vpop.permute.xlu1 %546  ;;  %v543_v52 = vpop.permute.xlu0 %542 }
  0xaa   : > { %v615_v51 = vmax.bf16 %v547_v50, %v956_v42  ;;  %v613_v53 = vmax.bf16 %v543_v52, %v960_v43 }
  0xac   : > { %640 = vst.msk [vmem:[%s1091_s18 + $0xc] sm:$0xf] %vm636_vm0, %v615_v51  ;;  %638 = vst.msk [vmem:[%s1091_s18 + $0x4] sm:$0xf] %vm636_vm0, %v613_v53 }
  0xad   : > { %v551_v35 = vpop.permute.xlu1 %550  ;;  %v549_v56 = vpop.permute.xlu0 %548 }
  0xae   : > { %v617_v39 = vmax.bf16 %v551_v35, %v968_v48  ;;  %v616_v57 = vmax.bf16 %v549_v56, %v972_v49 }
  0xb0   : > { %642 = vst.msk [vmem:[%s1091_s18 + $0x14] sm:$0xf] %vm636_vm0, %v617_v39  ;;  %641 = vst.msk [vmem:[%s1091_s18 + $0x10] sm:$0xf] %vm636_vm0, %v616_v57 }
  0xb1   : > { %v555_v42 = vpop.permute.xlu1 %554  ;;  %v553_v58 = vpop.permute.xlu0 %552 }
  0xb2   : > { %v619_v43 = vmax.bf16 %v555_v42, %v980_v54  ;;  %v618_v59 = vmax.bf16 %v553_v58, %v984_v55 }
  0xb4   : > { %644 = vst.msk [vmem:[%s1091_s18 + $0x1c] sm:$0xf] %vm636_vm0, %v619_v43  ;;  %643 = vst.msk [vmem:[%s1091_s18 + $0x18] sm:$0xf] %vm636_vm0, %v618_v59 }
  0xb5   : > { %v559_v48 = vpop.permute.xlu1 %558  ;;  %v557_v62 = vpop.permute.xlu0 %556 }
  0xb6   : > { %v621_v49 = vmax.bf16 %v559_v48, %v992_v60  ;;  %v620_v63 = vmax.bf16 %v557_v62, %v996_v61 }
  0xb8   : > { %646 = vst.msk [vmem:[%s1091_s18 + $0x24] sm:$0xf] %vm636_vm0, %v621_v49  ;;  %645 = vst.msk [vmem:[%s1091_s18 + $0x20] sm:$0xf] %vm636_vm0, %v620_v63 }
  0xb9   : > { %v563_v54 = vpop.permute.xlu1 %562  ;;  %v561_v0 = vpop.permute.xlu0 %560 }
  0xba   : > { %v623_v55 = vmax.bf16 %v563_v54, %v1004_v2  ;;  %v622_v1 = vmax.bf16 %v561_v0, %v1008_v3 }
  0xbc   : > { %648 = vst.msk [vmem:[%s1091_s18 + $0x2c] sm:$0xf] %vm636_vm0, %v623_v55  ;;  %647 = vst.msk [vmem:[%s1091_s18 + $0x28] sm:$0xf] %vm636_vm0, %v622_v1 }
  0xbd   : > { %v567_v60 = vpop.permute.xlu1 %566  ;;  %v565_v4 = vpop.permute.xlu0 %564 }
  0xbe   : > { %v625_v61 = vmax.bf16 %v567_v60, %v1016_v8  ;;  %v624_v5 = vmax.bf16 %v565_v4, %v1020_v9 }
  0xc0   : > { %650 = vst.msk [vmem:[%s1091_s18 + $0x34] sm:$0xf] %vm636_vm0, %v625_v61  ;;  %649 = vst.msk [vmem:[%s1091_s18 + $0x30] sm:$0xf] %vm636_vm0, %v624_v5 }
  0xc1   : > { %v571_v2 = vpop.permute.xlu1 %570  ;;  %v569_v6 = vpop.permute.xlu0 %568 }
  0xc2   : > { %v627_v3 = vmax.bf16 %v571_v2, %v1028_v14  ;;  %v626_v7 = vmax.bf16 %v569_v6, %v1032_v15 }
  0xc4   : > { %652 = vst.msk [vmem:[%s1091_s18 + $0x3c] sm:$0xf] %vm636_vm0, %v627_v3  ;;  %651 = vst.msk [vmem:[%s1091_s18 + $0x38] sm:$0xf] %vm636_vm0, %v626_v7 }
  0xc5   : > { %v575_v8 = vpop.permute.xlu1 %574  ;;  %v573_v10 = vpop.permute.xlu0 %572 }
  0xc6   : > { %v629_v9 = vmax.bf16 %v575_v8, %v1040_v20  ;;  %v628_v11 = vmax.bf16 %v573_v10, %v1044_v21 }
  0xc8   : > { %654 = vst.msk [vmem:[%s1091_s18 + $0x44] sm:$0xf] %vm636_vm0, %v629_v9  ;;  %653 = vst.msk [vmem:[%s1091_s18 + $0x40] sm:$0xf] %vm636_vm0, %v628_v11 }
  0xc9   : > { %v579_v12 = vpop.permute.xlu1 %578  ;;  %v577_v14 = vpop.permute.xlu0 %576 }
  0xca   : > { %v631_v13 = vmax.bf16 %v579_v12, %v1052_v26  ;;  %v630_v15 = vmax.bf16 %v577_v14, %v1056_v27 }
  0xcc   : > { %656 = vst.msk [vmem:[%s1091_s18 + $0x4c] sm:$0xf] %vm636_vm0, %v631_v13  ;;  %655 = vst.msk [vmem:[%s1091_s18 + $0x48] sm:$0xf] %vm636_vm0, %v630_v15 }
  0xcd   : > { %v583_v16 = vpop.permute.xlu1 %582  ;;  %v581_v18 = vpop.permute.xlu0 %580 }
  0xce   : > { %v633_v17 = vmax.bf16 %v583_v16, %v1064_v32  ;;  %v632_v19 = vmax.bf16 %v581_v18, %v1068_v33 }
  0xd0   : > { %658 = vst.msk [vmem:[%s1091_s18 + $0x54] sm:$0xf] %vm636_vm0, %v633_v17  ;;  %657 = vst.msk [vmem:[%s1091_s18 + $0x50] sm:$0xf] %vm636_vm0, %v632_v19 }
  0xd1   : > { %v587_v20 = vpop.permute.xlu1 %586  ;;  %v585_v22 = vpop.permute.xlu0 %584 }
  0xd2   : > { %v635_v21 = vmax.bf16 %v587_v20, %v1076_v40  ;;  %v634_v23 = vmax.bf16 %v585_v22, %v1080_v41 }
  0xd4   : > { %660 = vst.msk [vmem:[%s1091_s18 + $0x5c] sm:$0xf] %vm636_vm0, %v635_v21  ;;  %659 = vst.msk [vmem:[%s1091_s18 + $0x58] sm:$0xf] %vm636_vm0, %v634_v23 }
  0xd5 PF: > { %p9_p9 = scmp.ge.s32.totalorder %s869_s13, 8   ;;  %s1179_s9 = smov %s830_s10 }
  0xd6   : > { %s1180_s10 = smov %s878_s16  ;;  %s1181_s11 = smov %s869_s13 }
  0xd7   :  { %11 = sbr.rel (!%p9_p9) target bundleno = 2 (0x2), region = 153 }

// kernel: fer_cnn_forward.13
= control target key start
LH: loop header
LB: loop body
LE: loop exit
PB: predicated region body
PF: predicated region fallthrough
CT: control target
= control target key end

     0   :  { %s5741_s15 = smov 0   ;;  %s5743_s16 = smov 0   ;;  %s7009_s0 = inlined_call_operand.vmem [shape: bf16[1280,1600], index: 0, kind: input, shape index: {}]   ;;  %s7010_s1 = inlined_call_operand.vmem [shape: bf16[1600,128], index: 1, kind: input, shape index: {}]   ;;  %s7011_s2 = inlined_call_operand.vmem [shape: f32[1,128], index: 2, kind: input, shape index: {}]   ;;  %s7012_s3 = inlined_call_operand.vmem [shape: f32[1,128], index: 3, kind: input, shape index: {}]   ;;  %s7013_s4 = inlined_call_operand.vmem [shape: bf16[1280,128], index: 4, kind: output, shape index: {}]  }
   0x1   :  { %s5745_s17 = smov 0  }
   0x2 LB: > { %s26_s18 = sadd.s32 1, %s5710_s16  ;;  %p4023_p0 = scmp.ge.s32.totalorder %s5714_s17, 1  ;;  %s5714_s17 = sphi %s5745_s17, %s14_s17   ;;  %s5710_s16 = sphi %s5743_s16, %s7035_s16   ;;  %s5706_s15 = sphi %s5741_s15, %s7034_s15  }
   0x3   : > { %p28_p1 = scmp.ge.s32.totalorder %s26_s18, 5  ;;  %p194_p2 = scmp.lt.s32.totalorder %s5714_s17, 6 }
   0x5   : > { %s7037_s18 = smov (%p28_p1, %s26_s18), 0  ;;  %p195_p3 = pnand %p4023_p0, %p194_p2 }
   0x7   : > { %198 = sbr.rel (%p195_p3) target bundleno = 667 (0x29b), region = 36 }
   0xc   : > { %v5288_v0 = vld [vmem:[%s7010_s1 + $0x78] sm:$0xff]   ;;  %s4024_s21 = sshll.u32 %s5706_s15, 5  ;;  %v5290_v2 = vld [vmem:[%s7010_s1 + $0x70] sm:$0xff]   ;;  %v5292_v4 = vld [vmem:[%s7010_s1 + $0x68] sm:$0xff]   ;;  %vm2387_vm0 = vcmask 523264  }
   0xd   : > { %v5289_v1 = vld [vmem:[%s7010_s1 + $0x38] sm:$0xff]   ;;  %4515 = vmatprep.subr.bf16.mxu0 %v5288_v0  ;;  %5247 = vmatprep.subr.bf16.mxu1 %v5288_v0  ;;  %p232_p4 = scmp.lt.s32.totalorder %s4024_s21, 159  ;;  %v5291_v3 = vld [vmem:[%s7010_s1 + $0x30] sm:$0xff]   ;;  %v5293_v5 = vld [vmem:[%s7010_s1 + $0x28] sm:$0xff]  }
   0xe   : > { %4516 = vmatpush3.bf16.msra.mxu0 %v5289_v1  ;;  %5255 = vmatpush3.bf16.msra.mxu1 %v5289_v1  ;;  %v5294_v6 = vld [vmem:[%s7010_s1 + $0x60] sm:$0xff]   ;;  %v5296_v8 = vld [vmem:[%s7010_s1 + $0x58] sm:$0xff]   ;;  %v5298_v10 = vld [vmem:[%s7010_s1 + $0x50] sm:$0xff]  }
   0xf   : > { %4517 = vmatprep.subr.bf16.mxu0 %v5290_v2  ;;  %5248 = vmatprep.subr.bf16.mxu1 %v5290_v2  ;;  %s7039_s21 = smov (!%p232_p4, %s4024_s21), 159  ;;  %v5295_v7 = vld [vmem:[%s7010_s1 + $0x20] sm:$0xff]   ;;  %v5297_v9 = vld [vmem:[%s7010_s1 + $0x18] sm:$0xff]   ;;  %v5299_v13 = vld [vmem:[%s7010_s1 + $0x10] sm:$0xff]  }
  0x10   : > { %s5263_s8 = smul.u32 52, %s7039_s21  ;;  %v5300_v14 = vld [vmem:[%s7010_s1 + $0x48] sm:$0xff]   ;;  %v5302_v16 = vld [vmem:[%s7010_s1 + $0x40] sm:$0xff]   ;;  %v5310_v18 = vld [vmem:[%s7010_s1 + $0xf8] sm:$0xff]   ;;  %s4027_s11 = sshll.u32 %s7039_s21, 2 }
  0x11   : > { %v5301_v15 = vld [vmem:[%s7010_s1 + $0x8] sm:$0xff]   ;;  %v5303_v17 = vld [vmem:[%s7010_s1] sm:$0xff]   ;;  %v5313_v21 = vld [vmem:[%s7010_s1 + $0x178] sm:$0xff]   ;;  %s6863_s13 = scalar_lea.vmem %s7013_s4, %s4027_s11 }
  0x12   : > { %4518 = vmatpush3.bf16.msra.mxu0 %v5291_v3  ;;  %5256 = vmatpush3.bf16.msra.mxu1 %v5291_v3  ;;  %s5792_s15 = scalar_lea.vmem %s7009_s0, %s5263_s8  ;;  %v5311_v22 = vld [vmem:[%s7010_s1 + $0xb8] sm:$0xff]   ;;  %v5312_v23 = vld [vmem:[%s7010_s1 + $0xf0] sm:$0xff]   ;;  %v5322_v31 = vld [vmem:[%s7010_s1 + $0xe8] sm:$0xff]  }
  0x13   : > { %4519 = vmatprep.subr.bf16.mxu0 %v5292_v4  ;;  %5249 = vmatprep.subr.bf16.mxu1 %v5292_v4  ;;  %v5306_v11 = vld [vmem:[%s5792_s15 + $0x4] ss:$52 sps:$4 sm:$0xff]   ;;  %v5304_v19 = vld [vmem:[%s5792_s15] ss:$52 sps:$4 sm:$0xff]   ;;  %v5320_v29 = vld [vmem:[%s5792_s15 + $0x68] ss:$52 sps:$4 sm:$0xff]  }
  0x14   : > { %v5309_v12 = vld [vmem:[%s5792_s15 + $0x4e4] ss:$52 sps:$4 sm:$0xff]   ;;  %2468 = vmatprep.mubr.bf16.mxu0 %v5306_v11  ;;  %v5307_v20 = vld [vmem:[%s5792_s15 + $0x4e0] ss:$52 sps:$4 sm:$0xff]   ;;  %v5321_v30 = vld [vmem:[%s5792_s15 + $0x548] ss:$52 sps:$4 sm:$0xff]  }
  0x15   : > { %2564 = vmatprep.mubr.bf16.mxu1 %v5309_v12  ;;  %v5315_v24 = vld [vmem:[%s7010_s1 + $0x138] sm:$0xff]   ;;  %v5316_v25 = vld [vmem:[%s5792_s15 + $0x6c] ss:$52 sps:$4 sm:$0xff]   ;;  %v5314_v27 = vld [vmem:[%s7010_s1 + $0xb0] sm:$0xff]  }
  0x16   : > { %4520 = vmatpush3.bf16.msra.mxu0 %v5293_v5  ;;  %5257 = vmatpush3.bf16.msra.mxu1 %v5293_v5  ;;  %v5318_v26 = vld [vmem:[%s5792_s15 + $0x54c] ss:$52 sps:$4 sm:$0xff]   ;;  %v5333_v28 = vld [vmem:[%s7010_s1 + $0x170] sm:$0xff]   ;;  %v5332_v40 = vld [vmem:[%s7010_s1 + $0xd8] sm:$0xff]  }
  0x17   : > { %4521 = vmatprep.subr.bf16.mxu0 %v5294_v6  ;;  %5250 = vmatprep.subr.bf16.mxu1 %v5294_v6  ;;  %v5323_v32 = vld [vmem:[%s7010_s1 + $0xa8] sm:$0xff]   ;;  %v5335_v33 = vld [vmem:[%s7010_s1 + $0x130] sm:$0xff]   ;;  %v5324_v34 = vld [vmem:[%s7010_s1 + $0xe0] sm:$0xff]  }
  0x18   : > { %v5326_v35 = vld [vmem:[%s5792_s15 + $0xd4] ss:$52 sps:$4 sm:$0xff]   ;;  %v5325_v37 = vld [vmem:[%s7010_s1 + $0xa0] sm:$0xff]   ;;  %v5334_v41 = vld [vmem:[%s7010_s1 + $0x98] sm:$0xff]  }
  0x19   : > { %v5328_v36 = vld [vmem:[%s5792_s15 + $0x5b4] ss:$52 sps:$4 sm:$0xff]   ;;  %v5330_v38 = vld [vmem:[%s5792_s15 + $0xd0] ss:$52 sps:$4 sm:$0xff]   ;;  %v5342_v49 = vld [vmem:[%s5792_s15 + $0x138] ss:$52 sps:$4 sm:$0xff]  }
  0x1a   : > { %4522 = vmatpush3.bf16.msra.mxu0 %v5295_v7  ;;  %5258 = vmatpush3.bf16.msra.mxu1 %v5295_v7  ;;  %v5331_v39 = vld [vmem:[%s5792_s15 + $0x5b0] ss:$52 sps:$4 sm:$0xff]   ;;  %v5347_v43 = vld [vmem:[%s7010_s1 + $0x168] sm:$0xff]   ;;  %v5355_v59 = vld [vmem:[%s5792_s15 + $0x1a0] ss:$52 sps:$4 sm:$0xff]  }
  0x1b   : > { %4523 = vmatprep.subr.bf16.mxu0 %v5296_v8  ;;  %5251 = vmatprep.subr.bf16.mxu1 %v5296_v8  ;;  %v5336_v42 = vld [vmem:[%s7010_s1 + $0xd0] sm:$0xff]   ;;  %v5349_v46 = vld [vmem:[%s7010_s1 + $0x128] sm:$0xff]   ;;  %v5346_v52 = vld [vmem:[%s7010_s1 + $0xc0] sm:$0xff]  }
  0x1c   : > { %v5338_v44 = vld [vmem:[%s5792_s15 + $0x13c] ss:$52 sps:$4 sm:$0xff]   ;;  %v5344_v48 = vld [vmem:[%s7010_s1 + $0xc8] sm:$0xff]   ;;  %v5350_v53 = vld [vmem:[%s5792_s15 + $0x1a4] ss:$52 sps:$4 sm:$0xff]  }
  0x1d   : > { %v5340_v45 = vld [vmem:[%s5792_s15 + $0x61c] ss:$52 sps:$4 sm:$0xff]   ;;  %v5343_v50 = vld [vmem:[%s5792_s15 + $0x618] ss:$52 sps:$4 sm:$0xff]   ;;  %v5364_v55 = vld [vmem:[%s7010_s1 + $0x160] sm:$0xff]  }
  0x1e   : > { %4524 = vmatpush3.bf16.msra.mxu0 %v5297_v9  ;;  %5259 = vmatpush3.bf16.msra.mxu1 %v5297_v9  ;;  %v5337_v47 = vld [vmem:[%s7010_s1 + $0x90] sm:$0xff]   ;;  %v5345_v51 = vld [vmem:[%s7010_s1 + $0x88] sm:$0xff]   ;;  %v5365_v56 = vld [vmem:[%s7010_s1 + $0x120] sm:$0xff]  }
  0x1f   : > { %4525 = vmatprep.subr.bf16.mxu0 %v5298_v10  ;;  %5252 = vmatprep.subr.bf16.mxu1 %v5298_v10  ;;  %v5354_v54 = vld [vmem:[%s5792_s15 + $0xc] ss:$52 sps:$4 sm:$0xff]   ;;  %v5352_v58 = vld [vmem:[%s5792_s15 + $0x8] ss:$52 sps:$4 sm:$0xff]   ;;  %v5372_v1 = vld [vmem:[%s7010_s1 + $0x1f0] sm:$0xff]  }
  0x20   : > { %v5348_v57 = vld [vmem:[%s7010_s1 + $0x80] sm:$0xff]   ;;  %v5356_v60 = vld [vmem:[%s7010_s1 + $0x1f8] sm:$0xff]   ;;  %v5360_v63 = vld [vmem:[%s5792_s15 + $0x74] ss:$52 sps:$4 sm:$0xff]  }
  0x21   : > { %v5357_v61 = vld [vmem:[%s7010_s1 + $0x1b8] sm:$0xff]   ;;  %v5358_v62 = vld [vmem:[%s5792_s15 + $0x20c] ss:$52 sps:$4 sm:$0xff]   ;;  %v5373_v3 = vld [vmem:[%s7010_s1 + $0x1b0] sm:$0xff]  }
  0x22   : > { %4526 = vmatpush3.bf16.msra.mxu0 %v5299_v13  ;;  %5260 = vmatpush3.bf16.msra.mxu1 %v5299_v13  ;;  %v5374_v0 = vld [vmem:[%s7010_s1 + $0x158] sm:$0xff]   ;;  %v5363_v5 = vld [vmem:[%s5792_s15 + $0x70] ss:$52 sps:$4 sm:$0xff]   ;;  %v5366_v6 = vld [vmem:[%s5792_s15 + $0x274] ss:$52 sps:$4 sm:$0xff]  }
  0x23   : > { %4527 = vmatprep.subr.bf16.mxu0 %v5300_v14  ;;  %5253 = vmatprep.subr.bf16.mxu1 %v5300_v14  ;;  %v5375_v2 = vld [vmem:[%s7010_s1 + $0x118] sm:$0xff]   ;;  %v5388_v8 = vld [vmem:[%s7010_s1 + $0x150] sm:$0xff]   ;;  %v5389_v9 = vld [vmem:[%s7010_s1 + $0x1e8] sm:$0xff]  }
  0x24   : > { %v5362_v4 = vld [vmem:[%s5792_s15 + $0x208] ss:$52 sps:$4 sm:$0xff]   ;;  %v5390_v10 = vld [vmem:[%s7010_s1 + $0x110] sm:$0xff]   ;;  %v5371_v13 = vld [vmem:[%s5792_s15 + $0xd8] ss:$52 sps:$4 sm:$0xff]  }
  0x25   : > { %v5368_v7 = vld [vmem:[%s5792_s15 + $0xdc] ss:$52 sps:$4 sm:$0xff]   ;;  %v5391_v11 = vld [vmem:[%s7010_s1 + $0x1a8] sm:$0xff]  }
  0x26   : > { %4528 = vmatpush3.bf16.msra.mxu0 %v5301_v15  ;;  %5261 = vmatpush3.bf16.msra.mxu1 %v5301_v15  ;;  %v5370_v12 = vld [vmem:[%s5792_s15 + $0x270] ss:$52 sps:$4 sm:$0xff]   ;;  %v5398_v15 = vld [vmem:[%s7010_s1 + $0x148] sm:$0xff]  }
  0x27   : > { %4529 = vmatprep.subr.bf16.mxu0 %v5302_v16  ;;  %5254 = vmatprep.subr.bf16.mxu1 %v5302_v16  ;;  %v5376_v14 = vld [vmem:[%s5792_s15 + $0x2dc] ss:$52 sps:$4 sm:$0xff]   ;;  %v5399_v16 = vld [vmem:[%s7010_s1 + $0x108] sm:$0xff]  }
  0x2a   : > { %4530 = vmatpush3.bf16.msra.mxu0 %v5303_v17  ;;  %5262 = vmatpush3.bf16.msra.mxu1 %v5303_v17  ;;  %v5378_v17 = vld [vmem:[%s5792_s15 + $0x144] ss:$52 sps:$4 sm:$0xff]  }
  0x2b   : > { %4627 = vmatprep.subr.bf16.mxu1 %v5310_v18  ;;  %4739 = vmatprep.subr.bf16.mxu0 %v5313_v21  ;;  %v5406_v18 = vld [vmem:[%s7010_s1 + $0x1e0] sm:$0xff]  }
  0x2c   : > { %v5381_v21 = vld [vmem:[%s5792_s15 + $0x140] ss:$52 sps:$4 sm:$0xff]  }
  0x2d   : > { %2469 = vmatmul.mubr.bf16.vlgmr.msra.gmra.mxu0 %v5304_v19  ;;  %2565 = vmatmul.mubr.bf16.vlgmr.msra.gmra.mxu1 %v5307_v20  ;;  %v5407_v19 = vld [vmem:[%s7010_s1 + $0x1a0] sm:$0xff]   ;;  %v5380_v20 = vld [vmem:[%s5792_s15 + $0x2d8] ss:$52 sps:$4 sm:$0xff]  }
  0x2e   : > { %4628 = vmatpush3.bf16.msra.mxu1 %v5311_v22  ;;  %4740 = vmatpush3.bf16.msra.mxu0 %v5315_v24  ;;  %v5382_v22 = vld [vmem:[%s5792_s15 + $0x344] ss:$52 sps:$4 sm:$0xff]  }
  0x2f   : > { %4629 = vmatprep.subr.bf16.mxu1 %v5312_v23  ;;  %2476 = vmatprep.mubr.bf16.mxu0 %v5316_v25  ;;  %v5384_v23 = vld [vmem:[%s5792_s15 + $0x1ac] ss:$52 sps:$4 sm:$0xff]  }
  0x30   : > { %2572 = vmatprep.mubr.bf16.mxu1 %v5318_v26  ;;  %4741 = vmatprep.subr.bf16.mxu0 %v5333_v28  ;;  %v5414_v24 = vld [vmem:[%s7010_s1 + $0x140] sm:$0xff]   ;;  %v5422_v26 = vld [vmem:[%s7010_s1 + $0x1d8] sm:$0xff]  }
  0x31   : > { %v5415_v25 = vld [vmem:[%s7010_s1 + $0x100] sm:$0xff]   ;;  %v5387_v28 = vld [vmem:[%s5792_s15 + $0x1a8] ss:$52 sps:$4 sm:$0xff]  }
  0x32   : > { %4630 = vmatpush3.bf16.msra.mxu1 %v5314_v27  ;;  %4742 = vmatpush3.bf16.msra.mxu0 %v5335_v33  ;;  %v5386_v27 = vld [vmem:[%s5792_s15 + $0x340] ss:$52 sps:$4 sm:$0xff]   ;;  %v5396_v33 = vld [vmem:[%s5792_s15 + $0x3a8] ss:$52 sps:$4 sm:$0xff]  }
  0x33   : > { %4631 = vmatprep.subr.bf16.mxu1 %v5322_v31  ;;  %4743 = vmatprep.subr.bf16.mxu0 %v5347_v43  ;;  %v5392_v31 = vld [vmem:[%s5792_s15 + $0x3ac] ss:$52 sps:$4 sm:$0xff]  }
  0x34   : > { %v5454_v43 = vld [vmem:[%s7010_s1 + $0x1c8] sm:$0xff]  }
  0x35   : > { %2477 = vmatmul.mubr.bf16.gmra.mxu0 %v5320_v29  ;;  %2573 = vmatmul.mubr.bf16.gmra.mxu1 %v5321_v30  ;;  %v5423_v29 = vld [vmem:[%s7010_s1 + $0x198] sm:$0xff]  }
  0x36   : > { %4632 = vmatpush3.bf16.msra.mxu1 %v5323_v32  ;;  %2484 = vmatprep.mubr.bf16.mxu0 %v5326_v35  ;;  %v5424_v30 = vld [vmem:[%s7010_s1 + $0x278] sm:$0xff]   ;;  %v5394_v32 = vld [vmem:[%s5792_s15 + $0x214] ss:$52 sps:$4 sm:$0xff]  }
  0x37   : > { %4633 = vmatprep.subr.bf16.mxu1 %v5324_v34  ;;  %2580 = vmatprep.mubr.bf16.mxu1 %v5328_v36  ;;  %v5397_v34 = vld [vmem:[%s5792_s15 + $0x210] ss:$52 sps:$4 sm:$0xff]  }
  0x38   : > { %4744 = vmatpush3.bf16.msra.mxu0 %v5349_v46  ;;  %v5438_v35 = vld [vmem:[%s7010_s1 + $0x1d0] sm:$0xff]  }
  0x39   : > { %4745 = vmatprep.subr.bf16.mxu0 %v5364_v55  ;;  %v5439_v36 = vld [vmem:[%s7010_s1 + $0x190] sm:$0xff]  }
  0x3a   : > { %4634 = vmatpush3.bf16.msra.mxu1 %v5325_v37  ;;  %v5400_v37 = vld [vmem:[%s5792_s15 + $0x414] ss:$52 sps:$4 sm:$0xff]   ;;  %v5428_v55 = vld [vmem:[%s5792_s15 + $0x7c] ss:$52 sps:$4 sm:$0xff]  }
  0x3b   : > { %4635 = vmatprep.subr.bf16.mxu1 %v5332_v40  ;;  %v5405_v40 = vld [vmem:[%s5792_s15 + $0x278] ss:$52 sps:$4 sm:$0xff]   ;;  %v5413_v46 = vld [vmem:[%s5792_s15 + $0x2e0] ss:$52 sps:$4 sm:$0xff]  }
  0x3c   : > { %4746 = vmatpush3.bf16.msra.mxu0 %v5365_v56  ;;  %v5440_v56 = vld [vmem:[%s7010_s1 + $0x270] sm:$0xff]  }
  0x3d   : > { %2485 = vmatmul.mubr.bf16.gmra.mxu0 %v5330_v38  ;;  %2581 = vmatmul.mubr.bf16.gmra.mxu1 %v5331_v39  ;;  %v5402_v38 = vld [vmem:[%s5792_s15 + $0x27c] ss:$52 sps:$4 sm:$0xff]  }
  0x3e   : > { %4636 = vmatpush3.bf16.msra.mxu1 %v5334_v41  ;;  %2492 = vmatprep.mubr.bf16.mxu0 %v5338_v44  ;;  %v5404_v39 = vld [vmem:[%s5792_s15 + $0x410] ss:$52 sps:$4 sm:$0xff]   ;;  %v5455_v44 = vld [vmem:[%s7010_s1 + $0x188] sm:$0xff]  }
  0x3f   : > { %4637 = vmatprep.subr.bf16.mxu1 %v5336_v42  ;;  %2588 = vmatprep.mubr.bf16.mxu1 %v5340_v45  ;;  %v5408_v41 = vld [vmem:[%s5792_s15 + $0x47c] ss:$52 sps:$4 sm:$0xff]   ;;  %v5410_v42 = vld [vmem:[%s5792_s15 + $0x2e4] ss:$52 sps:$4 sm:$0xff]  }
  0x40   : > { %4747 = vmatprep.subr.bf16.mxu0 %v5374_v0  ;;  %v5412_v45 = vld [vmem:[%s5792_s15 + $0x478] ss:$52 sps:$4 sm:$0xff]  }
  0x41   : > { %4748 = vmatpush3.bf16.msra.mxu0 %v5375_v2  ;;  %v5457_v0 = vld [vmem:[%s7010_s1 + $0x228] sm:$0xff]  }
  0x42   : > { %4638 = vmatpush3.bf16.msra.mxu1 %v5337_v47  ;;  %4749 = vmatprep.subr.bf16.mxu0 %v5388_v8  ;;  %v5416_v47 = vld [vmem:[%s5792_s15 + $0x34c] ss:$52 sps:$4 sm:$0xff]   ;;  %v5489_v8 = vld [vmem:[%s7010_s1 + $0x218] sm:$0xff]  }
  0x43   : > { %4639 = vmatprep.subr.bf16.mxu1 %v5344_v48  ;;  %v5420_v48 = vld [vmem:[%s5792_s15 + $0x14] ss:$52 sps:$4 sm:$0xff]   ;;  %v5436_v2 = vld [vmem:[%s5792_s15 + $0x418] ss:$52 sps:$4 sm:$0xff]  }
  0x45   : > { %2493 = vmatmul.mubr.bf16.gmra.mxu0 %v5342_v49  ;;  %2589 = vmatmul.mubr.bf16.gmra.mxu1 %v5343_v50  ;;  %v5470_v49 = vld [vmem:[%s7010_s1 + $0x1c0] sm:$0xff]  }
  0x46   : > { %4640 = vmatpush3.bf16.msra.mxu1 %v5345_v51  ;;  %2500 = vmatprep.mubr.bf16.mxu0 %v5350_v53  ;;  %v5471_v50 = vld [vmem:[%s7010_s1 + $0x180] sm:$0xff]   ;;  %v5425_v53 = vld [vmem:[%s7010_s1 + $0x238] sm:$0xff]  }
  0x47   : > { %4641 = vmatprep.subr.bf16.mxu1 %v5346_v52  ;;  %2629 = vmatprep.mubr.bf16.mxu1 %v5354_v54  ;;  %v5418_v51 = vld [vmem:[%s5792_s15 + $0x10] ss:$52 sps:$4 sm:$0xff]   ;;  %v5421_v52 = vld [vmem:[%s5792_s15 + $0x348] ss:$52 sps:$4 sm:$0xff]  }
  0x48   : > { %4750 = vmatpush3.bf16.msra.mxu0 %v5390_v10  ;;  %v5426_v54 = vld [vmem:[%s5792_s15 + $0x3b4] ss:$52 sps:$4 sm:$0xff]  }
  0x49   : > { %4751 = vmatprep.subr.bf16.mxu0 %v5398_v15  ;;  %v5446_v10 = vld [vmem:[%s5792_s15 + $0x480] ss:$52 sps:$4 sm:$0xff]  }
  0x4a   : > { %4642 = vmatpush3.bf16.msra.mxu1 %v5348_v57  ;;  %v5486_v57 = vld [vmem:[%s7010_s1 + $0x2f8] sm:$0xff]   ;;  %v5450_v15 = vld [vmem:[%s5792_s15 + $0x1b4] ss:$52 sps:$4 sm:$0xff]  }
  0x4b   : > { %4851 = vmatprep.subr.bf16.mxu1 %v5356_v60  ;;  %v5430_v60 = vld [vmem:[%s5792_s15 + $0x3b0] ss:$52 sps:$4 sm:$0xff]  }
  0x4c   : > { %4752 = vmatpush3.bf16.msra.mxu0 %v5399_v16  ;;  %v5521_v16 = vld [vmem:[%s7010_s1 + $0x208] sm:$0xff]  }
  0x4d   : > { %2501 = vmatmul.mubr.bf16.gmra.mxu0 %v5355_v59  ;;  %2630 = vmatmul.mubr.bf16.vlgmr.msra.gmra.mxu1 %v5352_v58  ;;  %v5441_v58 = vld [vmem:[%s7010_s1 + $0x230] sm:$0xff]   ;;  %v5456_v59 = vld [vmem:[%s7010_s1 + $0x268] sm:$0xff]  }
  0x4e   : > { %4852 = vmatpush3.bf16.msra.mxu1 %v5357_v61  ;;  %2508 = vmatprep.mubr.bf16.mxu0 %v5358_v62  ;;  %v5431_v61 = vld [vmem:[%s5792_s15 + $0x78] ss:$52 sps:$4 sm:$0xff]   ;;  %v5432_v62 = vld [vmem:[%s5792_s15 + $0x41c] ss:$52 sps:$4 sm:$0xff]  }
  0x4f   : > { %2637 = vmatprep.mubr.bf16.mxu1 %v5360_v63  ;;  %4853 = vmatprep.subr.bf16.mxu1 %v5372_v1  ;;  %v5434_v63 = vld [vmem:[%s5792_s15 + $0xe4] ss:$52 sps:$4 sm:$0xff]  }
  0x50   : > { %4753 = vmatprep.subr.bf16.mxu0 %v5414_v24  ;;  %v5472_v1 = vld [vmem:[%s7010_s1 + $0x260] sm:$0xff]   ;;  %v5463_v24 = vld [vmem:[%s5792_s15 + $0x218] ss:$52 sps:$4 sm:$0xff]  }
  0x51   : > { %4754 = vmatpush3.bf16.msra.mxu0 %v5415_v25  ;;  %v5464_v25 = vld [vmem:[%s5792_s15 + $0x5bc] ss:$52 sps:$4 sm:$0xff]  }
  0x52   : > { %4854 = vmatpush3.bf16.msra.mxu1 %v5373_v3  ;;  %4963 = vmatprep.subr.bf16.mxu0 %v5424_v30  ;;  %v5473_v3 = vld [vmem:[%s7010_s1 + $0x220] sm:$0xff]  }
  0x53   : > { %4855 = vmatprep.subr.bf16.mxu1 %v5389_v9  ;;  %v5504_v9 = vld [vmem:[%s7010_s1 + $0x250] sm:$0xff]   ;;  %v5474_v30 = vld [vmem:[%s5792_s15 + $0x624] ss:$52 sps:$4 sm:$0xff]  }
  0x55   : > { %2509 = vmatmul.mubr.bf16.gmra.mxu0 %v5362_v4  ;;  %2638 = vmatmul.mubr.bf16.gmra.mxu1 %v5363_v5  ;;  %v5488_v4 = vld [vmem:[%s7010_s1 + $0x258] sm:$0xff]   ;;  %v5437_v5 = vld [vmem:[%s5792_s15 + $0xe0] ss:$52 sps:$4 sm:$0xff]  }
  0x56   : > { %2516 = vmatprep.mubr.bf16.mxu0 %v5366_v6  ;;  %2645 = vmatprep.mubr.bf16.mxu1 %v5368_v7  ;;  %v5442_v6 = vld [vmem:[%s5792_s15 + $0x484] ss:$52 sps:$4 sm:$0xff]   ;;  %v5444_v7 = vld [vmem:[%s5792_s15 + $0x14c] ss:$52 sps:$4 sm:$0xff]  }
  0x57   : > { %4856 = vmatpush3.bf16.msra.mxu1 %v5391_v11  ;;  %v5447_v11 = vld [vmem:[%s5792_s15 + $0x148] ss:$52 sps:$4 sm:$0xff]  }
  0x58   : > { %4857 = vmatprep.subr.bf16.mxu1 %v5406_v18  ;;  %v5453_v18 = vld [vmem:[%s5792_s15 + $0x1b0] ss:$52 sps:$4 sm:$0xff]  }
  0x5b   : > { %4858 = vmatpush3.bf16.msra.mxu1 %v5407_v19  ;;  %v5458_v19 = vld [vmem:[%s5792_s15 + $0x554] ss:$52 sps:$4 sm:$0xff]  }
  0x5c   : > { %4859 = vmatprep.subr.bf16.mxu1 %v5422_v26  ;;  %v5466_v26 = vld [vmem:[%s5792_s15 + $0x284] ss:$52 sps:$4 sm:$0xff]  }
  0x5d   : > { %2517 = vmatmul.mubr.bf16.gmra.mxu0 %v5370_v12  ;;  %2646 = vmatmul.mubr.bf16.gmra.mxu1 %v5371_v13  ;;  %v5505_v12 = vld [vmem:[%s7010_s1 + $0x210] sm:$0xff]   ;;  %v5520_v13 = vld [vmem:[%s7010_s1 + $0x248] sm:$0xff]  }
  0x5e   : > { %2524 = vmatprep.mubr.bf16.mxu0 %v5376_v14  ;;  %2653 = vmatprep.mubr.bf16.mxu1 %v5378_v17  ;;  %v5448_v14 = vld [vmem:[%s5792_s15 + $0x4ec] ss:$52 sps:$4 sm:$0xff]   ;;  %v5452_v17 = vld [vmem:[%s5792_s15 + $0x4e8] ss:$52 sps:$4 sm:$0xff]  }
  0x5f   : > { %4860 = vmatpush3.bf16.msra.mxu1 %v5423_v29  ;;  %v5469_v29 = vld [vmem:[%s5792_s15 + $0x280] ss:$52 sps:$4 sm:$0xff]  }
  0x60   : > { %4861 = vmatprep.subr.bf16.mxu1 %v5438_v35  ;;  %v5484_v35 = vld [vmem:[%s5792_s15 + $0x1c] ss:$52 sps:$4 sm:$0xff]  }
  0x63   : > { %4862 = vmatpush3.bf16.msra.mxu1 %v5439_v36  ;;  %v5482_v36 = vld [vmem:[%s5792_s15 + $0x18] ss:$52 sps:$4 sm:$0xff]  }
  0x64   : > { %4863 = vmatprep.subr.bf16.mxu1 %v5454_v43  ;;  %v5494_v43 = vld [vmem:[%s5792_s15 + $0x3b8] ss:$52 sps:$4 sm:$0xff]  }
  0x65   : > { %2525 = vmatmul.mubr.bf16.gmra.mxu0 %v5380_v20  ;;  %2654 = vmatmul.mubr.bf16.gmra.mxu1 %v5381_v21  ;;  %v5460_v20 = vld [vmem:[%s5792_s15 + $0x21c] ss:$52 sps:$4 sm:$0xff]   ;;  %v5536_v21 = vld [vmem:[%s7010_s1 + $0x240] sm:$0xff]  }
  0x66   : > { %2532 = vmatprep.mubr.bf16.mxu0 %v5382_v22  ;;  %2661 = vmatprep.mubr.bf16.mxu1 %v5384_v23  ;;  %v5537_v22 = vld [vmem:[%s7010_s1 + $0x200] sm:$0xff]  }
  0x67   : > { %4864 = vmatpush3.bf16.msra.mxu1 %v5455_v44  ;;  %v5462_v23 = vld [vmem:[%s5792_s15 + $0x550] ss:$52 sps:$4 sm:$0xff]   ;;  %v5495_v44 = vld [vmem:[%s5792_s15 + $0x80] ss:$52 sps:$4 sm:$0xff]  }
  0x68   : > { %4865 = vmatprep.subr.bf16.mxu1 %v5470_v49  ;;  %v5534_v49 = vld [vmem:[%s7010_s1 + $0x2e0] sm:$0xff]  }
  0x6b   : > { %4866 = vmatpush3.bf16.msra.mxu1 %v5471_v50  ;;  %v5535_v50 = vld [vmem:[%s7010_s1 + $0x2a0] sm:$0xff]  }
  0x6c   : > { %5075 = vmatprep.subr.bf16.mxu1 %v5486_v57  ;;  %v5565_v57 = vld [vmem:[%s7010_s1 + $0x2d0] sm:$0xff]  }
  0x6d   : > { %2533 = vmatmul.mubr.bf16.gmra.mxu0 %v5386_v27  ;;  %2662 = vmatmul.mubr.bf16.gmra.mxu1 %v5387_v28  ;;  %v6087_v27 = vld [vmem:[%s7010_s1 + $0x318] sm:$0xff]  }
  0x6e   : > { %2540 = vmatprep.mubr.bf16.mxu0 %v5392_v31  ;;  %2669 = vmatprep.mubr.bf16.mxu1 %v5394_v32  ;;  %v5468_v28 = vld [vmem:[%s5792_s15 + $0x5b8] ss:$52 sps:$4 sm:$0xff]   ;;  %v5478_v32 = vld [vmem:[%s5792_s15 + $0x620] ss:$52 sps:$4 sm:$0xff]  }
  0x6f   : > { %v5476_v31 = vld [vmem:[%s5792_s15 + $0x2ec] ss:$52 sps:$4 sm:$0xff]  }
  0x75   : > { %2541 = vmatmul.mubr.bf16.gmra.mxu0 %v5396_v33  ;;  %2670 = vmatmul.mubr.bf16.gmra.mxu1 %v5397_v34  ;;  %v5479_v33 = vld [vmem:[%s5792_s15 + $0x2e8] ss:$52 sps:$4 sm:$0xff]  }
  0x76   : > { %2548 = vmatprep.mubr.bf16.mxu0 %v5400_v37  ;;  %2677 = vmatprep.mubr.bf16.mxu1 %v5402_v38  ;;  %v5480_v34 = vld [vmem:[%s5792_s15 + $0x354] ss:$52 sps:$4 sm:$0xff]   ;;  %v5485_v37 = vld [vmem:[%s5792_s15 + $0x350] ss:$52 sps:$4 sm:$0xff]   ;;  %v5487_v38 = vld [vmem:[%s7010_s1 + $0x2b8] sm:$0xff]  }
  0x7d   : > { %2549 = vmatmul.mubr.bf16.gmra.mxu0 %v5404_v39  ;;  %2678 = vmatmul.mubr.bf16.gmra.mxu1 %v5405_v40  ;;  %v5490_v39 = vld [vmem:[%s5792_s15 + $0x3bc] ss:$52 sps:$4 sm:$0xff]   ;;  %v5492_v40 = vld [vmem:[%s5792_s15 + $0x84] ss:$52 sps:$4 sm:$0xff]  }
  0x7e   : > { %2556 = vmatprep.mubr.bf16.mxu0 %v5408_v41  ;;  %2685 = vmatprep.mubr.bf16.mxu1 %v5410_v42  ;;  %v5502_v41 = vld [vmem:[%s7010_s1 + $0x2f0] sm:$0xff]  }
  0x7f   : > { %v5503_v42 = vld [vmem:[%s7010_s1 + $0x2b0] sm:$0xff]  }
  0x85   : > { %2557 = vmatmul.mubr.bf16.gmra.mxu0 %v5412_v45  ;;  %2686 = vmatmul.mubr.bf16.gmra.mxu1 %v5413_v46  ;;  %v5518_v45 = vld [vmem:[%s7010_s1 + $0x2e8] sm:$0xff]   ;;  %v5496_v46 = vld [vmem:[%s5792_s15 + $0x424] ss:$52 sps:$4 sm:$0xff]  }
  0x86   : > { %2693 = vmatprep.mubr.bf16.mxu1 %v5416_v47  ;;  %2790 = vmatprep.mubr.bf16.mxu0 %v5420_v48  ;;  %v5498_v47 = vld [vmem:[%s5792_s15 + $0xec] ss:$52 sps:$4 sm:$0xff]  }
  0x87   : > { %v5519_v48 = vld [vmem:[%s7010_s1 + $0x2a8] sm:$0xff]  }
  0x8d   : > { %2694 = vmatmul.mubr.bf16.gmra.mxu1 %v5421_v52  ;;  %2791 = vmatmul.mubr.bf16.vlgmr.msra.gmra.mxu0 %v5418_v51  ;;  %v5550_v51 = vld [vmem:[%s7010_s1 + $0x2d8] sm:$0xff]   ;;  %v5500_v52 = vld [vmem:[%s5792_s15 + $0x420] ss:$52 sps:$4 sm:$0xff]  }
  0x8e   : > { %4964 = vmatpush3.bf16.msra.mxu0 %v5425_v53  ;;  %2701 = vmatprep.mubr.bf16.mxu1 %v5426_v54  ;;  %v5501_v53 = vld [vmem:[%s5792_s15 + $0xe8] ss:$52 sps:$4 sm:$0xff]   ;;  %v5506_v54 = vld [vmem:[%s5792_s15 + $0x48c] ss:$52 sps:$4 sm:$0xff]  }
  0x8f   : > { %2798 = vmatprep.mubr.bf16.mxu0 %v5428_v55  ;;  %4965 = vmatprep.subr.bf16.mxu0 %v5440_v56  ;;  %v5508_v55 = vld [vmem:[%s5792_s15 + $0x154] ss:$52 sps:$4 sm:$0xff]   ;;  %v5551_v56 = vld [vmem:[%s7010_s1 + $0x298] sm:$0xff]  }
  0x92   : > { %4966 = vmatpush3.bf16.msra.mxu0 %v5441_v58  ;;  %v5566_v58 = vld [vmem:[%s7010_s1 + $0x290] sm:$0xff]  }
  0x93   : > { %4967 = vmatprep.subr.bf16.mxu0 %v5456_v59  ;;  %v5579_v59 = vld [vmem:[%s7010_s1 + $0x2c8] sm:$0xff]  }
  0x95   : > { %2702 = vmatmul.mubr.bf16.gmra.mxu1 %v5430_v60  ;;  %2799 = vmatmul.mubr.bf16.gmra.mxu0 %v5431_v61  ;;  %v5510_v60 = vld [vmem:[%s5792_s15 + $0x488] ss:$52 sps:$4 sm:$0xff]   ;;  %v5511_v61 = vld [vmem:[%s5792_s15 + $0x150] ss:$52 sps:$4 sm:$0xff]  }
  0x96   : > { %2709 = vmatprep.mubr.bf16.mxu1 %v5432_v62  ;;  %2806 = vmatprep.mubr.bf16.mxu0 %v5434_v63  ;;  %v5512_v62 = vld [vmem:[%s5792_s15 + $0x4f4] ss:$52 sps:$4 sm:$0xff]   ;;  %v5514_v63 = vld [vmem:[%s5792_s15 + $0x1bc] ss:$52 sps:$4 sm:$0xff]  }
  0x97   : > { %4968 = vmatpush3.bf16.msra.mxu0 %v5457_v0  ;;  %v5580_v0 = vld [vmem:[%s7010_s1 + $0x288] sm:$0xff]  }
  0x98   : > { %4969 = vmatprep.subr.bf16.mxu0 %v5472_v1  ;;  %v5594_v1 = vld [vmem:[%s7010_s1 + $0x2c0] sm:$0xff]  }
  0x9b   : > { %4970 = vmatpush3.bf16.msra.mxu0 %v5473_v3  ;;  %v5516_v3 = vld [vmem:[%s5792_s15 + $0x4f0] ss:$52 sps:$4 sm:$0xff]  }
  0x9c   : > { %4971 = vmatprep.subr.bf16.mxu0 %v5488_v4  ;;  %v5517_v4 = vld [vmem:[%s5792_s15 + $0x1b8] ss:$52 sps:$4 sm:$0xff]  }
  0x9d   : > { %2710 = vmatmul.mubr.bf16.gmra.mxu1 %v5436_v2  ;;  %2807 = vmatmul.mubr.bf16.gmra.mxu0 %v5437_v5  ;;  %v5595_v2 = vld [vmem:[%s7010_s1 + $0x280] sm:$0xff]   ;;  %v5522_v5 = vld [vmem:[%s5792_s15 + $0x55c] ss:$52 sps:$4 sm:$0xff]  }
  0x9e   : > { %2717 = vmatprep.mubr.bf16.mxu1 %v5442_v6  ;;  %2814 = vmatprep.mubr.bf16.mxu0 %v5444_v7  ;;  %v5524_v6 = vld [vmem:[%s5792_s15 + $0x224] ss:$52 sps:$4 sm:$0xff]  }
  0x9f   : > { %4972 = vmatpush3.bf16.msra.mxu0 %v5489_v8 }
  0xa0   : > { %4973 = vmatprep.subr.bf16.mxu0 %v5504_v9 }
  0xa3   : > { %4974 = vmatpush3.bf16.msra.mxu0 %v5505_v12 }
  0xa4   : > { %4975 = vmatprep.subr.bf16.mxu0 %v5520_v13 }
  0xa5   : > { %2718 = vmatmul.mubr.bf16.gmra.mxu1 %v5446_v10  ;;  %2815 = vmatmul.mubr.bf16.gmra.mxu0 %v5447_v11 }
  0xa6   : > { %2725 = vmatprep.mubr.bf16.mxu1 %v5448_v14  ;;  %2822 = vmatprep.mubr.bf16.mxu0 %v5450_v15  ;;  %v5526_v15 = vld [vmem:[%s5792_s15 + $0x558] ss:$52 sps:$4 sm:$0xff]  }
  0xa7   : > { %4976 = vmatpush3.bf16.msra.mxu0 %v5521_v16  ;;  %v5527_v16 = vld [vmem:[%s5792_s15 + $0x220] ss:$52 sps:$4 sm:$0xff]  }
  0xa8   : > { %4977 = vmatprep.subr.bf16.mxu0 %v5536_v21 }
  0xab   : > { %4978 = vmatpush3.bf16.msra.mxu0 %v5537_v22 }
  0xac   : > { %5207 = vmatprep.subr.bf16.mxu0 %v6087_v27 }
  0xad   : > { %2726 = vmatmul.mubr.bf16.gmra.mxu1 %v5452_v17  ;;  %2823 = vmatmul.mubr.bf16.gmra.mxu0 %v5453_v18  ;;  %v5528_v17 = vld [vmem:[%s5792_s15 + $0x5c4] ss:$52 sps:$4 sm:$0xff]   ;;  %v5530_v18 = vld [vmem:[%s5792_s15 + $0x28c] ss:$52 sps:$4 sm:$0xff]  }
  0xae   : > { %2733 = vmatprep.mubr.bf16.mxu1 %v5458_v19  ;;  %2830 = vmatprep.mubr.bf16.mxu0 %v5460_v20 }
  0xb5   : > { %2734 = vmatmul.mubr.bf16.gmra.mxu1 %v5462_v23  ;;  %2831 = vmatmul.mubr.bf16.gmra.mxu0 %v5463_v24 }
  0xb6   : > { %2741 = vmatprep.mubr.bf16.mxu1 %v5464_v25  ;;  %2838 = vmatprep.mubr.bf16.mxu0 %v5466_v26 }
  0xbd   : > { %2742 = vmatmul.mubr.bf16.gmra.mxu1 %v5468_v28  ;;  %2839 = vmatmul.mubr.bf16.gmra.mxu0 %v5469_v29 }
  0xbe   : > { %2749 = vmatprep.mubr.bf16.mxu1 %v5474_v30  ;;  %2846 = vmatprep.mubr.bf16.mxu0 %v5476_v31 }
  0xc5   : > { %2750 = vmatmul.mubr.bf16.gmra.mxu1 %v5478_v32  ;;  %2847 = vmatmul.mubr.bf16.gmra.mxu0 %v5479_v33  ;;  %v5532_v32 = vld [vmem:[%s5792_s15 + $0x5c0] ss:$52 sps:$4 sm:$0xff]   ;;  %v5533_v33 = vld [vmem:[%s5792_s15 + $0x288] ss:$52 sps:$4 sm:$0xff]  }
  0xc6   : > { %2854 = vmatprep.mubr.bf16.mxu0 %v5480_v34  ;;  %2951 = vmatprep.mubr.bf16.mxu1 %v5484_v35  ;;  %v5538_v34 = vld [vmem:[%s5792_s15 + $0x62c] ss:$52 sps:$4 sm:$0xff]   ;;  %v5540_v35 = vld [vmem:[%s5792_s15 + $0x2f4] ss:$52 sps:$4 sm:$0xff]  }
  0xcd   : > { %2855 = vmatmul.mubr.bf16.gmra.mxu0 %v5485_v37  ;;  %2952 = vmatmul.mubr.bf16.vlgmr.msra.gmra.mxu1 %v5482_v36 }
  0xce   : > { %5076 = vmatpush3.bf16.msra.mxu1 %v5487_v38  ;;  %2862 = vmatprep.mubr.bf16.mxu0 %v5490_v39 }
  0xcf   : > { %2959 = vmatprep.mubr.bf16.mxu1 %v5492_v40  ;;  %5077 = vmatprep.subr.bf16.mxu1 %v5502_v41 }
  0xd2   : > { %5078 = vmatpush3.bf16.msra.mxu1 %v5503_v42 }
  0xd3   : > { %5079 = vmatprep.subr.bf16.mxu1 %v5518_v45 }
  0xd5   : > { %2863 = vmatmul.mubr.bf16.gmra.mxu0 %v5494_v43  ;;  %2960 = vmatmul.mubr.bf16.gmra.mxu1 %v5495_v44 }
  0xd6   : > { %2870 = vmatprep.mubr.bf16.mxu0 %v5496_v46  ;;  %2967 = vmatprep.mubr.bf16.mxu1 %v5498_v47 }
  0xd7   : > { %5080 = vmatpush3.bf16.msra.mxu1 %v5519_v48  ;;  %v5542_v48 = vld [vmem:[%s5792_s15 + $0x628] ss:$52 sps:$4 sm:$0xff]  }
  0xd8   : > { %5081 = vmatprep.subr.bf16.mxu1 %v5534_v49  ;;  %v5543_v49 = vld [vmem:[%s5792_s15 + $0x2f0] ss:$52 sps:$4 sm:$0xff]  }
  0xdb   : > { %5082 = vmatpush3.bf16.msra.mxu1 %v5535_v50  ;;  %v5546_v50 = vld [vmem:[%s5792_s15 + $0x35c] ss:$52 sps:$4 sm:$0xff]  }
  0xdc   : > { %5083 = vmatprep.subr.bf16.mxu1 %v5550_v51  ;;  %v5549_v51 = vld [vmem:[%s5792_s15 + $0x24] ss:$52 sps:$4 sm:$0xff]  }
  0xdd   : > { %2871 = vmatmul.mubr.bf16.gmra.mxu0 %v5500_v52  ;;  %2968 = vmatmul.mubr.bf16.gmra.mxu1 %v5501_v53 }
  0xde   : > { %2878 = vmatprep.mubr.bf16.mxu0 %v5506_v54  ;;  %2975 = vmatprep.mubr.bf16.mxu1 %v5508_v55 }
  0xdf   : > { %5084 = vmatpush3.bf16.msra.mxu1 %v5551_v56 }
  0xe0   : > { %5085 = vmatprep.subr.bf16.mxu1 %v5565_v57 }
  0xe3   : > { %5086 = vmatpush3.bf16.msra.mxu1 %v5566_v58 }
  0xe4   : > { %5087 = vmatprep.subr.bf16.mxu1 %v5579_v59 }
  0xe5   : > { %2879 = vmatmul.mubr.bf16.gmra.mxu0 %v5510_v60  ;;  %2976 = vmatmul.mubr.bf16.gmra.mxu1 %v5511_v61 }
  0xe6   : > { %2886 = vmatprep.mubr.bf16.mxu0 %v5512_v62  ;;  %2983 = vmatprep.mubr.bf16.mxu1 %v5514_v63 }
  0xe7   : > { %5088 = vmatpush3.bf16.msra.mxu1 %v5580_v0  ;;  %v5544_v0 = vld [vmem:[%s5792_s15 + $0x358] ss:$52 sps:$4 sm:$0xff]  }
  0xe8   : > { %5089 = vmatprep.subr.bf16.mxu1 %v5594_v1  ;;  %v5547_v1 = vld [vmem:[%s5792_s15 + $0x20] ss:$52 sps:$4 sm:$0xff]  }
  0xeb   : > { %5090 = vmatpush3.bf16.msra.mxu1 %v5595_v2  ;;  %v5555_v2 = vld [vmem:[%s5792_s15 + $0x3c4] ss:$52 sps:$4 sm:$0xff]  }
  0xed   : > { %v4531_v7 = vpop.f32.mrf.mxu0  ;;  %v4603_v8 = vpop.f32.mrf.mxu1  ;;  %2887 = vmatmul.mubr.bf16.gmra.mxu0 %v5516_v3  ;;  %2984 = vmatmul.mubr.bf16.gmra.mxu1 %v5517_v4 }
  0xee   : > { %2894 = vmatprep.mubr.bf16.mxu0 %v5522_v5  ;;  %2991 = vmatprep.mubr.bf16.mxu1 %v5524_v6  ;;  %v5558_v5 = vld [vmem:[%s5792_s15 + $0x8c] ss:$52 sps:$4 sm:$0xff]   ;;  %v5581_v6 = vld [vmem:[%s7010_s1 + $0x310] sm:$0xff]  }
  0xef   : > { %v4532_v9 = vpop.f32.mrf.mxu0  ;;  %v4604_v10 = vpop.f32.mrf.mxu1 }
  0xf0   : > { %v6163_v11 = vadd.f32 %v4532_v9, %v4531_v7  ;;  %v6165_v12 = vadd.f32 %v4604_v10, %v4603_v8 }
  0xf1   : > { %v4534_v13 = vpop.f32.mrf.mxu0  ;;  %v4606_v14 = vpop.f32.mrf.mxu1 }
  0xf3   : > { %v4535_v19 = vpop.f32.mrf.mxu0  ;;  %v4607_v20 = vpop.f32.mrf.mxu1 }
  0xf4   : > { %v6171_v21 = vadd.f32 %v4535_v19, %v4534_v13  ;;  %v6173_v22 = vadd.f32 %v4607_v20, %v4606_v14  ;;  %v5553_v20 = vld [vmem:[%s5792_s15 + $0x3c0] ss:$52 sps:$4 sm:$0xff]  }
  0xf5   : > { %v4537_v23 = vpop.f32.mrf.mxu0  ;;  %v4609_v24 = vpop.f32.mrf.mxu1  ;;  %2895 = vmatmul.mubr.bf16.gmra.mxu0 %v5526_v15  ;;  %2992 = vmatmul.mubr.bf16.gmra.mxu1 %v5527_v16  ;;  %v5608_v15 = vld [vmem:[%s7010_s1 + $0x308] sm:$0xff]  }
  0xf6   : > { %2902 = vmatprep.mubr.bf16.mxu0 %v5528_v17  ;;  %2999 = vmatprep.mubr.bf16.mxu1 %v5530_v18 }
  0xf7   : > { %v4538_v25 = vpop.f32.mrf.mxu0  ;;  %v4610_v26 = vpop.f32.mrf.mxu1 }
  0xf8   : > { %v6175_v28 = vadd.f32 %v4538_v25, %v4537_v23  ;;  %v6177_v29 = vadd.f32 %v4610_v26, %v4609_v24  ;;  %v5556_v23 = vld [vmem:[%s5792_s15 + $0x88] ss:$52 sps:$4 sm:$0xff]  }
  0xf9   : > { %v4540_v30 = vpop.f32.mrf.mxu0  ;;  %v4612_v31 = vpop.f32.mrf.mxu1  ;;  %v5564_v25 = vld [vmem:[%s5792_s15 + $0xf4] ss:$52 sps:$4 sm:$0xff]  }
  0xfb   : > { %v4541_v36 = vpop.f32.mrf.mxu0  ;;  %v4613_v37 = vpop.f32.mrf.mxu1 }
  0xfc   : > { %v6183_v38 = vadd.f32 %v4541_v36, %v4540_v30  ;;  %v6185_v39 = vadd.f32 %v4613_v37, %v4612_v31 }
  0xfd   : > { %v4543_v40 = vpop.f32.mrf.mxu0  ;;  %v4615_v41 = vpop.f32.mrf.mxu1  ;;  %2903 = vmatmul.mubr.bf16.gmra.mxu0 %v5532_v32  ;;  %3000 = vmatmul.mubr.bf16.gmra.mxu1 %v5533_v33  ;;  %v5633_v33 = vld [vmem:[%s7010_s1 + $0x300] sm:$0xff]  }
  0xfe   : > { %2910 = vmatprep.mubr.bf16.mxu0 %v5538_v34  ;;  %3007 = vmatprep.mubr.bf16.mxu1 %v5540_v35 }
  0xff   : > { %v4544_v42 = vpop.f32.mrf.mxu0  ;;  %v4616_v43 = vpop.f32.mrf.mxu1 }
 0x100   : > { %v6187_v44 = vadd.f32 %v4544_v42, %v4543_v40  ;;  %v6189_v45 = vadd.f32 %v4616_v43, %v4615_v41 }
 0x101   : > { %v4546_v46 = vpop.f32.mrf.mxu0  ;;  %v4618_v47 = vpop.f32.mrf.mxu1 }
 0x103   : > { %v4547_v52 = vpop.f32.mrf.mxu0  ;;  %v4619_v53 = vpop.f32.mrf.mxu1 }
 0x104   : > { %v6195_v54 = vadd.f32 %v4547_v52, %v4546_v46  ;;  %v6197_v55 = vadd.f32 %v4619_v53, %v4618_v47  ;;  %v5559_v46 = vld [vmem:[%s5792_s15 + $0x428] ss:$52 sps:$4 sm:$0xff]   ;;  %v5562_v47 = vld [vmem:[%s5792_s15 + $0xf0] ss:$52 sps:$4 sm:$0xff]  }
 0x105   : > { %v4549_v56 = vpop.f32.mrf.mxu0  ;;  %v4621_v57 = vpop.f32.mrf.mxu1  ;;  %2911 = vmatmul.mubr.bf16.gmra.mxu0 %v5542_v48  ;;  %3008 = vmatmul.mubr.bf16.gmra.mxu1 %v5543_v49  ;;  %v5569_v49 = vld [vmem:[%s5792_s15 + $0x494] ss:$52 sps:$4 sm:$0xff]  }
 0x106   : > { %3015 = vmatprep.mubr.bf16.mxu1 %v5546_v50  ;;  %3112 = vmatprep.mubr.bf16.mxu0 %v5549_v51  ;;  %v5572_v50 = vld [vmem:[%s5792_s15 + $0x15c] ss:$52 sps:$4 sm:$0xff]  }
 0x107   : > { %v4550_v58 = vpop.f32.mrf.mxu0  ;;  %v4622_v59 = vpop.f32.mrf.mxu1 }
 0x108   : > { %v6199_v60 = vadd.f32 %v4550_v58, %v4549_v56  ;;  %v6201_v61 = vadd.f32 %v4622_v59, %v4621_v57 }
 0x109   : > { %v4552_v62 = vpop.f32.mrf.mxu0  ;;  %v4624_v63 = vpop.f32.mrf.mxu1 }
 0x10b   : > { %v4553_v3 = vpop.f32.mrf.mxu0  ;;  %v4625_v4 = vpop.f32.mrf.mxu1 }
 0x10c   : > { %v6210_v7 = vadd.f32 %v4553_v3, %v4552_v62  ;;  %v6212_v8 = vadd.f32 %v4625_v4, %v4624_v63  ;;  %v5570_v3 = vld [vmem:[%s5792_s15 + $0x158] ss:$52 sps:$4 sm:$0xff]  }
 0x10d   : > { %v4555_v9 = vpop.f32.mrf.mxu0  ;;  %v4643_v10 = vpop.f32.mrf.mxu1  ;;  %3016 = vmatmul.mubr.bf16.gmra.mxu1 %v5544_v0  ;;  %3113 = vmatmul.mubr.bf16.vlgmr.msra.gmra.mxu0 %v5547_v1 }
 0x10e   : > { %5208 = vmatpush3.bf16.msra.mxu0 %v6087_v27  ;;  %3023 = vmatprep.mubr.bf16.mxu1 %v5555_v2  ;;  %v5561_v27 = vld [vmem:[%s5792_s15 + $0x42c] ss:$52 sps:$4 sm:$0xff]   ;;  %v5567_v2 = vld [vmem:[%s5792_s15 + $0x490] ss:$52 sps:$4 sm:$0xff]  }
 0x10f   : > { %v4556_v13 = vpop.f32.mrf.mxu0  ;;  %v4644_v14 = vpop.f32.mrf.mxu1  ;;  %3120 = vmatprep.mubr.bf16.mxu0 %v5558_v5  ;;  %5209 = vmatprep.subr.bf16.mxu0 %v5581_v6  ;;  %v5575_v5 = vld [vmem:[%s5792_s15 + $0x4fc] ss:$52 sps:$4 sm:$0xff]  }
 0x110   : > { %v6218_v16 = vadd.f32 %v4556_v13, %v4555_v9  ;;  %v4645_v17 = vadd.f32 %v4644_v14, %v4643_v10 }
 0x111   : > { %v4558_v18 = vpop.f32.mrf.mxu0  ;;  %v4646_v19 = vpop.f32.mrf.mxu1 }
 0x112   : > { %v6223_v24 = vadd.f32 %v4645_v17, %v6163_v11  ;;  %5210 = vmatpush3.bf16.msra.mxu0 %v5581_v6  ;;  %v5578_v6 = vld [vmem:[%s5792_s15 + $0x1c4] ss:$52 sps:$4 sm:$0xff]  }
 0x113   : > { %v4559_v26 = vpop.f32.mrf.mxu0  ;;  %v4647_v30 = vpop.f32.mrf.mxu1  ;;  %5211 = vmatprep.subr.bf16.mxu0 %v5608_v15 }
 0x114   : > { %v6227_v31 = vadd.f32 %v4559_v26, %v4558_v18  ;;  %v4648_v32 = vadd.f32 %v4647_v30, %v4646_v19  ;;  %v5576_v26 = vld [vmem:[%s5792_s15 + $0x1c0] ss:$52 sps:$4 sm:$0xff]  }
 0x115   : > { %v4561_v34 = vpop.f32.mrf.mxu0  ;;  %v4649_v35 = vpop.f32.mrf.mxu1  ;;  %3024 = vmatmul.mubr.bf16.gmra.mxu1 %v5553_v20  ;;  %3121 = vmatmul.mubr.bf16.gmra.mxu0 %v5556_v23 }
 0x116   : > { %v6233_v11 = vadd.f32 %v4648_v32, %v6171_v21  ;;  %3031 = vmatprep.mubr.bf16.mxu1 %v5561_v27  ;;  %3128 = vmatprep.mubr.bf16.mxu0 %v5564_v25  ;;  %v5573_v25 = vld [vmem:[%s5792_s15 + $0x4f8] ss:$52 sps:$4 sm:$0xff]  }
 0x117   : > { %v4562_v36 = vpop.f32.mrf.mxu0  ;;  %v4650_v37 = vpop.f32.mrf.mxu1  ;;  %5212 = vmatpush3.bf16.msra.mxu0 %v5608_v15  ;;  %v5584_v32 = vld [vmem:[%s5792_s15 + $0x564] ss:$52 sps:$4 sm:$0xff]  }
 0x118   : > { %v6235_v40 = vadd.f32 %v4562_v36, %v4561_v34  ;;  %v4651_v41 = vadd.f32 %v4650_v37, %v4649_v35  ;;  %5213 = vmatprep.subr.bf16.mxu0 %v5633_v33 }
 0x119   : > { %v4564_v42 = vpop.f32.mrf.mxu0  ;;  %v4652_v43 = vpop.f32.mrf.mxu1 }
 0x11a   : > { %v6240_v48 = vadd.f32 %v4651_v41, %v6175_v28 }
 0x11b   : > { %v4565_v21 = vpop.f32.mrf.mxu0  ;;  %v4653_v51 = vpop.f32.mrf.mxu1  ;;  %5214 = vmatpush3.bf16.msra.mxu0 %v5633_v33  ;;  %v5587_v33 = vld [vmem:[%s5792_s15 + $0x22c] ss:$52 sps:$4 sm:$0xff]  }
 0x11c   : > { %v6244_v52 = vadd.f32 %v4565_v21, %v4564_v42  ;;  %v4654_v53 = vadd.f32 %v4653_v51, %v4652_v43  ;;  %v5582_v21 = vld [vmem:[%s5792_s15 + $0x560] ss:$52 sps:$4 sm:$0xff]   ;;  %v5585_v51 = vld [vmem:[%s5792_s15 + $0x228] ss:$52 sps:$4 sm:$0xff]  }
 0x11d   : > { %v4567_v56 = vpop.f32.mrf.mxu0  ;;  %v4655_v57 = vpop.f32.mrf.mxu1  ;;  %3032 = vmatmul.mubr.bf16.gmra.mxu1 %v5559_v46  ;;  %3129 = vmatmul.mubr.bf16.gmra.mxu0 %v5562_v47 }
 0x11e   : > { %v6247_v58 = vadd.f32 %v4654_v53, %v6183_v38  ;;  %3039 = vmatprep.mubr.bf16.mxu1 %v5569_v49  ;;  %3136 = vmatprep.mubr.bf16.mxu0 %v5572_v50 }
 0x11f   : > { %v4568_v28 = vpop.f32.mrf.mxu0  ;;  %v4656_v59 = vpop.f32.mrf.mxu1 }
 0x120   : > { %v6249_v62 = vadd.f32 %v4568_v28, %v4567_v56  ;;  %v4657_v63 = vadd.f32 %v4656_v59, %v4655_v57  ;;  %v5590_v56 = vld [vmem:[%s5792_s15 + $0x5cc] ss:$52 sps:$4 sm:$0xff]   ;;  %v5593_v57 = vld [vmem:[%s5792_s15 + $0x294] ss:$52 sps:$4 sm:$0xff]  }
 0x121   : > { %v4570_v0 = vpop.f32.mrf.mxu0  ;;  %v4658_v1 = vpop.f32.mrf.mxu1 }
 0x122   : > { %v6254_v4 = vadd.f32 %v4657_v63, %v6187_v44 }
 0x123   : > { %v4571_v9 = vpop.f32.mrf.mxu0  ;;  %v4659_v10 = vpop.f32.mrf.mxu1 }
 0x124   : > { %v6258_v38 = vadd.f32 %v4571_v9, %v4570_v0  ;;  %v4660_v13 = vadd.f32 %v4659_v10, %v4658_v1 }
 0x125   : > { %v4573_v14 = vpop.f32.mrf.mxu0  ;;  %v4661_v15 = vpop.f32.mrf.mxu1  ;;  %3040 = vmatmul.mubr.bf16.gmra.mxu1 %v5567_v2  ;;  %3137 = vmatmul.mubr.bf16.gmra.mxu0 %v5570_v3 }
 0x126   : > { %v6261_v17 = vadd.f32 %v4660_v13, %v6195_v54  ;;  %3047 = vmatprep.mubr.bf16.mxu1 %v5575_v5  ;;  %3144 = vmatprep.mubr.bf16.mxu0 %v5578_v6  ;;  %v5588_v13 = vld [vmem:[%s5792_s15 + $0x5c8] ss:$52 sps:$4 sm:$0xff]  }
 0x127   : > { %v4574_v44 = vpop.f32.mrf.mxu0  ;;  %v4662_v18 = vpop.f32.mrf.mxu1 }
 0x128   : > { %v6263_v19 = vadd.f32 %v4574_v44, %v4573_v14  ;;  %v4663_v20 = vadd.f32 %v4662_v18, %v4661_v15  ;;  %v5591_v14 = vld [vmem:[%s5792_s15 + $0x290] ss:$52 sps:$4 sm:$0xff]   ;;  %v5598_v44 = vld [vmem:[%s5792_s15 + $0x634] ss:$52 sps:$4 sm:$0xff]  }
 0x129   : > { %v4576_v23 = vpop.f32.mrf.mxu0  ;;  %v4664_v27 = vpop.f32.mrf.mxu1  ;;  %v5601_v18 = vld [vmem:[%s5792_s15 + $0x2fc] ss:$52 sps:$4 sm:$0xff]  }
 0x12a   : > { %v6268_v30 = vadd.f32 %v4663_v20, %v6199_v60 }
 0x12b   : > { %v4577_v34 = vpop.f32.mrf.mxu0  ;;  %v4665_v35 = vpop.f32.mrf.mxu1 }
 0x12c   : > { %v6272_v54 = vadd.f32 %v4577_v34, %v4576_v23  ;;  %v4666_v36 = vadd.f32 %v4665_v35, %v4664_v27 }
 0x12d   : > { %v4579_v37 = vpop.f32.mrf.mxu0  ;;  %v4667_v41 = vpop.f32.mrf.mxu1  ;;  %3048 = vmatmul.mubr.bf16.gmra.mxu1 %v5573_v25  ;;  %3145 = vmatmul.mubr.bf16.gmra.mxu0 %v5576_v26 }
 0x12e   : > { %v6275_v42 = vadd.f32 %v4666_v36, %v6210_v7  ;;  %3055 = vmatprep.mubr.bf16.mxu1 %v5584_v32  ;;  %3152 = vmatprep.mubr.bf16.mxu0 %v5587_v33 }
 0x12f   : > { %v4580_v60 = vpop.f32.mrf.mxu0  ;;  %v4668_v43 = vpop.f32.mrf.mxu1 }
 0x130   : > { %v6277_v46 = vadd.f32 %v4580_v60, %v4579_v37  ;;  %v4669_v47 = vadd.f32 %v4668_v43, %v4667_v41  ;;  %v5596_v41 = vld [vmem:[%s5792_s15 + $0x630] ss:$52 sps:$4 sm:$0xff]   ;;  %v5599_v60 = vld [vmem:[%s5792_s15 + $0x2f8] ss:$52 sps:$4 sm:$0xff]  }
 0x131   : > { %v4582_v49 = vpop.f32.mrf.mxu0  ;;  %v4670_v50 = vpop.f32.mrf.mxu1 }
 0x132   : > { %v6282_v53 = vadd.f32 %v4669_v47, %v6218_v16  ;;  %v5604_v47 = vld [vmem:[%s5792_s15 + $0x364] ss:$52 sps:$4 sm:$0xff]  }
 0x133   : > { %v4583_v28 = vpop.f32.mrf.mxu0  ;;  %v4671_v59 = vpop.f32.mrf.mxu1 }
 0x134   : > { %v6286_v7 = vadd.f32 %v4583_v28, %v4582_v49  ;;  %v4672_v63 = vadd.f32 %v4671_v59, %v4670_v50  ;;  %v5607_v49 = vld [vmem:[%s5792_s15 + $0x2c] ss:$52 sps:$4 sm:$0xff]  }
 0x135   : > { %v4585_v0 = vpop.f32.mrf.mxu0  ;;  %v4673_v1 = vpop.f32.mrf.mxu1  ;;  %3056 = vmatmul.mubr.bf16.gmra.mxu1 %v5582_v21  ;;  %3153 = vmatmul.mubr.bf16.gmra.mxu0 %v5585_v51 }
 0x136   : > { %v6289_v2 = vadd.f32 %v4672_v63, %v6227_v31  ;;  %3063 = vmatprep.mubr.bf16.mxu1 %v5590_v56  ;;  %3160 = vmatprep.mubr.bf16.mxu0 %v5593_v57 }
 0x137   : > { %v4586_v16 = vpop.f32.mrf.mxu0  ;;  %v4674_v3 = vpop.f32.mrf.mxu1 }
 0x138   : > { %v6291_v5 = vadd.f32 %v4586_v16, %v4585_v0  ;;  %v4675_v6 = vadd.f32 %v4674_v3, %v4673_v1  ;;  %v5602_v3 = vld [vmem:[%s5792_s15 + $0x360] ss:$52 sps:$4 sm:$0xff]  }
 0x139   : > { %v4588_v9 = vpop.f32.mrf.mxu0  ;;  %v4676_v10 = vpop.f32.mrf.mxu1 }
 0x13a   : > { %v6296_v15 = vadd.f32 %v4675_v6, %v6235_v40  ;;  %v5605_v6 = vld [vmem:[%s5792_s15 + $0x28] ss:$52 sps:$4 sm:$0xff]  }
 0x13b   : > { %v4589_v20 = vpop.f32.mrf.mxu0  ;;  %v4677_v23 = vpop.f32.mrf.mxu1 }
 0x13c   : > { %v6300_v31 = vadd.f32 %v4589_v20, %v4588_v9  ;;  %v4678_v27 = vadd.f32 %v4677_v23, %v4676_v10  ;;  %v5611_v10 = vld [vmem:[%s5792_s15 + $0x3cc] ss:$52 sps:$4 sm:$0xff]  }
 0x13d   : > { %v4591_v25 = vpop.f32.mrf.mxu0  ;;  %v4679_v26 = vpop.f32.mrf.mxu1  ;;  %3064 = vmatmul.mubr.bf16.gmra.mxu1 %v5588_v13  ;;  %3161 = vmatmul.mubr.bf16.gmra.mxu0 %v5591_v14  ;;  %v5614_v13 = vld [vmem:[%s5792_s15 + $0x94] ss:$52 sps:$4 sm:$0xff]  }
 0x13e   : > { %v6303_v32 = vadd.f32 %v4678_v27, %v6244_v52  ;;  %3071 = vmatprep.mubr.bf16.mxu1 %v5598_v44  ;;  %3168 = vmatprep.mubr.bf16.mxu0 %v5601_v18 }
 0x13f   : > { %v4592_v40 = vpop.f32.mrf.mxu0  ;;  %v4680_v33 = vpop.f32.mrf.mxu1 }
 0x140   : > { %v6305_v34 = vadd.f32 %v4592_v40, %v4591_v25  ;;  %v4681_v35 = vadd.f32 %v4680_v33, %v4679_v26 }
 0x141   : > { %v4594_v36 = vpop.f32.mrf.mxu0  ;;  %v4682_v37 = vpop.f32.mrf.mxu1 }
 0x142   : > { %v6310_v43 = vadd.f32 %v4681_v35, %v6249_v62 }
 0x143   : > { %v4595_v50 = vpop.f32.mrf.mxu0  ;;  %v4683_v21 = vpop.f32.mrf.mxu1 }
 0x144   : > { %v6314_v52 = vadd.f32 %v4595_v50, %v4594_v36  ;;  %v4684_v51 = vadd.f32 %v4683_v21, %v4682_v37  ;;  %v5609_v36 = vld [vmem:[%s5792_s15 + $0x3c8] ss:$52 sps:$4 sm:$0xff]   ;;  %v5612_v37 = vld [vmem:[%s5792_s15 + $0x90] ss:$52 sps:$4 sm:$0xff]  }
 0x145   : > { %v4597_v56 = vpop.f32.mrf.mxu0  ;;  %v4685_v57 = vpop.f32.mrf.mxu1  ;;  %3072 = vmatmul.mubr.bf16.gmra.mxu1 %v5596_v41  ;;  %3169 = vmatmul.mubr.bf16.gmra.mxu0 %v5599_v60 }
 0x146   : > { %v6317_v28 = vadd.f32 %v4684_v51, %v6258_v38  ;;  %3176 = vmatprep.mubr.bf16.mxu0 %v5604_v47  ;;  %3273 = vmatprep.mubr.bf16.mxu1 %v5607_v49  ;;  %v5617_v47 = vld [vmem:[%s5792_s15 + $0x434] ss:$52 sps:$4 sm:$0xff]   ;;  %v5620_v49 = vld [vmem:[%s5792_s15 + $0xfc] ss:$52 sps:$4 sm:$0xff]  }
 0x147   : > { %v4598_v62 = vpop.f32.mrf.mxu0  ;;  %v4686_v59 = vpop.f32.mrf.mxu1 }
 0x148   : > { %v6319_v63 = vadd.f32 %v4598_v62, %v4597_v56  ;;  %v4687_v0 = vadd.f32 %v4686_v59, %v4685_v57 }
 0x149   : > { %v4600_v1 = vpop.f32.mrf.mxu0  ;;  %v4688_v16 = vpop.f32.mrf.mxu1 }
 0x14a   : > { %v6324_v9 = vadd.f32 %v4687_v0, %v6263_v19 }
 0x14b   : > { %v4601_v14 = vpop.f32.mrf.mxu0  ;;  %v4689_v44 = vpop.f32.mrf.mxu1 }
 0x14c   : > { %v6328_v38 = vadd.f32 %v4601_v14, %v4600_v1  ;;  %v4690_v18 = vadd.f32 %v4689_v44, %v4688_v16  ;;  %v5626_v44 = vld [vmem:[%s5792_s15 + $0x164] ss:$52 sps:$4 sm:$0xff]  }
 0x14d   : > { %v4691_v20 = vpop.f32.mrf.mxu1  ;;  %v4755_v23 = vpop.f32.mrf.mxu0  ;;  %3177 = vmatmul.mubr.bf16.gmra.mxu0 %v5602_v3  ;;  %3274 = vmatmul.mubr.bf16.vlgmr.msra.gmra.mxu1 %v5605_v6  ;;  %v5615_v6 = vld [vmem:[%s5792_s15 + $0x430] ss:$52 sps:$4 sm:$0xff]  }
 0x14e   : > { %v6331_v27 = vadd.f32 %v4690_v18, %v6272_v54  ;;  %3184 = vmatprep.mubr.bf16.mxu0 %v5611_v10  ;;  %3281 = vmatprep.mubr.bf16.mxu1 %v5614_v13  ;;  %v5618_v10 = vld [vmem:[%s5792_s15 + $0xf8] ss:$52 sps:$4 sm:$0xff]  }
 0x14f   : > { %v4692_v19 = vpop.f32.mrf.mxu1  ;;  %v4756_v25 = vpop.f32.mrf.mxu0 }
 0x150   : > { %v4693_v26 = vadd.f32 %v4692_v19, %v4691_v20  ;;  %v4757_v40 = vadd.f32 %v4756_v25, %v4755_v23 }
 0x151   : > { %v4694_v33 = vpop.f32.mrf.mxu1  ;;  %v4758_v35 = vpop.f32.mrf.mxu0 }
 0x152   : > { %v6336_v41 = vadd.f32 %v4693_v26, %v6277_v46  ;;  %v6339_v60 = vadd.f32 %v4757_v40, %v6223_v24 }
 0x153   : > { %v4695_v54 = vpop.f32.mrf.mxu1  ;;  %v4759_v50 = vpop.f32.mrf.mxu0 }
 0x154   : > { %v4696_v21 = vadd.f32 %v4695_v54, %v4694_v33  ;;  %v4760_v51 = vadd.f32 %v4759_v50, %v4758_v35 }
 0x155   : > { %v4697_v56 = vpop.f32.mrf.mxu1  ;;  %v4761_v57 = vpop.f32.mrf.mxu0  ;;  %3185 = vmatmul.mubr.bf16.gmra.mxu0 %v5609_v36  ;;  %3282 = vmatmul.mubr.bf16.gmra.mxu1 %v5612_v37 }
 0x156   : > { %v6344_v46 = vadd.f32 %v4696_v21, %v6286_v7  ;;  %v6347_v24 = vadd.f32 %v4760_v51, %v6233_v11  ;;  %3192 = vmatprep.mubr.bf16.mxu0 %v5617_v47  ;;  %3289 = vmatprep.mubr.bf16.mxu1 %v5620_v49  ;;  %v5623_v7 = vld [vmem:[%s5792_s15 + $0x49c] ss:$52 sps:$4 sm:$0xff]   ;;  %v5621_v47 = vld [vmem:[%s5792_s15 + $0x498] ss:$52 sps:$4 sm:$0xff]   ;;  %v5624_v49 = vld [vmem:[%s5792_s15 + $0x160] ss:$52 sps:$4 sm:$0xff]  }
 0x157   : > { %v4698_v62 = vpop.f32.mrf.mxu1  ;;  %v4762_v59 = vpop.f32.mrf.mxu0  ;;  %v5632_v21 = vld [vmem:[%s5792_s15 + $0x1cc] ss:$52 sps:$4 sm:$0xff]  }
 0x158   : > { %v4699_v0 = vadd.f32 %v4698_v62, %v4697_v56  ;;  %v4763_v1 = vadd.f32 %v4762_v59, %v4761_v57 }
 0x159   : > { %v4700_v16 = vpop.f32.mrf.mxu1  ;;  %v4764_v3 = vpop.f32.mrf.mxu0 }
 0x15a   : > { %v6352_v13 = vadd.f32 %v4699_v0, %v6291_v5  ;;  %v6355_v14 = vadd.f32 %v4763_v1, %v6240_v48 }
 0x15b   : > { %v4701_v11 = vpop.f32.mrf.mxu1  ;;  %v4765_v18 = vpop.f32.mrf.mxu0 }
 0x15c   : > { %v4702_v20 = vadd.f32 %v4701_v11, %v4700_v16  ;;  %v4766_v23 = vadd.f32 %v4765_v18, %v4764_v3 }
 0x15d   : > { %v4703_v19 = vpop.f32.mrf.mxu1  ;;  %v4767_v25 = vpop.f32.mrf.mxu0  ;;  %3193 = vmatmul.mubr.bf16.gmra.mxu0 %v5615_v6  ;;  %3290 = vmatmul.mubr.bf16.gmra.mxu1 %v5618_v10 }
 0x15e   : > { %v6360_v5 = vadd.f32 %v4702_v20, %v6300_v31  ;;  %v6363_v48 = vadd.f32 %v4766_v23, %v6247_v58  ;;  %3200 = vmatprep.mubr.bf16.mxu0 %v5623_v7  ;;  %3297 = vmatprep.mubr.bf16.mxu1 %v5626_v44  ;;  %v5629_v31 = vld [vmem:[%s5792_s15 + $0x504] ss:$52 sps:$4 sm:$0xff]   ;;  %v5627_v7 = vld [vmem:[%s5792_s15 + $0x500] ss:$52 sps:$4 sm:$0xff]   ;;  %v5630_v44 = vld [vmem:[%s5792_s15 + $0x1c8] ss:$52 sps:$4 sm:$0xff]  }
 0x15f   : > { %v4704_v26 = vpop.f32.mrf.mxu1  ;;  %v4768_v40 = vpop.f32.mrf.mxu0  ;;  %v5639_v20 = vld [vmem:[%s5792_s15 + $0x234] ss:$52 sps:$4 sm:$0xff]  }
 0x160   : > { %v4705_v33 = vadd.f32 %v4704_v26, %v4703_v19  ;;  %v4769_v35 = vadd.f32 %v4768_v40, %v4767_v25 }
 0x161   : > { %v4706_v36 = vpop.f32.mrf.mxu1  ;;  %v4770_v37 = vpop.f32.mrf.mxu0 }
 0x162   : > { %v6368_v54 = vadd.f32 %v4705_v33, %v6305_v34  ;;  %v6371_v50 = vadd.f32 %v4769_v35, %v6254_v4 }
 0x163   : > { %v4707_v58 = vpop.f32.mrf.mxu1  ;;  %v4771_v51 = vpop.f32.mrf.mxu0 }
 0x164   : > { %v4708_v56 = vadd.f32 %v4707_v58, %v4706_v36  ;;  %v4772_v57 = vadd.f32 %v4771_v51, %v4770_v37 }
 0x165   : > { %v4709_v62 = vpop.f32.mrf.mxu1  ;;  %v4773_v59 = vpop.f32.mrf.mxu0  ;;  %3201 = vmatmul.mubr.bf16.gmra.mxu0 %v5621_v47  ;;  %3298 = vmatmul.mubr.bf16.gmra.mxu1 %v5624_v49 }
 0x166   : > { %v6376_v34 = vadd.f32 %v4708_v56, %v6314_v52  ;;  %v6379_v4 = vadd.f32 %v4772_v57, %v6261_v17  ;;  %3208 = vmatprep.mubr.bf16.mxu0 %v5629_v31  ;;  %3305 = vmatprep.mubr.bf16.mxu1 %v5632_v21  ;;  %v5636_v52 = vld [vmem:[%s5792_s15 + $0x56c] ss:$52 sps:$4 sm:$0xff]   ;;  %v5634_v31 = vld [vmem:[%s5792_s15 + $0x568] ss:$52 sps:$4 sm:$0xff]   ;;  %v5637_v21 = vld [vmem:[%s5792_s15 + $0x230] ss:$52 sps:$4 sm:$0xff]  }
 0x167   : > { %v4710_v0 = vpop.f32.mrf.mxu1  ;;  %v4774_v1 = vpop.f32.mrf.mxu0  ;;  %v5645_v56 = vld [vmem:[%s5792_s15 + $0x29c] ss:$52 sps:$4 sm:$0xff]  }
 0x168   : > { %v4711_v16 = vadd.f32 %v4710_v0, %v4709_v62  ;;  %v4775_v3 = vadd.f32 %v4774_v1, %v4773_v59 }
 0x169   : > { %v4712_v6 = vpop.f32.mrf.mxu1  ;;  %v4776_v10 = vpop.f32.mrf.mxu0 }
 0x16a   : > { %v6384_v11 = vadd.f32 %v4711_v16, %v6319_v63  ;;  %v6387_v18 = vadd.f32 %v4775_v3, %v6268_v30 }
 0x16b   : > { %v4713_v17 = vpop.f32.mrf.mxu1  ;;  %v4777_v23 = vpop.f32.mrf.mxu0 }
 0x16c   : > { %v4714_v19 = vadd.f32 %v4713_v17, %v4712_v6  ;;  %v4778_v25 = vadd.f32 %v4777_v23, %v4776_v10 }
 0x16d   : > { %v4715_v26 = vpop.f32.mrf.mxu1  ;;  %v4779_v40 = vpop.f32.mrf.mxu0  ;;  %3209 = vmatmul.mubr.bf16.gmra.mxu0 %v5627_v7  ;;  %3306 = vmatmul.mubr.bf16.gmra.mxu1 %v5630_v44 }
 0x16e   : > { %v6392_v63 = vadd.f32 %v4714_v19, %v6328_v38  ;;  %v6395_v30 = vadd.f32 %v4778_v25, %v6275_v42  ;;  %3216 = vmatprep.mubr.bf16.mxu0 %v5636_v52  ;;  %3313 = vmatprep.mubr.bf16.mxu1 %v5639_v20  ;;  %v5642_v38 = vld [vmem:[%s5792_s15 + $0x5d4] ss:$52 sps:$4 sm:$0xff]   ;;  %v5640_v52 = vld [vmem:[%s5792_s15 + $0x5d0] ss:$52 sps:$4 sm:$0xff]   ;;  %v5643_v20 = vld [vmem:[%s5792_s15 + $0x298] ss:$52 sps:$4 sm:$0xff]  }
 0x16f   : > { %v4716_v33 = vpop.f32.mrf.mxu1  ;;  %v4780_v35 = vpop.f32.mrf.mxu0  ;;  %v5651_v19 = vld [vmem:[%s5792_s15 + $0x304] ss:$52 sps:$4 sm:$0xff]  }
 0x170   : > { %v4717_v36 = vadd.f32 %v4716_v33, %v4715_v26  ;;  %v4781_v37 = vadd.f32 %v4780_v35, %v4779_v40 }
 0x171   : > { %v4718_v47 = vpop.f32.mrf.mxu1  ;;  %v4782_v49 = vpop.f32.mrf.mxu0 }
 0x172   : > { %v6400_v58 = vadd.f32 %v4717_v36, %v6165_v12  ;;  %v6403_v51 = vadd.f32 %v4781_v37, %v6282_v53 }
 0x173   : > { %v4719_v42 = vpop.f32.mrf.mxu1  ;;  %v4783_v57 = vpop.f32.mrf.mxu0 }
 0x174   : > { %v4720_v62 = vadd.f32 %v4719_v42, %v4718_v47  ;;  %v4784_v59 = vadd.f32 %v4783_v57, %v4782_v49 }
 0x175   : > { %v4721_v0 = vpop.f32.mrf.mxu1  ;;  %v4785_v1 = vpop.f32.mrf.mxu0  ;;  %3217 = vmatmul.mubr.bf16.gmra.mxu0 %v5634_v31  ;;  %3314 = vmatmul.mubr.bf16.gmra.mxu1 %v5637_v21 }
 0x176   : > { %v6408_v12 = vadd.f32 %v4720_v62, %v6173_v22  ;;  %v6411_v53 = vadd.f32 %v4784_v59, %v6289_v2  ;;  %3224 = vmatprep.mubr.bf16.mxu0 %v5642_v38  ;;  %3321 = vmatprep.mubr.bf16.mxu1 %v5645_v56  ;;  %v5648_v22 = vld [vmem:[%s5792_s15 + $0x63c] ss:$52 sps:$4 sm:$0xff]   ;;  %v5646_v38 = vld [vmem:[%s5792_s15 + $0x638] ss:$52 sps:$4 sm:$0xff]   ;;  %v5649_v56 = vld [vmem:[%s5792_s15 + $0x300] ss:$52 sps:$4 sm:$0xff]  }
 0x177   : > { %v4722_v16 = vpop.f32.mrf.mxu1  ;;  %v4786_v3 = vpop.f32.mrf.mxu0  ;;  %v5655_v62 = vld [vmem:[%s5792_s15 + $0x30] ss:$52 sps:$4 sm:$0xff]  }
 0x178   : > { %v4723_v6 = vadd.f32 %v4722_v16, %v4721_v0  ;;  %v4787_v10 = vadd.f32 %v4786_v3, %v4785_v1 }
 0x179   : > { %v4724_v7 = vpop.f32.mrf.mxu1  ;;  %v4788_v44 = vpop.f32.mrf.mxu0 }
 0x17a   : > { %v6416_v17 = vadd.f32 %v4723_v6, %v6177_v29  ;;  %v6419_v23 = vadd.f32 %v4787_v10, %v6296_v15 }
 0x17b   : > { %v4725_v2 = vpop.f32.mrf.mxu1  ;;  %v4789_v25 = vpop.f32.mrf.mxu0 }
 0x17c   : > { %v4726_v26 = vadd.f32 %v4725_v2, %v4724_v7  ;;  %v4790_v40 = vadd.f32 %v4789_v25, %v4788_v44  ;;  %v5659_v25 = vld [vmem:[%s5792_s15 + $0x3d4] ss:$52 sps:$4 sm:$0xff]  }
 0x17d   : > { %v4727_v33 = vpop.f32.mrf.mxu1  ;;  %v4791_v35 = vpop.f32.mrf.mxu0  ;;  %3225 = vmatmul.mubr.bf16.gmra.mxu0 %v5640_v52  ;;  %3322 = vmatmul.mubr.bf16.gmra.mxu1 %v5643_v20 }
 0x17e   : > { %v6424_v29 = vadd.f32 %v4726_v26, %v6185_v39  ;;  %v6427_v15 = vadd.f32 %v4790_v40, %v6303_v32  ;;  %3232 = vmatprep.mubr.bf16.mxu0 %v5648_v22  ;;  %3329 = vmatprep.mubr.bf16.mxu1 %v5651_v19  ;;  %v5654_v39 = vld [vmem:[%s5792_s15 + $0x36c] ss:$52 sps:$4 sm:$0xff]   ;;  %v5652_v22 = vld [vmem:[%s5792_s15 + $0x368] ss:$52 sps:$4 sm:$0xff]  }
 0x17f   : > { %v4728_v36 = vpop.f32.mrf.mxu1  ;;  %v4792_v37 = vpop.f32.mrf.mxu0  ;;  %v5656_v19 = vld [vmem:[%s5792_s15 + $0x98] ss:$52 sps:$4 sm:$0xff]  }
 0x180   : > { %v4729_v47 = vadd.f32 %v4728_v36, %v4727_v33  ;;  %v4793_v49 = vadd.f32 %v4792_v37, %v4791_v35 }
 0x181   : > { %v4730_v31 = vpop.f32.mrf.mxu1  ;;  %v4794_v21 = vpop.f32.mrf.mxu0 }
 0x182   : > { %v6432_v42 = vadd.f32 %v4729_v47, %v6189_v45  ;;  %v6435_v57 = vadd.f32 %v4793_v49, %v6310_v43 }
 0x183   : > { %v4731_v32 = vpop.f32.mrf.mxu1  ;;  %v4795_v59 = vpop.f32.mrf.mxu0 }
 0x184   : > { %v4732_v0 = vadd.f32 %v4731_v32, %v4730_v31  ;;  %v4796_v1 = vadd.f32 %v4795_v59, %v4794_v21  ;;  %v5664_v59 = vld [vmem:[%s5792_s15 + $0x43c] ss:$52 sps:$4 sm:$0xff]  }
 0x185   : > { %v4733_v16 = vpop.f32.mrf.mxu1  ;;  %v4797_v3 = vpop.f32.mrf.mxu0  ;;  %3233 = vmatmul.mubr.bf16.gmra.mxu0 %v5646_v38  ;;  %3330 = vmatmul.mubr.bf16.gmra.mxu1 %v5649_v56 }
 0x186   : > { %v6440_v45 = vadd.f32 %v4732_v0, %v6197_v55  ;;  %v6443_v43 = vadd.f32 %v4796_v1, %v6317_v28  ;;  %3337 = vmatprep.mubr.bf16.mxu1 %v5654_v39  ;;  %5215 = vmatprep.mubr.msk.bf16.mxu0 %vm2387_vm0, %v5655_v62  ;;  %v5660_v28 = vld [vmem:[%s5792_s15 + $0x100] ss:$52 sps:$4 sm:$0xff]   ;;  %v5657_v39 = vld [vmem:[%s5792_s15 + $0x3d0] ss:$52 sps:$4 sm:$0xff]   ;;  %v5661_v62 = vld [vmem:[%s5792_s15 + $0x168] ss:$52 sps:$4 sm:$0xff]  }
 0x187   : > { %v4734_v6 = vpop.f32.mrf.mxu1  ;;  %v4798_v10 = vpop.f32.mrf.mxu0 }
 0x188   : > { %v4735_v7 = vadd.f32 %v4734_v6, %v4733_v16  ;;  %v4799_v44 = vadd.f32 %v4798_v10, %v4797_v3 }
 0x189   : > { %v4736_v52 = vpop.f32.mrf.mxu1  ;;  %v4800_v20 = vpop.f32.mrf.mxu0 }
 0x18a   : > { %v6449_v2 = vadd.f32 %v4735_v7, %v6201_v61  ;;  %v6452_v55 = vadd.f32 %v4799_v44, %v6324_v9 }
 0x18b   : > { %v4737_v26 = vpop.f32.mrf.mxu1  ;;  %v4801_v40 = vpop.f32.mrf.mxu0 }
 0x18c   : > { %v4738_v33 = vadd.f32 %v4737_v26, %v4736_v52  ;;  %v4802_v35 = vadd.f32 %v4801_v40, %v4800_v20  ;;  %v5669_v40 = vld [vmem:[%s5792_s15 + $0x4a4] ss:$52 sps:$4 sm:$0xff]  }
 0x18d   : > { %v4803_v36 = vpop.f32.mrf.mxu0  ;;  %v4867_v37 = vpop.f32.mrf.mxu1  ;;  %3338 = vmatmul.mubr.bf16.gmra.mxu1 %v5652_v22  ;;  %5216 = vmatmul.mubr.msk.bf16.vlgmr.msra.gmra.mxu0 %vm2387_vm0, %v5656_v19 }
 0x18e   : > { %v6458_v61 = vadd.f32 %v4738_v33, %v6212_v8  ;;  %v6461_v9 = vadd.f32 %v4802_v35, %v6331_v27  ;;  %3345 = vmatprep.mubr.bf16.mxu1 %v5659_v25  ;;  %5219 = vmatprep.mubr.msk.bf16.mxu0 %vm2387_vm0, %v5660_v28  ;;  %v5665_v27 = vld [vmem:[%s5792_s15 + $0x1d0] ss:$52 sps:$4 sm:$0xff]   ;;  %v5662_v25 = vld [vmem:[%s5792_s15 + $0x438] ss:$52 sps:$4 sm:$0xff]  }
 0x18f   : > { %v4804_v47 = vpop.f32.mrf.mxu0  ;;  %v4868_v49 = vpop.f32.mrf.mxu1  ;;  %v5666_v28 = vld [vmem:[%s5792_s15 + $0x238] ss:$52 sps:$4 sm:$0xff]  }
 0x190   : > { %v4805_v31 = vadd.f32 %v4804_v47, %v4803_v36  ;;  %v4869_v21 = vadd.f32 %v4868_v49, %v4867_v37 }
 0x191   : > { %v4806_v38 = vpop.f32.mrf.mxu0  ;;  %v4870_v56 = vpop.f32.mrf.mxu1 }
 0x192   : > { %v6467_v32 = vadd.f32 %v4805_v31, %v6336_v41  ;;  %v6470_v8 = vadd.f32 %v4869_v21, %v6339_v60 }
 0x193   : > { %v4807_v0 = vpop.f32.mrf.mxu0  ;;  %v4871_v1 = vpop.f32.mrf.mxu1 }
 0x194   : > { %v4808_v16 = vadd.f32 %v4807_v0, %v4806_v38  ;;  %v4872_v3 = vadd.f32 %v4871_v1, %v4870_v56  ;;  %v5674_v1 = vld [vmem:[%s5792_s15 + $0x50c] ss:$52 sps:$4 sm:$0xff]  }
 0x195   : > { %v4809_v6 = vpop.f32.mrf.mxu0  ;;  %v4873_v10 = vpop.f32.mrf.mxu1  ;;  %3346 = vmatmul.mubr.bf16.gmra.mxu1 %v5657_v39  ;;  %5220 = vmatmul.mubr.msk.bf16.gmra.mxu0 %vm2387_vm0, %v5661_v62 }
 0x196   : > { %v6476_v41 = vadd.f32 %v4808_v16, %v6344_v46  ;;  %v6479_v60 = vadd.f32 %v4872_v3, %v6347_v24  ;;  %3353 = vmatprep.mubr.bf16.mxu1 %v5664_v59  ;;  %5223 = vmatprep.mubr.msk.bf16.mxu0 %vm2387_vm0, %v5665_v27  ;;  %v5670_v24 = vld [vmem:[%s5792_s15 + $0x2a0] ss:$52 sps:$4 sm:$0xff]   ;;  %v5671_v27 = vld [vmem:[%s5792_s15 + $0x308] ss:$52 sps:$4 sm:$0xff]  }
 0x197   : > { %v4810_v7 = vpop.f32.mrf.mxu0  ;;  %v4874_v44 = vpop.f32.mrf.mxu1  ;;  %v5667_v59 = vld [vmem:[%s5792_s15 + $0x4a0] ss:$52 sps:$4 sm:$0xff]  }
 0x198   : > { %v4811_v52 = vadd.f32 %v4810_v7, %v4809_v6  ;;  %v4875_v20 = vadd.f32 %v4874_v44, %v4873_v10 }
 0x199   : > { %v4812_v22 = vpop.f32.mrf.mxu0  ;;  %v4876_v19 = vpop.f32.mrf.mxu1 }
 0x19a   : > { %v6485_v26 = vadd.f32 %v4811_v52, %v6352_v13  ;;  %v6488_v46 = vadd.f32 %v4875_v20, %v6355_v14 }
 0x19b   : > { %v4813_v33 = vpop.f32.mrf.mxu0  ;;  %v4877_v35 = vpop.f32.mrf.mxu1 }
 0x19c   : > { %v4814_v36 = vadd.f32 %v4813_v33, %v4812_v22  ;;  %v4878_v37 = vadd.f32 %v4877_v35, %v4876_v19  ;;  %v5679_v35 = vld [vmem:[%s5792_s15 + $0x574] ss:$52 sps:$4 sm:$0xff]  }
 0x19d   : > { %v4815_v47 = vpop.f32.mrf.mxu0  ;;  %v4879_v49 = vpop.f32.mrf.mxu1  ;;  %3354 = vmatmul.mubr.bf16.gmra.mxu1 %v5662_v25  ;;  %5224 = vmatmul.mubr.msk.bf16.gmra.mxu0 %vm2387_vm0, %v5666_v28 }
 0x19e   : > { %v6494_v13 = vadd.f32 %v4814_v36, %v6360_v5  ;;  %v6497_v14 = vadd.f32 %v4878_v37, %v6363_v48  ;;  %3361 = vmatprep.mubr.bf16.mxu1 %v5669_v40  ;;  %5227 = vmatprep.mubr.msk.bf16.mxu0 %vm2387_vm0, %v5670_v24  ;;  %v5675_v48 = vld [vmem:[%s5792_s15 + $0x370] ss:$52 sps:$4 sm:$0xff]   ;;  %v5672_v40 = vld [vmem:[%s5792_s15 + $0x508] ss:$52 sps:$4 sm:$0xff]   ;;  %v5676_v24 = vld [vmem:[%s5792_s15 + $0x3d8] ss:$52 sps:$4 sm:$0xff]  }
 0x19f   : > { %v4816_v31 = vpop.f32.mrf.mxu0  ;;  %v4880_v21 = vpop.f32.mrf.mxu1 }
 0x1a0   : > { %v4817_v38 = vadd.f32 %v4816_v31, %v4815_v47  ;;  %v4881_v56 = vadd.f32 %v4880_v21, %v4879_v49 }
 0x1a1   : > { %v4818_v39 = vpop.f32.mrf.mxu0  ;;  %v4882_v62 = vpop.f32.mrf.mxu1 }
 0x1a2   : > { %v6503_v0 = vadd.f32 %v4817_v38, %v6368_v54  ;;  %v6506_v5 = vadd.f32 %v4881_v56, %v6371_v50 }
 0x1a3   : > { %v4819_v16 = vpop.f32.mrf.mxu0  ;;  %v4883_v3 = vpop.f32.mrf.mxu1 }
 0x1a4   : > { %v4820_v6 = vadd.f32 %v4819_v16, %v4818_v39  ;;  %v4884_v10 = vadd.f32 %v4883_v3, %v4882_v62  ;;  %v5684_v3 = vld [vmem:[%s5792_s15 + $0x5dc] ss:$52 sps:$4 sm:$0xff]  }
 0x1a5   : > { %v4821_v7 = vpop.f32.mrf.mxu0  ;;  %v4885_v44 = vpop.f32.mrf.mxu1  ;;  %3362 = vmatmul.mubr.bf16.gmra.mxu1 %v5667_v59  ;;  %5228 = vmatmul.mubr.msk.bf16.gmra.mxu0 %vm2387_vm0, %v5671_v27 }
 0x1a6   : > { %v6512_v54 = vadd.f32 %v4820_v6, %v6376_v34  ;;  %v6515_v50 = vadd.f32 %v4884_v10, %v6379_v4  ;;  %3369 = vmatprep.mubr.bf16.mxu1 %v5674_v1  ;;  %5231 = vmatprep.mubr.msk.bf16.mxu0 %vm2387_vm0, %v5675_v48  ;;  %v5680_v4 = vld [vmem:[%s5792_s15 + $0x440] ss:$52 sps:$4 sm:$0xff]   ;;  %v5677_v1 = vld [vmem:[%s5792_s15 + $0x570] ss:$52 sps:$4 sm:$0xff]   ;;  %v5681_v48 = vld [vmem:[%s5792_s15 + $0x4a8] ss:$52 sps:$4 sm:$0xff]  }
 0x1a7   : > { %v4822_v52 = vpop.f32.mrf.mxu0  ;;  %v4886_v20 = vpop.f32.mrf.mxu1 }
 0x1a8   : > { %v4823_v22 = vadd.f32 %v4822_v52, %v4821_v7  ;;  %v4887_v19 = vadd.f32 %v4886_v20, %v4885_v44 }
 0x1a9   : > { %v4824_v25 = vpop.f32.mrf.mxu0  ;;  %v4888_v28 = vpop.f32.mrf.mxu1 }
 0x1aa   : > { %v6521_v33 = vadd.f32 %v4823_v22, %v6384_v11  ;;  %v6524_v34 = vadd.f32 %v4887_v19, %v6387_v18 }
 0x1ab   : > { %v4825_v36 = vpop.f32.mrf.mxu0  ;;  %v4889_v37 = vpop.f32.mrf.mxu1 }
 0x1ac   : > { %v4826_v47 = vadd.f32 %v4825_v36, %v4824_v25  ;;  %v4890_v49 = vadd.f32 %v4889_v37, %v4888_v28  ;;  %v5689_v37 = vld [vmem:[%s5792_s15 + $0x644] ss:$52 sps:$4 sm:$0xff]  }
 0x1ad   : > { %v4827_v31 = vpop.f32.mrf.mxu0  ;;  %v4891_v21 = vpop.f32.mrf.mxu1  ;;  %3370 = vmatmul.mubr.bf16.gmra.mxu1 %v5672_v40  ;;  %5232 = vmatmul.mubr.msk.bf16.gmra.mxu0 %vm2387_vm0, %v5676_v24 }
 0x1ae   : > { %v6530_v11 = vadd.f32 %v4826_v47, %v6392_v63  ;;  %v6533_v18 = vadd.f32 %v4890_v49, %v6395_v30  ;;  %3377 = vmatprep.mubr.bf16.mxu1 %v5679_v35  ;;  %5235 = vmatprep.mubr.msk.bf16.mxu0 %vm2387_vm0, %v5680_v4  ;;  %v5685_v30 = vld [vmem:[%s5792_s15 + $0x510] ss:$52 sps:$4 sm:$0xff]   ;;  %v5682_v35 = vld [vmem:[%s5792_s15 + $0x5d8] ss:$52 sps:$4 sm:$0xff]  }
 0x1af   : > { %v4828_v38 = vpop.f32.mrf.mxu0  ;;  %v4892_v56 = vpop.f32.mrf.mxu1  ;;  %v5686_v4 = vld [vmem:[%s5792_s15 + $0x578] ss:$52 sps:$4 sm:$0xff]  }
 0x1b0   : > { %v4829_v39 = vadd.f32 %v4828_v38, %v4827_v31  ;;  %v4893_v62 = vadd.f32 %v4892_v56, %v4891_v21 }
 0x1b1   : > { %v4830_v59 = vpop.f32.mrf.mxu0  ;;  %v4894_v27 = vpop.f32.mrf.mxu1 }
 0x1b2   : > { %v6539_v16 = vadd.f32 %v4829_v39, %v6400_v58  ;;  %v6542_v63 = vadd.f32 %v4893_v62, %v6403_v51 }
 0x1b3   : > { %v4831_v6 = vpop.f32.mrf.mxu0  ;;  %v4895_v10 = vpop.f32.mrf.mxu1 }
 0x1b4   : > { %v4832_v7 = vadd.f32 %v4831_v6, %v4830_v59  ;;  %v4896_v44 = vadd.f32 %v4895_v10, %v4894_v27 }
 0x1b5   : > { %v4833_v52 = vpop.f32.mrf.mxu0  ;;  %v4897_v20 = vpop.f32.mrf.mxu1  ;;  %3378 = vmatmul.mubr.bf16.gmra.mxu1 %v5677_v1  ;;  %5236 = vmatmul.mubr.msk.bf16.gmra.mxu0 %vm2387_vm0, %v5681_v48 }
 0x1b6   : > { %v6548_v58 = vadd.f32 %v4832_v7, %v6408_v12  ;;  %v6551_v51 = vadd.f32 %v4896_v44, %v6411_v53  ;;  %3385 = vmatprep.mubr.bf16.mxu1 %v5684_v3  ;;  %5239 = vmatprep.mubr.msk.bf16.mxu0 %vm2387_vm0, %v5685_v30  ;;  %v5690_v53 = vld [vmem:[%s5792_s15 + $0x5e0] ss:$52 sps:$4 sm:$0xff]   ;;  %v5691_v30 = vld [vmem:[%s5792_s15 + $0x648] ss:$52 sps:$4 sm:$0xff]  }
 0x1b7   : > { %v4834_v22 = vpop.f32.mrf.mxu0  ;;  %v4898_v19 = vpop.f32.mrf.mxu1  ;;  %v5687_v3 = vld [vmem:[%s5792_s15 + $0x640] ss:$52 sps:$4 sm:$0xff]  }
 0x1b8   : > { %v4835_v25 = vadd.f32 %v4834_v22, %v4833_v52  ;;  %v4899_v28 = vadd.f32 %v4898_v19, %v4897_v20 }
 0x1b9   : > { %v4836_v40 = vpop.f32.mrf.mxu0  ;;  %v4900_v24 = vpop.f32.mrf.mxu1 }
 0x1ba   : > { %v6557_v36 = vadd.f32 %v4835_v25, %v6416_v17  ;;  %v6560_v12 = vadd.f32 %v4899_v28, %v6419_v23 }
 0x1bb   : > { %v4837_v47 = vpop.f32.mrf.mxu0  ;;  %v4901_v49 = vpop.f32.mrf.mxu1 }
 0x1bc   : > { %v4838_v31 = vadd.f32 %v4837_v47, %v4836_v40  ;;  %v4902_v21 = vadd.f32 %v4901_v49, %v4900_v24 }
 0x1bd   : > { %v4839_v38 = vpop.f32.mrf.mxu0  ;;  %v4903_v56 = vpop.f32.mrf.mxu1  ;;  %3386 = vmatmul.mubr.bf16.gmra.mxu1 %v5682_v35  ;;  %5240 = vmatmul.mubr.msk.bf16.gmra.mxu0 %vm2387_vm0, %v5686_v4 }
 0x1be   : > { %v6566_v39 = vadd.f32 %v4838_v31, %v6424_v29  ;;  %v6569_v17 = vadd.f32 %v4902_v21, %v6427_v15  ;;  %3393 = vmatprep.mubr.bf16.mxu1 %v5689_v37  ;;  %5243 = vmatprep.mubr.msk.bf16.mxu0 %vm2387_vm0, %v5690_v53 }
 0x1bf   : > { %v4840_v23 = vpop.f32.mrf.mxu0  ;;  %v4904_v62 = vpop.f32.mrf.mxu1 }
 0x1c0   : > { %v4841_v59 = vadd.f32 %v4840_v23, %v4839_v38  ;;  %v4905_v27 = vadd.f32 %v4904_v62, %v4903_v56 }
 0x1c1   : > { %v4842_v1 = vpop.f32.mrf.mxu0  ;;  %v4906_v48 = vpop.f32.mrf.mxu1 }
 0x1c2   : > { %v6575_v6 = vadd.f32 %v4841_v59, %v6432_v42  ;;  %v6578_v29 = vadd.f32 %v4905_v27, %v6435_v57 }
 0x1c3   : > { %v4843_v10 = vpop.f32.mrf.mxu0  ;;  %v4907_v15 = vpop.f32.mrf.mxu1 }
 0x1c4   : > { %v4844_v7 = vadd.f32 %v4843_v10, %v4842_v1  ;;  %v4908_v44 = vadd.f32 %v4907_v15, %v4906_v48 }
 0x1c5   : > { %v4845_v52 = vpop.f32.mrf.mxu0  ;;  %v4909_v20 = vpop.f32.mrf.mxu1  ;;  %3394 = vmatmul.mubr.bf16.gmra.mxu1 %v5687_v3  ;;  %5244 = vmatmul.mubr.msk.bf16.gmra.mxu0 %vm2387_vm0, %v5691_v30 }
 0x1c6   : > { %v6582_v22 = vadd.f32 %v4844_v7, %v6440_v45  ;;  %v6585_v19 = vadd.f32 %v4908_v44, %v6443_v43 }
 0x1c7   : > { %v4846_v42 = vpop.f32.mrf.mxu0  ;;  %v4910_v25 = vpop.f32.mrf.mxu1 }
 0x1c8   : > { %v4847_v28 = vadd.f32 %v4846_v42, %v4845_v52  ;;  %v4911_v57 = vadd.f32 %v4910_v25, %v4909_v20 }
 0x1c9   : > { %v4848_v40 = vpop.f32.mrf.mxu0  ;;  %v4912_v24 = vpop.f32.mrf.mxu1 }
 0x1ca   : > { %v6588_v35 = vadd.f32 %v4847_v28, %v6449_v2  ;;  %v6591_v4 = vadd.f32 %v4911_v57, %v6452_v55 }
 0x1cb   : > { %v4849_v37 = vpop.f32.mrf.mxu0  ;;  %v4913_v53 = vpop.f32.mrf.mxu1 }
 0x1cc   : > { %v4850_v47 = vadd.f32 %v4849_v37, %v4848_v40  ;;  %v4914_v45 = vadd.f32 %v4913_v53, %v4912_v24 }
 0x1cd   : > { %v4915_v49 = vpop.f32.mrf.mxu1  ;;  %v4979_v31 = vpop.f32.mrf.mxu0 }
 0x1ce   : > { %v6594_v43 = vadd.f32 %v4850_v47, %v6458_v61  ;;  %v6597_v21 = vadd.f32 %v4914_v45, %v6461_v9 }
 0x1cf   : > { %v4916_v38 = vpop.f32.mrf.mxu1  ;;  %v4980_v56 = vpop.f32.mrf.mxu0 }
 0x1d0   : > { %v4917_v23 = vadd.f32 %v4916_v38, %v4915_v49  ;;  %v4981_v2 = vadd.f32 %v4980_v56, %v4979_v31 }
 0x1d1   : > { %v4918_v62 = vpop.f32.mrf.mxu1  ;;  %v4982_v59 = vpop.f32.mrf.mxu0 }
 0x1d2   : > { %v6600_v55 = vadd.f32 %v4917_v23, %v6467_v32  ;;  %v6603_v27 = vadd.f32 %v4981_v2, %v6470_v8 }
 0x1d3   : > { %v4919_v1 = vpop.f32.mrf.mxu1  ;;  %v4983_v48 = vpop.f32.mrf.mxu0 }
 0x1d4   : > { %v4920_v3 = vadd.f32 %v4919_v1, %v4918_v62  ;;  %v4984_v61 = vadd.f32 %v4983_v48, %v4982_v59 }
 0x1d5   : > { %v4921_v30 = vpop.f32.mrf.mxu1  ;;  %v4985_v10 = vpop.f32.mrf.mxu0 }
 0x1d6   : > { %v6606_v9 = vadd.f32 %v4920_v3, %v6476_v41  ;;  %v6609_v15 = vadd.f32 %v4984_v61, %v6479_v60 }
 0x1d7   : > { %v4922_v7 = vpop.f32.mrf.mxu1  ;;  %v4986_v44 = vpop.f32.mrf.mxu0 }
 0x1d8   : > { %v4923_v52 = vadd.f32 %v4922_v7, %v4921_v30  ;;  %v4987_v32 = vadd.f32 %v4986_v44, %v4985_v10 }
 0x1d9   : > { %v4924_v20 = vpop.f32.mrf.mxu1  ;;  %v4988_v42 = vpop.f32.mrf.mxu0 }
 0x1da   : > { %v6612_v8 = vadd.f32 %v4923_v52, %v6485_v26  ;;  %v6615_v25 = vadd.f32 %v4987_v32, %v6488_v46 }
 0x1db   : > { %v4925_v28 = vpop.f32.mrf.mxu1  ;;  %v4989_v57 = vpop.f32.mrf.mxu0 }
 0x1dc   : > { %v4926_v40 = vadd.f32 %v4925_v28, %v4924_v20  ;;  %v4990_v41 = vadd.f32 %v4989_v57, %v4988_v42 }
 0x1dd   : > { %v4927_v24 = vpop.f32.mrf.mxu1  ;;  %v4991_v37 = vpop.f32.mrf.mxu0 }
 0x1de   : > { %v6618_v60 = vadd.f32 %v4926_v40, %v6494_v13  ;;  %v6621_v53 = vadd.f32 %v4990_v41, %v6497_v14 }
 0x1df   : > { %v4928_v47 = vpop.f32.mrf.mxu1  ;;  %v4992_v45 = vpop.f32.mrf.mxu0 }
 0x1e0   : > { %v4929_v49 = vadd.f32 %v4928_v47, %v4927_v24  ;;  %v4993_v26 = vadd.f32 %v4992_v45, %v4991_v37 }
 0x1e1   : > { %v4930_v31 = vpop.f32.mrf.mxu1  ;;  %v4994_v38 = vpop.f32.mrf.mxu0 }
 0x1e2   : > { %v6624_v46 = vadd.f32 %v4929_v49, %v6503_v0  ;;  %v6627_v56 = vadd.f32 %v4993_v26, %v6506_v5 }
 0x1e3   : > { %v4931_v23 = vpop.f32.mrf.mxu1  ;;  %v4995_v2 = vpop.f32.mrf.mxu0 }
 0x1e4   : > { %v4932_v62 = vadd.f32 %v4931_v23, %v4930_v31  ;;  %v4996_v13 = vadd.f32 %v4995_v2, %v4994_v38 }
 0x1e5   : > { %v4933_v59 = vpop.f32.mrf.mxu1  ;;  %v4997_v1 = vpop.f32.mrf.mxu0 }
 0x1e6   : > { %v6630_v14 = vadd.f32 %v4932_v62, %v6512_v54  ;;  %v6633_v48 = vadd.f32 %v4996_v13, %v6515_v50 }
 0x1e7   : > { %v4934_v3 = vpop.f32.mrf.mxu1  ;;  %v4998_v61 = vpop.f32.mrf.mxu0 }
 0x1e8   : > { %v4935_v30 = vadd.f32 %v4934_v3, %v4933_v59  ;;  %v4999_v0 = vadd.f32 %v4998_v61, %v4997_v1 }
 0x1e9   : > { %v4936_v10 = vpop.f32.mrf.mxu1  ;;  %v5000_v7 = vpop.f32.mrf.mxu0 }
 0x1ea   : > { %v6636_v5 = vadd.f32 %v4935_v30, %v6521_v33  ;;  %v6639_v44 = vadd.f32 %v4999_v0, %v6524_v34 }
 0x1eb   : > { %v4937_v52 = vpop.f32.mrf.mxu1  ;;  %v5001_v32 = vpop.f32.mrf.mxu0 }
 0x1ec   : > { %v4938_v20 = vadd.f32 %v4937_v52, %v4936_v10  ;;  %v5002_v54 = vadd.f32 %v5001_v32, %v5000_v7 }
 0x1ed   : > { %v4939_v42 = vpop.f32.mrf.mxu1  ;;  %v5003_v28 = vpop.f32.mrf.mxu0 }
 0x1ee   : > { %v6642_v50 = vadd.f32 %v4938_v20, %v6530_v11  ;;  %v6645_v57 = vadd.f32 %v5002_v54, %v6533_v18 }
 0x1ef   : > { %v4940_v40 = vpop.f32.mrf.mxu1  ;;  %v5004_v41 = vpop.f32.mrf.mxu0 }
 0x1f0   : > { %v4941_v24 = vadd.f32 %v4940_v40, %v4939_v42  ;;  %v5005_v33 = vadd.f32 %v5004_v41, %v5003_v28 }
 0x1f1   : > { %v4942_v37 = vpop.f32.mrf.mxu1  ;;  %v5006_v47 = vpop.f32.mrf.mxu0 }
 0x1f2   : > { %v6648_v34 = vadd.f32 %v4941_v24, %v6539_v16  ;;  %v6651_v45 = vadd.f32 %v5005_v33, %v6542_v63 }
 0x1f3   : > { %v4943_v49 = vpop.f32.mrf.mxu1  ;;  %v5007_v26 = vpop.f32.mrf.mxu0 }
 0x1f4   : > { %v4944_v31 = vadd.f32 %v4943_v49, %v4942_v37  ;;  %v5008_v11 = vadd.f32 %v5007_v26, %v5006_v47 }
 0x1f5   : > { %v4945_v38 = vpop.f32.mrf.mxu1  ;;  %v5009_v23 = vpop.f32.mrf.mxu0 }
 0x1f6   : > { %v6654_v18 = vadd.f32 %v4944_v31, %v6548_v58  ;;  %v6657_v2 = vadd.f32 %v5008_v11, %v6551_v51 }
 0x1f7   : > { %v4946_v62 = vpop.f32.mrf.mxu1  ;;  %v5010_v13 = vpop.f32.mrf.mxu0 }
 0x1f8   : > { %v4947_v59 = vadd.f32 %v4946_v62, %v4945_v38  ;;  %v5011_v16 = vadd.f32 %v5010_v13, %v5009_v23 }
 0x1f9   : > { %v4948_v1 = vpop.f32.mrf.mxu1  ;;  %v5012_v3 = vpop.f32.mrf.mxu0 }
 0x1fa   : > { %v6660_v63 = vadd.f32 %v4947_v59, %v6557_v36  ;;  %v6663_v61 = vadd.f32 %v5011_v16, %v6560_v12 }
 0x1fb   : > { %v4949_v30 = vpop.f32.mrf.mxu1  ;;  %v5013_v0 = vpop.f32.mrf.mxu0 }
 0x1fc   : > { %v4950_v10 = vadd.f32 %v4949_v30, %v4948_v1  ;;  %v5014_v58 = vadd.f32 %v5013_v0, %v5012_v3 }
 0x1fd   : > { %v4951_v7 = vpop.f32.mrf.mxu1  ;;  %v5015_v52 = vpop.f32.mrf.mxu0 }
 0x1fe   : > { %v6666_v51 = vadd.f32 %v4950_v10, %v6566_v39  ;;  %v6669_v32 = vadd.f32 %v5014_v58, %v6569_v17 }
 0x1ff   : > { %v4952_v20 = vpop.f32.mrf.mxu1  ;;  %v5016_v54 = vpop.f32.mrf.mxu0 }
 0x200   : > { %v4953_v42 = vadd.f32 %v4952_v20, %v4951_v7  ;;  %v5017_v36 = vadd.f32 %v5016_v54, %v5015_v52 }
 0x201   : > { %v4954_v28 = vpop.f32.mrf.mxu1  ;;  %v5018_v40 = vpop.f32.mrf.mxu0 }
 0x202   : > { %v6672_v12 = vadd.f32 %v4953_v42, %v6575_v6  ;;  %v6675_v41 = vadd.f32 %v5017_v36, %v6578_v29 }
 0x203   : > { %v4955_v24 = vpop.f32.mrf.mxu1  ;;  %v5019_v33 = vpop.f32.mrf.mxu0 }
 0x204   : > { %v4956_v37 = vadd.f32 %v4955_v24, %v4954_v28  ;;  %v5020_v39 = vadd.f32 %v5019_v33, %v5018_v40 }
 0x205   : > { %v4957_v47 = vpop.f32.mrf.mxu1  ;;  %v5021_v49 = vpop.f32.mrf.mxu0 }
 0x206   : > { %v6678_v17 = vadd.f32 %v4956_v37, %v6582_v22  ;;  %v6681_v26 = vadd.f32 %v5020_v39, %v6585_v19 }
 0x207   : > { %v4958_v31 = vpop.f32.mrf.mxu1  ;;  %v5022_v11 = vpop.f32.mrf.mxu0 }
 0x208   : > { %v4959_v38 = vadd.f32 %v4958_v31, %v4957_v47  ;;  %v5023_v6 = vadd.f32 %v5022_v11, %v5021_v49 }
 0x209   : > { %v4960_v23 = vpop.f32.mrf.mxu1  ;;  %v5024_v62 = vpop.f32.mrf.mxu0 }
 0x20a   : > { %v6684_v29 = vadd.f32 %v4959_v38, %v6588_v35  ;;  %v6687_v13 = vadd.f32 %v5023_v6, %v6591_v4 }
 0x20b   : > { %v4961_v59 = vpop.f32.mrf.mxu1  ;;  %v5025_v16 = vpop.f32.mrf.mxu0 }
 0x20c   : > { %v4962_v1 = vadd.f32 %v4961_v59, %v4960_v23  ;;  %v5026_v22 = vadd.f32 %v5025_v16, %v5024_v62 }
 0x20d   : > { %v5027_v3 = vpop.f32.mrf.mxu0  ;;  %v5091_v30 = vpop.f32.mrf.mxu1 }
 0x20e   : > { %v6690_v19 = vadd.f32 %v4962_v1, %v6594_v43  ;;  %v6693_v0 = vadd.f32 %v5026_v22, %v6597_v21 }
 0x20f   : > { %v5028_v10 = vpop.f32.mrf.mxu0  ;;  %v5092_v58 = vpop.f32.mrf.mxu1 }
 0x210   : > { %v5029_v7 = vadd.f32 %v5028_v10, %v5027_v3  ;;  %v5093_v35 = vadd.f32 %v5092_v58, %v5091_v30 }
 0x211   : > { %v5030_v52 = vpop.f32.mrf.mxu0  ;;  %v6695_v20 = vpop.f32.mrf.mxu1 }
 0x212   : > { %v6698_v4 = vadd.f32 %v5029_v7, %v6600_v55  ;;  %v6701_v54 = vadd.f32 %v5093_v35, %v6603_v27 }
 0x213   : > { %v5031_v42 = vpop.f32.mrf.mxu0  ;;  %v6703_v36 = vpop.f32.mrf.mxu1 }
 0x214   : > { %v5032_v43 = vadd.f32 %v5031_v42, %v5030_v52 }
 0x215   : > { %v5033_v28 = vpop.f32.mrf.mxu0  ;;  %v6705_v21 = vpop.f32.mrf.mxu1 }
 0x216   : > { %v6708_v40 = vadd.f32 %v5032_v43, %v6606_v9 }
 0x217   : > { %v5034_v24 = vpop.f32.mrf.mxu0  ;;  %v6710_v33 = vpop.f32.mrf.mxu1 }
 0x218   : > { %v5035_v37 = vadd.f32 %v5034_v24, %v5033_v28 }
 0x219   : > { %v5036_v39 = vpop.f32.mrf.mxu0  ;;  %v6712_v55 = vpop.f32.mrf.mxu1 }
 0x21a   : > { %v6715_v27 = vadd.f32 %v5035_v37, %v6612_v8 }
 0x21b   : > { %v5037_v47 = vpop.f32.mrf.mxu0  ;;  %v6717_v49 = vpop.f32.mrf.mxu1 }
 0x21c   : > { %v5038_v31 = vadd.f32 %v5037_v47, %v5036_v39 }
 0x21d   : > { %v5039_v11 = vpop.f32.mrf.mxu0  ;;  %v6719_v38 = vpop.f32.mrf.mxu1 }
 0x21e   : > { %v6722_v9 = vadd.f32 %v5038_v31, %v6618_v60 }
 0x21f   : > { %v5040_v6 = vpop.f32.mrf.mxu0  ;;  %v6724_v23 = vpop.f32.mrf.mxu1 }
 0x220   : > { %v5041_v62 = vadd.f32 %v5040_v6, %v5039_v11 }
 0x221   : > { %v5042_v59 = vpop.f32.mrf.mxu0  ;;  %v6726_v16 = vpop.f32.mrf.mxu1 }
 0x222   : > { %v6729_v8 = vadd.f32 %v5041_v62, %v6624_v46 }
 0x223   : > { %v5043_v1 = vpop.f32.mrf.mxu0  ;;  %v6731_v22 = vpop.f32.mrf.mxu1 }
 0x224   : > { %7014 = vst [vmem:[#allocation3_spill] sm:$0xff] %v6729_v8  ;;  %v5044_v3 = vadd.f32 %v5043_v1, %v5042_v59 }
 0x225   : > { %v5045_v30 = vpop.f32.mrf.mxu0  ;;  %v6733_v10 = vpop.f32.mrf.mxu1 }
 0x226   : > { %v6736_v60 = vadd.f32 %v5044_v3, %v6630_v14 }
 0x227   : > { %v5046_v58 = vpop.f32.mrf.mxu0  ;;  %v6738_v7 = vpop.f32.mrf.mxu1 }
 0x228   : > { %7015 = vst [vmem:[#allocation4_spill] sm:$0xff] %v6736_v60  ;;  %v5047_v35 = vadd.f32 %v5046_v58, %v5045_v30 }
 0x229   : > { %v5048_v52 = vpop.f32.mrf.mxu0  ;;  %v6740_v42 = vpop.f32.mrf.mxu1 }
 0x22a   : > { %v6743_v46 = vadd.f32 %v5047_v35, %v6636_v5 }
 0x22b   : > { %v5049_v43 = vpop.f32.mrf.mxu0  ;;  %v6745_v28 = vpop.f32.mrf.mxu1 }
 0x22c   : > { %7016 = vst [vmem:[#allocation5_spill] sm:$0xff] %v6743_v46  ;;  %v5050_v24 = vadd.f32 %v5049_v43, %v5048_v52 }
 0x22d   : > { %v5051_v37 = vpop.f32.mrf.mxu0  ;;  %v6747_v39 = vpop.f32.mrf.mxu1 }
 0x22e   : > { %v6750_v14 = vadd.f32 %v5050_v24, %v6642_v50 }
 0x22f   : > { %v5052_v47 = vpop.f32.mrf.mxu0  ;;  %v6752_v31 = vpop.f32.mrf.mxu1 }
 0x230   : > { %7017 = vst [vmem:[#allocation6_spill] sm:$0xff] %v6750_v14  ;;  %v5053_v11 = vadd.f32 %v5052_v47, %v5051_v37 }
 0x231   : > { %v5054_v6 = vpop.f32.mrf.mxu0  ;;  %v6754_v62 = vpop.f32.mrf.mxu1 }
 0x232   : > { %v6757_v5 = vadd.f32 %v5053_v11, %v6648_v34 }
 0x233   : > { %v5055_v59 = vpop.f32.mrf.mxu0  ;;  %v6759_v1 = vpop.f32.mrf.mxu1 }
 0x234   : > { %7018 = vst [vmem:[#allocation7_spill] sm:$0xff] %v6757_v5  ;;  %v5056_v3 = vadd.f32 %v5055_v59, %v5054_v6 }
 0x235   : > { %v5057_v30 = vpop.f32.mrf.mxu0  ;;  %v6761_v58 = vpop.f32.mrf.mxu1 }
 0x236   : > { %v6764_v50 = vadd.f32 %v5056_v3, %v6654_v18 }
 0x237   : > { %v5058_v35 = vpop.f32.mrf.mxu0  ;;  %v6766_v52 = vpop.f32.mrf.mxu1 }
 0x238   : > { %7019 = vst [vmem:[#allocation8_spill] sm:$0xff] %v6764_v50  ;;  %v5059_v43 = vadd.f32 %v5058_v35, %v5057_v30 }
 0x239   : > { %v5060_v24 = vpop.f32.mrf.mxu0  ;;  %v6768_v37 = vpop.f32.mrf.mxu1 }
 0x23a   : > { %v6771_v34 = vadd.f32 %v5059_v43, %v6660_v63 }
 0x23b   : > { %v5061_v47 = vpop.f32.mrf.mxu0  ;;  %v6773_v11 = vpop.f32.mrf.mxu1 }
 0x23c   : > { %7020 = vst [vmem:[#allocation9_spill] sm:$0xff] %v6771_v34  ;;  %v5062_v6 = vadd.f32 %v5061_v47, %v5060_v24 }
 0x23d   : > { %v5063_v59 = vpop.f32.mrf.mxu0  ;;  %v6775_v5 = vpop.f32.mrf.mxu1 }
 0x23e   : > { %v6778_v18 = vadd.f32 %v5062_v6, %v6666_v51 }
 0x23f   : > { %v5064_v3 = vpop.f32.mrf.mxu0  ;;  %v6780_v50 = vpop.f32.mrf.mxu1 }
 0x240   : > { %7021 = vst [vmem:[#allocation10_spill] sm:$0xff] %v6778_v18  ;;  %v5065_v30 = vadd.f32 %v5064_v3, %v5063_v59  ;;  %v5099_v59 = vadd.f32 %v6710_v33, %v6705_v21  ;;  %v6813_v21 = vld [vmem:[%s7011_s2] ss:$0 sm:$0xff] }
 0x241   : > { %v5066_v35 = vpop.f32.mrf.mxu0  ;;  %v6782_v60 = vpop.f32.mrf.mxu1 }
 0x242   : > { %v6785_v63 = vadd.f32 %v5065_v30, %v6672_v12 }
 0x243   : > { %v5067_v43 = vpop.f32.mrf.mxu0  ;;  %v6787_v34 = vpop.f32.mrf.mxu1 }
 0x244   : > { %7022 = vst [vmem:[#allocation11_spill] sm:$0xff] %v6785_v63  ;;  %v5068_v24 = vadd.f32 %v5067_v43, %v5066_v35 }
 0x245   : > { %v5069_v47 = vpop.f32.mrf.mxu0  ;;  %v6789_v14 = vpop.f32.mrf.mxu1 }
 0x246   : > { %v6792_v51 = vadd.f32 %v5068_v24, %v6678_v17  ;;  %v5102_v17 = vadd.f32 %v6717_v49, %v6712_v55 }
 0x247   : > { %v5070_v6 = vpop.f32.mrf.mxu0  ;;  %v6794_v18 = vpop.f32.mrf.mxu1 }
 0x248   : > { %7023 = vst [vmem:[#allocation12_spill] sm:$0xff] %v6792_v51  ;;  %v5071_v3 = vadd.f32 %v5070_v6, %v5069_v47  ;;  %v3284_v51 = vadd.f32 %v5099_v59, %v6615_v25  ;;  %v5096_v47 = vadd.f32 %v6703_v36, %v6695_v20  ;;  %v5111_v25 = vadd.f32 %v6738_v7, %v6733_v10 }
 0x249   : > { %v5072_v8 = vpop.f32.mrf.mxu0  ;;  %v6798_v12 = vpop.f32.mrf.mxu1  ;;  %v3287_v59 = vadd.f32 %v5102_v17, %v6621_v53  ;;  %v5105_v36 = vadd.f32 %v6724_v23, %v6719_v38  ;;  %v5114_v10 = vadd.f32 %v6745_v28, %v6740_v42  ;;  %v5108_v23 = vadd.f32 %v6731_v22, %v6726_v16 }
 0x24a   : > { %v6801_v30 = vadd.f32 %v5071_v3, %v6684_v29  ;;  %v3279_v53 = vadd.f32 %v5096_v47, %v6609_v15  ;;  %v5123_v47 = vadd.f32 %v6766_v52, %v6761_v58 }
 0x24b   : > { %v5073_v35 = vpop.f32.mrf.mxu0  ;;  %v6803_v43 = vpop.f32.mrf.mxu1  ;;  %v3292_v15 = vadd.f32 %v5105_v36, %v6627_v56  ;;  %v5117_v36 = vadd.f32 %v6752_v31, %v6747_v39 }
 0x24c   : > { %v5074_v24 = vadd.f32 %v5073_v35, %v5072_v8  ;;  %v3316_v31 = vadd.f32 %v5123_v47, %v6663_v61 }
 0x24d   : > { %v6808_v63 = vpop.f32.mrf.mxu1  ;;  %v5217_v46 = vpop.f32.mrf.mxu0 }
 0x24e   : > { %v6816_v29 = vadd.f32 %v5074_v24, %v6690_v19  ;;  %v3445_v33 = vadd.f32 %v5217_v46, %v3284_v51  ;;  %v6830_v19 = vld [vmem:[%s7012_s3] ss:$0 sm:$0xff]  ;;  %v3300_v24 = vadd.f32 %v5111_v25, %v6639_v44 }
 0x24f   : > { %v6820_v6 = vpop.f32.mrf.mxu1  ;;  %v3436_v55 = vpop.f32.mrf.mxu0 }
 0x250   : > { %v3671_v49 = vmul.f32 %v6813_v21, %v3445_v33  ;;  %v3437_v8 = vadd.f32 %v3436_v55, %v6701_v54 }
 0x251   : > { %v6832_v46 = vpop.f32.mrf.mxu1  ;;  %v5218_v20 = vpop.f32.mrf.mxu0 }
 0x252   : > { %v3448_v51 = vadd.f32 %v5218_v20, %v3287_v59  ;;  %v3669_v54 = vmul.f32 %v6813_v21, %v3437_v8  ;;  %v3710_v35 = vadd.f32 %v6830_v19, %v3671_v49  ;;  %v3303_v59 = vadd.f32 %v5114_v10, %v6645_v57 }
 0x253   : > { %v6839_v7 = vpop.f32.mrf.mxu1  ;;  %v3439_v3 = vpop.f32.mrf.mxu0 }
 0x254   : > { %v3672_v17 = vmul.f32 %v6813_v21, %v3448_v51  ;;  %v3440_v33 = vadd.f32 %v3439_v3, %v3279_v53  ;;  %v3708_v49 = vadd.f32 %v6830_v19, %v3669_v54  ;;  %v3742_v20 = vmax.f32 %v3710_v35, 0.0 }
 0x255   : > { %v6845_v55 = vpop.f32.mrf.mxu1  ;;  %v5221_v38 = vpop.f32.mrf.mxu0  ;;  %v3295_v54 = vadd.f32 %v5108_v23, %v6633_v48  ;;  %v5126_v53 = vadd.f32 %v6773_v11, %v6768_v37  ;;  %v5120_v11 = vadd.f32 %v6759_v1, %v6754_v62 }
 0x256   : > { %v3711_v42 = vadd.f32 %v6830_v19, %v3672_v17  ;;  %v3461_v28 = vadd.f32 %v5221_v38, %v3300_v24  ;;  %v3670_v44 = vmul.f32 %v6813_v21, %v3440_v33  ;;  %v3740_v3 = vmax.f32 %v3708_v49, 0.0 }
 0x257   : > { %v6856_v25 = vpop.f32.mrf.mxu1  ;;  %v3452_v8 = vpop.f32.mrf.mxu0  ;;  %v3308_v49 = vadd.f32 %v5117_v36, %v6651_v45  ;;  %v3311_v36 = vadd.f32 %v5120_v11, %v6657_v2 }
 0x258   : > { %v3743_v16 = vmax.f32 %v3711_v42, 0.0  ;;  %v3675_v22 = vmul.f32 %v6813_v21, %v3461_v28  ;;  %v3453_v51 = vadd.f32 %v3452_v8, %v3292_v15  ;;  %v3709_v56 = vadd.f32 %v6830_v19, %v3670_v44 }
 0x259   : > { %v6866_v58 = vpop.f32.mrf.mxu1  ;;  %v5222_v52 = vpop.f32.mrf.mxu0  ;;  %v5135_v44 = vadd.f32 %v6794_v18, %v6789_v14  ;;  %v5129_v18 = vadd.f32 %v6780_v50, %v6775_v5 }
 0x25a   : > { %v4428_v57 = vpack.c.bf16 %v3743_v16, %v3742_v20  ;;  %v3464_v10 = vadd.f32 %v5222_v52, %v3303_v59  ;;  %v3741_v35 = vmax.f32 %v3709_v56, 0.0  ;;  %v3673_v17 = vmul.f32 %v6813_v21, %v3453_v51 }
 0x25b   : > { %v6874_v24 = vpop.f32.mrf.mxu1  ;;  %v3455_v33 = vpop.f32.mrf.mxu0  ;;  %v3714_v38 = vadd.f32 %v6830_v19, %v3675_v22  ;;  %v3319_v20 = vadd.f32 %v5126_v53, %v6669_v32  ;;  %v5138_v32 = vadd.f32 %v6803_v43, %v6798_v12  ;;  %v3332_v50 = vadd.f32 %v5135_v44, %v6687_v13 }
 0x25c   : > { %4500 = vst [vmem:[%s6863_s13 + $0x8] sm:$0xff] %v4428_v57   ;;  %v3676_v39 = vmul.f32 %v6813_v21, %v3464_v10  ;;  %v4423_v42 = vpack.c.bf16 %v3741_v35, %v3740_v3  ;;  %v3456_v48 = vadd.f32 %v3455_v33, %v3295_v54  ;;  %v3712_v8 = vadd.f32 %v6830_v19, %v3673_v17 }
 0x25d   : > { %v6880_v23 = vpop.f32.mrf.mxu1  ;;  %v5225_v37 = vpop.f32.mrf.mxu0  ;;  %v3746_v16 = vmax.f32 %v3714_v38, 0.0  ;;  %v5132_v12 = vadd.f32 %v6787_v34, %v6782_v60 }
 0x25e   : > { %v3715_v28 = vadd.f32 %v6830_v19, %v3676_v39  ;;  %v3477_v15 = vadd.f32 %v5225_v37, %v3316_v31  ;;  %4424 = vst [vmem:[%s6863_s13] sm:$0xff] %v4423_v42   ;;  %v3674_v61 = vmul.f32 %v6813_v21, %v3456_v48  ;;  %v3744_v57 = vmax.f32 %v3712_v8, 0.0 }
 0x25f   : > { %v6891_v47 = vpop.f32.mrf.mxu1  ;;  %v3468_v59 = vpop.f32.mrf.mxu0  ;;  %v3324_v31 = vadd.f32 %v5129_v18, %v6675_v41  ;;  %v5147_v42 = vadd.f32 %v6856_v25, %v6845_v55  ;;  %v5141_v55 = vadd.f32 %v6820_v6, %v6808_v63 }
 0x260   : > { %v3747_v62 = vmax.f32 %v3715_v28, 0.0  ;;  %v3679_v1 = vmul.f32 %v6813_v21, %v3477_v15  ;;  %v3469_v22 = vadd.f32 %v3468_v59, %v3308_v49  ;;  %v3713_v45 = vadd.f32 %v6830_v19, %v3674_v61 }
 0x261   : > { %v6896_v51 = vpop.f32.mrf.mxu1  ;;  %v5226_v14 = vpop.f32.mrf.mxu0  ;;  %v3335_v28 = vadd.f32 %v5138_v32, %v6693_v0  ;;  %v3327_v59 = vadd.f32 %v5132_v12, %v6681_v26  ;;  %v5150_v0 = vadd.f32 %v6874_v24, %v6866_v58  ;;  %v3348_v63 = vadd.f32 %v5147_v42, %v6715_v27 }
 0x262   : > { %v4438_v56 = vpack.c.bf16 %v3747_v62, %v3746_v16  ;;  %v3480_v52 = vadd.f32 %v5226_v14, %v3319_v20  ;;  %v3745_v10 = vmax.f32 %v3713_v45, 0.0  ;;  %v3677_v54 = vmul.f32 %v6813_v21, %v3469_v22 }
 0x263   : > { %v6904_v53 = vpop.f32.mrf.mxu1  ;;  %v3471_v3 = vpop.f32.mrf.mxu0  ;;  %v3718_v35 = vadd.f32 %v6830_v19, %v3679_v1  ;;  %v5144_v26 = vadd.f32 %v6839_v7, %v6832_v46 }
 0x264   : > { %4502 = vst [vmem:[%s6863_s13 + $0x18] sm:$0xff] %v4438_v56   ;;  %v3680_v5 = vmul.f32 %v6813_v21, %v3480_v52  ;;  %v4433_v17 = vpack.c.bf16 %v3745_v10, %v3744_v57  ;;  %v3472_v2 = vadd.f32 %v3471_v3, %v3311_v36  ;;  %v3716_v48 = vadd.f32 %v6830_v19, %v3677_v54 }
 0x265   : > { %v5157_v33 = vpop.f32.mrf.mxu1  ;;  %v5229_v38 = vpop.f32.mrf.mxu0  ;;  %v3750_v15 = vmax.f32 %v3718_v35, 0.0  ;;  %v3340_v36 = vadd.f32 %v5141_v55, %v6698_v4  ;;  %v3351_v3 = vadd.f32 %v5150_v0, %v6722_v9  ;;  %v7026_v0 = vld [vmem:[#allocation6_spill] sm:$0xff] }
 0x266   : > { %v3719_v43 = vadd.f32 %v6830_v19, %v3680_v5  ;;  %v3493_v39 = vadd.f32 %v5229_v38, %v3332_v50  ;;  %4501 = vst [vmem:[%s6863_s13 + $0x10] sm:$0xff] %v4433_v17   ;;  %v3678_v13 = vmul.f32 %v6813_v21, %v3472_v2  ;;  %v3748_v20 = vmax.f32 %v3716_v48, 0.0 }
 0x267   : > { %v5158_v37 = vpop.f32.mrf.mxu1  ;;  %v3484_v11 = vpop.f32.mrf.mxu0  ;;  %v3343_v2 = vadd.f32 %v5144_v26, %v6708_v40 }
 0x268   : > { %v3751_v49 = vmax.f32 %v3719_v43, 0.0  ;;  %v3683_v60 = vmul.f32 %v6813_v21, %v3493_v39  ;;  %v3485_v34 = vadd.f32 %v3484_v11, %v3324_v31  ;;  %v3717_v41 = vadd.f32 %v6830_v19, %v3678_v13  ;;  %v7024_v11 = vld [vmem:[#allocation5_spill] sm:$0xff] }
 0x269   : > { %v5160_v44 = vpop.f32.mrf.mxu1  ;;  %v5230_v8 = vpop.f32.mrf.mxu0  ;;  %v5159_v32 = vadd.f32 %v5158_v37, %v5157_v33  ;;  %v5153_v33 = vadd.f32 %v6891_v47, %v6880_v23 }
 0x26a   : > { %v4448_v25 = vpack.c.bf16 %v3751_v49, %v3750_v15  ;;  %v3496_v61 = vadd.f32 %v5230_v8, %v3335_v28  ;;  %v3749_v16 = vmax.f32 %v3717_v41, 0.0  ;;  %v3681_v62 = vmul.f32 %v6813_v21, %v3485_v34  ;;  %v7025_v41 = vld [vmem:[#allocation3_spill] sm:$0xff] }
 0x26b   : > { %v5161_v1 = vpop.f32.mrf.mxu1  ;;  %v3487_v22 = vpop.f32.mrf.mxu0  ;;  %v3722_v45 = vadd.f32 %v6830_v19, %v3683_v60  ;;  %v3364_v40 = vadd.f32 %v5159_v32, %v7024_v11  ;;  %v5156_v49 = vadd.f32 %v6904_v53, %v6896_v51 }
 0x26c   : > { %4504 = vst [vmem:[%s6863_s13 + $0x28] sm:$0xff] %v4448_v25   ;;  %v3684_v14 = vmul.f32 %v6813_v21, %v3496_v61  ;;  %v4443_v6 = vpack.c.bf16 %v3749_v16, %v3748_v20  ;;  %v3488_v18 = vadd.f32 %v3487_v22, %v3327_v59  ;;  %v3720_v57 = vadd.f32 %v6830_v19, %v3681_v62 }
 0x26d   : > { %v5163_v58 = vpop.f32.mrf.mxu1  ;;  %v5233_v24 = vpop.f32.mrf.mxu0  ;;  %v3754_v46 = vmax.f32 %v3722_v45, 0.0  ;;  %v5162_v12 = vadd.f32 %v5161_v1, %v5160_v44  ;;  %v3356_v44 = vadd.f32 %v5153_v33, %v7025_v41  ;;  %v7031_v41 = vld [vmem:[#allocation8_spill] sm:$0xff] }
 0x26e   : > { %v3723_v56 = vadd.f32 %v6830_v19, %v3684_v14  ;;  %v3509_v52 = vadd.f32 %v5233_v24, %v3348_v63  ;;  %4503 = vst [vmem:[%s6863_s13 + $0x20] sm:$0xff] %v4443_v6   ;;  %v3682_v10 = vmul.f32 %v6813_v21, %v3488_v18  ;;  %v3752_v39 = vmax.f32 %v3720_v57, 0.0  ;;  %v7027_v6 = vld [vmem:[#allocation4_spill] sm:$0xff] }
 0x26f   : > { %v5164_v54 = vpop.f32.mrf.mxu1  ;;  %v3500_v27 = vpop.f32.mrf.mxu0  ;;  %v3367_v20 = vadd.f32 %v5162_v12, %v7026_v0  ;;  %v3359_v18 = vadd.f32 %v5156_v49, %v7027_v6 }
 0x270   : > { %v3755_v7 = vmax.f32 %v3723_v56, 0.0  ;;  %v3687_v35 = vmul.f32 %v6813_v21, %v3509_v52  ;;  %v3501_v5 = vadd.f32 %v3500_v27, %v3340_v36  ;;  %v3721_v50 = vadd.f32 %v6830_v19, %v3682_v10 }
 0x271   : > { %v5166_v17 = vpop.f32.mrf.mxu1  ;;  %v5234_v4 = vpop.f32.mrf.mxu0  ;;  %v5165_v14 = vadd.f32 %v5164_v54, %v5163_v58 }
 0x272   : > { %v4458_v38 = vpack.c.bf16 %v3755_v7, %v3754_v46  ;;  %v3512_v43 = vadd.f32 %v5234_v4, %v3351_v3  ;;  %v3753_v9 = vmax.f32 %v3721_v50, 0.0  ;;  %v3726_v31 = vadd.f32 %v6830_v19, %v3687_v35  ;;  %v7028_v3 = vld [vmem:[#allocation9_spill] sm:$0xff]  ;;  %v7029_v4 = vld [vmem:[#allocation7_spill] sm:$0xff] }
 0x273   : > { %v3685_v42 = vmul.f32 %v6813_v21, %v3501_v5  ;;  %v5167_v48 = vpop.f32.mrf.mxu1  ;;  %v3503_v13 = vpop.f32.mrf.mxu0 }
 0x274   : > { %4506 = vst [vmem:[%s6863_s13 + $0x38] sm:$0xff] %v4458_v38   ;;  %v3688_v37 = vmul.f32 %v6813_v21, %v3512_v43  ;;  %v4453_v28 = vpack.c.bf16 %v3753_v9, %v3752_v39  ;;  %v3504_v15 = vadd.f32 %v3503_v13, %v3343_v2  ;;  %v3758_v8 = vmax.f32 %v3726_v31, 0.0 }
 0x275   : > { %v5169_v23 = vpop.f32.mrf.mxu1  ;;  %v5237_v47 = vpop.f32.mrf.mxu0  ;;  %v3724_v55 = vadd.f32 %v6830_v19, %v3685_v42  ;;  %v3372_v2 = vadd.f32 %v5165_v14, %v7029_v4  ;;  %v5168_v33 = vadd.f32 %v5167_v48, %v5166_v17 }
 0x276   : > { %v3727_v60 = vadd.f32 %v6830_v19, %v3688_v37  ;;  %v3525_v34 = vadd.f32 %v5237_v47, %v3364_v40  ;;  %4505 = vst [vmem:[%s6863_s13 + $0x30] sm:$0xff] %v4453_v28   ;;  %v3686_v25 = vmul.f32 %v6813_v21, %v3504_v15  ;;  %v7030_v37 = vld [vmem:[#allocation10_spill] sm:$0xff] }
 0x277   : > { %v5170_v61 = vpop.f32.mrf.mxu1  ;;  %v3516_v59 = vpop.f32.mrf.mxu0  ;;  %v3756_v24 = vmax.f32 %v3724_v55, 0.0 }
 0x278   : > { %v3759_v16 = vmax.f32 %v3727_v60, 0.0  ;;  %v3691_v62 = vmul.f32 %v6813_v21, %v3525_v34  ;;  %v5171_v51 = vadd.f32 %v5170_v61, %v5169_v23  ;;  %v3517_v53 = vadd.f32 %v3516_v59, %v3356_v44 }
 0x279   : > { %v3725_v1 = vadd.f32 %v6830_v19, %v3686_v25  ;;  %v5172_v22 = vpop.f32.mrf.mxu1  ;;  %v5238_v45 = vpop.f32.mrf.mxu0  ;;  %v3375_v44 = vadd.f32 %v5168_v33, %v7031_v41 }
 0x27a   : > { %v4468_v63 = vpack.c.bf16 %v3759_v16, %v3758_v8  ;;  %v3528_v26 = vadd.f32 %v5238_v45, %v3367_v20  ;;  %v3730_v52 = vadd.f32 %v6830_v19, %v3691_v62  ;;  %v3689_v36 = vmul.f32 %v6813_v21, %v3517_v53 }
 0x27b   : > { %v3757_v56 = vmax.f32 %v3725_v1, 0.0  ;;  %v5173_v32 = vpop.f32.mrf.mxu1  ;;  %v3519_v57 = vpop.f32.mrf.mxu0  ;;  %v3380_v46 = vadd.f32 %v5171_v51, %v7028_v3  ;;  %v7032_v51 = vld [vmem:[#allocation11_spill] sm:$0xff] }
 0x27c   : > { %4508 = vst [vmem:[%s6863_s13 + $0x48] sm:$0xff] %v4468_v63   ;;  %v3692_v10 = vmul.f32 %v6813_v21, %v3528_v26  ;;  %v5174_v27 = vadd.f32 %v5173_v32, %v5172_v22  ;;  %v3520_v54 = vadd.f32 %v3519_v57, %v3359_v18  ;;  %v3762_v38 = vmax.f32 %v3730_v52, 0.0 }
 0x27d   : > { %v4463_v58 = vpack.c.bf16 %v3757_v56, %v3756_v24  ;;  %v5175_v7 = vpop.f32.mrf.mxu1  ;;  %v5241_v35 = vpop.f32.mrf.mxu0  ;;  %v3728_v12 = vadd.f32 %v6830_v19, %v3689_v36 }
 0x27e   : > { %v3731_v5 = vadd.f32 %v6830_v19, %v3692_v10  ;;  %v3541_v50 = vadd.f32 %v5241_v35, %v3380_v46  ;;  %v3690_v43 = vmul.f32 %v6813_v21, %v3520_v54  ;;  %v3383_v11 = vadd.f32 %v5174_v27, %v7030_v37  ;;  %v7033_v10 = vld [vmem:[#allocation12_spill] sm:$0xff] }
 0x27f   : > { %4507 = vst [vmem:[%s6863_s13 + $0x40] sm:$0xff] %v4463_v58   ;;  %v5176_v39 = vpop.f32.mrf.mxu1  ;;  %v3532_v9 = vpop.f32.mrf.mxu0  ;;  %v3760_v47 = vmax.f32 %v3728_v12, 0.0 }
 0x280   : > { %v3763_v31 = vmax.f32 %v3731_v5, 0.0  ;;  %v3695_v42 = vmul.f32 %v6813_v21, %v3541_v50  ;;  %v3533_v13 = vadd.f32 %v3532_v9, %v3372_v2  ;;  %v3729_v40 = vadd.f32 %v6830_v19, %v3690_v43 }
 0x281   : > { %v5178_v28 = vpop.f32.mrf.mxu1  ;;  %v5242_v15 = vpop.f32.mrf.mxu0  ;;  %v5177_v48 = vadd.f32 %v5176_v39, %v5175_v7 }
 0x282   : > { %v4478_v17 = vpack.c.bf16 %v3763_v31, %v3762_v38  ;;  %v3544_v23 = vadd.f32 %v5242_v15, %v3383_v11  ;;  %v3761_v49 = vmax.f32 %v3729_v40, 0.0  ;;  %v3693_v60 = vmul.f32 %v6813_v21, %v3533_v13 }
 0x283   : > { %v5179_v34 = vpop.f32.mrf.mxu1  ;;  %v3535_v8 = vpop.f32.mrf.mxu0  ;;  %v3734_v55 = vadd.f32 %v6830_v19, %v3695_v42  ;;  %v3388_v53 = vadd.f32 %v5177_v48, %v7032_v51 }
 0x284   : > { %4510 = vst [vmem:[%s6863_s13 + $0x58] sm:$0xff] %v4478_v17   ;;  %v3696_v25 = vmul.f32 %v6813_v21, %v3544_v23  ;;  %v4473_v61 = vpack.c.bf16 %v3761_v49, %v3760_v47  ;;  %v3536_v59 = vadd.f32 %v3535_v8, %v3375_v44  ;;  %v5180_v62 = vadd.f32 %v5179_v34, %v5178_v28 }
 0x285   : > { %v5181_v0 = vpop.f32.mrf.mxu1  ;;  %v5245_v20 = vpop.f32.mrf.mxu0  ;;  %v3732_v1 = vadd.f32 %v6830_v19, %v3693_v60  ;;  %v3766_v63 = vmax.f32 %v3734_v55, 0.0 }
 0x286   : > { %v3735_v16 = vadd.f32 %v6830_v19, %v3696_v25  ;;  %4509 = vst [vmem:[%s6863_s13 + $0x50] sm:$0xff] %v4473_v61   ;;  %v3694_v22 = vmul.f32 %v6813_v21, %v3536_v59  ;;  %v3391_v27 = vadd.f32 %v5180_v62, %v7033_v10 }
 0x287   : > { %v5182_v45 = vpop.f32.mrf.mxu1  ;;  %v3548_v14 = vpop.f32.mrf.mxu0  ;;  %v3764_v3 = vmax.f32 %v3732_v1, 0.0 }
 0x288   : > { %v3767_v26 = vmax.f32 %v3735_v16, 0.0  ;;  %v5183_v6 = vadd.f32 %v5182_v45, %v5181_v0  ;;  %v3549_v18 = vadd.f32 %v3548_v14, %v3388_v53  ;;  %v3733_v24 = vadd.f32 %v6830_v19, %v3694_v22 }
 0x289   : > { %v5184_v56 = vpop.f32.mrf.mxu1  ;;  %v5246_v52 = vpop.f32.mrf.mxu0 }
 0x28a   : > { %v4488_v36 = vpack.c.bf16 %v3767_v26, %v3766_v63  ;;  %v3396_v32 = vadd.f32 %v5183_v6, %v6801_v30  ;;  %v3697_v57 = vmul.f32 %v6813_v21, %v3549_v18  ;;  %v3765_v46 = vmax.f32 %v3733_v24, 0.0 }
 0x28b   : > { %v5185_v58 = vpop.f32.mrf.mxu1  ;;  %v3551_v54 = vpop.f32.mrf.mxu0 }
 0x28c   : > { %4512 = vst [vmem:[%s6863_s13 + $0x68] sm:$0xff] %v4488_v36   ;;  %v3557_v7 = vadd.f32 %v5245_v20, %v3396_v32  ;;  %v5186_v35 = vadd.f32 %v5185_v58, %v5184_v56  ;;  %v3552_v5 = vadd.f32 %v3551_v54, %v3391_v27  ;;  %v4483_v50 = vpack.c.bf16 %v3765_v46, %v3764_v3 }
 0x28d   : > { %v3736_v2 = vadd.f32 %v6830_v19, %v3697_v57 }
 0x28e   : > { %v3699_v4 = vmul.f32 %v6813_v21, %v3557_v7  ;;  %v3399_v30 = vadd.f32 %v5186_v35, %v6816_v29  ;;  %v3698_v33 = vmul.f32 %v6813_v21, %v3552_v5  ;;  %4511 = vst [vmem:[%s6863_s13 + $0x60] sm:$0xff] %v4483_v50  }
 0x28f   : > { %v3768_v39 = vmax.f32 %v3736_v2, 0.0 }
 0x290   : > { %v3560_v38 = vadd.f32 %v5246_v52, %v3399_v30  ;;  %v3737_v12 = vadd.f32 %v6830_v19, %v3698_v33  ;;  %v3738_v43 = vadd.f32 %v6830_v19, %v3699_v4 }
 0x292   : > { %v3700_v9 = vmul.f32 %v6813_v21, %v3560_v38  ;;  %v3769_v31 = vmax.f32 %v3737_v12, 0.0  ;;  %v3770_v37 = vmax.f32 %v3738_v43, 0.0 }
 0x294   : > { %v3739_v42 = vadd.f32 %v6830_v19, %v3700_v9  ;;  %v4493_v13 = vpack.c.bf16 %v3769_v31, %v3768_v39 }
 0x296   : > { %v3771_v11 = vmax.f32 %v3739_v42, 0.0  ;;  %4513 = vst [vmem:[%s6863_s13 + $0x70] sm:$0xff] %v4493_v13  }
 0x298   : > { %v4498_v40 = vpack.c.bf16 %v3771_v11, %v3770_v37 }
 0x29a   : > { %4514 = vst [vmem:[%s6863_s13 + $0x78] sm:$0xff] %v4498_v40  }
 0x29b PF: > { %s14_s17 = sadd.s32 1, %s5714_s17   ;;  %s7034_s15 = smov %s5710_s16 }
 0x29c   : > { %p11_p5 = scmp.ge.s32.totalorder %s14_s17, 7   ;;  %s7035_s16 = smov %s7037_s18 }
 0x29e   :  { %13 = sbr.rel (!%p11_p5) target bundleno = 2 (0x2), region = 77 }

// kernel: fer_cnn_forward.14
= control target key start
LH: loop header
LB: loop body
LE: loop exit
PB: predicated region body
PF: predicated region fallthrough
CT: control target
= control target key end

     0   :  { %s678_s9 = smov 0   ;;  %s680_s10 = smov 0   ;;  %s833_s0 = inlined_call_operand.vmem [shape: bf16[24,2,12,256], index: 0, kind: input, shape index: {}, may-alias: {0,1}]   ;;  %s834_s1 = inlined_call_operand.vmem [shape: bf16[24,2,12,256], index: 1, kind: input, shape index: {}, may-alias: {0,1}]   ;;  %s835_s2 = inlined_call_operand.vmem [shape: bf16[24,12,128], index: 2, kind: output, shape index: {}]  }
   0x1   :  { %s682_s11 = smov 0  }
   0x2 LB: > { %s576_s12 = sadd.s32 4294967295, %s661_s11   ;;  %s695_s13 = sadd.s32 1, %s661_s11   ;;  %s661_s11 = sphi %s682_s11, %s839_s11   ;;  %s657_s10 = sphi %s680_s10, %s838_s10   ;;  %s653_s9 = sphi %s678_s9, %s837_s9  }
   0x3   : > { %s16_s14 = ssub.s32 %s661_s11, %s695_s13  ;;  %s19_s15 = sadd.s32 1, %s657_s10 }
   0x4   : > { %p17_p0 = scmp.eq.s32.totalorder %s16_s14, 0  ;;  %p26_p1 = scmp.ne.s32.totalorder %s657_s10, %s653_s9 }
   0x5   : > { %p27_p2 = scmp.eq.s32.totalorder %s661_s11, 0  ;;  %p579_p4 = scmp.ge.s32.totalorder %s661_s11, 3 }
   0x6   : > { %s704_s16 = scalar_select %p17_p0, %s657_s10, %s19_s15  }
   0x7   : > { %p706_p3 = por %p27_p2, %p26_p1  ;;  %104 = sbr.rel (%p579_p4) target bundleno = 36 (0x24), region = 16 }
   0xc   : > { %107 = sbr.rel (!%p706_p3) target bundleno = 24 (0x18), region = 20  ;;  %s109_s18 = sand.u32 (%p706_p3), 1, %s657_s10  }
   0xd   : > { %s612_s19 = sshll.u32 (%p706_p3), %s661_s11, 8  ;;  %s580_s20 = sshll.u32 (%p706_p3), %s109_s18, 7 }
   0xe   : > { %s718_s23 = scalar_lea.vmem (%p706_p3), %s833_s0, %s612_s19  ;;  %s111_s24 = scalar_lea.vmem (%p706_p3), [#allocation2], %s580_s20 }
   0xf   : > { %v174_v0 = vld [vmem:[%s718_s23] sm:$0xff] (%p706_p3)  ;;  %v176_v1 = vld [vmem:[%s718_s23 + $0x8] sm:$0xff] (%p706_p3) }
  0x10   : > { %v178_v2 = vld [vmem:[%s718_s23 + $0x20] sm:$0xff] (%p706_p3)  ;;  %175 = vst [vmem:[%s111_s24] sm:$0xff] (%p706_p3), %v174_v0  ;;  %177 = vst [vmem:[%s111_s24 + $0x8] sm:$0xff] (%p706_p3), %v176_v1  ;;  %v180_v3 = vld [vmem:[%s718_s23 + $0x28] sm:$0xff] (%p706_p3) }
  0x11   : > { %179 = vst [vmem:[%s111_s24 + $0x10] sm:$0xff] %v178_v2  ;;  %v182_v4 = vld [vmem:[%s718_s23 + $0x40] sm:$0xff]  ;;  %v184_v5 = vld [vmem:[%s718_s23 + $0x48] sm:$0xff]  ;;  %181 = vst [vmem:[%s111_s24 + $0x18] sm:$0xff] %v180_v3 }
  0x12   : > { %183 = vst [vmem:[%s111_s24 + $0x20] sm:$0xff] %v182_v4  ;;  %185 = vst [vmem:[%s111_s24 + $0x28] sm:$0xff] %v184_v5  ;;  %v186_v6 = vld [vmem:[%s718_s23 + $0x60] sm:$0xff]  ;;  %v188_v7 = vld [vmem:[%s718_s23 + $0x68] sm:$0xff] }
  0x13   : > { %v190_v8 = vld [vmem:[%s718_s23 + $0x80] sm:$0xff]  ;;  %187 = vst [vmem:[%s111_s24 + $0x30] sm:$0xff] %v186_v6  ;;  %189 = vst [vmem:[%s111_s24 + $0x38] sm:$0xff] %v188_v7  ;;  %v192_v9 = vld [vmem:[%s718_s23 + $0x88] sm:$0xff] }
  0x14   : > { %191 = vst [vmem:[%s111_s24 + $0x40] sm:$0xff] %v190_v8  ;;  %v194_v10 = vld [vmem:[%s718_s23 + $0xa0] sm:$0xff]  ;;  %v196_v11 = vld [vmem:[%s718_s23 + $0xa8] sm:$0xff]  ;;  %193 = vst [vmem:[%s111_s24 + $0x48] sm:$0xff] %v192_v9 }
  0x15   : > { %195 = vst [vmem:[%s111_s24 + $0x50] sm:$0xff] %v194_v10  ;;  %197 = vst [vmem:[%s111_s24 + $0x58] sm:$0xff] %v196_v11  ;;  %v198_v12 = vld [vmem:[%s718_s23 + $0xc0] sm:$0xff]  ;;  %v200_v13 = vld [vmem:[%s718_s23 + $0xc8] sm:$0xff] }
  0x16   : > { %v202_v14 = vld [vmem:[%s718_s23 + $0xe0] sm:$0xff]  ;;  %199 = vst [vmem:[%s111_s24 + $0x60] sm:$0xff] %v198_v12  ;;  %201 = vst [vmem:[%s111_s24 + $0x68] sm:$0xff] %v200_v13  ;;  %v204_v15 = vld [vmem:[%s718_s23 + $0xe8] sm:$0xff] }
  0x17   : > { %203 = vst [vmem:[%s111_s24 + $0x70] sm:$0xff] %v202_v14  ;;  %205 = vst [vmem:[%s111_s24 + $0x78] sm:$0xff] %v204_v15 }
  0x18 PF: > { %211 = sbr.rel (!%p706_p3) target bundleno = 36 (0x24), region = 58  ;;  %s213_s25 = sand.u32 (%p706_p3), 1, %s657_s10  }
  0x19   : > { %s613_s26 = sshll.u32 (%p706_p3), %s661_s11, 8  ;;  %s584_s27 = sshll.u32 (%p706_p3), %s213_s25, 7 }
  0x1a   : > { %s743_s30 = scalar_lea.vmem (%p706_p3), %s834_s1, %s613_s26  ;;  %s215_s3 = scalar_lea.vmem (%p706_p3), [#allocation3], %s584_s27 }
  0x1b   : > { %v587_v16 = vld [vmem:[%s743_s30 + $0x10] sm:$0xff] (%p706_p3)  ;;  %v588_v17 = vld [vmem:[%s743_s30 + $0x18] sm:$0xff] (%p706_p3) }
  0x1c   : > { %v589_v18 = vld [vmem:[%s743_s30 + $0x30] sm:$0xff] (%p706_p3)  ;;  %280 = vst [vmem:[%s215_s3] sm:$0xff] (%p706_p3), %v587_v16  ;;  %282 = vst [vmem:[%s215_s3 + $0x8] sm:$0xff] (%p706_p3), %v588_v17  ;;  %v590_v19 = vld [vmem:[%s743_s30 + $0x38] sm:$0xff] (%p706_p3) }
  0x1d   : > { %284 = vst [vmem:[%s215_s3 + $0x10] sm:$0xff] %v589_v18  ;;  %v591_v20 = vld [vmem:[%s743_s30 + $0x50] sm:$0xff]  ;;  %v592_v21 = vld [vmem:[%s743_s30 + $0x58] sm:$0xff]  ;;  %286 = vst [vmem:[%s215_s3 + $0x18] sm:$0xff] %v590_v19 }
  0x1e   : > { %288 = vst [vmem:[%s215_s3 + $0x20] sm:$0xff] %v591_v20  ;;  %290 = vst [vmem:[%s215_s3 + $0x28] sm:$0xff] %v592_v21  ;;  %v593_v22 = vld [vmem:[%s743_s30 + $0x70] sm:$0xff]  ;;  %v594_v23 = vld [vmem:[%s743_s30 + $0x78] sm:$0xff] }
  0x1f   : > { %v595_v24 = vld [vmem:[%s743_s30 + $0x90] sm:$0xff]  ;;  %292 = vst [vmem:[%s215_s3 + $0x30] sm:$0xff] %v593_v22  ;;  %294 = vst [vmem:[%s215_s3 + $0x38] sm:$0xff] %v594_v23  ;;  %v596_v25 = vld [vmem:[%s743_s30 + $0x98] sm:$0xff] }
  0x20   : > { %296 = vst [vmem:[%s215_s3 + $0x40] sm:$0xff] %v595_v24  ;;  %v597_v26 = vld [vmem:[%s743_s30 + $0xb0] sm:$0xff]  ;;  %v598_v27 = vld [vmem:[%s743_s30 + $0xb8] sm:$0xff]  ;;  %298 = vst [vmem:[%s215_s3 + $0x48] sm:$0xff] %v596_v25 }
  0x21   : > { %300 = vst [vmem:[%s215_s3 + $0x50] sm:$0xff] %v597_v26  ;;  %302 = vst [vmem:[%s215_s3 + $0x58] sm:$0xff] %v598_v27  ;;  %v599_v28 = vld [vmem:[%s743_s30 + $0xd0] sm:$0xff]  ;;  %v600_v29 = vld [vmem:[%s743_s30 + $0xd8] sm:$0xff] }
  0x22   : > { %v601_v30 = vld [vmem:[%s743_s30 + $0xf0] sm:$0xff]  ;;  %304 = vst [vmem:[%s215_s3 + $0x60] sm:$0xff] %v599_v28  ;;  %306 = vst [vmem:[%s215_s3 + $0x68] sm:$0xff] %v600_v29  ;;  %v602_v31 = vld [vmem:[%s743_s30 + $0xf8] sm:$0xff] }
  0x23   : > { %308 = vst [vmem:[%s215_s3 + $0x70] sm:$0xff] %v601_v30  ;;  %310 = vst [vmem:[%s215_s3 + $0x78] sm:$0xff] %v602_v31 }
  0x24 PF: > { %p603_p5 = scmp.ge.s32.totalorder %s661_s11, 1  ;;  %p315_p6 = scmp.lt.s32.totalorder %s661_s11, 4 }
  0x26   : > { %p316_p7 = pnand %p603_p5, %p315_p6 }
  0x27   : > { %s322_s4 = sand.u32 (!%p316_p7), 1, %s653_s9   ;;  %s606_s5 = sshll.u32 (!%p316_p7), %s576_s12, 3 }
  0x28   : > { %319 = sbr.rel (%p316_p7) target bundleno = 66 (0x42), region = 96  ;;  %s604_s6 = sshll.u32 (!%p316_p7), %s322_s4, 7 }
  0x29   : > { %p358_p8 = scmp.lt.s32.totalorder (!%p316_p7), %s606_s5, 23  ;;  %s766_s7 = scalar_lea.vmem (!%p316_p7), [#allocation2], %s604_s6 }
  0x2a   : > { %s769_s8 = scalar_lea.vmem (!%p316_p7), [#allocation3], %s604_s6 }
  0x2d   : > { %s841_s5 = smov (!%p358_p8, %s606_s5), 23  ;;  %v364_v32 = vld [vmem:[%s766_s7] sm:$0xff]  ;;  %v365_v34 = vld [vmem:[%s766_s7 + $0x8] sm:$0x33]  ;;  %v366_v37 = vld [vmem:[%s766_s7 + $0x10] sm:$0xff] }
  0x2e   : > { %v380_v33 = vld [vmem:[%s769_s8] sm:$0xff]  ;;  %v381_v36 = vld [vmem:[%s769_s8 + $0x8] sm:$0x33]  ;;  %v382_v38 = vld [vmem:[%s769_s8 + $0x10] sm:$0xff]  ;;  %s614_s9 = sshll.u32 %s841_s5, 3 }
  0x2f   : > { %v396_v35 = vmax.bf16 %v380_v33, %v364_v32  ;;  %v397_v39 = vmax.bf16 %v381_v36, %v365_v34  ;;  %v398_v40 = vmax.bf16 %v382_v38, %v366_v37  ;;  %v367_v41 = vld [vmem:[%s766_s7 + $0x18] sm:$0x33]  ;;  %v368_v43 = vld [vmem:[%s766_s7 + $0x20] sm:$0xff]  ;;  %v369_v47 = vld [vmem:[%s766_s7 + $0x28] sm:$0x33]  ;;  %s785_s14 = scalar_lea.vmem %s835_s2, %s614_s9 }
  0x30   : > { %v383_v42 = vld [vmem:[%s769_s8 + $0x18] sm:$0x33]  ;;  %v384_v46 = vld [vmem:[%s769_s8 + $0x20] sm:$0xff]  ;;  %v385_v48 = vld [vmem:[%s769_s8 + $0x28] sm:$0x33] }
  0x31   : > { %v428_v44 = vrot.slane %v396_v35, 4  ;;  %v399_v45 = vmax.bf16 %v383_v42, %v367_v41  ;;  %v429_v49 = vrot.slane %v397_v39, 4  ;;  %v430_v50 = vrot.slane %v398_v40, 4  ;;  %v370_v53 = vld [vmem:[%s766_s7 + $0x30] sm:$0xff]  ;;  %v371_v55 = vld [vmem:[%s766_s7 + $0x38] sm:$0x33] }
  0x32   : > { %v400_v51 = vmax.bf16 %v384_v46, %v368_v43  ;;  %v401_v52 = vmax.bf16 %v385_v48, %v369_v47  ;;  %v386_v54 = vld [vmem:[%s769_s8 + $0x30] sm:$0xff]  ;;  %v387_v59 = vld [vmem:[%s769_s8 + $0x38] sm:$0x33]  ;;  %v372_v60 = vld [vmem:[%s766_s7 + $0x40] sm:$0xff] }
  0x33   : > { %v460_v56 = vmax.bf16 %v428_v44, %v396_v35  ;;  %v431_v57 = vrot.slane %v399_v45, 4  ;;  %v402_v58 = vmax.bf16 %v386_v54, %v370_v53  ;;  %v388_v61 = vld [vmem:[%s769_s8 + $0x40] sm:$0xff]  ;;  %v461_v62 = vmax.bf16 %v429_v49, %v397_v39  ;;  %v373_v2 = vld [vmem:[%s766_s7 + $0x48] sm:$0x33]  ;;  %v374_v8 = vld [vmem:[%s766_s7 + $0x50] sm:$0xff] }
  0x34   : > { %v462_v63 = vmax.bf16 %v430_v50, %v398_v40  ;;  %v432_v0 = vrot.slane %v400_v51, 4  ;;  %v433_v1 = vrot.slane %v401_v52, 4  ;;  %v389_v3 = vld [vmem:[%s769_s8 + $0x48] sm:$0x33]  ;;  %v403_v6 = vmax.bf16 %v387_v59, %v371_v55  ;;  %v390_v9 = vld [vmem:[%s769_s8 + $0x50] sm:$0xff]  ;;  %v376_v16 = vld [vmem:[%s766_s7 + $0x60] sm:$0xff] }
  0x35   : > { %476 = vst [vmem:[%s785_s14] sm:$0xf] %v460_v56  ;;  %v463_v4 = vmax.bf16 %v431_v57, %v399_v45  ;;  %v434_v5 = vrot.slane %v402_v58, 4  ;;  %v404_v7 = vmax.bf16 %v388_v61, %v372_v60  ;;  %v375_v10 = vld [vmem:[%s766_s7 + $0x58] sm:$0x33]  ;;  %477 = vst [vmem:[%s785_s14 + $0x4] sm:$0x3] %v461_v62  ;;  %v405_v13 = vmax.bf16 %v389_v3, %v373_v2 }
  0x36   : > { %478 = vst [vmem:[%s785_s14 + $0x8] sm:$0xf] %v462_v63  ;;  %v464_v11 = vmax.bf16 %v432_v0, %v400_v51  ;;  %v465_v12 = vmax.bf16 %v433_v1, %v401_v52  ;;  %v406_v14 = vmax.bf16 %v390_v9, %v374_v8  ;;  %v391_v15 = vld [vmem:[%s769_s8 + $0x58] sm:$0x33]  ;;  %v392_v17 = vld [vmem:[%s769_s8 + $0x60] sm:$0xff]  ;;  %v435_v19 = vrot.slane %v403_v6, 4 }
  0x37   : > { %479 = vst [vmem:[%s785_s14 + $0xc] sm:$0x3] %v463_v4  ;;  %v466_v18 = vmax.bf16 %v434_v5, %v402_v58  ;;  %v436_v20 = vrot.slane %v404_v7, 4  ;;  %v407_v21 = vmax.bf16 %v391_v15, %v375_v10  ;;  %v377_v22 = vld [vmem:[%s766_s7 + $0x68] sm:$0x33]  ;;  %v437_v24 = vrot.slane %v405_v13, 4 }
  0x38   : > { %v393_v23 = vld [vmem:[%s769_s8 + $0x68] sm:$0x33]  ;;  %480 = vst [vmem:[%s785_s14 + $0x10] sm:$0xf] %v464_v11  ;;  %481 = vst [vmem:[%s785_s14 + $0x14] sm:$0x3] %v465_v12  ;;  %v408_v26 = vmax.bf16 %v392_v17, %v376_v16  ;;  %v467_v31 = vmax.bf16 %v435_v19, %v403_v6 }
  0x39   : > { %v438_v25 = vrot.slane %v406_v14, 4  ;;  %v409_v27 = vmax.bf16 %v393_v23, %v377_v22  ;;  %v378_v28 = vld [vmem:[%s766_s7 + $0x70] sm:$0xff]  ;;  %v379_v30 = vld [vmem:[%s766_s7 + $0x78] sm:$0x33]  ;;  %482 = vst [vmem:[%s785_s14 + $0x18] sm:$0xf] %v466_v18  ;;  %v468_v32 = vmax.bf16 %v436_v20, %v404_v7  ;;  %v469_v36 = vmax.bf16 %v437_v24, %v405_v13 }
  0x3a   : > { %v394_v29 = vld [vmem:[%s769_s8 + $0x70] sm:$0xff]  ;;  %v439_v33 = vrot.slane %v407_v21, 4  ;;  %v395_v35 = vld [vmem:[%s769_s8 + $0x78] sm:$0x33]  ;;  %v440_v38 = vrot.slane %v408_v26, 4 }
  0x3b   : > { %v410_v34 = vmax.bf16 %v394_v29, %v378_v28  ;;  %v470_v37 = vmax.bf16 %v438_v25, %v406_v14  ;;  %v441_v39 = vrot.slane %v409_v27, 4  ;;  %483 = vst [vmem:[%s785_s14 + $0x1c] sm:$0x3] %v467_v31  ;;  %484 = vst [vmem:[%s785_s14 + $0x20] sm:$0xf] %v468_v32  ;;  %v411_v42 = vmax.bf16 %v395_v35, %v379_v30 }
  0x3c   : > { %v471_v40 = vmax.bf16 %v439_v33, %v407_v21  ;;  %485 = vst [vmem:[%s785_s14 + $0x24] sm:$0x3] %v469_v36  ;;  %v472_v43 = vmax.bf16 %v440_v38, %v408_v26 }
  0x3d   : > { %v442_v41 = vrot.slane %v410_v34, 4  ;;  %486 = vst [vmem:[%s785_s14 + $0x28] sm:$0xf] %v470_v37  ;;  %v473_v44 = vmax.bf16 %v441_v39, %v409_v27  ;;  %v443_v46 = vrot.slane %v411_v42, 4 }
  0x3e   : > { %487 = vst [vmem:[%s785_s14 + $0x2c] sm:$0x3] %v471_v40  ;;  %488 = vst [vmem:[%s785_s14 + $0x30] sm:$0xf] %v472_v43 }
  0x3f   : > { %v474_v45 = vmax.bf16 %v442_v41, %v410_v34  ;;  %489 = vst [vmem:[%s785_s14 + $0x34] sm:$0x3] %v473_v44  ;;  %v475_v47 = vmax.bf16 %v443_v46, %v411_v42 }
  0x41   : > { %490 = vst [vmem:[%s785_s14 + $0x38] sm:$0xf] %v474_v45  ;;  %491 = vst [vmem:[%s785_s14 + $0x3c] sm:$0x3] %v475_v47 }
  0x42 PF: > { %p9_p9 = scmp.ge.s32.totalorder %s695_s13, 5   ;;  %s837_s9 = smov %s657_s10 }
  0x43   : > { %s838_s10 = smov %s704_s16  ;;  %s839_s11 = smov %s695_s13 }
  0x44   :  { %11 = sbr.rel (!%p9_p9) target bundleno = 2 (0x2), region = 147 }

// kernel: fer_cnn_forward.16
= control target key start
LH: loop header
LB: loop body
LE: loop exit
PB: predicated region body
PF: predicated region fallthrough
CT: control target
= control target key end

     0   :  { %s865_s0 = inlined_call_operand.vmem [shape: bf16[12,2,6,1024], index: 0, kind: input, shape index: {}, may-alias: {0,1}]   ;;  %s866_s1 = inlined_call_operand.vmem [shape: bf16[12,2,6,1024], index: 1, kind: input, shape index: {}, may-alias: {0,1}]   ;;  %s867_s2 = inlined_call_operand.vmem [shape: bf16[12,6,512], index: 2, kind: output, shape index: {}]  }
   0x1   :  { %v21_v0 = vld [vmem:[%s865_s0] sm:$0xff]  ;;  %v23_v1 = vld [vmem:[%s865_s0 + $0x8] sm:$0xff]  ;;  %v25_v2 = vld [vmem:[%s865_s0 + $0x10] sm:$0xff] }
   0x2   :  { %22 = vst [vmem:[#allocation2 + $0xb0] sm:$0xff] %v21_v0  ;;  %24 = vst [vmem:[#allocation2 + $0xd0] sm:$0xff] %v23_v1  ;;  %v27_v3 = vld [vmem:[%s865_s0 + $0x18] sm:$0xff]  ;;  %v29_v4 = vld [vmem:[%s865_s0 + $0x40] sm:$0xff] }
   0x3   :  { %26 = vst [vmem:[#allocation2 + $0x10] sm:$0xff] %v25_v2  ;;  %v31_v5 = vld [vmem:[%s865_s0 + $0x48] sm:$0xff]  ;;  %28 = vst [vmem:[#allocation2 + $0x48] sm:$0xff] %v27_v3  ;;  %v33_v6 = vld [vmem:[%s865_s0 + $0x50] sm:$0xff] }
   0x4   :  { %30 = vst [vmem:[#allocation2 + $0x160] sm:$0xff] %v29_v4  ;;  %32 = vst [vmem:[#allocation2 + $0x128] sm:$0xff] %v31_v5  ;;  %v35_v7 = vld [vmem:[%s865_s0 + $0x58] sm:$0xff]  ;;  %v37_v8 = vld [vmem:[%s865_s0 + $0x80] sm:$0xff] }
   0x5   :  { %34 = vst [vmem:[#allocation2 + $0x40] sm:$0xff] %v33_v6  ;;  %36 = vst [vmem:[#allocation2 + $0x178] sm:$0xff] %v35_v7  ;;  %v39_v9 = vld [vmem:[%s865_s0 + $0x88] sm:$0xff]  ;;  %v41_v10 = vld [vmem:[%s865_s0 + $0x90] sm:$0xff] }
   0x6   :  { %38 = vst [vmem:[#allocation2 + $0x108] sm:$0xff] %v37_v8  ;;  %v43_v11 = vld [vmem:[%s865_s0 + $0x98] sm:$0xff]  ;;  %40 = vst [vmem:[#allocation2 + $0x110] sm:$0xff] %v39_v9  ;;  %v45_v12 = vld [vmem:[%s865_s0 + $0xc0] sm:$0xff] }
   0x7   :  { %42 = vst [vmem:[#allocation2 + $0x90] sm:$0xff] %v41_v10  ;;  %44 = vst [vmem:[#allocation2 + $0x118] sm:$0xff] %v43_v11  ;;  %v47_v13 = vld [vmem:[%s865_s0 + $0xc8] sm:$0xff]  ;;  %v49_v14 = vld [vmem:[%s865_s0 + $0xd0] sm:$0xff] }
   0x8   :  { %46 = vst [vmem:[#allocation2 + $0x148] sm:$0xff] %v45_v12  ;;  %48 = vst [vmem:[#allocation2 + $0x100] sm:$0xff] %v47_v13  ;;  %v51_v15 = vld [vmem:[%s865_s0 + $0xd8] sm:$0xff]  ;;  %v53_v16 = vld [vmem:[%s865_s0 + $0x100] sm:$0xff] }
   0x9   :  { %50 = vst [vmem:[#allocation2 + $0x58] sm:$0xff] %v49_v14  ;;  %v55_v17 = vld [vmem:[%s865_s0 + $0x108] sm:$0xff]  ;;  %52 = vst [vmem:[#allocation2 + $0xd8] sm:$0xff] %v51_v15  ;;  %v57_v18 = vld [vmem:[%s865_s0 + $0x110] sm:$0xff] }
   0xa   :  { %54 = vst [vmem:[#allocation2 + $0x80] sm:$0xff] %v53_v16  ;;  %56 = vst [vmem:[#allocation2 + $0x130] sm:$0xff] %v55_v17  ;;  %v59_v19 = vld [vmem:[%s865_s0 + $0x118] sm:$0xff]  ;;  %v61_v20 = vld [vmem:[%s865_s0 + $0x140] sm:$0xff] }
   0xb   :  { %58 = vst [vmem:[#allocation2 + $0x138] sm:$0xff] %v57_v18  ;;  %60 = vst [vmem:[#allocation2 + $0x120] sm:$0xff] %v59_v19  ;;  %v63_v21 = vld [vmem:[%s865_s0 + $0x148] sm:$0xff]  ;;  %v65_v22 = vld [vmem:[%s865_s0 + $0x150] sm:$0xff] }
   0xc   :  { %62 = vst [vmem:[#allocation2 + $0xe0] sm:$0xff] %v61_v20  ;;  %v67_v23 = vld [vmem:[%s865_s0 + $0x158] sm:$0xff]  ;;  %64 = vst [vmem:[#allocation2 + $0xa8] sm:$0xff] %v63_v21  ;;  %v69_v24 = vld [vmem:[%s865_s0 + $0x180] sm:$0xff] }
   0xd   :  { %66 = vst [vmem:[#allocation2 + $0xb8] sm:$0xff] %v65_v22  ;;  %68 = vst [vmem:[#allocation2 + $0x168] sm:$0xff] %v67_v23  ;;  %v71_v25 = vld [vmem:[%s865_s0 + $0x188] sm:$0xff]  ;;  %v73_v26 = vld [vmem:[%s865_s0 + $0x190] sm:$0xff] }
   0xe   :  { %70 = vst [vmem:[#allocation2 + $0xe8] sm:$0xff] %v69_v24  ;;  %72 = vst [vmem:[#allocation2 + $0xf8] sm:$0xff] %v71_v25  ;;  %v75_v27 = vld [vmem:[%s865_s0 + $0x198] sm:$0xff]  ;;  %v77_v28 = vld [vmem:[%s865_s0 + $0x1c0] sm:$0xff] }
   0xf   :  { %74 = vst [vmem:[#allocation2 + $0x20] sm:$0xff] %v73_v26  ;;  %v79_v29 = vld [vmem:[%s865_s0 + $0x1c8] sm:$0xff]  ;;  %76 = vst [vmem:[#allocation2 + $0x88] sm:$0xff] %v75_v27  ;;  %v81_v30 = vld [vmem:[%s865_s0 + $0x1d0] sm:$0xff] }
  0x10   :  { %78 = vst [vmem:[#allocation2 + $0xa0] sm:$0xff] %v77_v28  ;;  %80 = vst [vmem:[#allocation2 + $0x170] sm:$0xff] %v79_v29  ;;  %v83_v31 = vld [vmem:[%s865_s0 + $0x1d8] sm:$0xff]  ;;  %v85_v32 = vld [vmem:[%s865_s0 + $0x200] sm:$0xff] }
  0x11   :  { %82 = vst [vmem:[#allocation2 + $0xf0] sm:$0xff] %v81_v30  ;;  %84 = vst [vmem:[#allocation2 + $0x140] sm:$0xff] %v83_v31  ;;  %v87_v33 = vld [vmem:[%s865_s0 + $0x208] sm:$0xff]  ;;  %v89_v34 = vld [vmem:[%s865_s0 + $0x210] sm:$0xff] }
  0x12   :  { %86 = vst [vmem:[#allocation2 + $0x60] sm:$0xff] %v85_v32  ;;  %v91_v35 = vld [vmem:[%s865_s0 + $0x218] sm:$0xff]  ;;  %88 = vst [vmem:[#allocation2 + $0xc8] sm:$0xff] %v87_v33  ;;  %v93_v36 = vld [vmem:[%s865_s0 + $0x240] sm:$0xff] }
  0x13   :  { %90 = vst [vmem:[#allocation2 + $0x28] sm:$0xff] %v89_v34  ;;  %92 = vst [vmem:[#allocation2 + $0x38] sm:$0xff] %v91_v35  ;;  %v95_v37 = vld [vmem:[%s865_s0 + $0x248] sm:$0xff]  ;;  %v97_v38 = vld [vmem:[%s865_s0 + $0x250] sm:$0xff] }
  0x14   :  { %94 = vst [vmem:[#allocation2 + $0xc0] sm:$0xff] %v93_v36  ;;  %96 = vst [vmem:[#allocation2 + $0x18] sm:$0xff] %v95_v37  ;;  %v99_v39 = vld [vmem:[%s865_s0 + $0x258] sm:$0xff]  ;;  %v101_v40 = vld [vmem:[%s865_s0 + $0x280] sm:$0xff] }
  0x15   :  { %98 = vst [vmem:[#allocation2 + $0x98] sm:$0xff] %v97_v38  ;;  %v103_v41 = vld [vmem:[%s865_s0 + $0x288] sm:$0xff]  ;;  %100 = vst [vmem:[#allocation2 + $0x8] sm:$0xff] %v99_v39  ;;  %v105_v42 = vld [vmem:[%s865_s0 + $0x290] sm:$0xff] }
  0x16   :  { %102 = vst [vmem:[#allocation2] sm:$0xff] %v101_v40  ;;  %104 = vst [vmem:[#allocation2 + $0x78] sm:$0xff] %v103_v41  ;;  %v107_v43 = vld [vmem:[%s865_s0 + $0x298] sm:$0xff]  ;;  %v109_v44 = vld [vmem:[%s865_s0 + $0x2c0] sm:$0xff] }
  0x17   :  { %106 = vst [vmem:[#allocation2 + $0x50] sm:$0xff] %v105_v42  ;;  %108 = vst [vmem:[#allocation2 + $0x68] sm:$0xff] %v107_v43  ;;  %v111_v45 = vld [vmem:[%s865_s0 + $0x2c8] sm:$0xff]  ;;  %v113_v46 = vld [vmem:[%s865_s0 + $0x2d0] sm:$0xff] }
  0x18   :  { %110 = vst [vmem:[#allocation2 + $0x70] sm:$0xff] %v109_v44  ;;  %v115_v47 = vld [vmem:[%s865_s0 + $0x2d8] sm:$0xff]  ;;  %112 = vst [vmem:[#allocation2 + $0x30] sm:$0xff] %v111_v45  ;;  %v442_v48 = vld [vmem:[%s866_s1 + $0x20] sm:$0xff] }
  0x19   :  { %114 = vst [vmem:[#allocation2 + $0x158] sm:$0xff] %v113_v46  ;;  %116 = vst [vmem:[#allocation2 + $0x150] sm:$0xff] %v115_v47  ;;  %v443_v49 = vld [vmem:[%s866_s1 + $0x28] sm:$0xff]  ;;  %v444_v50 = vld [vmem:[%s866_s1 + $0x30] sm:$0xff] }
  0x1a   :  { %136 = vst [vmem:[#allocation3 + $0xb0] sm:$0xff] %v442_v48  ;;  %138 = vst [vmem:[#allocation3 + $0xc0] sm:$0xff] %v443_v49  ;;  %v445_v51 = vld [vmem:[%s866_s1 + $0x38] sm:$0xff]  ;;  %v446_v52 = vld [vmem:[%s866_s1 + $0x60] sm:$0xff] }
  0x1b   :  { %140 = vst [vmem:[#allocation3 + $0x88] sm:$0xff] %v444_v50  ;;  %v447_v53 = vld [vmem:[%s866_s1 + $0x68] sm:$0xff]  ;;  %142 = vst [vmem:[#allocation3 + $0x108] sm:$0xff] %v445_v51  ;;  %v448_v54 = vld [vmem:[%s866_s1 + $0x70] sm:$0xff] }
  0x1c   :  { %144 = vst [vmem:[#allocation3 + $0x28] sm:$0xff] %v446_v52  ;;  %146 = vst [vmem:[#allocation3 + $0x90] sm:$0xff] %v447_v53  ;;  %v449_v55 = vld [vmem:[%s866_s1 + $0x78] sm:$0xff]  ;;  %v450_v56 = vld [vmem:[%s866_s1 + $0xa0] sm:$0xff] }
  0x1d   :  { %148 = vst [vmem:[#allocation3 + $0x118] sm:$0xff] %v448_v54  ;;  %150 = vst [vmem:[#allocation3 + $0x150] sm:$0xff] %v449_v55  ;;  %v451_v57 = vld [vmem:[%s866_s1 + $0xa8] sm:$0xff]  ;;  %v452_v58 = vld [vmem:[%s866_s1 + $0xb0] sm:$0xff] }
  0x1e   :  { %152 = vst [vmem:[#allocation3 + $0xc8] sm:$0xff] %v450_v56  ;;  %v453_v59 = vld [vmem:[%s866_s1 + $0xb8] sm:$0xff]  ;;  %154 = vst [vmem:[#allocation3] sm:$0xff] %v451_v57  ;;  %v454_v60 = vld [vmem:[%s866_s1 + $0xe0] sm:$0xff] }
  0x1f   :  { %156 = vst [vmem:[#allocation3 + $0xa8] sm:$0xff] %v452_v58  ;;  %158 = vst [vmem:[#allocation3 + $0xf8] sm:$0xff] %v453_v59  ;;  %v455_v61 = vld [vmem:[%s866_s1 + $0xe8] sm:$0xff]  ;;  %v456_v62 = vld [vmem:[%s866_s1 + $0xf0] sm:$0xff] }
  0x20   :  { %160 = vst [vmem:[#allocation3 + $0x40] sm:$0xff] %v454_v60  ;;  %162 = vst [vmem:[#allocation3 + $0x60] sm:$0xff] %v455_v61  ;;  %v457_v63 = vld [vmem:[%s866_s1 + $0xf8] sm:$0xff]  ;;  %v458_v0 = vld [vmem:[%s866_s1 + $0x120] sm:$0xff] }
  0x21   :  { %164 = vst [vmem:[#allocation3 + $0x120] sm:$0xff] %v456_v62  ;;  %v459_v1 = vld [vmem:[%s866_s1 + $0x128] sm:$0xff]  ;;  %166 = vst [vmem:[#allocation3 + $0x128] sm:$0xff] %v457_v63  ;;  %v460_v2 = vld [vmem:[%s866_s1 + $0x130] sm:$0xff] }
  0x22   :  { %168 = vst [vmem:[#allocation3 + $0x130] sm:$0xff] %v458_v0  ;;  %170 = vst [vmem:[#allocation3 + $0x80] sm:$0xff] %v459_v1  ;;  %v461_v3 = vld [vmem:[%s866_s1 + $0x138] sm:$0xff]  ;;  %v462_v4 = vld [vmem:[%s866_s1 + $0x160] sm:$0xff] }
  0x23   :  { %172 = vst [vmem:[#allocation3 + $0x98] sm:$0xff] %v460_v2  ;;  %174 = vst [vmem:[#allocation3 + $0xa0] sm:$0xff] %v461_v3  ;;  %v463_v5 = vld [vmem:[%s866_s1 + $0x168] sm:$0xff]  ;;  %v464_v6 = vld [vmem:[%s866_s1 + $0x170] sm:$0xff] }
  0x24   :  { %176 = vst [vmem:[#allocation3 + $0x140] sm:$0xff] %v462_v4  ;;  %v465_v7 = vld [vmem:[%s866_s1 + $0x178] sm:$0xff]  ;;  %178 = vst [vmem:[#allocation3 + $0x170] sm:$0xff] %v463_v5  ;;  %v466_v8 = vld [vmem:[%s866_s1 + $0x1a0] sm:$0xff] }
  0x25   :  { %180 = vst [vmem:[#allocation3 + $0xe0] sm:$0xff] %v464_v6  ;;  %182 = vst [vmem:[#allocation3 + $0xd0] sm:$0xff] %v465_v7  ;;  %v467_v9 = vld [vmem:[%s866_s1 + $0x1a8] sm:$0xff]  ;;  %v468_v10 = vld [vmem:[%s866_s1 + $0x1b0] sm:$0xff] }
  0x26   :  { %184 = vst [vmem:[#allocation3 + $0x78] sm:$0xff] %v466_v8  ;;  %186 = vst [vmem:[#allocation3 + $0x8] sm:$0xff] %v467_v9  ;;  %v469_v11 = vld [vmem:[%s866_s1 + $0x1b8] sm:$0xff]  ;;  %v470_v12 = vld [vmem:[%s866_s1 + $0x1e0] sm:$0xff] }
  0x27   :  { %188 = vst [vmem:[#allocation3 + $0xb8] sm:$0xff] %v468_v10  ;;  %v471_v13 = vld [vmem:[%s866_s1 + $0x1e8] sm:$0xff]  ;;  %190 = vst [vmem:[#allocation3 + $0xf0] sm:$0xff] %v469_v11  ;;  %v472_v14 = vld [vmem:[%s866_s1 + $0x1f0] sm:$0xff] }
  0x28   :  { %192 = vst [vmem:[#allocation3 + $0x178] sm:$0xff] %v470_v12  ;;  %194 = vst [vmem:[#allocation3 + $0x158] sm:$0xff] %v471_v13  ;;  %v473_v15 = vld [vmem:[%s866_s1 + $0x1f8] sm:$0xff]  ;;  %v474_v16 = vld [vmem:[%s866_s1 + $0x220] sm:$0xff] }
  0x29   :  { %196 = vst [vmem:[#allocation3 + $0x160] sm:$0xff] %v472_v14  ;;  %198 = vst [vmem:[#allocation3 + $0x100] sm:$0xff] %v473_v15  ;;  %v475_v17 = vld [vmem:[%s866_s1 + $0x228] sm:$0xff]  ;;  %v476_v18 = vld [vmem:[%s866_s1 + $0x230] sm:$0xff] }
  0x2a   :  { %200 = vst [vmem:[#allocation3 + $0x70] sm:$0xff] %v474_v16  ;;  %v477_v19 = vld [vmem:[%s866_s1 + $0x238] sm:$0xff]  ;;  %202 = vst [vmem:[#allocation3 + $0x20] sm:$0xff] %v475_v17  ;;  %v478_v20 = vld [vmem:[%s866_s1 + $0x260] sm:$0xff] }
  0x2b   :  { %204 = vst [vmem:[#allocation3 + $0x48] sm:$0xff] %v476_v18  ;;  %206 = vst [vmem:[#allocation3 + $0x168] sm:$0xff] %v477_v19  ;;  %v479_v21 = vld [vmem:[%s866_s1 + $0x268] sm:$0xff]  ;;  %v480_v22 = vld [vmem:[%s866_s1 + $0x270] sm:$0xff] }
  0x2c   :  { %208 = vst [vmem:[#allocation3 + $0x110] sm:$0xff] %v478_v20  ;;  %210 = vst [vmem:[#allocation3 + $0x38] sm:$0xff] %v479_v21  ;;  %v481_v23 = vld [vmem:[%s866_s1 + $0x278] sm:$0xff]  ;;  %v482_v24 = vld [vmem:[%s866_s1 + $0x2a0] sm:$0xff] }
  0x2d   :  { %212 = vst [vmem:[#allocation3 + $0xe8] sm:$0xff] %v480_v22  ;;  %v483_v25 = vld [vmem:[%s866_s1 + $0x2a8] sm:$0xff]  ;;  %214 = vst [vmem:[#allocation3 + $0xd8] sm:$0xff] %v481_v23  ;;  %v484_v26 = vld [vmem:[%s866_s1 + $0x2b0] sm:$0xff] }
  0x2e   :  { %216 = vst [vmem:[#allocation3 + $0x68] sm:$0xff] %v482_v24  ;;  %218 = vst [vmem:[#allocation3 + $0x50] sm:$0xff] %v483_v25  ;;  %v485_v27 = vld [vmem:[%s866_s1 + $0x2b8] sm:$0xff]  ;;  %v486_v28 = vld [vmem:[%s866_s1 + $0x2e0] sm:$0xff] }
  0x2f   :  { %220 = vst [vmem:[#allocation3 + $0x10] sm:$0xff] %v484_v26  ;;  %222 = vst [vmem:[#allocation3 + $0x18] sm:$0xff] %v485_v27  ;;  %v487_v29 = vld [vmem:[%s866_s1 + $0x2e8] sm:$0xff]  ;;  %v488_v30 = vld [vmem:[%s866_s1 + $0x2f0] sm:$0xff] }
  0x30   :  { %224 = vst [vmem:[#allocation3 + $0x148] sm:$0xff] %v486_v28  ;;  %v489_v31 = vld [vmem:[%s866_s1 + $0x2f8] sm:$0xff]  ;;  %226 = vst [vmem:[#allocation3 + $0x30] sm:$0xff] %v487_v29  ;;  %v238_v32 = vld [vmem:[#allocation2 + $0xb0] sm:$0x77] }
  0x31   :  { %228 = vst [vmem:[#allocation3 + $0x58] sm:$0xff] %v488_v30  ;;  %230 = vst [vmem:[#allocation3 + $0x138] sm:$0xff] %v489_v31  ;;  %v240_v33 = vld [vmem:[#allocation2 + $0x10] sm:$0x77]  ;;  %v288_v35 = vld [vmem:[#allocation3 + $0x88] sm:$0x77] }
  0x32   :  { %v286_v34 = vld [vmem:[#allocation3 + $0xb0] sm:$0x77]  ;;  %v241_v38 = vld [vmem:[#allocation2 + $0x48] sm:$0x77]  ;;  %v336_v39 = vmax.bf16 %v288_v35, %v240_v33  ;;  %v287_v40 = vld [vmem:[#allocation3 + $0xc0] sm:$0x77] }
  0x33   :  { %v334_v36 = vmax.bf16 %v286_v34, %v238_v32  ;;  %v239_v37 = vld [vmem:[#allocation2 + $0xd0] sm:$0x77]  ;;  %v289_v41 = vld [vmem:[#allocation3 + $0x108] sm:$0x77]  ;;  %v242_v42 = vld [vmem:[#allocation2 + $0x160] sm:$0x77] }
  0x34   :  { %v335_v43 = vmax.bf16 %v287_v40, %v239_v37  ;;  %v337_v44 = vmax.bf16 %v289_v41, %v241_v38  ;;  %v244_v45 = vld [vmem:[#allocation2 + $0x40] sm:$0x77]  ;;  %v290_v46 = vld [vmem:[#allocation3 + $0x28] sm:$0x77]  ;;  %v292_v47 = vld [vmem:[#allocation3 + $0x118] sm:$0x77] }
  0x35   :  { %v382_v48 = vmax.bf16 %v336_v39, %v334_v36  ;;  %v338_v49 = vmax.bf16 %v290_v46, %v242_v42  ;;  %v340_v50 = vmax.bf16 %v292_v47, %v244_v45  ;;  %v243_v51 = vld [vmem:[#allocation2 + $0x128] sm:$0x77]  ;;  %v245_v52 = vld [vmem:[#allocation2 + $0x178] sm:$0x77]  ;;  %v291_v53 = vld [vmem:[#allocation3 + $0x90] sm:$0x77] }
  0x36   :  { %v383_v54 = vmax.bf16 %v337_v44, %v335_v43  ;;  %v293_v55 = vld [vmem:[#allocation3 + $0x150] sm:$0x77]  ;;  %v339_v56 = vmax.bf16 %v291_v53, %v243_v51  ;;  %v246_v57 = vld [vmem:[#allocation2 + $0x108] sm:$0x77]  ;;  %v249_v2 = vld [vmem:[#allocation2 + $0x118] sm:$0x77] }
  0x37   :  { %v248_v58 = vld [vmem:[#allocation2 + $0x90] sm:$0x77]  ;;  %406 = vst [vmem:[%s867_s2] sm:$0x77] %v382_v48  ;;  %v384_v59 = vmax.bf16 %v340_v50, %v338_v49  ;;  %v341_v60 = vmax.bf16 %v293_v55, %v245_v52  ;;  %v294_v61 = vld [vmem:[#allocation3 + $0xc8] sm:$0x77] }
  0x38   :  { %v296_v62 = vld [vmem:[#allocation3 + $0xa8] sm:$0x77]  ;;  %v247_v63 = vld [vmem:[#allocation2 + $0x110] sm:$0x77]  ;;  %407 = vst [vmem:[%s867_s2 + $0x8] sm:$0x77] %v383_v54  ;;  %v342_v0 = vmax.bf16 %v294_v61, %v246_v57 }
  0x39   :  { %v344_v1 = vmax.bf16 %v296_v62, %v248_v58  ;;  %v295_v3 = vld [vmem:[#allocation3] sm:$0x77]  ;;  %v297_v4 = vld [vmem:[#allocation3 + $0xf8] sm:$0x77]  ;;  %408 = vst [vmem:[%s867_s2 + $0x10] sm:$0x77] %v384_v59  ;;  %v385_v5 = vmax.bf16 %v341_v60, %v339_v56 }
  0x3a   :  { %v343_v6 = vmax.bf16 %v295_v3, %v247_v63  ;;  %v345_v7 = vmax.bf16 %v297_v4, %v249_v2  ;;  %v250_v8 = vld [vmem:[#allocation2 + $0x148] sm:$0x77]  ;;  %v252_v9 = vld [vmem:[#allocation2 + $0x58] sm:$0x77]  ;;  %v298_v10 = vld [vmem:[#allocation3 + $0x40] sm:$0x77] }
  0x3b   :  { %v386_v11 = vmax.bf16 %v344_v1, %v342_v0  ;;  %v300_v12 = vld [vmem:[#allocation3 + $0x120] sm:$0x77]  ;;  %v346_v13 = vmax.bf16 %v298_v10, %v250_v8  ;;  %v253_v15 = vld [vmem:[#allocation2 + $0xd8] sm:$0x77]  ;;  %409 = vst [vmem:[%s867_s2 + $0x18] sm:$0x77] %v385_v5 }
  0x3c   :  { %v251_v14 = vld [vmem:[#allocation2 + $0x100] sm:$0x77]  ;;  %v387_v16 = vmax.bf16 %v345_v7, %v343_v6  ;;  %v348_v17 = vmax.bf16 %v300_v12, %v252_v9  ;;  %v301_v19 = vld [vmem:[#allocation3 + $0x128] sm:$0x77]  ;;  %v256_v23 = vld [vmem:[#allocation2 + $0x138] sm:$0x77] }
  0x3d   :  { %v299_v18 = vld [vmem:[#allocation3 + $0x60] sm:$0x77]  ;;  %410 = vst [vmem:[%s867_s2 + $0x20] sm:$0x77] %v386_v11  ;;  %v349_v22 = vmax.bf16 %v301_v19, %v253_v15  ;;  %v302_v24 = vld [vmem:[#allocation3 + $0x130] sm:$0x77] }
  0x3e   :  { %v254_v20 = vld [vmem:[#allocation2 + $0x80] sm:$0x77]  ;;  %v347_v21 = vmax.bf16 %v299_v18, %v251_v14  ;;  %v304_v25 = vld [vmem:[#allocation3 + $0x98] sm:$0x77]  ;;  %411 = vst [vmem:[%s867_s2 + $0x28] sm:$0x77] %v387_v16  ;;  %v388_v26 = vmax.bf16 %v348_v17, %v346_v13 }
  0x3f   :  { %v350_v27 = vmax.bf16 %v302_v24, %v254_v20  ;;  %v352_v28 = vmax.bf16 %v304_v25, %v256_v23  ;;  %v255_v29 = vld [vmem:[#allocation2 + $0x130] sm:$0x77]  ;;  %v257_v30 = vld [vmem:[#allocation2 + $0x120] sm:$0x77]  ;;  %v260_v36 = vld [vmem:[#allocation2 + $0xb8] sm:$0x77] }
  0x40   :  { %v303_v31 = vld [vmem:[#allocation3 + $0x80] sm:$0x77]  ;;  %v389_v32 = vmax.bf16 %v349_v22, %v347_v21  ;;  %412 = vst [vmem:[%s867_s2 + $0x30] sm:$0x77] %v388_v26  ;;  %v259_v41 = vld [vmem:[#allocation2 + $0xa8] sm:$0x77] }
  0x41   :  { %v305_v33 = vld [vmem:[#allocation3 + $0xa0] sm:$0x77]  ;;  %v351_v34 = vmax.bf16 %v303_v31, %v255_v29  ;;  %v390_v37 = vmax.bf16 %v352_v28, %v350_v27  ;;  %v261_v44 = vld [vmem:[#allocation2 + $0x168] sm:$0x77]  ;;  %v307_v45 = vld [vmem:[#allocation3 + $0x170] sm:$0x77] }
  0x42   :  { %v258_v35 = vld [vmem:[#allocation2 + $0xe0] sm:$0x77]  ;;  %v353_v38 = vmax.bf16 %v305_v33, %v257_v30  ;;  %413 = vst [vmem:[%s867_s2 + $0x38] sm:$0x77] %v389_v32  ;;  %v309_v46 = vld [vmem:[#allocation3 + $0xd0] sm:$0x77]  ;;  %v355_v48 = vmax.bf16 %v307_v45, %v259_v41 }
  0x43   :  { %v306_v39 = vld [vmem:[#allocation3 + $0x140] sm:$0x77]  ;;  %414 = vst [vmem:[%s867_s2 + $0x40] sm:$0x77] %v390_v37  ;;  %v357_v49 = vmax.bf16 %v309_v46, %v261_v44  ;;  %v262_v50 = vld [vmem:[#allocation2 + $0xe8] sm:$0x77] }
  0x44   :  { %v308_v40 = vld [vmem:[#allocation3 + $0xe0] sm:$0x77]  ;;  %v354_v42 = vmax.bf16 %v306_v39, %v258_v35  ;;  %v391_v47 = vmax.bf16 %v353_v38, %v351_v34  ;;  %v310_v52 = vld [vmem:[#allocation3 + $0x78] sm:$0x77]  ;;  %v265_v57 = vld [vmem:[#allocation2 + $0x88] sm:$0x77] }
  0x45   :  { %v356_v43 = vmax.bf16 %v308_v40, %v260_v36  ;;  %v264_v51 = vld [vmem:[#allocation2 + $0x20] sm:$0x77]  ;;  %v312_v54 = vld [vmem:[#allocation3 + $0xb8] sm:$0x77]  ;;  %v358_v55 = vmax.bf16 %v310_v52, %v262_v50  ;;  %v393_v58 = vmax.bf16 %v357_v49, %v355_v48  ;;  %v311_v60 = vld [vmem:[#allocation3 + $0x8] sm:$0x77] }
  0x46   :  { %v263_v56 = vld [vmem:[#allocation2 + $0xf8] sm:$0x77]  ;;  %415 = vst [vmem:[%s867_s2 + $0x48] sm:$0x77] %v391_v47  ;;  %v360_v59 = vmax.bf16 %v312_v54, %v264_v51  ;;  %v313_v61 = vld [vmem:[#allocation3 + $0xf0] sm:$0x77] }
  0x47   :  { %v392_v53 = vmax.bf16 %v356_v43, %v354_v42  ;;  %v266_v62 = vld [vmem:[#allocation2 + $0xa0] sm:$0x77]  ;;  %v359_v63 = vmax.bf16 %v311_v60, %v263_v56  ;;  %v361_v0 = vmax.bf16 %v313_v61, %v265_v57  ;;  %v268_v1 = vld [vmem:[#allocation2 + $0xf0] sm:$0x77]  ;;  %v314_v2 = vld [vmem:[#allocation3 + $0x178] sm:$0x77] }
  0x48   :  { %v316_v3 = vld [vmem:[#allocation3 + $0x160] sm:$0x77]  ;;  %417 = vst [vmem:[%s867_s2 + $0x58] sm:$0x77] %v393_v58  ;;  %v394_v4 = vmax.bf16 %v360_v59, %v358_v55  ;;  %v362_v5 = vmax.bf16 %v314_v2, %v266_v62  ;;  %v267_v7 = vld [vmem:[#allocation2 + $0x170] sm:$0x77] }
  0x49   :  { %416 = vst [vmem:[%s867_s2 + $0x50] sm:$0x77] %v392_v53  ;;  %v364_v6 = vmax.bf16 %v316_v3, %v268_v1  ;;  %v269_v8 = vld [vmem:[#allocation2 + $0x140] sm:$0x77]  ;;  %v315_v9 = vld [vmem:[#allocation3 + $0x158] sm:$0x77]  ;;  %v395_v10 = vmax.bf16 %v361_v0, %v359_v63 }
  0x4a   :  { %v317_v11 = vld [vmem:[#allocation3 + $0x100] sm:$0x77]  ;;  %v363_v12 = vmax.bf16 %v315_v9, %v267_v7  ;;  %v272_v14 = vld [vmem:[#allocation2 + $0x28] sm:$0x77]  ;;  %418 = vst [vmem:[%s867_s2 + $0x60] sm:$0x77] %v394_v4 }
  0x4b   :  { %v270_v13 = vld [vmem:[#allocation2 + $0x60] sm:$0x77]  ;;  %v396_v15 = vmax.bf16 %v364_v6, %v362_v5  ;;  %v365_v16 = vmax.bf16 %v317_v11, %v269_v8  ;;  %v318_v17 = vld [vmem:[#allocation3 + $0x70] sm:$0x77]  ;;  %v320_v18 = vld [vmem:[#allocation3 + $0x48] sm:$0x77] }
  0x4c   :  { %v271_v19 = vld [vmem:[#allocation2 + $0xc8] sm:$0x77]  ;;  %419 = vst [vmem:[%s867_s2 + $0x68] sm:$0x77] %v395_v10  ;;  %v366_v20 = vmax.bf16 %v318_v17, %v270_v13  ;;  %v368_v21 = vmax.bf16 %v320_v18, %v272_v14  ;;  %v273_v22 = vld [vmem:[#allocation2 + $0x38] sm:$0x77] }
  0x4d   :  { %v319_v23 = vld [vmem:[#allocation3 + $0x20] sm:$0x77]  ;;  %v321_v24 = vld [vmem:[#allocation3 + $0x168] sm:$0x77]  ;;  %420 = vst [vmem:[%s867_s2 + $0x70] sm:$0x77] %v396_v15  ;;  %v397_v25 = vmax.bf16 %v365_v16, %v363_v12 }
  0x4e   :  { %v367_v26 = vmax.bf16 %v319_v23, %v271_v19  ;;  %v369_v27 = vmax.bf16 %v321_v24, %v273_v22  ;;  %v274_v28 = vld [vmem:[#allocation2 + $0xc0] sm:$0x77]  ;;  %v276_v29 = vld [vmem:[#allocation2 + $0x98] sm:$0x77]  ;;  %v322_v30 = vld [vmem:[#allocation3 + $0x110] sm:$0x77]  ;;  %v398_v31 = vmax.bf16 %v368_v21, %v366_v20 }
  0x4f   :  { %v324_v32 = vld [vmem:[#allocation3 + $0xe8] sm:$0x77]  ;;  %v370_v33 = vmax.bf16 %v322_v30, %v274_v28  ;;  %v275_v34 = vld [vmem:[#allocation2 + $0x18] sm:$0x77]  ;;  %421 = vst [vmem:[%s867_s2 + $0x78] sm:$0x77] %v397_v25 }
  0x50   :  { %v277_v35 = vld [vmem:[#allocation2 + $0x8] sm:$0x77]  ;;  %v399_v36 = vmax.bf16 %v369_v27, %v367_v26  ;;  %v372_v37 = vmax.bf16 %v324_v32, %v276_v29  ;;  %v323_v38 = vld [vmem:[#allocation3 + $0x38] sm:$0x77]  ;;  %v278_v40 = vld [vmem:[#allocation2] sm:$0x77] }
  0x51   :  { %v325_v39 = vld [vmem:[#allocation3 + $0xd8] sm:$0x77]  ;;  %422 = vst [vmem:[%s867_s2 + $0x80] sm:$0x77] %v398_v31  ;;  %v371_v41 = vmax.bf16 %v323_v38, %v275_v34  ;;  %v280_v43 = vld [vmem:[#allocation2 + $0x50] sm:$0x77] }
  0x52   :  { %v373_v42 = vmax.bf16 %v325_v39, %v277_v35  ;;  %v326_v44 = vld [vmem:[#allocation3 + $0x68] sm:$0x77]  ;;  %v328_v45 = vld [vmem:[#allocation3 + $0x10] sm:$0x77]  ;;  %423 = vst [vmem:[%s867_s2 + $0x88] sm:$0x77] %v399_v36  ;;  %v400_v46 = vmax.bf16 %v372_v37, %v370_v33 }
  0x53   :  { %v374_v47 = vmax.bf16 %v326_v44, %v278_v40  ;;  %v376_v48 = vmax.bf16 %v328_v45, %v280_v43  ;;  %v279_v49 = vld [vmem:[#allocation2 + $0x78] sm:$0x77]  ;;  %v281_v50 = vld [vmem:[#allocation2 + $0x68] sm:$0x77]  ;;  %v327_v51 = vld [vmem:[#allocation3 + $0x50] sm:$0x77] }
  0x54   :  { %v401_v52 = vmax.bf16 %v373_v42, %v371_v41  ;;  %v329_v53 = vld [vmem:[#allocation3 + $0x18] sm:$0x77]  ;;  %v375_v54 = vmax.bf16 %v327_v51, %v279_v49  ;;  %v282_v55 = vld [vmem:[#allocation2 + $0x70] sm:$0x77]  ;;  %424 = vst [vmem:[%s867_s2 + $0x90] sm:$0x77] %v400_v46 }
  0x55   :  { %v284_v56 = vld [vmem:[#allocation2 + $0x158] sm:$0x77]  ;;  %v402_v57 = vmax.bf16 %v376_v48, %v374_v47  ;;  %v377_v58 = vmax.bf16 %v329_v53, %v281_v50  ;;  %v330_v59 = vld [vmem:[#allocation3 + $0x148] sm:$0x77]  ;;  %v283_v61 = vld [vmem:[#allocation2 + $0x30] sm:$0x77] }
  0x56   :  { %v332_v60 = vld [vmem:[#allocation3 + $0x58] sm:$0x77]  ;;  %425 = vst [vmem:[%s867_s2 + $0x98] sm:$0x77] %v401_v52  ;;  %v378_v62 = vmax.bf16 %v330_v59, %v282_v55  ;;  %v285_v0 = vld [vmem:[#allocation2 + $0x150] sm:$0x77] }
  0x57   :  { %v380_v63 = vmax.bf16 %v332_v60, %v284_v56  ;;  %v331_v1 = vld [vmem:[#allocation3 + $0x30] sm:$0x77]  ;;  %v333_v2 = vld [vmem:[#allocation3 + $0x138] sm:$0x77]  ;;  %426 = vst [vmem:[%s867_s2 + $0xa0] sm:$0x77] %v402_v57  ;;  %v403_v3 = vmax.bf16 %v377_v58, %v375_v54 }
  0x58   :  { %v379_v4 = vmax.bf16 %v331_v1, %v283_v61  ;;  %v381_v5 = vmax.bf16 %v333_v2, %v285_v0 }
  0x59   :  { %v404_v6 = vmax.bf16 %v380_v63, %v378_v62  ;;  %427 = vst [vmem:[%s867_s2 + $0xa8] sm:$0x77] %v403_v3 }
  0x5a   :  { %v405_v7 = vmax.bf16 %v381_v5, %v379_v4 }
  0x5b   :  { %428 = vst [vmem:[%s867_s2 + $0xb0] sm:$0x77] %v404_v6 }
  0x5c   :  { %429 = vst [vmem:[%s867_s2 + $0xb8] sm:$0x77] %v405_v7 }

// kernel: fer_cnn_forward.15
= control target key start
LH: loop header
LB: loop body
LE: loop exit
PB: predicated region body
PF: predicated region fallthrough
CT: control target
= control target key end

     0   :  { %s5841_s15 = smov 0   ;;  %s5843_s16 = smov 0   ;;  %s7602_s0 = inlined_call_operand.vmem [shape: bf16[288,1152], index: 0, kind: input, shape index: {}]   ;;  %s7603_s1 = inlined_call_operand.vmem [shape: bf16[1152,512], index: 1, kind: input, shape index: {}]   ;;  %s7604_s2 = inlined_call_operand.vmem [shape: f32[1,512], index: 2, kind: input, shape index: {}]   ;;  %s7605_s3 = inlined_call_operand.vmem [shape: f32[1,512], index: 3, kind: input, shape index: {}]   ;;  %s7606_s4 = inlined_call_operand.vmem [shape: bf16[288,512], index: 4, kind: output, shape index: {}]  }
   0x1   :  { %s5845_s17 = smov 0  }
   0x2 LB: > { %s26_s18 = sadd.s32 1, %s5809_s16  ;;  %p4694_p0 = scmp.ge.s32.totalorder %s5813_s17, 1  ;;  %s5813_s17 = sphi %s5845_s17, %s14_s17   ;;  %s5809_s16 = sphi %s5843_s16, %s7608_s16   ;;  %s5805_s15 = sphi %s5841_s15, %s7607_s15  }
   0x3   : > { %p28_p1 = scmp.ge.s32.totalorder %s26_s18, 2  ;;  %p195_p2 = scmp.lt.s32.totalorder %s5813_s17, 3 }
   0x5   : > { %s7610_s18 = smov (%p28_p1, %s26_s18), 0  ;;  %p196_p3 = pnand %p4694_p0, %p195_p2 }
   0x6   : > { %s233_s7 = smul.u32 (!%p196_p3), 18, %s5805_s15 }
   0x7   : > { %199 = sbr.rel (%p196_p3) target bundleno = 641 (0x281), region = 36 }
   0x8   : > { %p235_p4 = scmp.lt.s32.totalorder (!%p196_p3), %s233_s7, 35 }
   0xc   : > { %v5168_v0 = vld [vmem:[%s7603_s1 + $0xe4] ss:$16 sps:$4 sm:$0xff]   ;;  %v5172_v2 = vld [vmem:[%s7603_s1 + $0xe0] ss:$16 sps:$4 sm:$0xff]   ;;  %s7612_s7 = smov (!%p235_p4, %s233_s7), 35 }
   0xd   : > { %v5170_v1 = vld [vmem:[%s7603_s1 + $0x2e4] ss:$16 sps:$4 sm:$0xff]   ;;  %2640 = vmatprep.subr.bf16.mxu0 %v5168_v0  ;;  %v5173_v3 = vld [vmem:[%s7603_s1 + $0x2e0] ss:$16 sps:$4 sm:$0xff]   ;;  %s5142_s10 = smul.u32 36, %s7612_s7  ;;  %s5105_s6 = sshll.u32 %s7612_s7, 4 }
   0xe   : > { %2763 = vmatprep.subr.bf16.mxu1 %v5170_v1  ;;  %v5174_v4 = vld [vmem:[%s7603_s1 + $0xc4] ss:$16 sps:$4 sm:$0xff]   ;;  %2641 = vmatpush1.bf16.msra.mxu0 %v5172_v2  ;;  %v5178_v6 = vld [vmem:[%s7603_s1 + $0xc0] ss:$16 sps:$4 sm:$0xff]   ;;  %s7165_s9 = scalar_lea.vmem %s7606_s4, %s5105_s6 }
   0xf   : > { %2764 = vmatpush1.bf16.msra.mxu1 %v5173_v3  ;;  %v5176_v5 = vld [vmem:[%s7603_s1 + $0x2c4] ss:$16 sps:$4 sm:$0xff]   ;;  %2642 = vmatprep.subr.bf16.mxu0 %v5174_v4  ;;  %v5179_v7 = vld [vmem:[%s7603_s1 + $0x2c0] ss:$16 sps:$4 sm:$0xff]   ;;  %s6003_s24 = scalar_lea.vmem %s7602_s0, %s5142_s10 }
  0x10   : > { %2765 = vmatprep.subr.bf16.mxu1 %v5176_v5  ;;  %v5180_v8 = vld [vmem:[%s7603_s1 + $0xa4] ss:$16 sps:$4 sm:$0xff]   ;;  %v5184_v10 = vld [vmem:[%s7603_s1 + $0xa0] ss:$16 sps:$4 sm:$0xff]   ;;  %v5267_v5 = vld [vmem:[%s6003_s24 + $0x8] ss:$36 sps:$4 sm:$0xff]  }
  0x11   : > { %v5182_v9 = vld [vmem:[%s7603_s1 + $0x2a4] ss:$16 sps:$4 sm:$0xff]   ;;  %v5185_v11 = vld [vmem:[%s7603_s1 + $0x2a0] ss:$16 sps:$4 sm:$0xff]  }
  0x12   : > { %2643 = vmatpush1.bf16.msra.mxu0 %v5178_v6  ;;  %v5186_v12 = vld [vmem:[%s7603_s1 + $0x84] ss:$16 sps:$4 sm:$0xff]   ;;  %v5190_v14 = vld [vmem:[%s7603_s1 + $0x80] ss:$16 sps:$4 sm:$0xff]  }
  0x13   : > { %2766 = vmatpush1.bf16.msra.mxu1 %v5179_v7  ;;  %2644 = vmatprep.subr.bf16.mxu0 %v5180_v8  ;;  %v5188_v13 = vld [vmem:[%s7603_s1 + $0x284] ss:$16 sps:$4 sm:$0xff]   ;;  %v5191_v15 = vld [vmem:[%s7603_s1 + $0x280] ss:$16 sps:$4 sm:$0xff]  }
  0x14   : > { %2767 = vmatprep.subr.bf16.mxu1 %v5182_v9  ;;  %v5192_v16 = vld [vmem:[%s7603_s1 + $0x64] ss:$16 sps:$4 sm:$0xff]   ;;  %v5196_v18 = vld [vmem:[%s7603_s1 + $0x60] ss:$16 sps:$4 sm:$0xff]  }
  0x15   : > { %v5194_v17 = vld [vmem:[%s7603_s1 + $0x264] ss:$16 sps:$4 sm:$0xff]   ;;  %v5197_v19 = vld [vmem:[%s7603_s1 + $0x260] ss:$16 sps:$4 sm:$0xff]  }
  0x16   : > { %2645 = vmatpush1.bf16.msra.mxu0 %v5184_v10  ;;  %v5198_v20 = vld [vmem:[%s7603_s1 + $0x44] ss:$16 sps:$4 sm:$0xff]   ;;  %v5202_v22 = vld [vmem:[%s7603_s1 + $0x40] ss:$16 sps:$4 sm:$0xff]  }
  0x17   : > { %2768 = vmatpush1.bf16.msra.mxu1 %v5185_v11  ;;  %2646 = vmatprep.subr.bf16.mxu0 %v5186_v12  ;;  %v5200_v21 = vld [vmem:[%s7603_s1 + $0x244] ss:$16 sps:$4 sm:$0xff]   ;;  %v5203_v23 = vld [vmem:[%s7603_s1 + $0x240] ss:$16 sps:$4 sm:$0xff]  }
  0x18   : > { %2769 = vmatprep.subr.bf16.mxu1 %v5188_v13  ;;  %v5204_v24 = vld [vmem:[%s7603_s1 + $0x24] ss:$16 sps:$4 sm:$0xff]   ;;  %v5208_v26 = vld [vmem:[%s7603_s1 + $0x20] ss:$16 sps:$4 sm:$0xff]  }
  0x19   : > { %v5206_v25 = vld [vmem:[%s7603_s1 + $0x224] ss:$16 sps:$4 sm:$0xff]   ;;  %v5209_v27 = vld [vmem:[%s7603_s1 + $0x220] ss:$16 sps:$4 sm:$0xff]  }
  0x1a   : > { %2647 = vmatpush1.bf16.msra.mxu0 %v5190_v14  ;;  %v5210_v28 = vld [vmem:[%s7603_s1 + $0x4] ss:$16 sps:$4 sm:$0xff]   ;;  %v5214_v30 = vld [vmem:[%s7603_s1] ss:$16 sps:$4 sm:$0xff]  }
  0x1b   : > { %2770 = vmatpush1.bf16.msra.mxu1 %v5191_v15  ;;  %2648 = vmatprep.subr.bf16.mxu0 %v5192_v16  ;;  %v5212_v29 = vld [vmem:[%s7603_s1 + $0x204] ss:$16 sps:$4 sm:$0xff]   ;;  %v5215_v31 = vld [vmem:[%s7603_s1 + $0x200] ss:$16 sps:$4 sm:$0xff]   ;;  %v5286_v16 = vld [vmem:[%s6003_s24 + $0x48] ss:$36 sps:$4 sm:$0xff]  }
  0x1c   : > { %2771 = vmatprep.subr.bf16.mxu1 %v5194_v17  ;;  %v5216_v32 = vld [vmem:[%s7603_s1 + $0x1e4] ss:$16 sps:$4 sm:$0xff]   ;;  %v5220_v34 = vld [vmem:[%s7603_s1 + $0x1e0] ss:$16 sps:$4 sm:$0xff]  }
  0x1d   : > { %v5218_v33 = vld [vmem:[%s7603_s1 + $0x3e4] ss:$16 sps:$4 sm:$0xff]   ;;  %v5221_v35 = vld [vmem:[%s7603_s1 + $0x3e0] ss:$16 sps:$4 sm:$0xff]  }
  0x1e   : > { %2649 = vmatpush1.bf16.msra.mxu0 %v5196_v18  ;;  %v5222_v36 = vld [vmem:[%s7603_s1 + $0x1c4] ss:$16 sps:$4 sm:$0xff]   ;;  %v5226_v38 = vld [vmem:[%s7603_s1 + $0x1c0] ss:$16 sps:$4 sm:$0xff]  }
  0x1f   : > { %2772 = vmatpush1.bf16.msra.mxu1 %v5197_v19  ;;  %2650 = vmatprep.subr.bf16.mxu0 %v5198_v20  ;;  %v5224_v37 = vld [vmem:[%s7603_s1 + $0x3c4] ss:$16 sps:$4 sm:$0xff]   ;;  %v5227_v39 = vld [vmem:[%s7603_s1 + $0x3c0] ss:$16 sps:$4 sm:$0xff]  }
  0x20   : > { %2773 = vmatprep.subr.bf16.mxu1 %v5200_v21  ;;  %v5228_v40 = vld [vmem:[%s7603_s1 + $0x1a4] ss:$16 sps:$4 sm:$0xff]   ;;  %v5232_v42 = vld [vmem:[%s7603_s1 + $0x1a0] ss:$16 sps:$4 sm:$0xff]  }
  0x21   : > { %v5230_v41 = vld [vmem:[%s7603_s1 + $0x3a4] ss:$16 sps:$4 sm:$0xff]   ;;  %v5233_v43 = vld [vmem:[%s7603_s1 + $0x3a0] ss:$16 sps:$4 sm:$0xff]  }
  0x22   : > { %2651 = vmatpush1.bf16.msra.mxu0 %v5202_v22  ;;  %v5234_v44 = vld [vmem:[%s7603_s1 + $0x184] ss:$16 sps:$4 sm:$0xff]   ;;  %v5238_v46 = vld [vmem:[%s7603_s1 + $0x180] ss:$16 sps:$4 sm:$0xff]  }
  0x23   : > { %2774 = vmatpush1.bf16.msra.mxu1 %v5203_v23  ;;  %2652 = vmatprep.subr.bf16.mxu0 %v5204_v24  ;;  %v5236_v45 = vld [vmem:[%s7603_s1 + $0x384] ss:$16 sps:$4 sm:$0xff]   ;;  %v5239_v47 = vld [vmem:[%s7603_s1 + $0x380] ss:$16 sps:$4 sm:$0xff]  }
  0x24   : > { %2775 = vmatprep.subr.bf16.mxu1 %v5206_v25  ;;  %v5240_v48 = vld [vmem:[%s7603_s1 + $0x164] ss:$16 sps:$4 sm:$0xff]   ;;  %v5269_v51 = vld [vmem:[%s6003_s24 + $0xc] ss:$36 sps:$4 sm:$0xff]   ;;  %v5299_v22 = vld [vmem:[%s6003_s24 + $0x9c] ss:$36 sps:$4 sm:$0xff]  }
  0x25   : > { %v5266_v49 = vld [vmem:[%s6003_s24 + $0x4] ss:$36 sps:$4 sm:$0xff]   ;;  %v5244_v52 = vld [vmem:[%s7603_s1 + $0x160] ss:$16 sps:$4 sm:$0xff]   ;;  %2795 = vmatprep.mubr.bf16.mxu1 %v5269_v51  ;;  %v5281_v10 = vld [vmem:[%s6003_s24 + $0x54] ss:$36 sps:$4 sm:$0xff]  }
  0x26   : > { %2653 = vmatpush1.bf16.msra.mxu0 %v5208_v26  ;;  %v5242_v50 = vld [vmem:[%s7603_s1 + $0x364] ss:$16 sps:$4 sm:$0xff]   ;;  %2672 = vmatprep.mubr.bf16.mxu0 %v5266_v49  ;;  %v5245_v53 = vld [vmem:[%s7603_s1 + $0x360] ss:$16 sps:$4 sm:$0xff]  }
  0x27   : > { %2776 = vmatpush1.bf16.msra.mxu1 %v5209_v27  ;;  %2654 = vmatprep.subr.bf16.mxu0 %v5210_v28  ;;  %v5246_v54 = vld [vmem:[%s7603_s1 + $0x144] ss:$16 sps:$4 sm:$0xff]   ;;  %v5250_v56 = vld [vmem:[%s7603_s1 + $0x140] ss:$16 sps:$4 sm:$0xff]  }
  0x28   : > { %2777 = vmatprep.subr.bf16.mxu1 %v5212_v29  ;;  %v5248_v55 = vld [vmem:[%s7603_s1 + $0x344] ss:$16 sps:$4 sm:$0xff]   ;;  %v5251_v57 = vld [vmem:[%s7603_s1 + $0x340] ss:$16 sps:$4 sm:$0xff]   ;;  %v5302_v29 = vld [vmem:[%s6003_s24 + $0x98] ss:$36 sps:$4 sm:$0xff]  }
  0x29   : > { %v5252_v58 = vld [vmem:[%s7603_s1 + $0x124] ss:$16 sps:$4 sm:$0xff]   ;;  %v5256_v60 = vld [vmem:[%s7603_s1 + $0x120] ss:$16 sps:$4 sm:$0xff]  }
  0x2a   : > { %2655 = vmatpush1.bf16.msra.mxu0 %v5214_v30  ;;  %v5254_v59 = vld [vmem:[%s7603_s1 + $0x324] ss:$16 sps:$4 sm:$0xff]   ;;  %v5257_v61 = vld [vmem:[%s7603_s1 + $0x320] ss:$16 sps:$4 sm:$0xff]  }
  0x2b   : > { %2778 = vmatpush1.bf16.msra.mxu1 %v5215_v31  ;;  %2656 = vmatprep.subr.bf16.mxu0 %v5216_v32  ;;  %v5258_v62 = vld [vmem:[%s7603_s1 + $0x104] ss:$16 sps:$4 sm:$0xff]   ;;  %v5262_v0 = vld [vmem:[%s7603_s1 + $0x100] ss:$16 sps:$4 sm:$0xff]  }
  0x2c   : > { %2779 = vmatprep.subr.bf16.mxu1 %v5218_v33  ;;  %v5260_v63 = vld [vmem:[%s7603_s1 + $0x304] ss:$16 sps:$4 sm:$0xff]   ;;  %v5263_v1 = vld [vmem:[%s7603_s1 + $0x300] ss:$16 sps:$4 sm:$0xff]  }
  0x2d   : > { %v5272_v2 = vld [vmem:[%s7603_s1 + $0x4e4] ss:$16 sps:$4 sm:$0xff]   ;;  %v5270_v6 = vld [vmem:[%s7603_s1 + $0x4e0] ss:$16 sps:$4 sm:$0xff]  }
  0x2e   : > { %2657 = vmatpush2.bf16.msra.mxu0 %v5220_v34  ;;  %v5264_v3 = vld [vmem:[%s6003_s24] ss:$36 sps:$4 sm:$0xff]   ;;  %v5279_v9 = vld [vmem:[%s6003_s24 + $0x4c] ss:$36 sps:$4 sm:$0xff]   ;;  %v5297_v21 = vld [vmem:[%s6003_s24 + $0x94] ss:$36 sps:$4 sm:$0xff]  }
  0x2f   : > { %2780 = vmatpush2.bf16.msra.mxu1 %v5221_v35  ;;  %2658 = vmatprep.subr.bf16.mxu0 %v5222_v36  ;;  %v5275_v4 = vld [vmem:[%s7603_s1 + $0x6e4] ss:$16 sps:$4 sm:$0xff]   ;;  %v5273_v7 = vld [vmem:[%s7603_s1 + $0x6e0] ss:$16 sps:$4 sm:$0xff]  }
  0x30   : > { %2781 = vmatprep.subr.bf16.mxu1 %v5224_v37  ;;  %v5278_v8 = vld [vmem:[%s7603_s1 + $0x4c4] ss:$16 sps:$4 sm:$0xff]   ;;  %v5276_v12 = vld [vmem:[%s7603_s1 + $0x4c0] ss:$16 sps:$4 sm:$0xff]  }
  0x31   : > { %v5285_v11 = vld [vmem:[%s7603_s1 + $0x6c4] ss:$16 sps:$4 sm:$0xff]   ;;  %v5283_v13 = vld [vmem:[%s7603_s1 + $0x6c0] ss:$16 sps:$4 sm:$0xff]  }
  0x32   : > { %2659 = vmatpush2.bf16.msra.mxu0 %v5226_v38  ;;  %v5290_v14 = vld [vmem:[%s7603_s1 + $0x4a4] ss:$16 sps:$4 sm:$0xff]   ;;  %v5288_v18 = vld [vmem:[%s7603_s1 + $0x4a0] ss:$16 sps:$4 sm:$0xff]  }
  0x33   : > { %2782 = vmatpush2.bf16.msra.mxu1 %v5227_v39  ;;  %2660 = vmatprep.subr.bf16.mxu0 %v5228_v40  ;;  %v5293_v15 = vld [vmem:[%s7603_s1 + $0x6a4] ss:$16 sps:$4 sm:$0xff]   ;;  %v5291_v19 = vld [vmem:[%s7603_s1 + $0x6a0] ss:$16 sps:$4 sm:$0xff]   ;;  %v5319_v40 = vld [vmem:[%s6003_s24 + $0xd8] ss:$36 sps:$4 sm:$0xff]  }
  0x34   : > { %2783 = vmatprep.subr.bf16.mxu1 %v5230_v41  ;;  %v5287_v17 = vld [vmem:[%s6003_s24 + $0x50] ss:$36 sps:$4 sm:$0xff]   ;;  %v5312_v32 = vld [vmem:[%s6003_s24 + $0xdc] ss:$36 sps:$4 sm:$0xff]   ;;  %v5314_v33 = vld [vmem:[%s6003_s24 + $0xe4] ss:$36 sps:$4 sm:$0xff]  }
  0x35   : > { %v5296_v20 = vld [vmem:[%s7603_s1 + $0x484] ss:$16 sps:$4 sm:$0xff]   ;;  %v5294_v24 = vld [vmem:[%s7603_s1 + $0x480] ss:$16 sps:$4 sm:$0xff]  }
  0x36   : > { %2661 = vmatpush2.bf16.msra.mxu0 %v5232_v42  ;;  %v5305_v23 = vld [vmem:[%s7603_s1 + $0x684] ss:$16 sps:$4 sm:$0xff]   ;;  %v5303_v25 = vld [vmem:[%s7603_s1 + $0x680] ss:$16 sps:$4 sm:$0xff]  }
  0x37   : > { %2784 = vmatpush2.bf16.msra.mxu1 %v5233_v43  ;;  %2662 = vmatprep.subr.bf16.mxu0 %v5234_v44  ;;  %v5308_v26 = vld [vmem:[%s7603_s1 + $0x464] ss:$16 sps:$4 sm:$0xff]   ;;  %v5306_v30 = vld [vmem:[%s7603_s1 + $0x460] ss:$16 sps:$4 sm:$0xff]  }
  0x38   : > { %2785 = vmatprep.subr.bf16.mxu1 %v5236_v45  ;;  %v5311_v27 = vld [vmem:[%s7603_s1 + $0x664] ss:$16 sps:$4 sm:$0xff]   ;;  %v5309_v31 = vld [vmem:[%s7603_s1 + $0x660] ss:$16 sps:$4 sm:$0xff]  }
  0x39   : > { %v5301_v28 = vld [vmem:[%s6003_s24 + $0x90] ss:$36 sps:$4 sm:$0xff]   ;;  %v5320_v41 = vld [vmem:[%s6003_s24 + $0xe0] ss:$36 sps:$4 sm:$0xff]  }
  0x3a   : > { %2663 = vmatpush2.bf16.msra.mxu0 %v5238_v46  ;;  %v5318_v34 = vld [vmem:[%s7603_s1 + $0x444] ss:$16 sps:$4 sm:$0xff]   ;;  %v5316_v36 = vld [vmem:[%s7603_s1 + $0x440] ss:$16 sps:$4 sm:$0xff]  }
  0x3b   : > { %2786 = vmatpush2.bf16.msra.mxu1 %v5239_v47  ;;  %2664 = vmatprep.subr.bf16.mxu0 %v5240_v48  ;;  %v5323_v35 = vld [vmem:[%s7603_s1 + $0x644] ss:$16 sps:$4 sm:$0xff]   ;;  %v5321_v37 = vld [vmem:[%s7603_s1 + $0x640] ss:$16 sps:$4 sm:$0xff]  }
  0x3c   : > { %2787 = vmatprep.subr.bf16.mxu1 %v5242_v50  ;;  %v5326_v38 = vld [vmem:[%s7603_s1 + $0x424] ss:$16 sps:$4 sm:$0xff]   ;;  %v5324_v42 = vld [vmem:[%s7603_s1 + $0x420] ss:$16 sps:$4 sm:$0xff]  }
  0x3d   : > { %v5329_v39 = vld [vmem:[%s7603_s1 + $0x624] ss:$16 sps:$4 sm:$0xff]   ;;  %v5327_v43 = vld [vmem:[%s7603_s1 + $0x620] ss:$16 sps:$4 sm:$0xff]  }
  0x3e   : > { %2665 = vmatpush2.bf16.msra.mxu0 %v5244_v52  ;;  %v5330_v44 = vld [vmem:[%s6003_s24 + $0x124] ss:$36 sps:$4 sm:$0xff]   ;;  %v5332_v45 = vld [vmem:[%s6003_s24 + $0x12c] ss:$36 sps:$4 sm:$0xff]  }
  0x3f   : > { %2788 = vmatpush2.bf16.msra.mxu1 %v5245_v53  ;;  %2666 = vmatprep.subr.bf16.mxu0 %v5246_v54  ;;  %v5338_v46 = vld [vmem:[%s7603_s1 + $0x404] ss:$16 sps:$4 sm:$0xff]   ;;  %v5336_v48 = vld [vmem:[%s7603_s1 + $0x400] ss:$16 sps:$4 sm:$0xff]   ;;  %v5335_v53 = vld [vmem:[%s6003_s24 + $0x128] ss:$36 sps:$4 sm:$0xff]  }
  0x40   : > { %2789 = vmatprep.subr.bf16.mxu1 %v5248_v55  ;;  %v5341_v47 = vld [vmem:[%s7603_s1 + $0x604] ss:$16 sps:$4 sm:$0xff]   ;;  %v5339_v49 = vld [vmem:[%s7603_s1 + $0x600] ss:$16 sps:$4 sm:$0xff]  }
  0x41   : > { %v5344_v50 = vld [vmem:[%s7603_s1 + $0x5e4] ss:$16 sps:$4 sm:$0xff]   ;;  %v5342_v54 = vld [vmem:[%s7603_s1 + $0x5e0] ss:$16 sps:$4 sm:$0xff]  }
  0x42   : > { %2667 = vmatpush2.bf16.msra.mxu0 %v5250_v56  ;;  %v5347_v51 = vld [vmem:[%s7603_s1 + $0x7e4] ss:$16 sps:$4 sm:$0xff]   ;;  %v5345_v55 = vld [vmem:[%s7603_s1 + $0x7e0] ss:$16 sps:$4 sm:$0xff]  }
  0x43   : > { %2790 = vmatpush2.bf16.msra.mxu1 %v5251_v57  ;;  %2668 = vmatprep.subr.bf16.mxu0 %v5252_v58  ;;  %v5334_v52 = vld [vmem:[%s6003_s24 + $0x120] ss:$36 sps:$4 sm:$0xff]   ;;  %v5348_v56 = vld [vmem:[%s6003_s24 + $0x16c] ss:$36 sps:$4 sm:$0xff]   ;;  %v5350_v57 = vld [vmem:[%s6003_s24 + $0x174] ss:$36 sps:$4 sm:$0xff]  }
  0x44   : > { %2791 = vmatprep.subr.bf16.mxu1 %v5254_v59  ;;  %v5356_v58 = vld [vmem:[%s7603_s1 + $0x5c4] ss:$16 sps:$4 sm:$0xff]  }
  0x45   : > { %v5359_v59 = vld [vmem:[%s7603_s1 + $0x7c4] ss:$16 sps:$4 sm:$0xff]  }
  0x46   : > { %2669 = vmatpush2.bf16.msra.mxu0 %v5256_v60  ;;  %v5354_v60 = vld [vmem:[%s7603_s1 + $0x5c0] ss:$16 sps:$4 sm:$0xff]  }
  0x47   : > { %2792 = vmatpush2.bf16.msra.mxu1 %v5257_v61  ;;  %2670 = vmatprep.subr.bf16.mxu0 %v5258_v62  ;;  %v5357_v61 = vld [vmem:[%s7603_s1 + $0x7c0] ss:$16 sps:$4 sm:$0xff]   ;;  %v5352_v62 = vld [vmem:[%s6003_s24 + $0x168] ss:$36 sps:$4 sm:$0xff]  }
  0x48   : > { %2793 = vmatprep.subr.bf16.mxu1 %v5260_v63  ;;  %v5362_v63 = vld [vmem:[%s7603_s1 + $0x5a4] ss:$16 sps:$4 sm:$0xff]  }
  0x4a   : > { %2671 = vmatpush2.bf16.msra.mxu0 %v5262_v0  ;;  %v5369_v0 = vld [vmem:[%s7603_s1 + $0x7a4] ss:$16 sps:$4 sm:$0xff]  }
  0x4b   : > { %2794 = vmatpush2.bf16.msra.mxu1 %v5263_v1  ;;  %2886 = vmatprep.subr.bf16.mxu0 %v5272_v2  ;;  %v5353_v1 = vld [vmem:[%s6003_s24 + $0x170] ss:$36 sps:$4 sm:$0xff]  }
  0x4c   : > { %3009 = vmatprep.subr.bf16.mxu1 %v5275_v4  ;;  %v5360_v2 = vld [vmem:[%s7603_s1 + $0x5a0] ss:$16 sps:$4 sm:$0xff]  }
  0x4d   : > { %2673 = vmatmul.mubr.bf16.vlgmr.msra.gmra.mxu0 %v5264_v3  ;;  %v5363_v3 = vld [vmem:[%s6003_s24 + $0x1b4] ss:$36 sps:$4 sm:$0xff]   ;;  %v5365_v4 = vld [vmem:[%s6003_s24 + $0x1bc] ss:$36 sps:$4 sm:$0xff]  }
  0x4e   : > { %2796 = vmatmul.mubr.bf16.vlgmr.msra.gmra.mxu1 %v5267_v5  ;;  %2887 = vmatpush1.bf16.msra.mxu0 %v5270_v6  ;;  %v5367_v5 = vld [vmem:[%s7603_s1 + $0x7a0] ss:$16 sps:$4 sm:$0xff]   ;;  %v5374_v6 = vld [vmem:[%s7603_s1 + $0x584] ss:$16 sps:$4 sm:$0xff]  }
  0x4f   : > { %3010 = vmatpush1.bf16.msra.mxu1 %v5273_v7  ;;  %2888 = vmatprep.subr.bf16.mxu0 %v5278_v8  ;;  %v5377_v7 = vld [vmem:[%s7603_s1 + $0x784] ss:$16 sps:$4 sm:$0xff]   ;;  %v5372_v8 = vld [vmem:[%s7603_s1 + $0x580] ss:$16 sps:$4 sm:$0xff]  }
  0x50   : > { %2682 = vmatprep.mubr.bf16.mxu0 %v5279_v9  ;;  %2805 = vmatprep.mubr.bf16.mxu1 %v5281_v10  ;;  %v5375_v9 = vld [vmem:[%s7603_s1 + $0x780] ss:$16 sps:$4 sm:$0xff]  }
  0x51   : > { %3011 = vmatprep.subr.bf16.mxu1 %v5285_v11  ;;  %v5370_v10 = vld [vmem:[%s6003_s24 + $0x1b0] ss:$36 sps:$4 sm:$0xff]  }
  0x52   : > { %2889 = vmatpush1.bf16.msra.mxu0 %v5276_v12  ;;  %v5380_v11 = vld [vmem:[%s7603_s1 + $0x564] ss:$16 sps:$4 sm:$0xff]   ;;  %v5371_v12 = vld [vmem:[%s6003_s24 + $0x1b8] ss:$36 sps:$4 sm:$0xff]  }
  0x53   : > { %3012 = vmatpush1.bf16.msra.mxu1 %v5283_v13  ;;  %2890 = vmatprep.subr.bf16.mxu0 %v5290_v14  ;;  %v5389_v13 = vld [vmem:[%s7603_s1 + $0x764] ss:$16 sps:$4 sm:$0xff]   ;;  %v5378_v14 = vld [vmem:[%s7603_s1 + $0x560] ss:$16 sps:$4 sm:$0xff]  }
  0x54   : > { %3013 = vmatprep.subr.bf16.mxu1 %v5293_v15  ;;  %v5381_v15 = vld [vmem:[%s6003_s24 + $0x1fc] ss:$36 sps:$4 sm:$0xff]  }
  0x55   : > { %2683 = vmatmul.mubr.bf16.gmra.mxu0 %v5286_v16  ;;  %v5383_v16 = vld [vmem:[%s6003_s24 + $0x204] ss:$36 sps:$4 sm:$0xff]  }
  0x56   : > { %2806 = vmatmul.mubr.bf16.gmra.mxu1 %v5287_v17  ;;  %2891 = vmatpush1.bf16.msra.mxu0 %v5288_v18  ;;  %v5387_v17 = vld [vmem:[%s7603_s1 + $0x760] ss:$16 sps:$4 sm:$0xff]   ;;  %v5392_v18 = vld [vmem:[%s7603_s1 + $0x544] ss:$16 sps:$4 sm:$0xff]  }
  0x57   : > { %3014 = vmatpush1.bf16.msra.mxu1 %v5291_v19  ;;  %2892 = vmatprep.subr.bf16.mxu0 %v5296_v20  ;;  %v5395_v19 = vld [vmem:[%s7603_s1 + $0x744] ss:$16 sps:$4 sm:$0xff]   ;;  %v5385_v20 = vld [vmem:[%s6003_s24 + $0x1f8] ss:$36 sps:$4 sm:$0xff]  }
  0x58   : > { %2692 = vmatprep.mubr.bf16.mxu0 %v5297_v21  ;;  %2815 = vmatprep.mubr.bf16.mxu1 %v5299_v22  ;;  %v5386_v21 = vld [vmem:[%s6003_s24 + $0x200] ss:$36 sps:$4 sm:$0xff]  }
  0x59   : > { %3015 = vmatprep.subr.bf16.mxu1 %v5305_v23  ;;  %v5390_v22 = vld [vmem:[%s7603_s1 + $0x540] ss:$16 sps:$4 sm:$0xff]  }
  0x5a   : > { %2893 = vmatpush1.bf16.msra.mxu0 %v5294_v24  ;;  %v5393_v23 = vld [vmem:[%s7603_s1 + $0x740] ss:$16 sps:$4 sm:$0xff]   ;;  %v5396_v24 = vld [vmem:[%s6003_s24 + $0x244] ss:$36 sps:$4 sm:$0xff]  }
  0x5b   : > { %3016 = vmatpush1.bf16.msra.mxu1 %v5303_v25  ;;  %2894 = vmatprep.subr.bf16.mxu0 %v5308_v26  ;;  %v5402_v25 = vld [vmem:[%s7603_s1 + $0x524] ss:$16 sps:$4 sm:$0xff]  }
  0x5c   : > { %3017 = vmatprep.subr.bf16.mxu1 %v5311_v27  ;;  %v5407_v26 = vld [vmem:[%s7603_s1 + $0x724] ss:$16 sps:$4 sm:$0xff]   ;;  %v5398_v27 = vld [vmem:[%s6003_s24 + $0x24c] ss:$36 sps:$4 sm:$0xff]  }
  0x5d   : > { %2693 = vmatmul.mubr.bf16.gmra.mxu0 %v5301_v28  ;;  %v5400_v28 = vld [vmem:[%s7603_s1 + $0x520] ss:$16 sps:$4 sm:$0xff]  }
  0x5e   : > { %2816 = vmatmul.mubr.bf16.gmra.mxu1 %v5302_v29  ;;  %2895 = vmatpush1.bf16.msra.mxu0 %v5306_v30  ;;  %v5405_v29 = vld [vmem:[%s7603_s1 + $0x720] ss:$16 sps:$4 sm:$0xff]   ;;  %v5410_v30 = vld [vmem:[%s7603_s1 + $0x504] ss:$16 sps:$4 sm:$0xff]  }
  0x5f   : > { %3018 = vmatpush1.bf16.msra.mxu1 %v5309_v31  ;;  %2702 = vmatprep.mubr.bf16.mxu0 %v5312_v32  ;;  %v5413_v31 = vld [vmem:[%s7603_s1 + $0x704] ss:$16 sps:$4 sm:$0xff]   ;;  %v5408_v32 = vld [vmem:[%s7603_s1 + $0x500] ss:$16 sps:$4 sm:$0xff]  }
  0x60   : > { %2825 = vmatprep.mubr.bf16.mxu1 %v5314_v33  ;;  %2896 = vmatprep.subr.bf16.mxu0 %v5318_v34  ;;  %v5403_v33 = vld [vmem:[%s6003_s24 + $0x240] ss:$36 sps:$4 sm:$0xff]  }
  0x61   : > { %3019 = vmatprep.subr.bf16.mxu1 %v5323_v35  ;;  %v5411_v34 = vld [vmem:[%s7603_s1 + $0x700] ss:$16 sps:$4 sm:$0xff]   ;;  %v5422_v35 = vld [vmem:[%s7603_s1 + $0x8e4] ss:$16 sps:$4 sm:$0xff]  }
  0x62   : > { %2897 = vmatpush1.bf16.msra.mxu0 %v5316_v36  ;;  %v5425_v36 = vld [vmem:[%s7603_s1 + $0xec] ss:$16 sps:$4 sm:$0xff]  }
  0x63   : > { %3020 = vmatpush1.bf16.msra.mxu1 %v5321_v37  ;;  %2898 = vmatprep.subr.bf16.mxu0 %v5326_v38  ;;  %v5404_v37 = vld [vmem:[%s6003_s24 + $0x248] ss:$36 sps:$4 sm:$0xff]   ;;  %v5416_v38 = vld [vmem:[%s6003_s24 + $0x14] ss:$36 sps:$4 sm:$0xff]  }
  0x64   : > { %3021 = vmatprep.subr.bf16.mxu1 %v5329_v39  ;;  %v5419_v39 = vld [vmem:[%s6003_s24 + $0x1c] ss:$36 sps:$4 sm:$0xff]  }
  0x65   : > { %2703 = vmatmul.mubr.bf16.gmra.mxu0 %v5319_v40  ;;  %v5414_v40 = vld [vmem:[%s6003_s24 + $0x10] ss:$36 sps:$4 sm:$0xff]  }
  0x66   : > { %2826 = vmatmul.mubr.bf16.gmra.mxu1 %v5320_v41  ;;  %2899 = vmatpush1.bf16.msra.mxu0 %v5324_v42  ;;  %v5417_v41 = vld [vmem:[%s6003_s24 + $0x18] ss:$36 sps:$4 sm:$0xff]   ;;  %v5420_v42 = vld [vmem:[%s7603_s1 + $0x8e0] ss:$16 sps:$4 sm:$0xff]  }
  0x67   : > { %3022 = vmatpush1.bf16.msra.mxu1 %v5327_v43  ;;  %2712 = vmatprep.mubr.bf16.mxu0 %v5330_v44  ;;  %v5423_v43 = vld [vmem:[%s7603_s1 + $0xe8] ss:$16 sps:$4 sm:$0xff]   ;;  %v5426_v44 = vld [vmem:[%s6003_s24 + $0x5c] ss:$36 sps:$4 sm:$0xff]  }
  0x68   : > { %2835 = vmatprep.mubr.bf16.mxu1 %v5332_v45  ;;  %2900 = vmatprep.subr.bf16.mxu0 %v5338_v46  ;;  %v5428_v45 = vld [vmem:[%s6003_s24 + $0x64] ss:$36 sps:$4 sm:$0xff]   ;;  %v5432_v46 = vld [vmem:[%s7603_s1 + $0xcc] ss:$16 sps:$4 sm:$0xff]  }
  0x69   : > { %3023 = vmatprep.subr.bf16.mxu1 %v5341_v47  ;;  %v5437_v47 = vld [vmem:[%s7603_s1 + $0x8c4] ss:$16 sps:$4 sm:$0xff]  }
  0x6a   : > { %2901 = vmatpush1.bf16.msra.mxu0 %v5336_v48  ;;  %v5430_v48 = vld [vmem:[%s7603_s1 + $0xc8] ss:$16 sps:$4 sm:$0xff]  }
  0x6b   : > { %3024 = vmatpush1.bf16.msra.mxu1 %v5339_v49  ;;  %2902 = vmatprep.subr.bf16.mxu0 %v5344_v50  ;;  %v5435_v49 = vld [vmem:[%s7603_s1 + $0x8c0] ss:$16 sps:$4 sm:$0xff]   ;;  %v5440_v50 = vld [vmem:[%s7603_s1 + $0xac] ss:$16 sps:$4 sm:$0xff]  }
  0x6c   : > { %3025 = vmatprep.subr.bf16.mxu1 %v5347_v51  ;;  %v5452_v51 = vld [vmem:[%s7603_s1 + $0x8a4] ss:$16 sps:$4 sm:$0xff]  }
  0x6d   : > { %2713 = vmatmul.mubr.bf16.gmra.mxu0 %v5334_v52  ;;  %v5433_v52 = vld [vmem:[%s6003_s24 + $0x58] ss:$36 sps:$4 sm:$0xff]  }
  0x6e   : > { %2836 = vmatmul.mubr.bf16.gmra.mxu1 %v5335_v53  ;;  %2903 = vmatpush2.bf16.msra.mxu0 %v5342_v54  ;;  %v5434_v53 = vld [vmem:[%s6003_s24 + $0x60] ss:$36 sps:$4 sm:$0xff]   ;;  %v5438_v54 = vld [vmem:[%s7603_s1 + $0xa8] ss:$16 sps:$4 sm:$0xff]  }
  0x6f   : > { %2722 = vmatprep.mubr.bf16.mxu0 %v5348_v56  ;;  %2845 = vmatprep.mubr.bf16.mxu1 %v5350_v57  ;;  %v5443_v56 = vld [vmem:[%s6003_s24 + $0xac] ss:$36 sps:$4 sm:$0xff]  }
  0x70   : > { %3026 = vmatpush2.bf16.msra.mxu1 %v5345_v55  ;;  %2904 = vmatprep.subr.bf16.mxu0 %v5356_v58  ;;  %v5441_v55 = vld [vmem:[%s6003_s24 + $0xa4] ss:$36 sps:$4 sm:$0xff]   ;;  %v5449_v57 = vld [vmem:[%s7603_s1 + $0x8c] ss:$16 sps:$4 sm:$0xff]   ;;  %v5450_v58 = vld [vmem:[%s7603_s1 + $0x8a0] ss:$16 sps:$4 sm:$0xff]  }
  0x71   : > { %3027 = vmatprep.subr.bf16.mxu1 %v5359_v59  ;;  %v5467_v59 = vld [vmem:[%s7603_s1 + $0x884] ss:$16 sps:$4 sm:$0xff]  }
  0x72   : > { %2905 = vmatpush2.bf16.msra.mxu0 %v5354_v60  ;;  %v5447_v60 = vld [vmem:[%s7603_s1 + $0x88] ss:$16 sps:$4 sm:$0xff]  }
  0x73   : > { %2906 = vmatprep.subr.bf16.mxu0 %v5362_v63  ;;  %v5446_v63 = vld [vmem:[%s6003_s24 + $0xa8] ss:$36 sps:$4 sm:$0xff]  }
  0x74   : > { %3028 = vmatpush2.bf16.msra.mxu1 %v5357_v61  ;;  %v5445_v61 = vld [vmem:[%s6003_s24 + $0xa0] ss:$36 sps:$4 sm:$0xff]  }
  0x75   : > { %3029 = vmatprep.subr.bf16.mxu1 %v5369_v0  ;;  %2723 = vmatmul.mubr.bf16.gmra.mxu0 %v5352_v62  ;;  %v5455_v62 = vld [vmem:[%s7603_s1 + $0x6c] ss:$16 sps:$4 sm:$0xff]   ;;  %v5465_v0 = vld [vmem:[%s7603_s1 + $0x880] ss:$16 sps:$4 sm:$0xff]  }
  0x76   : > { %2846 = vmatmul.mubr.bf16.gmra.mxu1 %v5353_v1  ;;  %2907 = vmatpush2.bf16.msra.mxu0 %v5360_v2  ;;  %v5453_v1 = vld [vmem:[%s7603_s1 + $0x68] ss:$16 sps:$4 sm:$0xff]   ;;  %v5456_v2 = vld [vmem:[%s6003_s24 + $0xec] ss:$36 sps:$4 sm:$0xff]  }
  0x77   : > { %2732 = vmatprep.mubr.bf16.mxu0 %v5363_v3  ;;  %2855 = vmatprep.mubr.bf16.mxu1 %v5365_v4  ;;  %v5458_v3 = vld [vmem:[%s6003_s24 + $0xf4] ss:$36 sps:$4 sm:$0xff]   ;;  %v5464_v4 = vld [vmem:[%s7603_s1 + $0x4c] ss:$16 sps:$4 sm:$0xff]  }
  0x78   : > { %3030 = vmatpush2.bf16.msra.mxu1 %v5367_v5  ;;  %2908 = vmatprep.subr.bf16.mxu0 %v5374_v6  ;;  %v5482_v5 = vld [vmem:[%s7603_s1 + $0x864] ss:$16 sps:$4 sm:$0xff]   ;;  %v5462_v6 = vld [vmem:[%s7603_s1 + $0x48] ss:$16 sps:$4 sm:$0xff]  }
  0x79   : > { %3031 = vmatprep.subr.bf16.mxu1 %v5377_v7  ;;  %v5480_v7 = vld [vmem:[%s7603_s1 + $0x860] ss:$16 sps:$4 sm:$0xff]  }
  0x7a   : > { %2909 = vmatpush2.bf16.msra.mxu0 %v5372_v8  ;;  %v5497_v8 = vld [vmem:[%s7603_s1 + $0x844] ss:$16 sps:$4 sm:$0xff]  }
  0x7b   : > { %2910 = vmatprep.subr.bf16.mxu0 %v5380_v11  ;;  %v5461_v11 = vld [vmem:[%s6003_s24 + $0xf0] ss:$36 sps:$4 sm:$0xff]  }
  0x7c   : > { %3032 = vmatpush2.bf16.msra.mxu1 %v5375_v9  ;;  %v5470_v9 = vld [vmem:[%s7603_s1 + $0x2c] ss:$16 sps:$4 sm:$0xff]  }
  0x7d   : > { %3033 = vmatprep.subr.bf16.mxu1 %v5389_v13  ;;  %2733 = vmatmul.mubr.bf16.gmra.mxu0 %v5370_v10  ;;  %v5460_v10 = vld [vmem:[%s6003_s24 + $0xe8] ss:$36 sps:$4 sm:$0xff]   ;;  %v5471_v13 = vld [vmem:[%s6003_s24 + $0x134] ss:$36 sps:$4 sm:$0xff]  }
  0x7e   : > { %2856 = vmatmul.mubr.bf16.gmra.mxu1 %v5371_v12  ;;  %2742 = vmatprep.mubr.bf16.mxu0 %v5381_v15  ;;  %v5468_v12 = vld [vmem:[%s7603_s1 + $0x28] ss:$16 sps:$4 sm:$0xff]   ;;  %v5479_v15 = vld [vmem:[%s7603_s1 + $0xc] ss:$16 sps:$4 sm:$0xff]  }
  0x7f   : > { %2865 = vmatprep.mubr.bf16.mxu1 %v5383_v16  ;;  %2911 = vmatpush2.bf16.msra.mxu0 %v5378_v14  ;;  %v5473_v14 = vld [vmem:[%s6003_s24 + $0x13c] ss:$36 sps:$4 sm:$0xff]  }
  0x80   : > { %3034 = vmatpush2.bf16.msra.mxu1 %v5387_v17  ;;  %2912 = vmatprep.subr.bf16.mxu0 %v5392_v18  ;;  %v5495_v16 = vld [vmem:[%s7603_s1 + $0x840] ss:$16 sps:$4 sm:$0xff]   ;;  %v5512_v17 = vld [vmem:[%s7603_s1 + $0x824] ss:$16 sps:$4 sm:$0xff]   ;;  %v5477_v18 = vld [vmem:[%s7603_s1 + $0x8] ss:$16 sps:$4 sm:$0xff]  }
  0x81   : > { %3035 = vmatprep.subr.bf16.mxu1 %v5395_v19  ;;  %v5475_v19 = vld [vmem:[%s6003_s24 + $0x130] ss:$36 sps:$4 sm:$0xff]  }
  0x83   : > { %2913 = vmatpush2.bf16.msra.mxu0 %v5390_v22  ;;  %v5510_v22 = vld [vmem:[%s7603_s1 + $0x820] ss:$16 sps:$4 sm:$0xff]  }
  0x84   : > { %3036 = vmatpush2.bf16.msra.mxu1 %v5393_v23  ;;  %2914 = vmatprep.subr.bf16.mxu0 %v5402_v25  ;;  %v5483_v23 = vld [vmem:[%s7603_s1 + $0x1e8] ss:$16 sps:$4 sm:$0xff]  }
  0x85   : > { %3037 = vmatprep.subr.bf16.mxu1 %v5407_v26  ;;  %2743 = vmatmul.mubr.bf16.gmra.mxu0 %v5385_v20  ;;  %v5476_v20 = vld [vmem:[%s6003_s24 + $0x138] ss:$36 sps:$4 sm:$0xff]   ;;  %v5488_v25 = vld [vmem:[%s6003_s24 + $0x184] ss:$36 sps:$4 sm:$0xff]  }
  0x86   : > { %2866 = vmatmul.mubr.bf16.gmra.mxu1 %v5386_v21  ;;  %2752 = vmatprep.mubr.bf16.mxu0 %v5396_v24  ;;  %v5485_v21 = vld [vmem:[%s7603_s1 + $0x1ec] ss:$16 sps:$4 sm:$0xff]  }
  0x87   : > { %2875 = vmatprep.mubr.bf16.mxu1 %v5398_v27  ;;  %2915 = vmatpush2.bf16.msra.mxu0 %v5400_v28  ;;  %v5486_v24 = vld [vmem:[%s6003_s24 + $0x17c] ss:$36 sps:$4 sm:$0xff]   ;;  %v5531_v27 = vld [vmem:[%s7603_s1 + $0x804] ss:$16 sps:$4 sm:$0xff]  }
  0x88   : > { %3038 = vmatpush2.bf16.msra.mxu1 %v5405_v29  ;;  %2916 = vmatprep.subr.bf16.mxu0 %v5410_v30  ;;  %v5494_v26 = vld [vmem:[%s7603_s1 + $0x1cc] ss:$16 sps:$4 sm:$0xff]   ;;  %v5529_v28 = vld [vmem:[%s7603_s1 + $0x800] ss:$16 sps:$4 sm:$0xff]  }
  0x89   : > { %3039 = vmatprep.subr.bf16.mxu1 %v5413_v31  ;;  %v5543_v29 = vld [vmem:[%s7603_s1 + $0x2ec] ss:$16 sps:$4 sm:$0xff]   ;;  %v5492_v31 = vld [vmem:[%s7603_s1 + $0x1c8] ss:$16 sps:$4 sm:$0xff]  }
  0x8a   : > { %v5490_v30 = vld [vmem:[%s6003_s24 + $0x178] ss:$36 sps:$4 sm:$0xff]  }
  0x8b   : > { %2917 = vmatpush2.bf16.msra.mxu0 %v5408_v32  ;;  %v5504_v32 = vld [vmem:[%s7603_s1 + $0x1ac] ss:$16 sps:$4 sm:$0xff]  }
  0x8c   : > { %3040 = vmatpush2.bf16.msra.mxu1 %v5411_v34  ;;  %3132 = vmatprep.subr.bf16.mxu0 %v5422_v35  ;;  %v5498_v34 = vld [vmem:[%s6003_s24 + $0x1c4] ss:$36 sps:$4 sm:$0xff]   ;;  %v5500_v35 = vld [vmem:[%s6003_s24 + $0x1cc] ss:$36 sps:$4 sm:$0xff]  }
  0x8d   : > { %3255 = vmatprep.subr.bf16.mxu1 %v5425_v36  ;;  %2753 = vmatmul.mubr.bf16.gmra.mxu0 %v5403_v33  ;;  %v5491_v33 = vld [vmem:[%s6003_s24 + $0x180] ss:$36 sps:$4 sm:$0xff]   ;;  %v5502_v36 = vld [vmem:[%s7603_s1 + $0x1a8] ss:$16 sps:$4 sm:$0xff]  }
  0x8e   : > { %2876 = vmatmul.mubr.bf16.gmra.mxu1 %v5404_v37  ;;  %2918 = vmatprep.mubr.bf16.mxu0 %v5416_v38  ;;  %v5509_v37 = vld [vmem:[%s7603_s1 + $0x18c] ss:$16 sps:$4 sm:$0xff]   ;;  %v5505_v38 = vld [vmem:[%s6003_s24 + $0x1c0] ss:$36 sps:$4 sm:$0xff]  }
  0x8f   : > { %3041 = vmatprep.mubr.bf16.mxu1 %v5419_v39  ;;  %v5507_v39 = vld [vmem:[%s7603_s1 + $0x188] ss:$16 sps:$4 sm:$0xff]  }
  0x95   : > { %2919 = vmatmul.mubr.bf16.vlgmr.msra.gmra.mxu0 %v5414_v40  ;;  %v5506_v40 = vld [vmem:[%s6003_s24 + $0x1c8] ss:$36 sps:$4 sm:$0xff]  }
  0x96   : > { %3042 = vmatmul.mubr.bf16.vlgmr.msra.gmra.mxu1 %v5417_v41  ;;  %3133 = vmatpush1.bf16.msra.mxu0 %v5420_v42  ;;  %v5521_v41 = vld [vmem:[%s7603_s1 + $0x16c] ss:$16 sps:$4 sm:$0xff]  }
  0x97   : > { %3256 = vmatpush1.bf16.msra.mxu1 %v5423_v43  ;;  %2928 = vmatprep.mubr.bf16.mxu0 %v5426_v44  ;;  %v5513_v42 = vld [vmem:[%s6003_s24 + $0x20c] ss:$36 sps:$4 sm:$0xff]   ;;  %v5515_v43 = vld [vmem:[%s6003_s24 + $0x214] ss:$36 sps:$4 sm:$0xff]  }
  0x98   : > { %3051 = vmatprep.mubr.bf16.mxu1 %v5428_v45  ;;  %3257 = vmatprep.subr.bf16.mxu1 %v5432_v46  ;;  %v5519_v44 = vld [vmem:[%s7603_s1 + $0x168] ss:$16 sps:$4 sm:$0xff]   ;;  %v5524_v45 = vld [vmem:[%s7603_s1 + $0x14c] ss:$16 sps:$4 sm:$0xff]  }
  0x99   : > { %3134 = vmatprep.subr.bf16.mxu0 %v5437_v47  ;;  %v5522_v46 = vld [vmem:[%s7603_s1 + $0x148] ss:$16 sps:$4 sm:$0xff]   ;;  %v5536_v47 = vld [vmem:[%s7603_s1 + $0x12c] ss:$16 sps:$4 sm:$0xff]  }
  0x9a   : > { %3135 = vmatpush1.bf16.msra.mxu0 %v5435_v49  ;;  %v5518_v49 = vld [vmem:[%s6003_s24 + $0x210] ss:$36 sps:$4 sm:$0xff]  }
  0x9b   : > { %3258 = vmatpush1.bf16.msra.mxu1 %v5430_v48  ;;  %3136 = vmatprep.subr.bf16.mxu0 %v5452_v51  ;;  %v5517_v48 = vld [vmem:[%s6003_s24 + $0x208] ss:$36 sps:$4 sm:$0xff]   ;;  %v5527_v51 = vld [vmem:[%s6003_s24 + $0x25c] ss:$36 sps:$4 sm:$0xff]  }
  0x9c   : > { %3259 = vmatprep.subr.bf16.mxu1 %v5440_v50  ;;  %v5525_v50 = vld [vmem:[%s6003_s24 + $0x254] ss:$36 sps:$4 sm:$0xff]  }
  0x9d   : > { %2929 = vmatmul.mubr.bf16.gmra.mxu0 %v5433_v52  ;;  %v5534_v52 = vld [vmem:[%s7603_s1 + $0x128] ss:$16 sps:$4 sm:$0xff]  }
  0x9e   : > { %3052 = vmatmul.mubr.bf16.gmra.mxu1 %v5434_v53  ;;  %2938 = vmatprep.mubr.bf16.mxu0 %v5441_v55  ;;  %v5539_v53 = vld [vmem:[%s7603_s1 + $0x10c] ss:$16 sps:$4 sm:$0xff]   ;;  %v5537_v55 = vld [vmem:[%s7603_s1 + $0x108] ss:$16 sps:$4 sm:$0xff]  }
  0x9f   : > { %3260 = vmatpush1.bf16.msra.mxu1 %v5438_v54  ;;  %3061 = vmatprep.mubr.bf16.mxu1 %v5443_v56  ;;  %v5532_v54 = vld [vmem:[%s6003_s24 + $0x250] ss:$36 sps:$4 sm:$0xff]   ;;  %v5546_v56 = vld [vmem:[%s7603_s1 + $0x4ec] ss:$16 sps:$4 sm:$0xff]  }
  0xa0   : > { %3261 = vmatprep.subr.bf16.mxu1 %v5449_v57  ;;  %3137 = vmatpush1.bf16.msra.mxu0 %v5450_v58  ;;  %v5533_v57 = vld [vmem:[%s6003_s24 + $0x258] ss:$36 sps:$4 sm:$0xff]   ;;  %v5815_v58 = vmov 0  }
  0xa1   : > { %3138 = vmatprep.subr.bf16.mxu0 %v5467_v59  ;;  %v5717_v59 = vld [vmem:[%s6003_s24 + $0x4] ss:$36 sps:$4 sm:$0xff]  }
  0xa3   : > { %3262 = vmatpush1.bf16.msra.mxu1 %v5447_v60  ;;  %v5540_v60 = vld [vmem:[%s6003_s24 + $0x20] ss:$36 sps:$4 sm:$0xff]  }
  0xa4   : > { %3263 = vmatprep.subr.bf16.mxu1 %v5455_v62  ;;  %3139 = vmatpush1.bf16.msra.mxu0 %v5465_v0  ;;  %v5544_v62 = vld [vmem:[%s7603_s1 + $0x4e8] ss:$16 sps:$4 sm:$0xff]   ;;  %v5552_v0 = vld [vmem:[%s7603_s1 + $0x4cc] ss:$16 sps:$4 sm:$0xff]  }
  0xa5   : > { %2939 = vmatmul.mubr.bf16.gmra.mxu0 %v5445_v61  ;;  %3140 = vmatprep.subr.bf16.mxu0 %v5482_v5  ;;  %v5541_v61 = vld [vmem:[%s7603_s1 + $0x2e8] ss:$16 sps:$4 sm:$0xff]   ;;  %v5559_v5 = vld [vmem:[%s7603_s1 + $0x4ac] ss:$16 sps:$4 sm:$0xff]  }
  0xa6   : > { %3062 = vmatmul.mubr.bf16.gmra.mxu1 %v5446_v63  ;;  %2948 = vmatprep.mubr.bf16.mxu0 %v5456_v2  ;;  %v5549_v63 = vld [vmem:[%s7603_s1 + $0x2cc] ss:$16 sps:$4 sm:$0xff]   ;;  %v5547_v2 = vld [vmem:[%s7603_s1 + $0x2c8] ss:$16 sps:$4 sm:$0xff]  }
  0xa7   : > { %3264 = vmatpush1.bf16.msra.mxu1 %v5453_v1  ;;  %3071 = vmatprep.mubr.bf16.mxu1 %v5458_v3  ;;  %v5718_v1 = vld [vmem:[%s6003_s24] ss:$36 sps:$4 sm:$0xff]   ;;  %v5550_v3 = vld [vmem:[%s7603_s1 + $0x4c8] ss:$16 sps:$4 sm:$0xff]  }
  0xa8   : > { %3265 = vmatprep.subr.bf16.mxu1 %v5464_v4  ;;  %3141 = vmatpush1.bf16.msra.mxu0 %v5480_v7  ;;  %v5556_v4 = vld [vmem:[%s7603_s1 + $0x2ac] ss:$16 sps:$4 sm:$0xff]  }
  0xa9   : > { %3142 = vmatprep.subr.bf16.mxu0 %v5497_v8  ;;  %v5553_v7 = vld [vmem:[%s6003_s24 + $0x68] ss:$36 sps:$4 sm:$0xff]  }
  0xaa   : > { %v5554_v8 = vld [vmem:[%s7603_s1 + $0x2a8] ss:$16 sps:$4 sm:$0xff]  }
  0xab   : > { %3266 = vmatpush1.bf16.msra.mxu1 %v5462_v6  ;;  %v5719_v6 = vld [vmem:[%s6003_s24 + $0x4c] ss:$36 sps:$4 sm:$0xff]  }
  0xac   : > { %3267 = vmatprep.subr.bf16.mxu1 %v5470_v9  ;;  %3143 = vmatpush1.bf16.msra.mxu0 %v5495_v16  ;;  %v5557_v9 = vld [vmem:[%s7603_s1 + $0x4a8] ss:$16 sps:$4 sm:$0xff]   ;;  %v5572_v16 = vld [vmem:[%s7603_s1 + $0x46c] ss:$16 sps:$4 sm:$0xff]  }
  0xad   : > { %2949 = vmatmul.mubr.bf16.gmra.mxu0 %v5460_v10  ;;  %3144 = vmatprep.subr.bf16.mxu0 %v5512_v17  ;;  %v5562_v10 = vld [vmem:[%s7603_s1 + $0x28c] ss:$16 sps:$4 sm:$0xff]   ;;  %v5721_v17 = vld [vmem:[%s6003_s24 + $0x94] ss:$36 sps:$4 sm:$0xff]  }
  0xae   : > { %3072 = vmatmul.mubr.bf16.gmra.mxu1 %v5461_v11  ;;  %2958 = vmatprep.mubr.bf16.mxu0 %v5471_v13  ;;  %v5566_v11 = vld [vmem:[%s7603_s1 + $0x48c] ss:$16 sps:$4 sm:$0xff]   ;;  %v5560_v13 = vld [vmem:[%s7603_s1 + $0x288] ss:$16 sps:$4 sm:$0xff]  }
  0xaf   : > { %3268 = vmatpush1.bf16.msra.mxu1 %v5468_v12  ;;  %3081 = vmatprep.mubr.bf16.mxu1 %v5473_v14  ;;  %v5720_v12 = vld [vmem:[%s6003_s24 + $0x48] ss:$36 sps:$4 sm:$0xff]  }
  0xb0   : > { %3269 = vmatprep.subr.bf16.mxu1 %v5479_v15  ;;  %3145 = vmatpush1.bf16.msra.mxu0 %v5510_v22  ;;  %v5564_v14 = vld [vmem:[%s7603_s1 + $0x488] ss:$16 sps:$4 sm:$0xff]   ;;  %v5569_v15 = vld [vmem:[%s7603_s1 + $0x26c] ss:$16 sps:$4 sm:$0xff]  }
  0xb1   : > { %3146 = vmatprep.subr.bf16.mxu0 %v5531_v27  ;;  %v5579_v22 = vld [vmem:[%s7603_s1 + $0x44c] ss:$16 sps:$4 sm:$0xff]  }
  0xb2   : > { %v5723_v27 = vld [vmem:[%s6003_s24 + $0xdc] ss:$36 sps:$4 sm:$0xff]  }
  0xb3   : > { %3270 = vmatpush1.bf16.msra.mxu1 %v5477_v18  ;;  %v6535_v18 = vld [vmem:[%s6003_s24 + $0xb0] ss:$36 sps:$4 sm:$0xff]  }
  0xb4   : > { %3271 = vmatprep.subr.bf16.mxu1 %v5485_v21  ;;  %3147 = vmatpush1.bf16.msra.mxu0 %v5529_v28  ;;  %v5575_v21 = vld [vmem:[%s7603_s1 + $0x24c] ss:$16 sps:$4 sm:$0xff]  }
  0xb5   : > { %2959 = vmatmul.mubr.bf16.gmra.mxu0 %v5475_v19  ;;  %3378 = vmatprep.subr.bf16.mxu0 %v5543_v29  ;;  %v5567_v19 = vld [vmem:[%s7603_s1 + $0x268] ss:$16 sps:$4 sm:$0xff]   ;;  %v5585_v28 = vld [vmem:[%s7603_s1 + $0x42c] ss:$16 sps:$4 sm:$0xff]  }
  0xb6   : > { %3082 = vmatmul.mubr.bf16.gmra.mxu1 %v5476_v20  ;;  %2968 = vmatprep.mubr.bf16.mxu0 %v5486_v24  ;;  %v5570_v20 = vld [vmem:[%s7603_s1 + $0x468] ss:$16 sps:$4 sm:$0xff]  }
  0xb7   : > { %3091 = vmatprep.mubr.bf16.mxu1 %v5488_v25  ;;  %3272 = vmatpush2.bf16.msra.mxu1 %v5483_v23  ;;  %v5722_v23 = vld [vmem:[%s6003_s24 + $0x90] ss:$36 sps:$4 sm:$0xff]   ;;  %v5573_v24 = vld [vmem:[%s7603_s1 + $0x248] ss:$16 sps:$4 sm:$0xff]  }
  0xb8   : > { %3273 = vmatprep.subr.bf16.mxu1 %v5494_v26  ;;  %v5577_v25 = vld [vmem:[%s7603_s1 + $0x448] ss:$16 sps:$4 sm:$0xff]   ;;  %v5582_v26 = vld [vmem:[%s7603_s1 + $0x22c] ss:$16 sps:$4 sm:$0xff]  }
  0xb9   : > { %v6566_v29 = vld [vmem:[%s6003_s24 + $0xf8] ss:$36 sps:$4 sm:$0xff]  }
  0xbb   : > { %3274 = vmatpush2.bf16.msra.mxu1 %v5492_v31  ;;  %v5583_v31 = vld [vmem:[%s7603_s1 + $0x428] ss:$16 sps:$4 sm:$0xff]  }
  0xbc   : > { %3275 = vmatprep.subr.bf16.mxu1 %v5504_v32  ;;  %v5589_v32 = vld [vmem:[%s7603_s1 + $0x20c] ss:$16 sps:$4 sm:$0xff]  }
  0xbd   : > { %2969 = vmatmul.mubr.bf16.gmra.mxu0 %v5490_v30  ;;  %v5580_v30 = vld [vmem:[%s7603_s1 + $0x228] ss:$16 sps:$4 sm:$0xff]  }
  0xbe   : > { %3092 = vmatmul.mubr.bf16.gmra.mxu1 %v5491_v33  ;;  %2978 = vmatprep.mubr.bf16.mxu0 %v5498_v34  ;;  %v5592_v33 = vld [vmem:[%s7603_s1 + $0x40c] ss:$16 sps:$4 sm:$0xff]  }
  0xbf   : > { %3101 = vmatprep.mubr.bf16.mxu1 %v5500_v35  ;;  %3276 = vmatpush2.bf16.msra.mxu1 %v5502_v36  ;;  %v5724_v34 = vld [vmem:[%s6003_s24 + $0xd8] ss:$36 sps:$4 sm:$0xff]  }
  0xc0   : > { %3277 = vmatprep.subr.bf16.mxu1 %v5509_v37  ;;  %v5587_v35 = vld [vmem:[%s7603_s1 + $0x208] ss:$16 sps:$4 sm:$0xff]   ;;  %v5595_v37 = vld [vmem:[%s7603_s1 + $0x3ec] ss:$16 sps:$4 sm:$0xff]  }
  0xc1   : > { %v5590_v36 = vld [vmem:[%s7603_s1 + $0x408] ss:$16 sps:$4 sm:$0xff]  }
  0xc3   : > { %3278 = vmatpush2.bf16.msra.mxu1 %v5507_v39  ;;  %v5598_v39 = vld [vmem:[%s7603_s1 + $0x5ec] ss:$16 sps:$4 sm:$0xff]  }
  0xc4   : > { %3279 = vmatprep.subr.bf16.mxu1 %v5521_v41  ;;  %v5593_v41 = vld [vmem:[%s7603_s1 + $0x3e8] ss:$16 sps:$4 sm:$0xff]  }
  0xc5   : > { %2979 = vmatmul.mubr.bf16.gmra.mxu0 %v5505_v38  ;;  %v5725_v38 = vld [vmem:[%s6003_s24 + $0x124] ss:$36 sps:$4 sm:$0xff]  }
  0xc6   : > { %3102 = vmatmul.mubr.bf16.gmra.mxu1 %v5506_v40  ;;  %2988 = vmatprep.mubr.bf16.mxu0 %v5513_v42  ;;  %v6597_v40 = vld [vmem:[%s6003_s24 + $0x140] ss:$36 sps:$4 sm:$0xff]   ;;  %v5596_v42 = vld [vmem:[%s7603_s1 + $0x5e8] ss:$16 sps:$4 sm:$0xff]  }
  0xc7   : > { %3111 = vmatprep.mubr.bf16.mxu1 %v5515_v43  ;;  %3280 = vmatpush2.bf16.msra.mxu1 %v5519_v44  ;;  %v5602_v43 = vld [vmem:[%s7603_s1 + $0x3cc] ss:$16 sps:$4 sm:$0xff]  }
  0xc8   : > { %3281 = vmatprep.subr.bf16.mxu1 %v5524_v45  ;;  %v5605_v44 = vld [vmem:[%s7603_s1 + $0x5cc] ss:$16 sps:$4 sm:$0xff]   ;;  %v5726_v45 = vld [vmem:[%s6003_s24 + $0x120] ss:$36 sps:$4 sm:$0xff]  }
  0xcb   : > { %3282 = vmatpush2.bf16.msra.mxu1 %v5522_v46  ;;  %v5600_v46 = vld [vmem:[%s7603_s1 + $0x3c8] ss:$16 sps:$4 sm:$0xff]  }
  0xcc   : > { %3283 = vmatprep.subr.bf16.mxu1 %v5536_v47  ;;  %v5603_v47 = vld [vmem:[%s7603_s1 + $0x5c8] ss:$16 sps:$4 sm:$0xff]  }
  0xcd   : > { %2989 = vmatmul.mubr.bf16.gmra.mxu0 %v5517_v48  ;;  %v5727_v48 = vld [vmem:[%s6003_s24 + $0x16c] ss:$36 sps:$4 sm:$0xff]  }
  0xce   : > { %3112 = vmatmul.mubr.bf16.gmra.mxu1 %v5518_v49  ;;  %2998 = vmatprep.mubr.bf16.mxu0 %v5525_v50  ;;  %v5608_v49 = vld [vmem:[%s7603_s1 + $0x3ac] ss:$16 sps:$4 sm:$0xff]  }
  0xcf   : > { %3121 = vmatprep.mubr.bf16.mxu1 %v5527_v51  ;;  %3284 = vmatpush2.bf16.msra.mxu1 %v5534_v52  ;;  %v5611_v50 = vld [vmem:[%s7603_s1 + $0x5ac] ss:$16 sps:$4 sm:$0xff]   ;;  %v5606_v52 = vld [vmem:[%s7603_s1 + $0x3a8] ss:$16 sps:$4 sm:$0xff]  }
  0xd0   : > { %3285 = vmatprep.subr.bf16.mxu1 %v5539_v53  ;;  %v6628_v51 = vld [vmem:[%s6003_s24 + $0x188] ss:$36 sps:$4 sm:$0xff]  }
  0xd1   : > { %v5609_v53 = vld [vmem:[%s7603_s1 + $0x5a8] ss:$16 sps:$4 sm:$0xff]  }
  0xd3   : > { %3286 = vmatpush2.bf16.msra.mxu1 %v5537_v55  ;;  %v5618_v55 = vld [vmem:[%s7603_s1 + $0x58c] ss:$16 sps:$4 sm:$0xff]  }
  0xd4   : > { %3501 = vmatprep.subr.bf16.mxu1 %v5546_v56  ;;  %v5728_v56 = vld [vmem:[%s6003_s24 + $0x168] ss:$36 sps:$4 sm:$0xff]  }
  0xd5   : > { %2999 = vmatmul.mubr.bf16.gmra.mxu0 %v5532_v54  ;;  %v5615_v54 = vld [vmem:[%s7603_s1 + $0x38c] ss:$16 sps:$4 sm:$0xff]  }
  0xd6   : > { %3122 = vmatmul.mubr.bf16.gmra.mxu1 %v5533_v57  ;;  %3164 = vmatprep.mubr.bf16.mxu0 %v5815_v58  ;;  %v5613_v57 = vld [vmem:[%s7603_s1 + $0x388] ss:$16 sps:$4 sm:$0xff]  }
  0xd7   : > { %3287 = vmatprep.mubr.bf16.mxu1 %v5717_v59  ;;  %v5729_v59 = vld [vmem:[%s6003_s24 + $0x1b4] ss:$36 sps:$4 sm:$0xff]  }
  0xdd   : > { %3165 = vmatmul.mubr.bf16.vlgmr.msra.gmra.mxu0 %v5540_v60  ;;  %v5616_v60 = vld [vmem:[%s7603_s1 + $0x588] ss:$16 sps:$4 sm:$0xff]  }
  0xde   : > { %3288 = vmatmul.mubr.bf16.vlgmr.msra.gmra.mxu1 %v5718_v1  ;;  %3379 = vmatpush1.bf16.msra.mxu0 %v5541_v61  ;;  %v5621_v61 = vld [vmem:[%s7603_s1 + $0x36c] ss:$16 sps:$4 sm:$0xff]   ;;  %v5623_v1 = vld [vmem:[%s7603_s1 + $0x568] ss:$16 sps:$4 sm:$0xff]  }
  0xdf   : > { %3502 = vmatpush1.bf16.msra.mxu1 %v5544_v62  ;;  %3380 = vmatprep.subr.bf16.mxu0 %v5549_v63  ;;  %v5625_v62 = vld [vmem:[%s7603_s1 + $0x56c] ss:$16 sps:$4 sm:$0xff]   ;;  %v6659_v63 = vld [vmem:[%s6003_s24 + $0x1d0] ss:$36 sps:$4 sm:$0xff]  }
  0xe0   : > { %3174 = vmatprep.mubr.bf16.mxu0 %v5815_v58  ;;  %3297 = vmatprep.mubr.bf16.mxu1 %v5719_v6  ;;  %v5730_v6 = vld [vmem:[%s6003_s24 + $0x1b0] ss:$36 sps:$4 sm:$0xff]  }
  0xe1   : > { %3503 = vmatprep.subr.bf16.mxu1 %v5552_v0  ;;  %v5619_v0 = vld [vmem:[%s7603_s1 + $0x368] ss:$16 sps:$4 sm:$0xff]  }
  0xe2   : > { %3381 = vmatpush1.bf16.msra.mxu0 %v5547_v2  ;;  %v5628_v2 = vld [vmem:[%s7603_s1 + $0x34c] ss:$16 sps:$4 sm:$0xff]  }
  0xe3   : > { %3504 = vmatpush1.bf16.msra.mxu1 %v5550_v3  ;;  %3382 = vmatprep.subr.bf16.mxu0 %v5556_v4  ;;  %v5631_v3 = vld [vmem:[%s7603_s1 + $0x54c] ss:$16 sps:$4 sm:$0xff]  }
  0xe4   : > { %3505 = vmatprep.subr.bf16.mxu1 %v5559_v5 }
  0xe5   : > { %3175 = vmatmul.mubr.bf16.gmra.mxu0 %v5553_v7 }
  0xe6   : > { %3298 = vmatmul.mubr.bf16.gmra.mxu1 %v5720_v12  ;;  %3383 = vmatpush1.bf16.msra.mxu0 %v5554_v8  ;;  %v5731_v8 = vld [vmem:[%s6003_s24 + $0x1fc] ss:$36 sps:$4 sm:$0xff]   ;;  %v5629_v12 = vld [vmem:[%s7603_s1 + $0x548] ss:$16 sps:$4 sm:$0xff]  }
  0xe7   : > { %3506 = vmatpush1.bf16.msra.mxu1 %v5557_v9  ;;  %3384 = vmatprep.subr.bf16.mxu0 %v5562_v10 }
  0xe8   : > { %3184 = vmatprep.mubr.bf16.mxu0 %v5815_v58  ;;  %3307 = vmatprep.mubr.bf16.mxu1 %v5721_v17 }
  0xe9   : > { %3507 = vmatprep.subr.bf16.mxu1 %v5566_v11  ;;  %v5626_v11 = vld [vmem:[%s7603_s1 + $0x348] ss:$16 sps:$4 sm:$0xff]  }
  0xea   : > { %3385 = vmatpush1.bf16.msra.mxu0 %v5560_v13 }
  0xeb   : > { %3508 = vmatpush1.bf16.msra.mxu1 %v5564_v14  ;;  %3386 = vmatprep.subr.bf16.mxu0 %v5569_v15  ;;  %v5634_v14 = vld [vmem:[%s7603_s1 + $0x32c] ss:$16 sps:$4 sm:$0xff]  }
  0xec   : > { %3509 = vmatprep.subr.bf16.mxu1 %v5572_v16  ;;  %v5638_v15 = vld [vmem:[%s7603_s1 + $0x52c] ss:$16 sps:$4 sm:$0xff]  }
  0xed   : > { %3185 = vmatmul.mubr.bf16.gmra.mxu0 %v6535_v18 }
  0xee   : > { %3308 = vmatmul.mubr.bf16.gmra.mxu1 %v5722_v23  ;;  %3387 = vmatpush1.bf16.msra.mxu0 %v5567_v19  ;;  %v6694_v19 = vld [vmem:[%s6003_s24 + $0x218] ss:$36 sps:$4 sm:$0xff]  }
  0xef   : > { %3510 = vmatpush1.bf16.msra.mxu1 %v5570_v20  ;;  %3194 = vmatprep.mubr.bf16.mxu0 %v5815_v58  ;;  %v5632_v23 = vld [vmem:[%s7603_s1 + $0x328] ss:$16 sps:$4 sm:$0xff]  }
  0xf0   : > { %3317 = vmatprep.mubr.bf16.mxu1 %v5723_v27  ;;  %3388 = vmatprep.subr.bf16.mxu0 %v5575_v21  ;;  %v5644_v27 = vld [vmem:[%s7603_s1 + $0x50c] ss:$16 sps:$4 sm:$0xff]  }
  0xf1   : > { %3511 = vmatprep.subr.bf16.mxu1 %v5579_v22 }
  0xf2   : > { %3389 = vmatpush1.bf16.msra.mxu0 %v5573_v24  ;;  %v5636_v24 = vld [vmem:[%s7603_s1 + $0x528] ss:$16 sps:$4 sm:$0xff]  }
  0xf3   : > { %3512 = vmatpush1.bf16.msra.mxu1 %v5577_v25  ;;  %3390 = vmatprep.subr.bf16.mxu0 %v5582_v26  ;;  %v5641_v26 = vld [vmem:[%s7603_s1 + $0x30c] ss:$16 sps:$4 sm:$0xff]  }
  0xf4   : > { %3513 = vmatprep.subr.bf16.mxu1 %v5585_v28 }
  0xf5   : > { %3195 = vmatmul.mubr.bf16.gmra.mxu0 %v6566_v29 }
  0xf6   : > { %3318 = vmatmul.mubr.bf16.gmra.mxu1 %v5724_v34  ;;  %3391 = vmatpush1.bf16.msra.mxu0 %v5580_v30 }
  0xf7   : > { %3514 = vmatpush1.bf16.msra.mxu1 %v5583_v31  ;;  %3204 = vmatprep.mubr.bf16.mxu0 %v5815_v58  ;;  %v5732_v31 = vld [vmem:[%s6003_s24 + $0x1f8] ss:$36 sps:$4 sm:$0xff]  }
  0xf8   : > { %3327 = vmatprep.mubr.bf16.mxu1 %v5725_v38  ;;  %3392 = vmatprep.subr.bf16.mxu0 %v5589_v32 }
  0xf9   : > { %3515 = vmatprep.subr.bf16.mxu1 %v5592_v33  ;;  %v5733_v33 = vld [vmem:[%s6003_s24 + $0x244] ss:$36 sps:$4 sm:$0xff]  }
  0xfa   : > { %3393 = vmatpush1.bf16.msra.mxu0 %v5587_v35 }
  0xfb   : > { %3516 = vmatpush1.bf16.msra.mxu1 %v5590_v36  ;;  %3394 = vmatprep.subr.bf16.mxu0 %v5595_v37  ;;  %v5639_v36 = vld [vmem:[%s7603_s1 + $0x308] ss:$16 sps:$4 sm:$0xff]  }
  0xfc   : > { %3517 = vmatprep.subr.bf16.mxu1 %v5598_v39  ;;  %v5642_v37 = vld [vmem:[%s7603_s1 + $0x508] ss:$16 sps:$4 sm:$0xff]   ;;  %v5647_v39 = vld [vmem:[%s7603_s1 + $0x6ec] ss:$16 sps:$4 sm:$0xff]  }
  0xfd   : > { %3205 = vmatmul.mubr.bf16.gmra.mxu0 %v6597_v40 }
  0xfe   : > { %3328 = vmatmul.mubr.bf16.gmra.mxu1 %v5726_v45  ;;  %3395 = vmatpush2.bf16.msra.mxu0 %v5593_v41  ;;  %v5650_v41 = vld [vmem:[%s7603_s1 + $0x8ec] ss:$16 sps:$4 sm:$0xff]  }
  0xff   : > { %3214 = vmatprep.mubr.bf16.mxu0 %v5815_v58  ;;  %3337 = vmatprep.mubr.bf16.mxu1 %v5727_v48 }
 0x100   : > { %3518 = vmatpush2.bf16.msra.mxu1 %v5596_v42  ;;  %3396 = vmatprep.subr.bf16.mxu0 %v5602_v43 }
 0x101   : > { %3519 = vmatprep.subr.bf16.mxu1 %v5605_v44  ;;  %v6733_v44 = vld [vmem:[%s6003_s24 + $0x260] ss:$36 sps:$4 sm:$0xff]  }
 0x102   : > { %3397 = vmatpush2.bf16.msra.mxu0 %v5600_v46 }
 0x103   : > { %3398 = vmatprep.subr.bf16.mxu0 %v5608_v49 }
 0x104   : > { %3520 = vmatpush2.bf16.msra.mxu1 %v5603_v47 }
 0x105   : > { %3521 = vmatprep.subr.bf16.mxu1 %v5611_v50  ;;  %3215 = vmatmul.mubr.bf16.gmra.mxu0 %v6628_v51 }
 0x106   : > { %3338 = vmatmul.mubr.bf16.gmra.mxu1 %v5728_v56  ;;  %3399 = vmatpush2.bf16.msra.mxu0 %v5606_v52  ;;  %v5734_v52 = vld [vmem:[%s6003_s24 + $0x240] ss:$36 sps:$4 sm:$0xff]  }
 0x107   : > { %3224 = vmatprep.mubr.bf16.mxu0 %v5815_v58  ;;  %3347 = vmatprep.mubr.bf16.mxu1 %v5729_v59 }
 0x108   : > { %3522 = vmatpush2.bf16.msra.mxu1 %v5609_v53  ;;  %3400 = vmatprep.subr.bf16.mxu0 %v5615_v54  ;;  %v5735_v54 = vld [vmem:[%s6003_s24 + $0xc] ss:$36 sps:$4 sm:$0xff]  }
 0x109   : > { %3523 = vmatprep.subr.bf16.mxu1 %v5618_v55  ;;  %v5736_v55 = vld [vmem:[%s6003_s24 + $0x14] ss:$36 sps:$4 sm:$0xff]  }
 0x10a   : > { %3401 = vmatpush2.bf16.msra.mxu0 %v5613_v57 }
 0x10b   : > { %3402 = vmatprep.subr.bf16.mxu0 %v5621_v61 }
 0x10c   : > { %3524 = vmatpush2.bf16.msra.mxu1 %v5616_v60 }
 0x10d   : > { %3525 = vmatprep.subr.bf16.mxu1 %v5625_v62  ;;  %v2674_v4 = vpop.f32.mrf.mxu0  ;;  %3225 = vmatmul.mubr.bf16.gmra.mxu0 %v6659_v63 }
 0x10e   : > { %v2797_v5 = vpop.f32.mrf.mxu1  ;;  %3348 = vmatmul.mubr.bf16.gmra.mxu1 %v5730_v6  ;;  %3234 = vmatprep.mubr.bf16.mxu0 %v5815_v58  ;;  %v5659_v6 = vld [vmem:[%s7603_s1 + $0x8cc] ss:$16 sps:$4 sm:$0xff]  }
 0x10f   : > { %v6675_v7 = vadd.f32 %v2797_v5, %v2674_v4  ;;  %3357 = vmatprep.mubr.bf16.mxu1 %v5731_v8  ;;  %v2676_v9 = vpop.f32.mrf.mxu0  ;;  %3403 = vmatpush2.bf16.msra.mxu0 %v5619_v0  ;;  %v5645_v0 = vld [vmem:[%s7603_s1 + $0x6e8] ss:$16 sps:$4 sm:$0xff]   ;;  %v5653_v4 = vld [vmem:[%s7603_s1 + $0x6cc] ss:$16 sps:$4 sm:$0xff]  }
 0x110   : > { %v2799_v10 = vpop.f32.mrf.mxu1  ;;  %3526 = vmatpush2.bf16.msra.mxu1 %v5623_v1  ;;  %3404 = vmatprep.subr.bf16.mxu0 %v5628_v2  ;;  %v5648_v1 = vld [vmem:[%s7603_s1 + $0x8e8] ss:$16 sps:$4 sm:$0xff]  }
 0x111   : > { %v6685_v13 = vadd.f32 %v2799_v10, %v2676_v9  ;;  %3527 = vmatprep.subr.bf16.mxu1 %v5631_v3  ;;  %v2678_v16 = vpop.f32.mrf.mxu0  ;;  %v5737_v10 = vld [vmem:[%s6003_s24 + $0x8] ss:$36 sps:$4 sm:$0xff]  }
 0x112   : > { %v2801_v17 = vpop.f32.mrf.mxu1 }
 0x113   : > { %v6696_v20 = vadd.f32 %v2801_v17, %v2678_v16  ;;  %v2680_v21 = vpop.f32.mrf.mxu0  ;;  %3405 = vmatpush2.bf16.msra.mxu0 %v5626_v11  ;;  %v5738_v11 = vld [vmem:[%s6003_s24 + $0x10] ss:$36 sps:$4 sm:$0xff]  }
 0x114   : > { %v2803_v22 = vpop.f32.mrf.mxu1  ;;  %3528 = vmatpush2.bf16.msra.mxu1 %v5629_v12  ;;  %3406 = vmatprep.subr.bf16.mxu0 %v5634_v14  ;;  %v5651_v14 = vld [vmem:[%s7603_s1 + $0x6c8] ss:$16 sps:$4 sm:$0xff]  }
 0x115   : > { %v6704_v25 = vadd.f32 %v2803_v22, %v2680_v21  ;;  %3529 = vmatprep.subr.bf16.mxu1 %v5638_v15  ;;  %v2684_v28 = vpop.f32.mrf.mxu0  ;;  %3235 = vmatmul.mubr.bf16.gmra.mxu0 %v6694_v19  ;;  %v5657_v15 = vld [vmem:[%s7603_s1 + $0x8c8] ss:$16 sps:$4 sm:$0xff]   ;;  %v5656_v22 = vld [vmem:[%s7603_s1 + $0x6ac] ss:$16 sps:$4 sm:$0xff]  }
 0x116   : > { %v2807_v30 = vpop.f32.mrf.mxu1  ;;  %3358 = vmatmul.mubr.bf16.gmra.mxu1 %v5732_v31  ;;  %3244 = vmatprep.mubr.bf16.mxu0 %v5815_v58  ;;  %v5739_v21 = vld [vmem:[%s6003_s24 + $0x54] ss:$36 sps:$4 sm:$0xff]  }
 0x117   : > { %v6714_v32 = vadd.f32 %v2807_v30, %v2684_v28  ;;  %3367 = vmatprep.mubr.bf16.mxu1 %v5733_v33  ;;  %v2686_v34 = vpop.f32.mrf.mxu0  ;;  %3407 = vmatpush2.bf16.msra.mxu0 %v5632_v23  ;;  %v5668_v23 = vld [vmem:[%s7603_s1 + $0x8ac] ss:$16 sps:$4 sm:$0xff]   ;;  %v5654_v31 = vld [vmem:[%s7603_s1 + $0x6a8] ss:$16 sps:$4 sm:$0xff]  }
 0x118   : > { %v2809_v35 = vpop.f32.mrf.mxu1  ;;  %3530 = vmatpush2.bf16.msra.mxu1 %v5636_v24  ;;  %3408 = vmatprep.subr.bf16.mxu0 %v5641_v26  ;;  %v5740_v26 = vld [vmem:[%s6003_s24 + $0x5c] ss:$36 sps:$4 sm:$0xff]  }
 0x119   : > { %v6724_v38 = vadd.f32 %v2809_v35, %v2686_v34  ;;  %3531 = vmatprep.subr.bf16.mxu1 %v5644_v27  ;;  %v2688_v42 = vpop.f32.mrf.mxu0  ;;  %v5662_v35 = vld [vmem:[%s7603_s1 + $0x68c] ss:$16 sps:$4 sm:$0xff]  }
 0x11a   : > { %v2811_v43 = vpop.f32.mrf.mxu1 }
 0x11b   : > { %v6735_v45 = vadd.f32 %v2811_v43, %v2688_v42  ;;  %v2690_v46 = vpop.f32.mrf.mxu0  ;;  %3409 = vmatpush2.bf16.msra.mxu0 %v5639_v36  ;;  %v5741_v42 = vld [vmem:[%s6003_s24 + $0x50] ss:$36 sps:$4 sm:$0xff]   ;;  %v5742_v43 = vld [vmem:[%s6003_s24 + $0x58] ss:$36 sps:$4 sm:$0xff]  }
 0x11c   : > { %v2813_v47 = vpop.f32.mrf.mxu1  ;;  %3532 = vmatpush2.bf16.msra.mxu1 %v5642_v37  ;;  %3624 = vmatprep.subr.bf16.mxu0 %v5647_v39  ;;  %v5666_v37 = vld [vmem:[%s7603_s1 + $0x8a8] ss:$16 sps:$4 sm:$0xff]  }
 0x11d   : > { %v6737_v48 = vadd.f32 %v2813_v47, %v2690_v46  ;;  %3747 = vmatprep.subr.bf16.mxu1 %v5650_v41  ;;  %v2694_v49 = vpop.f32.mrf.mxu0  ;;  %3245 = vmatmul.mubr.bf16.gmra.mxu0 %v6733_v44  ;;  %v5677_v46 = vld [vmem:[%s7603_s1 + $0x88c] ss:$16 sps:$4 sm:$0xff]  }
 0x11e   : > { %v2817_v50 = vpop.f32.mrf.mxu1  ;;  %3368 = vmatmul.mubr.bf16.gmra.mxu1 %v5734_v52  ;;  %3410 = vmatprep.mubr.bf16.mxu0 %v5735_v54 }
 0x11f   : > { %v6741_v53 = vadd.f32 %v2817_v50, %v2694_v49  ;;  %3533 = vmatprep.mubr.bf16.mxu1 %v5736_v55  ;;  %v2696_v56 = vpop.f32.mrf.mxu0  ;;  %v5660_v49 = vld [vmem:[%s7603_s1 + $0x688] ss:$16 sps:$4 sm:$0xff]   ;;  %v5743_v50 = vld [vmem:[%s6003_s24 + $0x9c] ss:$36 sps:$4 sm:$0xff]  }
 0x120   : > { %v2819_v57 = vpop.f32.mrf.mxu1  ;;  %v5744_v55 = vld [vmem:[%s6003_s24 + $0xa4] ss:$36 sps:$4 sm:$0xff]  }
 0x121   : > { %v6745_v59 = vadd.f32 %v2819_v57, %v2696_v56  ;;  %v2698_v60 = vpop.f32.mrf.mxu0  ;;  %v5665_v56 = vld [vmem:[%s7603_s1 + $0x66c] ss:$16 sps:$4 sm:$0xff]  }
 0x122   : > { %v2821_v61 = vpop.f32.mrf.mxu1 }
 0x123   : > { %v6747_v62 = vadd.f32 %v2821_v61, %v2698_v60  ;;  %v2700_v2 = vpop.f32.mrf.mxu0  ;;  %v5675_v60 = vld [vmem:[%s7603_s1 + $0x888] ss:$16 sps:$4 sm:$0xff]  }
 0x124   : > { %v2823_v3 = vpop.f32.mrf.mxu1 }
 0x125   : > { %v6758_v5 = vadd.f32 %v2823_v3, %v2700_v2  ;;  %v2704_v8 = vpop.f32.mrf.mxu0  ;;  %3411 = vmatmul.mubr.bf16.vlgmr.msra.gmra.mxu0 %v5737_v10  ;;  %v5663_v2 = vld [vmem:[%s7603_s1 + $0x668] ss:$16 sps:$4 sm:$0xff]  }
 0x126   : > { %v2827_v9 = vpop.f32.mrf.mxu1  ;;  %3534 = vmatmul.mubr.bf16.vlgmr.msra.gmra.mxu1 %v5738_v11  ;;  %3625 = vmatpush1.bf16.msra.mxu0 %v5645_v0 }
 0x127   : > { %v6765_v12 = vadd.f32 %v2827_v9, %v2704_v8  ;;  %3748 = vmatpush1.bf16.msra.mxu1 %v5648_v1  ;;  %v2706_v16 = vpop.f32.mrf.mxu0  ;;  %3626 = vmatprep.subr.bf16.mxu0 %v5653_v4  ;;  %v5686_v9 = vld [vmem:[%s7603_s1 + $0x86c] ss:$16 sps:$4 sm:$0xff]  }
 0x128   : > { %v2829_v17 = vpop.f32.mrf.mxu1  ;;  %3420 = vmatprep.mubr.bf16.mxu0 %v5739_v21  ;;  %3543 = vmatprep.mubr.bf16.mxu1 %v5740_v26  ;;  %v5747_v21 = vld [vmem:[%s6003_s24 + $0xe4] ss:$36 sps:$4 sm:$0xff]  }
 0x129   : > { %v6780_v24 = vadd.f32 %v2829_v17, %v2706_v16  ;;  %3749 = vmatprep.subr.bf16.mxu1 %v5659_v6  ;;  %v2708_v27 = vpop.f32.mrf.mxu0  ;;  %v5671_v6 = vld [vmem:[%s7603_s1 + $0x64c] ss:$16 sps:$4 sm:$0xff]   ;;  %v5684_v16 = vld [vmem:[%s7603_s1 + $0x868] ss:$16 sps:$4 sm:$0xff]  }
 0x12a   : > { %v2831_v28 = vpop.f32.mrf.mxu1  ;;  %3627 = vmatpush1.bf16.msra.mxu0 %v5651_v14  ;;  %v5745_v14 = vld [vmem:[%s6003_s24 + $0x98] ss:$36 sps:$4 sm:$0xff]  }
 0x12b   : > { %v6783_v30 = vadd.f32 %v2831_v28, %v2708_v27  ;;  %3750 = vmatpush1.bf16.msra.mxu1 %v5657_v15  ;;  %v2710_v33 = vpop.f32.mrf.mxu0  ;;  %3628 = vmatprep.subr.bf16.mxu0 %v5656_v22  ;;  %v5746_v15 = vld [vmem:[%s6003_s24 + $0xa0] ss:$36 sps:$4 sm:$0xff]   ;;  %v5669_v22 = vld [vmem:[%s7603_s1 + $0x648] ss:$16 sps:$4 sm:$0xff]   ;;  %v5748_v28 = vld [vmem:[%s6003_s24 + $0xec] ss:$36 sps:$4 sm:$0xff]  }
 0x12c   : > { %v2833_v34 = vpop.f32.mrf.mxu1  ;;  %3751 = vmatprep.subr.bf16.mxu1 %v5668_v23  ;;  %v5695_v23 = vld [vmem:[%s7603_s1 + $0x84c] ss:$16 sps:$4 sm:$0xff]  }
 0x12d   : > { %v6791_v36 = vadd.f32 %v2833_v34, %v2710_v33  ;;  %v2714_v39 = vpop.f32.mrf.mxu0  ;;  %3421 = vmatmul.mubr.bf16.gmra.mxu0 %v5741_v42 }
 0x12e   : > { %v2837_v41 = vpop.f32.mrf.mxu1  ;;  %3544 = vmatmul.mubr.bf16.gmra.mxu1 %v5742_v43  ;;  %3629 = vmatpush1.bf16.msra.mxu0 %v5654_v31  ;;  %v5674_v31 = vld [vmem:[%s7603_s1 + $0x62c] ss:$16 sps:$4 sm:$0xff]  }
 0x12f   : > { %v6801_v47 = vadd.f32 %v2837_v41, %v2714_v39  ;;  %3430 = vmatprep.mubr.bf16.mxu0 %v5743_v50  ;;  %v2716_v52 = vpop.f32.mrf.mxu0  ;;  %3630 = vmatprep.subr.bf16.mxu0 %v5662_v35  ;;  %v5672_v39 = vld [vmem:[%s7603_s1 + $0x628] ss:$16 sps:$4 sm:$0xff]   ;;  %v5680_v43 = vld [vmem:[%s7603_s1 + $0x60c] ss:$16 sps:$4 sm:$0xff]  }
 0x130   : > { %v2839_v54 = vpop.f32.mrf.mxu1  ;;  %3553 = vmatprep.mubr.bf16.mxu1 %v5744_v55  ;;  %3752 = vmatpush1.bf16.msra.mxu1 %v5666_v37  ;;  %v5750_v55 = vld [vmem:[%s6003_s24 + $0xe8] ss:$36 sps:$4 sm:$0xff]  }
 0x131   : > { %v6811_v57 = vadd.f32 %v2839_v54, %v2716_v52  ;;  %v2718_v61 = vpop.f32.mrf.mxu0  ;;  %3753 = vmatprep.subr.bf16.mxu1 %v5677_v46  ;;  %v5749_v54 = vld [vmem:[%s6003_s24 + $0xe0] ss:$36 sps:$4 sm:$0xff]  }
 0x132   : > { %v2841_v0 = vpop.f32.mrf.mxu1  ;;  %3631 = vmatpush1.bf16.msra.mxu0 %v5660_v49  ;;  %v5693_v49 = vld [vmem:[%s7603_s1 + $0x848] ss:$16 sps:$4 sm:$0xff]  }
 0x133   : > { %v6816_v1 = vadd.f32 %v2841_v0, %v2718_v61  ;;  %v2720_v3 = vpop.f32.mrf.mxu0  ;;  %3632 = vmatprep.subr.bf16.mxu0 %v5665_v56  ;;  %v5704_v56 = vld [vmem:[%s7603_s1 + $0x82c] ss:$16 sps:$4 sm:$0xff]   ;;  %v5678_v0 = vld [vmem:[%s7603_s1 + $0x608] ss:$16 sps:$4 sm:$0xff]  }
 0x134   : > { %v2843_v4 = vpop.f32.mrf.mxu1  ;;  %3754 = vmatpush1.bf16.msra.mxu1 %v5675_v60  ;;  %v5751_v61 = vld [vmem:[%s6003_s24 + $0x12c] ss:$36 sps:$4 sm:$0xff]  }
 0x135   : > { %v6824_v8 = vadd.f32 %v2843_v4, %v2720_v3  ;;  %v2724_v10 = vpop.f32.mrf.mxu0  ;;  %3431 = vmatmul.mubr.bf16.gmra.mxu0 %v5745_v14  ;;  %3755 = vmatprep.subr.bf16.mxu1 %v5686_v9  ;;  %v5752_v4 = vld [vmem:[%s6003_s24 + $0x134] ss:$36 sps:$4 sm:$0xff]  }
 0x136   : > { %v2847_v11 = vpop.f32.mrf.mxu1  ;;  %3554 = vmatmul.mubr.bf16.gmra.mxu1 %v5746_v15  ;;  %3633 = vmatpush1.bf16.msra.mxu0 %v5663_v2 }
 0x137   : > { %v6834_v17 = vadd.f32 %v2847_v11, %v2724_v10  ;;  %3440 = vmatprep.mubr.bf16.mxu0 %v5747_v21  ;;  %v2726_v26 = vpop.f32.mrf.mxu0  ;;  %3563 = vmatprep.mubr.bf16.mxu1 %v5748_v28  ;;  %v5702_v10 = vld [vmem:[%s7603_s1 + $0x828] ss:$16 sps:$4 sm:$0xff]  }
 0x138   : > { %v2849_v27 = vpop.f32.mrf.mxu1  ;;  %3634 = vmatprep.subr.bf16.mxu0 %v5671_v6  ;;  %3756 = vmatpush1.bf16.msra.mxu1 %v5684_v16  ;;  %v5683_v6 = vld [vmem:[%s7603_s1 + $0x7ec] ss:$16 sps:$4 sm:$0xff]   ;;  %v5681_v16 = vld [vmem:[%s7603_s1 + $0x7e8] ss:$16 sps:$4 sm:$0xff]  }
 0x139   : > { %v6847_v33 = vadd.f32 %v2849_v27, %v2726_v26  ;;  %v2728_v34 = vpop.f32.mrf.mxu0  ;;  %3757 = vmatprep.subr.bf16.mxu1 %v5695_v23  ;;  %v5689_v23 = vld [vmem:[%s7603_s1 + $0x7cc] ss:$16 sps:$4 sm:$0xff]  }
 0x13a   : > { %v2851_v35 = vpop.f32.mrf.mxu1  ;;  %3635 = vmatpush1.bf16.msra.mxu0 %v5669_v22  ;;  %v5713_v27 = vld [vmem:[%s7603_s1 + $0x80c] ss:$16 sps:$4 sm:$0xff]  }
 0x13b   : > { %v6849_v37 = vadd.f32 %v2851_v35, %v2728_v34  ;;  %v2730_v41 = vpop.f32.mrf.mxu0  ;;  %3636 = vmatprep.subr.bf16.mxu0 %v5674_v31  ;;  %v5753_v34 = vld [vmem:[%s6003_s24 + $0x128] ss:$36 sps:$4 sm:$0xff]   ;;  %v5754_v35 = vld [vmem:[%s6003_s24 + $0x130] ss:$36 sps:$4 sm:$0xff]  }
 0x13c   : > { %v2853_v42 = vpop.f32.mrf.mxu1  ;;  %3758 = vmatpush1.bf16.msra.mxu1 %v5693_v49 }
 0x13d   : > { %v6857_v46 = vadd.f32 %v2853_v42, %v2730_v41  ;;  %v2734_v50 = vpop.f32.mrf.mxu0  ;;  %3441 = vmatmul.mubr.bf16.gmra.mxu0 %v5749_v54  ;;  %3759 = vmatprep.subr.bf16.mxu1 %v5704_v56  ;;  %v5755_v42 = vld [vmem:[%s6003_s24 + $0x174] ss:$36 sps:$4 sm:$0xff]   ;;  %v5692_v54 = vld [vmem:[%s7603_s1 + $0x7ac] ss:$16 sps:$4 sm:$0xff]  }
 0x13e   : > { %v2857_v52 = vpop.f32.mrf.mxu1  ;;  %3564 = vmatmul.mubr.bf16.gmra.mxu1 %v5750_v55  ;;  %3637 = vmatpush1.bf16.msra.mxu0 %v5672_v39  ;;  %v5711_v39 = vld [vmem:[%s7603_s1 + $0x808] ss:$16 sps:$4 sm:$0xff]  }
 0x13f   : > { %v6867_v60 = vadd.f32 %v2857_v52, %v2734_v50  ;;  %3450 = vmatprep.mubr.bf16.mxu0 %v5751_v61  ;;  %v2736_v2 = vpop.f32.mrf.mxu0  ;;  %3573 = vmatprep.mubr.bf16.mxu1 %v5752_v4  ;;  %v5756_v52 = vld [vmem:[%s6003_s24 + $0x17c] ss:$36 sps:$4 sm:$0xff]  }
 0x140   : > { %v2859_v3 = vpop.f32.mrf.mxu1  ;;  %3638 = vmatprep.subr.bf16.mxu0 %v5680_v43  ;;  %3760 = vmatpush1.bf16.msra.mxu1 %v5702_v10  ;;  %v5687_v43 = vld [vmem:[%s7603_s1 + $0x7c8] ss:$16 sps:$4 sm:$0xff]  }
 0x141   : > { %v6877_v9 = vadd.f32 %v2859_v3, %v2736_v2  ;;  %v2738_v11 = vpop.f32.mrf.mxu0  ;;  %3761 = vmatprep.subr.bf16.mxu1 %v5713_v27  ;;  %v5690_v2 = vld [vmem:[%s7603_s1 + $0x7a8] ss:$16 sps:$4 sm:$0xff]  }
 0x142   : > { %v2861_v14 = vpop.f32.mrf.mxu1  ;;  %3639 = vmatpush1.bf16.msra.mxu0 %v5678_v0  ;;  %v5696_v27 = vld [vmem:[%s7603_s1 + $0x788] ss:$16 sps:$4 sm:$0xff]  }
 0x143   : > { %v6882_v15 = vadd.f32 %v2861_v14, %v2738_v11  ;;  %v2740_v21 = vpop.f32.mrf.mxu0  ;;  %3640 = vmatprep.subr.bf16.mxu0 %v5683_v6  ;;  %v5698_v6 = vld [vmem:[%s7603_s1 + $0x78c] ss:$16 sps:$4 sm:$0xff]  }
 0x144   : > { %v2863_v22 = vpop.f32.mrf.mxu1  ;;  %3762 = vmatpush1.bf16.msra.mxu1 %v5711_v39 }
 0x145   : > { %v6890_v26 = vadd.f32 %v2863_v22, %v2740_v21  ;;  %v2744_v28 = vpop.f32.mrf.mxu0  ;;  %3451 = vmatmul.mubr.bf16.gmra.mxu0 %v5753_v34  ;;  %v5758_v21 = vld [vmem:[%s6003_s24 + $0x178] ss:$36 sps:$4 sm:$0xff]   ;;  %v5760_v34 = vld [vmem:[%s6003_s24 + $0x1c4] ss:$36 sps:$4 sm:$0xff]  }
 0x146   : > { %v2867_v31 = vpop.f32.mrf.mxu1  ;;  %3574 = vmatmul.mubr.bf16.gmra.mxu1 %v5754_v35  ;;  %3641 = vmatpush2.bf16.msra.mxu0 %v5681_v16  ;;  %v5757_v16 = vld [vmem:[%s6003_s24 + $0x170] ss:$36 sps:$4 sm:$0xff]   ;;  %v5701_v35 = vld [vmem:[%s7603_s1 + $0x76c] ss:$16 sps:$4 sm:$0xff]  }
 0x147   : > { %v6900_v41 = vadd.f32 %v2867_v31, %v2744_v28  ;;  %3460 = vmatprep.mubr.bf16.mxu0 %v5755_v42  ;;  %v2746_v49 = vpop.f32.mrf.mxu0  ;;  %3583 = vmatprep.mubr.bf16.mxu1 %v5756_v52 }
 0x148   : > { %v2869_v50 = vpop.f32.mrf.mxu1  ;;  %3642 = vmatprep.subr.bf16.mxu0 %v5689_v23  ;;  %v5759_v23 = vld [vmem:[%s6003_s24 + $0x1bc] ss:$36 sps:$4 sm:$0xff]  }
 0x149   : > { %v6910_v55 = vadd.f32 %v2869_v50, %v2746_v49  ;;  %v2748_v56 = vpop.f32.mrf.mxu0 }
 0x14a   : > { %v2871_v61 = vpop.f32.mrf.mxu1  ;;  %3643 = vmatpush2.bf16.msra.mxu0 %v5687_v43 }
 0x14b   : > { %v6912_v0 = vadd.f32 %v2871_v61, %v2748_v56  ;;  %v2750_v3 = vpop.f32.mrf.mxu0  ;;  %3644 = vmatprep.subr.bf16.mxu0 %v5692_v54  ;;  %v5699_v54 = vld [vmem:[%s7603_s1 + $0x768] ss:$16 sps:$4 sm:$0xff]   ;;  %v5707_v61 = vld [vmem:[%s7603_s1 + $0x74c] ss:$16 sps:$4 sm:$0xff]  }
 0x14c   : > { %v2873_v4 = vpop.f32.mrf.mxu1 }
 0x14d   : > { %v6920_v10 = vadd.f32 %v2873_v4, %v2750_v3  ;;  %v2754_v11 = vpop.f32.mrf.mxu0  ;;  %3461 = vmatmul.mubr.bf16.gmra.mxu0 %v5757_v16  ;;  %v5761_v4 = vld [vmem:[%s6003_s24 + $0x1b8] ss:$36 sps:$4 sm:$0xff]   ;;  %v5764_v16 = vld [vmem:[%s6003_s24 + $0x20c] ss:$36 sps:$4 sm:$0xff]  }
 0x14e   : > { %v2877_v14 = vpop.f32.mrf.mxu1  ;;  %3584 = vmatmul.mubr.bf16.gmra.mxu1 %v5758_v21  ;;  %3645 = vmatpush2.bf16.msra.mxu0 %v5690_v2 }
 0x14f   : > { %v6924_v22 = vadd.f32 %v2877_v14, %v2754_v11  ;;  %3470 = vmatprep.mubr.bf16.mxu0 %v5759_v23  ;;  %v2756_v28 = vpop.f32.mrf.mxu0  ;;  %3593 = vmatprep.mubr.bf16.mxu1 %v5760_v34  ;;  %v5763_v14 = vld [vmem:[%s6003_s24 + $0x204] ss:$36 sps:$4 sm:$0xff]  }
 0x150   : > { %v2879_v31 = vpop.f32.mrf.mxu1  ;;  %3646 = vmatprep.subr.bf16.mxu0 %v5698_v6  ;;  %v5762_v6 = vld [vmem:[%s6003_s24 + $0x1c0] ss:$36 sps:$4 sm:$0xff]  }
 0x151   : > { %v6934_v39 = vadd.f32 %v2879_v31, %v2756_v28  ;;  %v2758_v42 = vpop.f32.mrf.mxu0 }
 0x152   : > { %v2881_v43 = vpop.f32.mrf.mxu1  ;;  %3647 = vmatpush2.bf16.msra.mxu0 %v5696_v27  ;;  %v5705_v27 = vld [vmem:[%s7603_s1 + $0x748] ss:$16 sps:$4 sm:$0xff]  }
 0x153   : > { %v6936_v49 = vadd.f32 %v2881_v43, %v2758_v42  ;;  %v2760_v50 = vpop.f32.mrf.mxu0  ;;  %3648 = vmatprep.subr.bf16.mxu0 %v5701_v35 }
 0x154   : > { %v2883_v52 = vpop.f32.mrf.mxu1 }
 0x155   : > { %v6941_v56 = vadd.f32 %v2883_v52, %v2760_v50  ;;  %v2920_v2 = vpop.f32.mrf.mxu0  ;;  %3471 = vmatmul.mubr.bf16.gmra.mxu0 %v5761_v4  ;;  %v5765_v4 = vld [vmem:[%s6003_s24 + $0x200] ss:$36 sps:$4 sm:$0xff]  }
 0x156   : > { %v3043_v3 = vpop.f32.mrf.mxu1  ;;  %3594 = vmatmul.mubr.bf16.gmra.mxu1 %v5762_v6  ;;  %v2921_v11 = vadd.f32 %v2920_v2, %v6675_v7  ;;  %3480 = vmatprep.mubr.bf16.mxu0 %v5763_v14  ;;  %v5710_v7 = vld [vmem:[%s7603_s1 + $0x72c] ss:$16 sps:$4 sm:$0xff]  }
 0x157   : > { %3603 = vmatprep.mubr.bf16.mxu1 %v5764_v16  ;;  %v2922_v21 = vpop.f32.mrf.mxu0  ;;  %3649 = vmatpush2.bf16.msra.mxu0 %v5699_v54  ;;  %v5716_v2 = vld [vmem:[%s7603_s1 + $0x70c] ss:$16 sps:$4 sm:$0xff]  }
 0x158   : > { %v3045_v23 = vpop.f32.mrf.mxu1  ;;  %v6954_v28 = vadd.f32 %v3043_v3, %v2921_v11  ;;  %v2923_v31 = vadd.f32 %v2922_v21, %v6685_v13  ;;  %3650 = vmatprep.subr.bf16.mxu0 %v5707_v61  ;;  %v5708_v13 = vld [vmem:[%s7603_s1 + $0x728] ss:$16 sps:$4 sm:$0xff]   ;;  %v5767_v16 = vld [vmem:[%s6003_s24 + $0x24c] ss:$36 sps:$4 sm:$0xff]  }
 0x159   : > { %v2924_v34 = vpop.f32.mrf.mxu0  ;;  %v5766_v6 = vld [vmem:[%s6003_s24 + $0x208] ss:$36 sps:$4 sm:$0xff]   ;;  %v5768_v21 = vld [vmem:[%s6003_s24 + $0x254] ss:$36 sps:$4 sm:$0xff]  }
 0x15a   : > { %v3047_v35 = vpop.f32.mrf.mxu1  ;;  %v6960_v42 = vadd.f32 %v3045_v23, %v2923_v31  ;;  %v2925_v43 = vadd.f32 %v2924_v34, %v6696_v20 }
 0x15b   : > { %v2926_v50 = vpop.f32.mrf.mxu0  ;;  %3651 = vmatpush2.bf16.msra.mxu0 %v5705_v27  ;;  %v5714_v27 = vld [vmem:[%s7603_s1 + $0x708] ss:$16 sps:$4 sm:$0xff]  }
 0x15c   : > { %v3049_v52 = vpop.f32.mrf.mxu1  ;;  %v6966_v54 = vadd.f32 %v3047_v35, %v2925_v43  ;;  %v2927_v61 = vadd.f32 %v2926_v50, %v6704_v25  ;;  %3652 = vmatprep.subr.bf16.mxu0 %v5710_v7 }
 0x15d   : > { %v2930_v3 = vpop.f32.mrf.mxu0  ;;  %3481 = vmatmul.mubr.bf16.gmra.mxu0 %v5765_v4  ;;  %v5769_v4 = vld [vmem:[%s6003_s24 + $0x248] ss:$36 sps:$4 sm:$0xff]  }
 0x15e   : > { %v3053_v20 = vpop.f32.mrf.mxu1  ;;  %3604 = vmatmul.mubr.bf16.gmra.mxu1 %v5766_v6  ;;  %v6974_v11 = vadd.f32 %v3049_v52, %v2927_v61  ;;  %v2931_v14 = vadd.f32 %v2930_v3, %v6714_v32  ;;  %3490 = vmatprep.mubr.bf16.mxu0 %v5767_v16 }
 0x15f   : > { %3613 = vmatprep.mubr.bf16.mxu1 %v5768_v21  ;;  %v2932_v25 = vpop.f32.mrf.mxu0  ;;  %3653 = vmatpush2.bf16.msra.mxu0 %v5708_v13 }
 0x160   : > { %v3055_v23 = vpop.f32.mrf.mxu1  ;;  %v6982_v31 = vadd.f32 %v3053_v20, %v2931_v14  ;;  %v2933_v7 = vadd.f32 %v2932_v25, %v6724_v38  ;;  %3654 = vmatprep.subr.bf16.mxu0 %v5716_v2  ;;  %v5770_v38 = vld [vmem:[%s6003_s24 + $0x250] ss:$36 sps:$4 sm:$0xff]   ;;  %v5771_v14 = vld [vmem:[%s6003_s24 + $0x1c] ss:$36 sps:$4 sm:$0xff]  }
 0x161   : > { %v2934_v34 = vpop.f32.mrf.mxu0 }
 0x162   : > { %v3057_v32 = vpop.f32.mrf.mxu1  ;;  %v6985_v35 = vadd.f32 %v3055_v23, %v2933_v7  ;;  %v2935_v43 = vadd.f32 %v2934_v34, %v6735_v45 }
 0x163   : > { %v2936_v50 = vpop.f32.mrf.mxu0  ;;  %3655 = vmatpush2.bf16.msra.mxu0 %v5714_v27 }
 0x164   : > { %v3059_v52 = vpop.f32.mrf.mxu1  ;;  %v6988_v13 = vadd.f32 %v3057_v32, %v2935_v43  ;;  %v2937_v61 = vadd.f32 %v2936_v50, %v6737_v48 }
 0x165   : > { %v2940_v3 = vpop.f32.mrf.mxu0  ;;  %3491 = vmatmul.mubr.bf16.gmra.mxu0 %v5769_v4  ;;  %v5774_v4 = vld [vmem:[%s6003_s24 + $0x64] ss:$36 sps:$4 sm:$0xff]  }
 0x166   : > { %v3063_v20 = vpop.f32.mrf.mxu1  ;;  %3614 = vmatmul.mubr.bf16.gmra.mxu1 %v5770_v38  ;;  %v6993_v2 = vadd.f32 %v3059_v52, %v2937_v61  ;;  %v2941_v6 = vadd.f32 %v2940_v3, %v6741_v53  ;;  %3656 = vmatprep.mubr.bf16.mxu0 %v5771_v14  ;;  %v5772_v61 = vld [vmem:[%s6003_s24 + $0x18] ss:$36 sps:$4 sm:$0xff]   ;;  %v5773_v3 = vld [vmem:[%s6003_s24 + $0x20] ss:$36 sps:$4 sm:$0xff]  }
 0x167   : > { %3779 = vmatprep.mubr.bf16.mxu1 %v5815_v58  ;;  %v2942_v45 = vpop.f32.mrf.mxu0 }
 0x168   : > { %v3065_v16 = vpop.f32.mrf.mxu1  ;;  %v6998_v21 = vadd.f32 %v3063_v20, %v2941_v6  ;;  %v2943_v48 = vadd.f32 %v2942_v45, %v6745_v59 }
 0x169   : > { %v2944_v25 = vpop.f32.mrf.mxu0 }
 0x16a   : > { %v3067_v23 = vpop.f32.mrf.mxu1  ;;  %v7001_v27 = vadd.f32 %v3065_v16, %v2943_v48  ;;  %v2945_v7 = vadd.f32 %v2944_v25, %v6747_v62 }
 0x16b   : > { %v2946_v53 = vpop.f32.mrf.mxu0 }
 0x16c   : > { %v3069_v34 = vpop.f32.mrf.mxu1  ;;  %v7004_v32 = vadd.f32 %v3067_v23, %v2945_v7  ;;  %v2947_v43 = vadd.f32 %v2946_v53, %v6758_v5 }
 0x16d   : > { %v2950_v50 = vpop.f32.mrf.mxu0  ;;  %3657 = vmatmul.mubr.bf16.vlgmr.msra.gmra.mxu0 %v5772_v61  ;;  %v5777_v61 = vld [vmem:[%s6003_s24 + $0xac] ss:$36 sps:$4 sm:$0xff]  }
 0x16e   : > { %v3073_v52 = vpop.f32.mrf.mxu1  ;;  %3780 = vmatmul.mubr.bf16.vlgmr.msra.gmra.mxu1 %v5773_v3  ;;  %v7009_v59 = vadd.f32 %v3069_v34, %v2947_v43  ;;  %v2951_v20 = vadd.f32 %v2950_v50, %v6765_v12  ;;  %3666 = vmatprep.mubr.bf16.mxu0 %v5774_v4  ;;  %v5775_v43 = vld [vmem:[%s6003_s24 + $0x60] ss:$36 sps:$4 sm:$0xff]   ;;  %v5776_v50 = vld [vmem:[%s6003_s24 + $0x68] ss:$36 sps:$4 sm:$0xff]  }
 0x16f   : > { %3789 = vmatprep.mubr.bf16.mxu1 %v5815_v58  ;;  %v2952_v62 = vpop.f32.mrf.mxu0 }
 0x170   : > { %v3075_v38 = vpop.f32.mrf.mxu1  ;;  %v7014_v6 = vadd.f32 %v3073_v52, %v2951_v20  ;;  %v2953_v5 = vadd.f32 %v2952_v62, %v6780_v24 }
 0x171   : > { %v2954_v14 = vpop.f32.mrf.mxu0 }
 0x172   : > { %v3077_v45 = vpop.f32.mrf.mxu1  ;;  %v7017_v16 = vadd.f32 %v3075_v38, %v2953_v5  ;;  %v2955_v48 = vadd.f32 %v2954_v14, %v6783_v30 }
 0x173   : > { %v2956_v12 = vpop.f32.mrf.mxu0 }
 0x174   : > { %v3079_v25 = vpop.f32.mrf.mxu1  ;;  %v7020_v23 = vadd.f32 %v3077_v45, %v2955_v48  ;;  %v2957_v7 = vadd.f32 %v2956_v12, %v6791_v36 }
 0x175   : > { %v2960_v53 = vpop.f32.mrf.mxu0  ;;  %3667 = vmatmul.mubr.bf16.gmra.mxu0 %v5775_v43 }
 0x176   : > { %v3083_v34 = vpop.f32.mrf.mxu1  ;;  %3790 = vmatmul.mubr.bf16.gmra.mxu1 %v5776_v50  ;;  %v7025_v24 = vadd.f32 %v3079_v25, %v2957_v7  ;;  %v2961_v52 = vadd.f32 %v2960_v53, %v6801_v47  ;;  %3676 = vmatprep.mubr.bf16.mxu0 %v5777_v61  ;;  %v5778_v7 = vld [vmem:[%s6003_s24 + $0xa8] ss:$36 sps:$4 sm:$0xff]  }
 0x177   : > { %3799 = vmatprep.mubr.bf16.mxu1 %v5815_v58  ;;  %v2962_v30 = vpop.f32.mrf.mxu0 }
 0x178   : > { %v3085_v3 = vpop.f32.mrf.mxu1  ;;  %v7030_v20 = vadd.f32 %v3083_v34, %v2961_v52  ;;  %v2963_v36 = vadd.f32 %v2962_v30, %v6811_v57  ;;  %v5779_v34 = vld [vmem:[%s6003_s24 + $0xf4] ss:$36 sps:$4 sm:$0xff]  }
 0x179   : > { %v2964_v4 = vpop.f32.mrf.mxu0 }
 0x17a   : > { %v3087_v62 = vpop.f32.mrf.mxu1  ;;  %v7033_v38 = vadd.f32 %v3085_v3, %v2963_v36  ;;  %v2965_v5 = vadd.f32 %v2964_v4, %v6816_v1 }
 0x17b   : > { %v2966_v14 = vpop.f32.mrf.mxu0 }
 0x17c   : > { %v3089_v47 = vpop.f32.mrf.mxu1  ;;  %v7036_v45 = vadd.f32 %v3087_v62, %v2965_v5  ;;  %v2967_v48 = vadd.f32 %v2966_v14, %v6824_v8  ;;  %v5780_v14 = vld [vmem:[%s6003_s24 + $0xf0] ss:$36 sps:$4 sm:$0xff]  }
 0x17d   : > { %v2970_v12 = vpop.f32.mrf.mxu0  ;;  %3677 = vmatmul.mubr.bf16.gmra.mxu0 %v5778_v7 }
 0x17e   : > { %v3093_v25 = vpop.f32.mrf.mxu1  ;;  %3800 = vmatmul.mubr.bf16.gmra.mxu1 %v6535_v18  ;;  %v7041_v57 = vadd.f32 %v3089_v47, %v2967_v48  ;;  %v2971_v53 = vadd.f32 %v2970_v12, %v6834_v17  ;;  %3686 = vmatprep.mubr.bf16.mxu0 %v5779_v34  ;;  %v5781_v48 = vld [vmem:[%s6003_s24 + $0x13c] ss:$36 sps:$4 sm:$0xff]  }
 0x17f   : > { %3809 = vmatprep.mubr.bf16.mxu1 %v5815_v58  ;;  %v2972_v1 = vpop.f32.mrf.mxu0 }
 0x180   : > { %v3095_v43 = vpop.f32.mrf.mxu1  ;;  %v7046_v50 = vadd.f32 %v3093_v25, %v2971_v53  ;;  %v2973_v8 = vadd.f32 %v2972_v1, %v6847_v33 }
 0x181   : > { %v2974_v52 = vpop.f32.mrf.mxu0 }
 0x182   : > { %v3097_v61 = vpop.f32.mrf.mxu1  ;;  %v7049_v30 = vadd.f32 %v3095_v43, %v2973_v8  ;;  %v2975_v18 = vadd.f32 %v2974_v52, %v6849_v37 }
 0x183   : > { %v2976_v3 = vpop.f32.mrf.mxu0 }
 0x184   : > { %v3099_v17 = vpop.f32.mrf.mxu1  ;;  %v7052_v36 = vadd.f32 %v3097_v61, %v2975_v18  ;;  %v2977_v4 = vadd.f32 %v2976_v3, %v6857_v46  ;;  %v5782_v18 = vld [vmem:[%s6003_s24 + $0x138] ss:$36 sps:$4 sm:$0xff]  }
 0x185   : > { %v2980_v62 = vpop.f32.mrf.mxu0  ;;  %3687 = vmatmul.mubr.bf16.gmra.mxu0 %v5780_v14 }
 0x186   : > { %v3103_v5 = vpop.f32.mrf.mxu1  ;;  %3810 = vmatmul.mubr.bf16.gmra.mxu1 %v6566_v29  ;;  %v7057_v33 = vadd.f32 %v3099_v17, %v2977_v4  ;;  %v2981_v47 = vadd.f32 %v2980_v62, %v6867_v60  ;;  %3696 = vmatprep.mubr.bf16.mxu0 %v5781_v48  ;;  %v5783_v17 = vld [vmem:[%s6003_s24 + $0x184] ss:$36 sps:$4 sm:$0xff]  }
 0x187   : > { %3819 = vmatprep.mubr.bf16.mxu1 %v5815_v58  ;;  %v2982_v37 = vpop.f32.mrf.mxu0 }
 0x188   : > { %v3105_v12 = vpop.f32.mrf.mxu1  ;;  %v7062_v25 = vadd.f32 %v3103_v5, %v2981_v47  ;;  %v2983_v46 = vadd.f32 %v2982_v37, %v6877_v9  ;;  %v4091_v5 = vlaneseq }
 0x189   : > { %v2984_v7 = vpop.f32.mrf.mxu0 }
 0x18a   : > { %v3107_v53 = vpop.f32.mrf.mxu1  ;;  %v7065_v34 = vadd.f32 %v3105_v12, %v2983_v46  ;;  %v2985_v29 = vadd.f32 %v2984_v7, %v6882_v15  ;;  %v7087_v7 = vshrl.u32 %v4091_v5, 7 }
 0x18b   : > { %v2986_v1 = vpop.f32.mrf.mxu0 }
 0x18c   : > { %v3109_v60 = vpop.f32.mrf.mxu1  ;;  %v7068_v43 = vadd.f32 %v3107_v53, %v2985_v29  ;;  %v2987_v8 = vadd.f32 %v2986_v1, %v6890_v26  ;;  %v5784_v1 = vld [vmem:[%s6003_s24 + $0x180] ss:$36 sps:$4 sm:$0xff]  }
 0x18d   : > { %v2990_v52 = vpop.f32.mrf.mxu0  ;;  %3697 = vmatmul.mubr.bf16.gmra.mxu0 %v5782_v18  ;;  %v4093_v18 = vsub.s32 0, %v7087_v7 }
 0x18e   : > { %v3113_v61 = vpop.f32.mrf.mxu1  ;;  %3820 = vmatmul.mubr.bf16.gmra.mxu1 %v6597_v40  ;;  %v7073_v9 = vadd.f32 %v3109_v60, %v2987_v8  ;;  %v2991_v3 = vadd.f32 %v2990_v52, %v6900_v41  ;;  %3706 = vmatprep.mubr.bf16.mxu0 %v5783_v17  ;;  %v5785_v8 = vld [vmem:[%s6003_s24 + $0x1cc] ss:$36 sps:$4 sm:$0xff]  }
 0x18f   : > { %3829 = vmatprep.mubr.bf16.mxu1 %v5815_v58  ;;  %v2992_v15 = vpop.f32.mrf.mxu0 }
 0x190   : > { %v3115_v4 = vpop.f32.mrf.mxu1  ;;  %v7078_v62 = vadd.f32 %v3113_v61, %v2991_v3  ;;  %v2993_v26 = vadd.f32 %v2992_v15, %v6910_v55 }
 0x191   : > { %v2994_v14 = vpop.f32.mrf.mxu0 }
 0x192   : > { %v3117_v47 = vpop.f32.mrf.mxu1  ;;  %v7081_v40 = vadd.f32 %v3115_v4, %v2993_v26  ;;  %v2995_v48 = vadd.f32 %v2994_v14, %v6912_v0  ;;  %v7111_v4 = vld [vmem:[%s7605_s3] sm:$0xf] }
 0x193   : > { %v2996_v41 = vpop.f32.mrf.mxu0 }
 0x194   : > { %v3119_v37 = vpop.f32.mrf.mxu1  ;;  %v7084_v12 = vadd.f32 %v3117_v47, %v2995_v48  ;;  %v2997_v46 = vadd.f32 %v2996_v41, %v6920_v10 }
 0x195   : > { %v3000_v53 = vpop.f32.mrf.mxu0  ;;  %3707 = vmatmul.mubr.bf16.gmra.mxu0 %v5784_v1 }
 0x196   : > { %v3123_v29 = vpop.f32.mrf.mxu1  ;;  %3830 = vmatmul.mubr.bf16.gmra.mxu1 %v6628_v51  ;;  %v7091_v55 = vadd.f32 %v3119_v37, %v2997_v46  ;;  %v3001_v60 = vadd.f32 %v3000_v53, %v6924_v22  ;;  %3716 = vmatprep.mubr.bf16.mxu0 %v5785_v8  ;;  %v7103_v51 = vld [vmem:[%s7604_s2] sm:$0xf]  ;;  %v5786_v46 = vld [vmem:[%s6003_s24 + $0x1c8] ss:$36 sps:$4 sm:$0xff]  }
 0x197   : > { %3839 = vmatprep.mubr.bf16.mxu1 %v5815_v58  ;;  %v3002_v0 = vpop.f32.mrf.mxu0  ;;  %v7118_v48 = vrot.slane %v7103_v51, %v4093_v18 }
 0x198   : > { %v3125_v52 = vpop.f32.mrf.mxu1  ;;  %v7096_v61 = vadd.f32 %v3123_v29, %v3001_v60  ;;  %v3003_v10 = vadd.f32 %v3002_v0, %v6934_v39  ;;  %v4097_v39 = vsub.s32 1, %v7087_v7 }
 0x199   : > { %v3004_v3 = vpop.f32.mrf.mxu0 }
 0x19a   : > { %v3127_v17 = vpop.f32.mrf.mxu1  ;;  %v7105_v22 = vadd.f32 %v3125_v52, %v3003_v10  ;;  %v3005_v15 = vadd.f32 %v3004_v3, %v6936_v49  ;;  %v7121_v49 = vrot.slane %v7111_v4, %v4093_v18  ;;  %v7131_v1 = vrot.slane %v7103_v51, %v4097_v39 }
 0x19b   : > { %v3006_v26 = vpop.f32.mrf.mxu0 }
 0x19c   : > { %v3129_v5 = vpop.f32.mrf.mxu1  ;;  %v7114_v14 = vadd.f32 %v3127_v17, %v3005_v15  ;;  %v3007_v47 = vadd.f32 %v3006_v26, %v6941_v56  ;;  %v5787_v56 = vld [vmem:[%s6003_s24 + $0x214] ss:$36 sps:$4 sm:$0xff]  }
 0x19d   : > { %v3166_v41 = vpop.f32.mrf.mxu0  ;;  %3717 = vmatmul.mubr.bf16.gmra.mxu0 %v5786_v46 }
 0x19e   : > { %v7123_v37 = vpop.f32.mrf.mxu1  ;;  %3840 = vmatmul.mubr.bf16.gmra.mxu1 %v6659_v63  ;;  %v7127_v53 = vadd.f32 %v3129_v5, %v3007_v47  ;;  %v3167_v29 = vadd.f32 %v3166_v41, %v6954_v28  ;;  %3726 = vmatprep.mubr.bf16.mxu0 %v5787_v56  ;;  %v7140_v63 = vrot.slane %v7111_v4, %v4097_v39 }
 0x19f   : > { %3849 = vmatprep.mubr.bf16.mxu1 %v5815_v58  ;;  %v3168_v60 = vpop.f32.mrf.mxu0 }
 0x1a0   : > { %v7135_v8 = vpop.f32.mrf.mxu1  ;;  %v4111_v0 = vmul.f32 %v7118_v48, %v3167_v29  ;;  %v3169_v52 = vadd.f32 %v3168_v60, %v6960_v42  ;;  %v5788_v29 = vld [vmem:[%s6003_s24 + $0x210] ss:$36 sps:$4 sm:$0xff]  }
 0x1a1   : > { %v3170_v28 = vpop.f32.mrf.mxu0 }
 0x1a2   : > { %v7142_v10 = vpop.f32.mrf.mxu1  ;;  %v4205_v18 = vadd.f32 %v7121_v49, %v4111_v0  ;;  %v4112_v3 = vmul.f32 %v7131_v1, %v3169_v52  ;;  %v3171_v17 = vadd.f32 %v3170_v28, %v6966_v54  ;;  %v5789_v52 = vld [vmem:[%s6003_s24 + $0x25c] ss:$36 sps:$4 sm:$0xff]  }
 0x1a3   : > { %v3172_v15 = vpop.f32.mrf.mxu0 }
 0x1a4   : > { %v7147_v26 = vpop.f32.mrf.mxu1  ;;  %v4206_v42 = vadd.f32 %v7140_v63, %v4112_v3  ;;  %v4115_v5 = vmul.f32 %v7118_v48, %v3171_v17  ;;  %v3173_v39 = vadd.f32 %v3172_v15, %v6974_v11  ;;  %v4277_v47 = vmax.f32 %v4205_v18, 0.0 }
 0x1a5   : > { %v3176_v41 = vpop.f32.mrf.mxu0  ;;  %3727 = vmatmul.mubr.bf16.gmra.mxu0 %v5788_v29 }
 0x1a6   : > { %v7153_v46 = vpop.f32.mrf.mxu1  ;;  %3850 = vmatmul.mubr.bf16.gmra.mxu1 %v6694_v19  ;;  %v4278_v54 = vmax.f32 %v4206_v42, 0.0  ;;  %v4209_v56 = vadd.f32 %v7121_v49, %v4115_v5  ;;  %v4116_v60 = vmul.f32 %v7131_v1, %v3173_v39  ;;  %v3177_v0 = vadd.f32 %v3176_v41, %v6982_v31  ;;  %3736 = vmatprep.mubr.bf16.mxu0 %v5789_v52 }
 0x1a7   : > { %3859 = vmatprep.mubr.bf16.mxu1 %v5815_v58  ;;  %v3178_v11 = vpop.f32.mrf.mxu0 }
 0x1a8   : > { %v7167_v28 = vpop.f32.mrf.mxu1  ;;  %v5106_v19 = vpack.c.bf16 %v4278_v54, %v4277_v47  ;;  %v4210_v18 = vadd.f32 %v7140_v63, %v4116_v60  ;;  %v4119_v3 = vmul.f32 %v7118_v48, %v3177_v0  ;;  %v3179_v31 = vadd.f32 %v3178_v11, %v6985_v35  ;;  %v5790_v11 = vld [vmem:[%s6003_s24 + $0x258] ss:$36 sps:$4 sm:$0xff]  }
 0x1a9   : > { %v3180_v17 = vpop.f32.mrf.mxu0  ;;  %v4281_v58 = vmax.f32 %v4209_v56, 0.0 }
 0x1aa   : > { %v7172_v15 = vpop.f32.mrf.mxu1  ;;  %4565 = vst [vmem:[%s7165_s9] sm:$0xff] %v5106_v19  ;;  %v4282_v42 = vmax.f32 %v4210_v18, 0.0  ;;  %v3181_v5 = vadd.f32 %v3180_v17, %v6988_v13  ;;  %v4213_v39 = vadd.f32 %v7121_v49, %v4119_v3  ;;  %v4120_v47 = vmul.f32 %v7131_v1, %v3179_v31 }
 0x1ab   : > { %v3182_v41 = vpop.f32.mrf.mxu0 }
 0x1ac   : > { %v7178_v29 = vpop.f32.mrf.mxu1  ;;  %v5108_v54 = vpack.c.bf16 %v4282_v42, %v4281_v58  ;;  %v4123_v35 = vmul.f32 %v7118_v48, %v3181_v5  ;;  %v3183_v60 = vadd.f32 %v3182_v41, %v6993_v2  ;;  %v4214_v0 = vadd.f32 %v7140_v63, %v4120_v47 }
 0x1ad   : > { %v3186_v52 = vpop.f32.mrf.mxu0  ;;  %3737 = vmatmul.mubr.bf16.gmra.mxu0 %v5790_v11  ;;  %v4285_v3 = vmax.f32 %v4213_v39, 0.0 }
 0x1ae   : > { %v7183_v56 = vpop.f32.mrf.mxu1  ;;  %3860 = vmatmul.mubr.bf16.gmra.mxu1 %v6733_v44  ;;  %4567 = vst [vmem:[%s7165_s9 + $0x10] sm:$0xff] %v5108_v54  ;;  %v4217_v13 = vadd.f32 %v7121_v49, %v4123_v35  ;;  %v4124_v19 = vmul.f32 %v7131_v1, %v3183_v60  ;;  %v3187_v18 = vadd.f32 %v3186_v52, %v6998_v21  ;;  %v4286_v31 = vmax.f32 %v4214_v0, 0.0 }
 0x1af   : > { %v3188_v2 = vpop.f32.mrf.mxu0 }
 0x1b0   : > { %v7191_v17 = vpop.f32.mrf.mxu1  ;;  %v4218_v58 = vadd.f32 %v7140_v63, %v4124_v19  ;;  %v4127_v42 = vmul.f32 %v7118_v48, %v3187_v18  ;;  %v3189_v5 = vadd.f32 %v3188_v2, %v7001_v27  ;;  %v5110_v44 = vpack.c.bf16 %v4286_v31, %v4285_v3 }
 0x1b1   : > { %v4289_v47 = vmax.f32 %v4217_v13, 0.0  ;;  %v3190_v41 = vpop.f32.mrf.mxu0 }
 0x1b2   : > { %v7196_v54 = vpop.f32.mrf.mxu1  ;;  %v4290_v35 = vmax.f32 %v4218_v58, 0.0  ;;  %v4221_v21 = vadd.f32 %v7121_v49, %v4127_v42  ;;  %v4128_v39 = vmul.f32 %v7131_v1, %v3189_v5  ;;  %v3191_v60 = vadd.f32 %v3190_v41, %v7004_v32  ;;  %4569 = vst [vmem:[%s7165_s9 + $0x20] sm:$0xff] %v5110_v44 }
 0x1b3   : > { %v3192_v0 = vpop.f32.mrf.mxu0 }
 0x1b4   : > { %v7202_v52 = vpop.f32.mrf.mxu1  ;;  %v5112_v11 = vpack.c.bf16 %v4290_v35, %v4289_v47  ;;  %v4222_v27 = vadd.f32 %v7140_v63, %v4128_v39  ;;  %v4131_v13 = vmul.f32 %v7118_v48, %v3191_v60  ;;  %v3193_v19 = vadd.f32 %v3192_v0, %v7009_v59 }
 0x1b5   : > { %v3196_v18 = vpop.f32.mrf.mxu0  ;;  %v4293_v31 = vmax.f32 %v4221_v21, 0.0 }
 0x1b6   : > { %v7207_v3 = vpop.f32.mrf.mxu1  ;;  %4571 = vst [vmem:[%s7165_s9 + $0x30] sm:$0xff] %v5112_v11  ;;  %v4294_v2 = vmax.f32 %v4222_v27, 0.0  ;;  %v3197_v32 = vadd.f32 %v3196_v18, %v7014_v6  ;;  %v4225_v58 = vadd.f32 %v7121_v49, %v4131_v13  ;;  %v4132_v42 = vmul.f32 %v7131_v1, %v3193_v19 }
 0x1b7   : > { %v3198_v5 = vpop.f32.mrf.mxu0 }
 0x1b8   : > { %v7213_v44 = vpop.f32.mrf.mxu1  ;;  %v5114_v47 = vpack.c.bf16 %v4294_v2, %v4293_v31  ;;  %v4135_v41 = vmul.f32 %v7118_v48, %v3197_v32  ;;  %v3199_v59 = vadd.f32 %v3198_v5, %v7017_v16  ;;  %v4226_v35 = vadd.f32 %v7140_v63, %v4132_v42 }
 0x1b9   : > { %v3200_v39 = vpop.f32.mrf.mxu0  ;;  %v4297_v11 = vmax.f32 %v4225_v58, 0.0 }
 0x1ba   : > { %v7218_v60 = vpop.f32.mrf.mxu1  ;;  %4573 = vst [vmem:[%s7165_s9 + $0x40] sm:$0xff] %v5114_v47  ;;  %v4229_v6 = vadd.f32 %v7121_v49, %v4135_v41  ;;  %v4136_v21 = vmul.f32 %v7131_v1, %v3199_v59  ;;  %v3201_v0 = vadd.f32 %v3200_v39, %v7020_v23  ;;  %v4298_v27 = vmax.f32 %v4226_v35, 0.0 }
 0x1bb   : > { %v3202_v13 = vpop.f32.mrf.mxu0 }
 0x1bc   : > { %v7224_v19 = vpop.f32.mrf.mxu1  ;;  %v4230_v16 = vadd.f32 %v7140_v63, %v4136_v21  ;;  %v4139_v18 = vmul.f32 %v7118_v48, %v3201_v0  ;;  %v3203_v31 = vadd.f32 %v3202_v13, %v7025_v24  ;;  %v5116_v2 = vpack.c.bf16 %v4298_v27, %v4297_v11 }
 0x1bd   : > { %v4301_v32 = vmax.f32 %v4229_v6, 0.0  ;;  %v3206_v42 = vpop.f32.mrf.mxu0 }
 0x1be   : > { %v7229_v5 = vpop.f32.mrf.mxu1  ;;  %v4302_v47 = vmax.f32 %v4230_v16, 0.0  ;;  %v4233_v23 = vadd.f32 %v7121_v49, %v4139_v18  ;;  %v4140_v58 = vmul.f32 %v7131_v1, %v3203_v31  ;;  %v3207_v41 = vadd.f32 %v3206_v42, %v7030_v20  ;;  %4575 = vst [vmem:[%s7165_s9 + $0x50] sm:$0xff] %v5116_v2 }
 0x1bf   : > { %v3208_v59 = vpop.f32.mrf.mxu0 }
 0x1c0   : > { %v7235_v35 = vpop.f32.mrf.mxu1  ;;  %v5118_v39 = vpack.c.bf16 %v4302_v47, %v4301_v32  ;;  %v4234_v24 = vadd.f32 %v7140_v63, %v4140_v58  ;;  %v4143_v6 = vmul.f32 %v7118_v48, %v3207_v41  ;;  %v3209_v21 = vadd.f32 %v3208_v59, %v7033_v38 }
 0x1c1   : > { %v3210_v0 = vpop.f32.mrf.mxu0  ;;  %v4305_v27 = vmax.f32 %v4233_v23, 0.0 }
 0x1c2   : > { %v7240_v11 = vpop.f32.mrf.mxu1  ;;  %4577 = vst [vmem:[%s7165_s9 + $0x60] sm:$0xff] %v5118_v39  ;;  %v4306_v13 = vmax.f32 %v4234_v24, 0.0  ;;  %v3211_v20 = vadd.f32 %v3210_v0, %v7036_v45  ;;  %v4237_v16 = vadd.f32 %v7121_v49, %v4143_v6  ;;  %v4144_v18 = vmul.f32 %v7131_v1, %v3209_v21 }
 0x1c3   : > { %v3212_v31 = vpop.f32.mrf.mxu0 }
 0x1c4   : > { %v7246_v2 = vpop.f32.mrf.mxu1  ;;  %v5120_v32 = vpack.c.bf16 %v4306_v13, %v4305_v27  ;;  %v4147_v42 = vmul.f32 %v7118_v48, %v3211_v20  ;;  %v3213_v38 = vadd.f32 %v3212_v31, %v7041_v57  ;;  %v4238_v47 = vadd.f32 %v7140_v63, %v4144_v18 }
 0x1c5   : > { %v3216_v58 = vpop.f32.mrf.mxu0  ;;  %v4309_v39 = vmax.f32 %v4237_v16, 0.0 }
 0x1c6   : > { %v7251_v41 = vpop.f32.mrf.mxu1  ;;  %4579 = vst [vmem:[%s7165_s9 + $0x70] sm:$0xff] %v5120_v32  ;;  %v4241_v45 = vadd.f32 %v7121_v49, %v4147_v42  ;;  %v4148_v23 = vmul.f32 %v7131_v1, %v3213_v38  ;;  %v3217_v59 = vadd.f32 %v3216_v58, %v7046_v50  ;;  %v4310_v24 = vmax.f32 %v4238_v47, 0.0 }
 0x1c7   : > { %v3218_v6 = vpop.f32.mrf.mxu0 }
 0x1c8   : > { %v7257_v21 = vpop.f32.mrf.mxu1  ;;  %v4242_v57 = vadd.f32 %v7140_v63, %v4148_v23  ;;  %v4151_v0 = vmul.f32 %v7118_v48, %v3217_v59  ;;  %v3219_v27 = vadd.f32 %v3218_v6, %v7049_v30  ;;  %v5122_v13 = vpack.c.bf16 %v4310_v24, %v4309_v39 }
 0x1c9   : > { %v4313_v20 = vmax.f32 %v4241_v45, 0.0  ;;  %v3220_v18 = vpop.f32.mrf.mxu0 }
 0x1ca   : > { %v7262_v31 = vpop.f32.mrf.mxu1  ;;  %v4314_v32 = vmax.f32 %v4242_v57, 0.0  ;;  %v4245_v50 = vadd.f32 %v7121_v49, %v4151_v0  ;;  %v4152_v16 = vmul.f32 %v7131_v1, %v3219_v27  ;;  %v3221_v42 = vadd.f32 %v3220_v18, %v7052_v36  ;;  %4581 = vst [vmem:[%s7165_s9 + $0x80] sm:$0xff] %v5122_v13 }
 0x1cb   : > { %v3222_v38 = vpop.f32.mrf.mxu0 }
 0x1cc   : > { %v7268_v47 = vpop.f32.mrf.mxu1  ;;  %v5124_v58 = vpack.c.bf16 %v4314_v32, %v4313_v20  ;;  %v4246_v30 = vadd.f32 %v7140_v63, %v4152_v16  ;;  %v4155_v45 = vmul.f32 %v7118_v48, %v3221_v42  ;;  %v3223_v23 = vadd.f32 %v3222_v38, %v7057_v33 }
 0x1cd   : > { %v3226_v59 = vpop.f32.mrf.mxu0  ;;  %v4317_v24 = vmax.f32 %v4245_v50, 0.0 }
 0x1ce   : > { %v7273_v39 = vpop.f32.mrf.mxu1  ;;  %4583 = vst [vmem:[%s7165_s9 + $0x90] sm:$0xff] %v5124_v58  ;;  %v4318_v6 = vmax.f32 %v4246_v30, 0.0  ;;  %v3227_v36 = vadd.f32 %v3226_v59, %v7062_v25  ;;  %v4249_v57 = vadd.f32 %v7121_v49, %v4155_v45  ;;  %v4156_v0 = vmul.f32 %v7131_v1, %v3223_v23 }
 0x1cf   : > { %v3228_v27 = vpop.f32.mrf.mxu0 }
 0x1d0   : > { %v7279_v13 = vpop.f32.mrf.mxu1  ;;  %v5126_v20 = vpack.c.bf16 %v4318_v6, %v4317_v24  ;;  %v4159_v18 = vmul.f32 %v7118_v48, %v3227_v36  ;;  %v3229_v33 = vadd.f32 %v3228_v27, %v7065_v34  ;;  %v4250_v32 = vadd.f32 %v7140_v63, %v4156_v0 }
 0x1d1   : > { %v3230_v16 = vpop.f32.mrf.mxu0  ;;  %v4321_v58 = vmax.f32 %v4249_v57, 0.0 }
 0x1d2   : > { %v7284_v42 = vpop.f32.mrf.mxu1  ;;  %4585 = vst [vmem:[%s7165_s9 + $0xa0] sm:$0xff] %v5126_v20  ;;  %v4253_v25 = vadd.f32 %v7121_v49, %v4159_v18  ;;  %v4160_v50 = vmul.f32 %v7131_v1, %v3229_v33  ;;  %v3231_v38 = vadd.f32 %v3230_v16, %v7068_v43  ;;  %v4322_v30 = vmax.f32 %v4250_v32, 0.0 }
 0x1d3   : > { %v3232_v45 = vpop.f32.mrf.mxu0 }
 0x1d4   : > { %v7290_v23 = vpop.f32.mrf.mxu1  ;;  %v4254_v34 = vadd.f32 %v7140_v63, %v4160_v50  ;;  %v4163_v59 = vmul.f32 %v7118_v48, %v3231_v38  ;;  %v3233_v24 = vadd.f32 %v3232_v45, %v7073_v9  ;;  %v5128_v6 = vpack.c.bf16 %v4322_v30, %v4321_v58 }
 0x1d5   : > { %v4325_v36 = vmax.f32 %v4253_v25, 0.0  ;;  %v3236_v0 = vpop.f32.mrf.mxu0 }
 0x1d6   : > { %v7295_v27 = vpop.f32.mrf.mxu1  ;;  %v4326_v20 = vmax.f32 %v4254_v34, 0.0  ;;  %v4257_v43 = vadd.f32 %v7121_v49, %v4163_v59  ;;  %v4164_v57 = vmul.f32 %v7131_v1, %v3233_v24  ;;  %v3237_v18 = vadd.f32 %v3236_v0, %v7078_v62  ;;  %4587 = vst [vmem:[%s7165_s9 + $0xb0] sm:$0xff] %v5128_v6 }
 0x1d7   : > { %v3238_v33 = vpop.f32.mrf.mxu0 }
 0x1d8   : > { %v7301_v32 = vpop.f32.mrf.mxu1  ;;  %v5130_v16 = vpack.c.bf16 %v4326_v20, %v4325_v36  ;;  %v4258_v9 = vadd.f32 %v7140_v63, %v4164_v57  ;;  %v4167_v25 = vmul.f32 %v7118_v48, %v3237_v18  ;;  %v3239_v50 = vadd.f32 %v3238_v33, %v7081_v40 }
 0x1d9   : > { %v3240_v38 = vpop.f32.mrf.mxu0  ;;  %v4329_v30 = vmax.f32 %v4257_v43, 0.0 }
 0x1da   : > { %v7306_v58 = vpop.f32.mrf.mxu1  ;;  %4589 = vst [vmem:[%s7165_s9 + $0xc0] sm:$0xff] %v5130_v16  ;;  %v4330_v45 = vmax.f32 %v4258_v9, 0.0  ;;  %v3241_v62 = vadd.f32 %v3240_v38, %v7084_v12  ;;  %v4261_v34 = vadd.f32 %v7121_v49, %v4167_v25  ;;  %v4168_v59 = vmul.f32 %v7131_v1, %v3239_v50 }
 0x1db   : > { %v3242_v24 = vpop.f32.mrf.mxu0 }
 0x1dc   : > { %v7312_v6 = vpop.f32.mrf.mxu1  ;;  %v5132_v36 = vpack.c.bf16 %v4330_v45, %v4329_v30  ;;  %v4171_v0 = vmul.f32 %v7118_v48, %v3241_v62  ;;  %v3243_v40 = vadd.f32 %v3242_v24, %v7091_v55  ;;  %v4262_v20 = vadd.f32 %v7140_v63, %v4168_v59 }
 0x1dd   : > { %v3246_v57 = vpop.f32.mrf.mxu0  ;;  %v4333_v16 = vmax.f32 %v4261_v34, 0.0 }
 0x1de   : > { %v7317_v18 = vpop.f32.mrf.mxu1  ;;  %4591 = vst [vmem:[%s7165_s9 + $0xd0] sm:$0xff] %v5132_v36  ;;  %v4265_v12 = vadd.f32 %v7121_v49, %v4171_v0  ;;  %v4172_v43 = vmul.f32 %v7131_v1, %v3243_v40  ;;  %v3247_v33 = vadd.f32 %v3246_v57, %v7096_v61  ;;  %v4334_v9 = vmax.f32 %v4262_v20, 0.0 }
 0x1df   : > { %v3248_v25 = vpop.f32.mrf.mxu0 }
 0x1e0   : > { %v7323_v50 = vpop.f32.mrf.mxu1  ;;  %v4266_v55 = vadd.f32 %v7140_v63, %v4172_v43  ;;  %v4175_v38 = vmul.f32 %v7118_v48, %v3247_v33  ;;  %v3249_v30 = vadd.f32 %v3248_v25, %v7105_v22  ;;  %v5134_v45 = vpack.c.bf16 %v4334_v9, %v4333_v16 }
 0x1e1   : > { %v4337_v62 = vmax.f32 %v4265_v12, 0.0  ;;  %v3250_v59 = vpop.f32.mrf.mxu0 }
 0x1e2   : > { %v7328_v24 = vpop.f32.mrf.mxu1  ;;  %v4338_v36 = vmax.f32 %v4266_v55, 0.0  ;;  %v4269_v61 = vadd.f32 %v7121_v49, %v4175_v38  ;;  %v4176_v34 = vmul.f32 %v7131_v1, %v3249_v30  ;;  %v3251_v0 = vadd.f32 %v3250_v59, %v7114_v14  ;;  %4593 = vst [vmem:[%s7165_s9 + $0xe0] sm:$0xff] %v5134_v45 }
 0x1e3   : > { %v3252_v40 = vpop.f32.mrf.mxu0 }
 0x1e4   : > { %v7334_v20 = vpop.f32.mrf.mxu1  ;;  %v5136_v57 = vpack.c.bf16 %v4338_v36, %v4337_v62  ;;  %v4270_v22 = vadd.f32 %v7140_v63, %v4176_v34  ;;  %v4179_v12 = vmul.f32 %v7118_v48, %v3251_v0  ;;  %v3253_v43 = vadd.f32 %v3252_v40, %v7127_v53 }
 0x1e5   : > { %v3412_v33 = vpop.f32.mrf.mxu0  ;;  %v4341_v9 = vmax.f32 %v4269_v61, 0.0 }
 0x1e6   : > { %v3535_v16 = vpop.f32.mrf.mxu1  ;;  %4595 = vst [vmem:[%s7165_s9 + $0xf0] sm:$0xff] %v5136_v57  ;;  %v4342_v25 = vmax.f32 %v4270_v22, 0.0  ;;  %v3413_v55 = vadd.f32 %v3412_v33, %v7123_v37  ;;  %v4273_v14 = vadd.f32 %v7121_v49, %v4179_v12  ;;  %v4180_v38 = vmul.f32 %v7131_v1, %v3253_v43 }
 0x1e7   : > { %v3414_v30 = vpop.f32.mrf.mxu0 }
 0x1e8   : > { %v3537_v45 = vpop.f32.mrf.mxu1  ;;  %v5138_v62 = vpack.c.bf16 %v4342_v25, %v4341_v9  ;;  %v7343_v59 = vadd.f32 %v3535_v16, %v3413_v55  ;;  %v3415_v48 = vadd.f32 %v3414_v30, %v7135_v8  ;;  %v4274_v53 = vadd.f32 %v7140_v63, %v4180_v38 }
 0x1e9   : > { %v3416_v36 = vpop.f32.mrf.mxu0  ;;  %v4345_v49 = vmax.f32 %v4273_v14, 0.0 }
 0x1ea   : > { %v3539_v34 = vpop.f32.mrf.mxu1  ;;  %4597 = vst [vmem:[%s7165_s9 + $0x100] sm:$0xff] %v5138_v62  ;;  %v7348_v61 = vadd.f32 %v3537_v45, %v3415_v48  ;;  %v3417_v37 = vadd.f32 %v3416_v36, %v7142_v10  ;;  %v4346_v0 = vmax.f32 %v4274_v53, 0.0 }
 0x1eb   : > { %v3418_v1 = vpop.f32.mrf.mxu0 }
 0x1ec   : > { %v3541_v40 = vpop.f32.mrf.mxu1  ;;  %v7351_v57 = vadd.f32 %v3539_v34, %v3417_v37  ;;  %v3419_v22 = vadd.f32 %v3418_v1, %v7147_v26  ;;  %v5140_v12 = vpack.c.bf16 %v4346_v0, %v4345_v49 }
 0x1ed   : > { %v3422_v8 = vpop.f32.mrf.mxu0 }
 0x1ee   : > { %v3545_v43 = vpop.f32.mrf.mxu1  ;;  %v7354_v63 = vadd.f32 %v3541_v40, %v3419_v22  ;;  %v3423_v33 = vadd.f32 %v3422_v8, %v7153_v46  ;;  %4599 = vst [vmem:[%s7165_s9 + $0x110] sm:$0xff] %v5140_v12 }
 0x1ef   : > { %v3424_v16 = vpop.f32.mrf.mxu0 }
 0x1f0   : > { %v3547_v9 = vpop.f32.mrf.mxu1  ;;  %v7358_v25 = vadd.f32 %v3545_v43, %v3423_v33  ;;  %v3425_v10 = vadd.f32 %v3424_v16, %v7167_v28 }
 0x1f1   : > { %v3426_v55 = vpop.f32.mrf.mxu0 }
 0x1f2   : > { %v3549_v14 = vpop.f32.mrf.mxu1  ;;  %v7361_v38 = vadd.f32 %v3547_v9, %v3425_v10  ;;  %v3427_v26 = vadd.f32 %v3426_v55, %v7172_v15 }
 0x1f3   : > { %v3428_v30 = vpop.f32.mrf.mxu0 }
 0x1f4   : > { %v3551_v45 = vpop.f32.mrf.mxu1  ;;  %v7364_v62 = vadd.f32 %v3549_v14, %v3427_v26  ;;  %v3429_v48 = vadd.f32 %v3428_v30, %v7178_v29 }
 0x1f5   : > { %v3432_v46 = vpop.f32.mrf.mxu0 }
 0x1f6   : > { %v3555_v53 = vpop.f32.mrf.mxu1  ;;  %v7367_v36 = vadd.f32 %v3551_v45, %v3429_v48  ;;  %v3433_v34 = vadd.f32 %v3432_v46, %v7183_v56 }
 0x1f7   : > { %v3434_v37 = vpop.f32.mrf.mxu0 }
 0x1f8   : > { %v3557_v28 = vpop.f32.mrf.mxu1  ;;  %v7370_v49 = vadd.f32 %v3555_v53, %v3433_v34  ;;  %v3435_v0 = vadd.f32 %v3434_v37, %v7191_v17 }
 0x1f9   : > { %v3436_v1 = vpop.f32.mrf.mxu0 }
 0x1fa   : > { %v3559_v15 = vpop.f32.mrf.mxu1  ;;  %v7373_v40 = vadd.f32 %v3557_v28, %v3435_v0  ;;  %v3437_v22 = vadd.f32 %v3436_v1, %v7196_v54 }
 0x1fb   : > { %v3438_v12 = vpop.f32.mrf.mxu0 }
 0x1fc   : > { %v3561_v29 = vpop.f32.mrf.mxu1  ;;  %v7376_v8 = vadd.f32 %v3559_v15, %v3437_v22  ;;  %v3439_v43 = vadd.f32 %v3438_v12, %v7202_v52 }
 0x1fd   : > { %v3442_v33 = vpop.f32.mrf.mxu0 }
 0x1fe   : > { %v3565_v56 = vpop.f32.mrf.mxu1  ;;  %v7379_v16 = vadd.f32 %v3561_v29, %v3439_v43  ;;  %v3443_v9 = vadd.f32 %v3442_v33, %v7207_v3 }
 0x1ff   : > { %v3444_v10 = vpop.f32.mrf.mxu0 }
 0x200   : > { %v3567_v17 = vpop.f32.mrf.mxu1  ;;  %v7382_v55 = vadd.f32 %v3565_v56, %v3443_v9  ;;  %v3445_v14 = vadd.f32 %v3444_v10, %v7213_v44 }
 0x201   : > { %v3446_v26 = vpop.f32.mrf.mxu0 }
 0x202   : > { %v3569_v54 = vpop.f32.mrf.mxu1  ;;  %v7385_v30 = vadd.f32 %v3567_v17, %v3445_v14  ;;  %v3447_v45 = vadd.f32 %v3446_v26, %v7218_v60 }
 0x203   : > { %v3448_v48 = vpop.f32.mrf.mxu0 }
 0x204   : > { %v3571_v52 = vpop.f32.mrf.mxu1  ;;  %v7388_v46 = vadd.f32 %v3569_v54, %v3447_v45  ;;  %v3449_v53 = vadd.f32 %v3448_v48, %v7224_v19 }
 0x205   : > { %v3452_v34 = vpop.f32.mrf.mxu0 }
 0x206   : > { %v3575_v3 = vpop.f32.mrf.mxu1  ;;  %v7391_v37 = vadd.f32 %v3571_v52, %v3449_v53  ;;  %v3453_v28 = vadd.f32 %v3452_v34, %v7229_v5 }
 0x207   : > { %v3454_v0 = vpop.f32.mrf.mxu0 }
 0x208   : > { %v3577_v44 = vpop.f32.mrf.mxu1  ;;  %v7394_v1 = vadd.f32 %v3575_v3, %v3453_v28  ;;  %v3455_v15 = vadd.f32 %v3454_v0, %v7235_v35 }
 0x209   : > { %v3456_v22 = vpop.f32.mrf.mxu0 }
 0x20a   : > { %v3579_v60 = vpop.f32.mrf.mxu1  ;;  %v7397_v12 = vadd.f32 %v3577_v44, %v3455_v15  ;;  %v3457_v29 = vadd.f32 %v3456_v22, %v7240_v11 }
 0x20b   : > { %v3458_v43 = vpop.f32.mrf.mxu0 }
 0x20c   : > { %v3581_v19 = vpop.f32.mrf.mxu1  ;;  %v7400_v33 = vadd.f32 %v3579_v60, %v3457_v29  ;;  %v3459_v56 = vadd.f32 %v3458_v43, %v7246_v2 }
 0x20d   : > { %v3462_v9 = vpop.f32.mrf.mxu0 }
 0x20e   : > { %v3585_v5 = vpop.f32.mrf.mxu1  ;;  %v7403_v10 = vadd.f32 %v3581_v19, %v3459_v56  ;;  %v3463_v17 = vadd.f32 %v3462_v9, %v7251_v41 }
 0x20f   : > { %v3464_v14 = vpop.f32.mrf.mxu0 }
 0x210   : > { %v3587_v35 = vpop.f32.mrf.mxu1  ;;  %v7406_v26 = vadd.f32 %v3585_v5, %v3463_v17  ;;  %v3465_v54 = vadd.f32 %v3464_v14, %v7257_v21 }
 0x211   : > { %v3466_v45 = vpop.f32.mrf.mxu0 }
 0x212   : > { %v3589_v11 = vpop.f32.mrf.mxu1  ;;  %v7409_v48 = vadd.f32 %v3587_v35, %v3465_v54  ;;  %v3467_v52 = vadd.f32 %v3466_v45, %v7262_v31 }
 0x213   : > { %v3468_v53 = vpop.f32.mrf.mxu0 }
 0x214   : > { %v3591_v2 = vpop.f32.mrf.mxu1  ;;  %v7412_v34 = vadd.f32 %v3589_v11, %v3467_v52  ;;  %v3469_v3 = vadd.f32 %v3468_v53, %v7268_v47 }
 0x215   : > { %v3472_v28 = vpop.f32.mrf.mxu0 }
 0x216   : > { %v3595_v41 = vpop.f32.mrf.mxu1  ;;  %v7415_v0 = vadd.f32 %v3591_v2, %v3469_v3  ;;  %v3473_v44 = vadd.f32 %v3472_v28, %v7273_v39 }
 0x217   : > { %v3474_v15 = vpop.f32.mrf.mxu0 }
 0x218   : > { %v3597_v21 = vpop.f32.mrf.mxu1  ;;  %v7418_v22 = vadd.f32 %v3595_v41, %v3473_v44  ;;  %v3475_v60 = vadd.f32 %v3474_v15, %v7279_v13 }
 0x219   : > { %v3476_v29 = vpop.f32.mrf.mxu0 }
 0x21a   : > { %v3599_v31 = vpop.f32.mrf.mxu1  ;;  %v7421_v43 = vadd.f32 %v3597_v21, %v3475_v60  ;;  %v3477_v19 = vadd.f32 %v3476_v29, %v7284_v42 }
 0x21b   : > { %v3478_v56 = vpop.f32.mrf.mxu0 }
 0x21c   : > { %v3601_v47 = vpop.f32.mrf.mxu1  ;;  %v7424_v9 = vadd.f32 %v3599_v31, %v3477_v19  ;;  %v3479_v5 = vadd.f32 %v3478_v56, %v7290_v23 }
 0x21d   : > { %v3482_v17 = vpop.f32.mrf.mxu0 }
 0x21e   : > { %v3605_v39 = vpop.f32.mrf.mxu1  ;;  %v7427_v14 = vadd.f32 %v3601_v47, %v3479_v5  ;;  %v3483_v35 = vadd.f32 %v3482_v17, %v7295_v27 }
 0x21f   : > { %v3484_v54 = vpop.f32.mrf.mxu0 }
 0x220   : > { %v3607_v13 = vpop.f32.mrf.mxu1  ;;  %v7430_v45 = vadd.f32 %v3605_v39, %v3483_v35  ;;  %v3485_v11 = vadd.f32 %v3484_v54, %v7301_v32  ;;  %v4105_v35 = vsub.s32 3, %v7087_v7 }
 0x221   : > { %v3486_v52 = vpop.f32.mrf.mxu0 }
 0x222   : > { %v3609_v42 = vpop.f32.mrf.mxu1  ;;  %v7433_v53 = vadd.f32 %v3607_v13, %v3485_v11  ;;  %v3487_v2 = vadd.f32 %v3486_v52, %v7306_v58 }
 0x223   : > { %v3488_v3 = vpop.f32.mrf.mxu0 }
 0x224   : > { %v3611_v23 = vpop.f32.mrf.mxu1  ;;  %v7436_v28 = vadd.f32 %v3609_v42, %v3487_v2  ;;  %v3489_v41 = vadd.f32 %v3488_v3, %v7312_v6  ;;  %v4101_v6 = vsub.s32 2, %v7087_v7 }
 0x225   : > { %v3492_v44 = vpop.f32.mrf.mxu0 }
 0x226   : > { %v3615_v27 = vpop.f32.mrf.mxu1  ;;  %v7439_v15 = vadd.f32 %v3611_v23, %v3489_v41  ;;  %v3493_v21 = vadd.f32 %v3492_v44, %v7317_v18  ;;  %v7457_v52 = vrot.slane %v7103_v51, %v4101_v6  ;;  %v7460_v3 = vrot.slane %v7111_v4, %v4101_v6 }
 0x227   : > { %v3494_v60 = vpop.f32.mrf.mxu0 }
 0x228   : > { %v3617_v32 = vpop.f32.mrf.mxu1  ;;  %v7442_v29 = vadd.f32 %v3615_v27, %v3493_v21  ;;  %v3495_v31 = vadd.f32 %v3494_v60, %v7323_v50 }
 0x229   : > { %v3496_v19 = vpop.f32.mrf.mxu0 }
 0x22a   : > { %v3619_v58 = vpop.f32.mrf.mxu1  ;;  %v7445_v56 = vadd.f32 %v3617_v32, %v3495_v31  ;;  %v3497_v47 = vadd.f32 %v3496_v19, %v7328_v24 }
 0x22b   : > { %v3498_v5 = vpop.f32.mrf.mxu0 }
 0x22c   : > { %v3621_v17 = vpop.f32.mrf.mxu1  ;;  %v7449_v39 = vadd.f32 %v3619_v58, %v3497_v47  ;;  %v3499_v18 = vadd.f32 %v3498_v5, %v7334_v20  ;;  %v7464_v20 = vrot.slane %v7103_v51, %v4105_v35 }
 0x22d   : > { %v3658_v54 = vpop.f32.mrf.mxu0 }
 0x22e   : > { %v3781_v13 = vpop.f32.mrf.mxu1  ;;  %v7453_v11 = vadd.f32 %v3621_v17, %v3499_v18  ;;  %v3659_v50 = vadd.f32 %v3658_v54, %v7343_v59  ;;  %v7468_v59 = vrot.slane %v7111_v4, %v4105_v35 }
 0x22f   : > { %v3660_v24 = vpop.f32.mrf.mxu0 }
 0x230   : > { %v3783_v42 = vpop.f32.mrf.mxu1  ;;  %v3782_v2 = vadd.f32 %v3781_v13, %v3659_v50  ;;  %v3661_v23 = vadd.f32 %v3660_v24, %v7348_v61 }
 0x231   : > { %v3662_v7 = vpop.f32.mrf.mxu0 }
 0x232   : > { %v3785_v41 = vpop.f32.mrf.mxu1  ;;  %v4113_v44 = vmul.f32 %v7457_v52, %v3782_v2  ;;  %v3784_v27 = vadd.f32 %v3783_v42, %v3661_v23  ;;  %v3663_v21 = vadd.f32 %v3662_v7, %v7351_v57 }
 0x233   : > { %v3664_v60 = vpop.f32.mrf.mxu0 }
 0x234   : > { %v3787_v32 = vpop.f32.mrf.mxu1  ;;  %v4207_v31 = vadd.f32 %v7460_v3, %v4113_v44  ;;  %v4114_v19 = vmul.f32 %v7464_v20, %v3784_v27  ;;  %v3786_v61 = vadd.f32 %v3785_v41, %v3663_v21  ;;  %v3665_v51 = vadd.f32 %v3664_v60, %v7354_v63 }
 0x235   : > { %v3668_v58 = vpop.f32.mrf.mxu0 }
 0x236   : > { %v3791_v47 = vpop.f32.mrf.mxu1  ;;  %v4208_v6 = vadd.f32 %v7468_v59, %v4114_v19  ;;  %v4117_v5 = vmul.f32 %v7457_v52, %v3786_v61  ;;  %v3788_v17 = vadd.f32 %v3787_v32, %v3665_v51  ;;  %v4279_v4 = vmax.f32 %v4207_v31, 0.0 }
 0x237   : > { %v3669_v18 = vadd.f32 %v3668_v58, %v7358_v25  ;;  %v3670_v57 = vpop.f32.mrf.mxu0 }
 0x238   : > { %v3793_v35 = vpop.f32.mrf.mxu1  ;;  %v4280_v54 = vmax.f32 %v4208_v6, 0.0  ;;  %v4211_v13 = vadd.f32 %v7460_v3, %v4117_v5  ;;  %v4118_v50 = vmul.f32 %v7464_v20, %v3788_v17  ;;  %v3671_v63 = vadd.f32 %v3670_v57, %v7361_v38 }
 0x239   : > { %v3792_v24 = vadd.f32 %v3791_v47, %v3669_v18  ;;  %v3672_v42 = vpop.f32.mrf.mxu0 }
 0x23a   : > { %v3795_v2 = vpop.f32.mrf.mxu1  ;;  %v5107_v23 = vpack.c.bf16 %v4280_v54, %v4279_v4  ;;  %v4212_v7 = vadd.f32 %v7468_v59, %v4118_v50  ;;  %v3794_v41 = vadd.f32 %v3793_v35, %v3671_v63  ;;  %v3673_v25 = vadd.f32 %v3672_v42, %v7364_v62 }
 0x23b   : > { %v4121_v44 = vmul.f32 %v7457_v52, %v3792_v24  ;;  %v3674_v27 = vpop.f32.mrf.mxu0  ;;  %v4283_v60 = vmax.f32 %v4211_v13, 0.0 }
 0x23c   : > { %v3797_v21 = vpop.f32.mrf.mxu1  ;;  %4566 = vst [vmem:[%s7165_s9 + $0x8] sm:$0xff] %v5107_v23  ;;  %v4284_v32 = vmax.f32 %v4212_v7, 0.0  ;;  %v4122_v31 = vmul.f32 %v7464_v20, %v3794_v41  ;;  %v3675_v38 = vadd.f32 %v3674_v27, %v7367_v36  ;;  %v3796_v61 = vadd.f32 %v3795_v2, %v3673_v25 }
 0x23d   : > { %v4215_v19 = vadd.f32 %v7460_v3, %v4121_v44  ;;  %v3678_v51 = vpop.f32.mrf.mxu0 }
 0x23e   : > { %v3801_v58 = vpop.f32.mrf.mxu1  ;;  %v5109_v47 = vpack.c.bf16 %v4284_v32, %v4283_v60  ;;  %v4216_v6 = vadd.f32 %v7468_v59, %v4122_v31  ;;  %v3798_v5 = vadd.f32 %v3797_v21, %v3675_v38  ;;  %v3679_v62 = vadd.f32 %v3678_v51, %v7370_v49 }
 0x23f   : > { %v4287_v17 = vmax.f32 %v4215_v19, 0.0  ;;  %v4125_v4 = vmul.f32 %v7457_v52, %v3796_v61  ;;  %v3680_v18 = vpop.f32.mrf.mxu0 }
 0x240   : > { %v3803_v57 = vpop.f32.mrf.mxu1  ;;  %4568 = vst [vmem:[%s7165_s9 + $0x18] sm:$0xff] %v5109_v47  ;;  %v4288_v35 = vmax.f32 %v4216_v6, 0.0  ;;  %v4126_v36 = vmul.f32 %v7464_v20, %v3798_v5  ;;  %v3802_v54 = vadd.f32 %v3801_v58, %v3679_v62  ;;  %v3681_v13 = vadd.f32 %v3680_v18, %v7373_v40 }
 0x241   : > { %v4219_v50 = vadd.f32 %v7460_v3, %v4125_v4  ;;  %v3682_v63 = vpop.f32.mrf.mxu0 }
 0x242   : > { %v3805_v24 = vpop.f32.mrf.mxu1  ;;  %v5111_v42 = vpack.c.bf16 %v4288_v35, %v4287_v17  ;;  %v4220_v49 = vadd.f32 %v7468_v59, %v4126_v36  ;;  %v4129_v2 = vmul.f32 %v7457_v52, %v3802_v54  ;;  %v3804_v23 = vadd.f32 %v3803_v57, %v3681_v13 }
 0x243   : > { %v4291_v7 = vmax.f32 %v4219_v50, 0.0  ;;  %v3683_v41 = vadd.f32 %v3682_v63, %v7376_v8  ;;  %v3684_v44 = vpop.f32.mrf.mxu0 }
 0x244   : > { %v3807_v25 = vpop.f32.mrf.mxu1  ;;  %4570 = vst [vmem:[%s7165_s9 + $0x28] sm:$0xff] %v5111_v42  ;;  %v4292_v27 = vmax.f32 %v4220_v49, 0.0  ;;  %v4223_v40 = vadd.f32 %v7460_v3, %v4129_v2  ;;  %v4130_v21 = vmul.f32 %v7464_v20, %v3804_v23  ;;  %v3685_v60 = vadd.f32 %v3684_v44, %v7379_v16 }
 0x245   : > { %v3806_v32 = vadd.f32 %v3805_v24, %v3683_v41  ;;  %v3688_v31 = vpop.f32.mrf.mxu0 }
 0x246   : > { %v3811_v38 = vpop.f32.mrf.mxu1  ;;  %v5113_v19 = vpack.c.bf16 %v4292_v27, %v4291_v7  ;;  %v4224_v61 = vadd.f32 %v7468_v59, %v4130_v21  ;;  %v3808_v51 = vadd.f32 %v3807_v25, %v3685_v60  ;;  %v3689_v58 = vadd.f32 %v3688_v31, %v7382_v55 }
 0x247   : > { %v4133_v8 = vmul.f32 %v7457_v52, %v3806_v32  ;;  %v3690_v47 = vpop.f32.mrf.mxu0  ;;  %v4295_v5 = vmax.f32 %v4223_v40, 0.0 }
 0x248   : > { %v3813_v6 = vpop.f32.mrf.mxu1  ;;  %4572 = vst [vmem:[%s7165_s9 + $0x38] sm:$0xff] %v5113_v19  ;;  %v4296_v62 = vmax.f32 %v4224_v61, 0.0  ;;  %v4134_v17 = vmul.f32 %v7464_v20, %v3808_v51  ;;  %v3691_v16 = vadd.f32 %v3690_v47, %v7385_v30  ;;  %v3812_v18 = vadd.f32 %v3811_v38, %v3689_v58 }
 0x249   : > { %v4227_v4 = vadd.f32 %v7460_v3, %v4133_v8  ;;  %v3692_v57 = vpop.f32.mrf.mxu0 }
 0x24a   : > { %v3815_v35 = vpop.f32.mrf.mxu1  ;;  %v5115_v36 = vpack.c.bf16 %v4296_v62, %v4295_v5  ;;  %v4228_v54 = vadd.f32 %v7468_v59, %v4134_v17  ;;  %v3814_v13 = vadd.f32 %v3813_v6, %v3691_v16  ;;  %v3693_v55 = vadd.f32 %v3692_v57, %v7388_v46 }
 0x24b   : > { %v4299_v50 = vmax.f32 %v4227_v4, 0.0  ;;  %v4137_v63 = vmul.f32 %v7457_v52, %v3812_v18  ;;  %v3694_v24 = vpop.f32.mrf.mxu0 }
 0x24c   : > { %v3817_v42 = vpop.f32.mrf.mxu1  ;;  %4574 = vst [vmem:[%s7165_s9 + $0x48] sm:$0xff] %v5115_v36  ;;  %v4300_v49 = vmax.f32 %v4228_v54, 0.0  ;;  %v4138_v30 = vmul.f32 %v7464_v20, %v3814_v13  ;;  %v3816_v2 = vadd.f32 %v3815_v35, %v3693_v55  ;;  %v3695_v23 = vadd.f32 %v3694_v24, %v7391_v37 }
 0x24d   : > { %v4231_v7 = vadd.f32 %v7460_v3, %v4137_v63  ;;  %v3698_v41 = vpop.f32.mrf.mxu0 }
 0x24e   : > { %v3821_v44 = vpop.f32.mrf.mxu1  ;;  %v5117_v25 = vpack.c.bf16 %v4300_v49, %v4299_v50  ;;  %v4232_v46 = vadd.f32 %v7468_v59, %v4138_v30  ;;  %v4141_v27 = vmul.f32 %v7457_v52, %v3816_v2  ;;  %v3818_v40 = vadd.f32 %v3817_v42, %v3695_v23 }
 0x24f   : > { %v4303_v21 = vmax.f32 %v4231_v7, 0.0  ;;  %v3699_v60 = vadd.f32 %v3698_v41, %v7394_v1  ;;  %v3700_v32 = vpop.f32.mrf.mxu0 }
 0x250   : > { %v3823_v31 = vpop.f32.mrf.mxu1  ;;  %4576 = vst [vmem:[%s7165_s9 + $0x58] sm:$0xff] %v5117_v25  ;;  %v4304_v38 = vmax.f32 %v4232_v46, 0.0  ;;  %v4235_v37 = vadd.f32 %v7460_v3, %v4141_v27  ;;  %v4142_v19 = vmul.f32 %v7464_v20, %v3818_v40  ;;  %v3701_v61 = vadd.f32 %v3700_v32, %v7397_v12 }
 0x251   : > { %v3822_v51 = vadd.f32 %v3821_v44, %v3699_v60  ;;  %v3702_v8 = vpop.f32.mrf.mxu0 }
 0x252   : > { %v3825_v58 = vpop.f32.mrf.mxu1  ;;  %v5119_v47 = vpack.c.bf16 %v4304_v38, %v4303_v21  ;;  %v4236_v6 = vadd.f32 %v7468_v59, %v4142_v19  ;;  %v3824_v5 = vadd.f32 %v3823_v31, %v3701_v61  ;;  %v3703_v62 = vadd.f32 %v3702_v8, %v7400_v33 }
 0x253   : > { %v4145_v1 = vmul.f32 %v7457_v52, %v3822_v51  ;;  %v3704_v17 = vpop.f32.mrf.mxu0  ;;  %v4307_v4 = vmax.f32 %v4235_v37, 0.0 }
 0x254   : > { %v3827_v16 = vpop.f32.mrf.mxu1  ;;  %4578 = vst [vmem:[%s7165_s9 + $0x68] sm:$0xff] %v5119_v47  ;;  %v4308_v18 = vmax.f32 %v4236_v6, 0.0  ;;  %v4146_v57 = vmul.f32 %v7464_v20, %v3824_v5  ;;  %v3705_v12 = vadd.f32 %v3704_v17, %v7403_v10  ;;  %v3826_v36 = vadd.f32 %v3825_v58, %v3703_v62 }
 0x255   : > { %v4239_v35 = vadd.f32 %v7460_v3, %v4145_v1  ;;  %v3708_v54 = vpop.f32.mrf.mxu0 }
 0x256   : > { %v3831_v13 = vpop.f32.mrf.mxu1  ;;  %v5121_v55 = vpack.c.bf16 %v4308_v18, %v4307_v4  ;;  %v4240_v50 = vadd.f32 %v7468_v59, %v4146_v57  ;;  %v3828_v63 = vadd.f32 %v3827_v16, %v3705_v12  ;;  %v3709_v33 = vadd.f32 %v3708_v54, %v7406_v26 }
 0x257   : > { %v4311_v24 = vmax.f32 %v4239_v35, 0.0  ;;  %v4149_v42 = vmul.f32 %v7457_v52, %v3826_v36  ;;  %v3710_v49 = vpop.f32.mrf.mxu0 }
 0x258   : > { %v3833_v30 = vpop.f32.mrf.mxu1  ;;  %4580 = vst [vmem:[%s7165_s9 + $0x78] sm:$0xff] %v5121_v55  ;;  %v4312_v2 = vmax.f32 %v4240_v50, 0.0  ;;  %v4150_v10 = vmul.f32 %v7464_v20, %v3828_v63  ;;  %v3832_v23 = vadd.f32 %v3831_v13, %v3709_v33  ;;  %v3711_v7 = vadd.f32 %v3710_v49, %v7409_v48 }
 0x259   : > { %v4243_v41 = vadd.f32 %v7460_v3, %v4149_v42  ;;  %v3712_v44 = vpop.f32.mrf.mxu0 }
 0x25a   : > { %v3835_v25 = vpop.f32.mrf.mxu1  ;;  %v5123_v46 = vpack.c.bf16 %v4312_v2, %v4311_v24  ;;  %v4244_v26 = vadd.f32 %v7468_v59, %v4150_v10  ;;  %v4153_v27 = vmul.f32 %v7457_v52, %v3832_v23  ;;  %v3834_v40 = vadd.f32 %v3833_v30, %v3711_v7 }
 0x25b   : > { %v4315_v21 = vmax.f32 %v4243_v41, 0.0  ;;  %v3713_v60 = vadd.f32 %v3712_v44, %v7412_v34  ;;  %v3714_v32 = vpop.f32.mrf.mxu0 }
 0x25c   : > { %v3837_v31 = vpop.f32.mrf.mxu1  ;;  %4582 = vst [vmem:[%s7165_s9 + $0x88] sm:$0xff] %v5123_v46  ;;  %v4316_v38 = vmax.f32 %v4244_v26, 0.0  ;;  %v4247_v48 = vadd.f32 %v7460_v3, %v4153_v27  ;;  %v4154_v37 = vmul.f32 %v7464_v20, %v3834_v40  ;;  %v3715_v19 = vadd.f32 %v3714_v32, %v7415_v0 }
 0x25d   : > { %v3836_v61 = vadd.f32 %v3835_v25, %v3713_v60  ;;  %v3718_v51 = vpop.f32.mrf.mxu0 }
 0x25e   : > { %v3841_v8 = vpop.f32.mrf.mxu1  ;;  %v5125_v58 = vpack.c.bf16 %v4316_v38, %v4315_v21  ;;  %v4248_v47 = vadd.f32 %v7468_v59, %v4154_v37  ;;  %v3838_v6 = vadd.f32 %v3837_v31, %v3715_v19  ;;  %v3719_v5 = vadd.f32 %v3718_v51, %v7418_v22 }
 0x25f   : > { %v4157_v34 = vmul.f32 %v7457_v52, %v3836_v61  ;;  %v3720_v1 = vpop.f32.mrf.mxu0  ;;  %v4319_v17 = vmax.f32 %v4247_v48, 0.0 }
 0x260   : > { %v3843_v62 = vpop.f32.mrf.mxu1  ;;  %4584 = vst [vmem:[%s7165_s9 + $0x98] sm:$0xff] %v5125_v58  ;;  %v4320_v16 = vmax.f32 %v4248_v47, 0.0  ;;  %v4158_v4 = vmul.f32 %v7464_v20, %v3838_v6  ;;  %v3721_v0 = vadd.f32 %v3720_v1, %v7421_v43  ;;  %v3842_v57 = vadd.f32 %v3841_v8, %v3719_v5 }
 0x261   : > { %v4251_v18 = vadd.f32 %v7460_v3, %v4157_v34  ;;  %v3722_v12 = vpop.f32.mrf.mxu0 }
 0x262   : > { %v3845_v35 = vpop.f32.mrf.mxu1  ;;  %v5127_v36 = vpack.c.bf16 %v4320_v16, %v4319_v17  ;;  %v4252_v54 = vadd.f32 %v7468_v59, %v4158_v4  ;;  %v3844_v13 = vadd.f32 %v3843_v62, %v3721_v0  ;;  %v3723_v22 = vadd.f32 %v3722_v12, %v7424_v9 }
 0x263   : > { %v4323_v55 = vmax.f32 %v4251_v18, 0.0  ;;  %v4161_v50 = vmul.f32 %v7457_v52, %v3842_v57  ;;  %v3724_v63 = vpop.f32.mrf.mxu0 }
 0x264   : > { %v3847_v33 = vpop.f32.mrf.mxu1  ;;  %4586 = vst [vmem:[%s7165_s9 + $0xa8] sm:$0xff] %v5127_v36  ;;  %v4324_v24 = vmax.f32 %v4252_v54, 0.0  ;;  %v4162_v43 = vmul.f32 %v7464_v20, %v3844_v13  ;;  %v3846_v42 = vadd.f32 %v3845_v35, %v3723_v22  ;;  %v3725_v49 = vadd.f32 %v3724_v63, %v7427_v14 }
 0x265   : > { %v4255_v30 = vadd.f32 %v7460_v3, %v4161_v50  ;;  %v3728_v2 = vpop.f32.mrf.mxu0 }
 0x266   : > { %v3851_v10 = vpop.f32.mrf.mxu1  ;;  %v5129_v23 = vpack.c.bf16 %v4324_v24, %v4323_v55  ;;  %v4256_v9 = vadd.f32 %v7468_v59, %v4162_v43  ;;  %v4165_v7 = vmul.f32 %v7457_v52, %v3846_v42  ;;  %v3848_v41 = vadd.f32 %v3847_v33, %v3725_v49 }
 0x267   : > { %v4327_v44 = vmax.f32 %v4255_v30, 0.0  ;;  %v3729_v25 = vadd.f32 %v3728_v2, %v7430_v45  ;;  %v3730_v46 = vpop.f32.mrf.mxu0 }
 0x268   : > { %v3853_v26 = vpop.f32.mrf.mxu1  ;;  %4588 = vst [vmem:[%s7165_s9 + $0xb8] sm:$0xff] %v5129_v23  ;;  %v4328_v27 = vmax.f32 %v4256_v9, 0.0  ;;  %v4259_v14 = vadd.f32 %v7460_v3, %v4165_v7  ;;  %v4166_v40 = vmul.f32 %v7464_v20, %v3848_v41  ;;  %v3731_v21 = vadd.f32 %v3730_v46, %v7433_v53 }
 0x269   : > { %v3852_v60 = vadd.f32 %v3851_v10, %v3729_v25  ;;  %v3732_v32 = vpop.f32.mrf.mxu0 }
 0x26a   : > { %v3855_v31 = vpop.f32.mrf.mxu1  ;;  %v5131_v38 = vpack.c.bf16 %v4328_v27, %v4327_v44  ;;  %v4260_v48 = vadd.f32 %v7468_v59, %v4166_v40  ;;  %v3854_v37 = vadd.f32 %v3853_v26, %v3731_v21  ;;  %v3733_v19 = vadd.f32 %v3732_v32, %v7436_v28 }
 0x26b   : > { %v4169_v45 = vmul.f32 %v7457_v52, %v3852_v60  ;;  %v3734_v61 = vpop.f32.mrf.mxu0  ;;  %v4331_v8 = vmax.f32 %v4259_v14, 0.0 }
 0x26c   : > { %v3857_v51 = vpop.f32.mrf.mxu1  ;;  %4590 = vst [vmem:[%s7165_s9 + $0xc8] sm:$0xff] %v5131_v38  ;;  %v4332_v58 = vmax.f32 %v4260_v48, 0.0  ;;  %v4170_v47 = vmul.f32 %v7464_v20, %v3854_v37  ;;  %v3735_v53 = vadd.f32 %v3734_v61, %v7439_v15  ;;  %v3856_v34 = vadd.f32 %v3855_v31, %v3733_v19 }
 0x26d   : > { %v4263_v6 = vadd.f32 %v7460_v3, %v4169_v45  ;;  %v3738_v5 = vpop.f32.mrf.mxu0 }
 0x26e   : > { %v3861_v1 = vpop.f32.mrf.mxu1  ;;  %v5133_v62 = vpack.c.bf16 %v4332_v58, %v4331_v8  ;;  %v4264_v17 = vadd.f32 %v7468_v59, %v4170_v47  ;;  %v3858_v16 = vadd.f32 %v3857_v51, %v3735_v53  ;;  %v3739_v28 = vadd.f32 %v3738_v5, %v7442_v29 }
 0x26f   : > { %v4335_v4 = vmax.f32 %v4263_v6, 0.0  ;;  %v4173_v0 = vmul.f32 %v7457_v52, %v3856_v34  ;;  %v3740_v18 = vpop.f32.mrf.mxu0 }
 0x270   : > { %v3863_v57 = vpop.f32.mrf.mxu1  ;;  %4592 = vst [vmem:[%s7165_s9 + $0xd8] sm:$0xff] %v5133_v62  ;;  %v4336_v12 = vmax.f32 %v4264_v17, 0.0  ;;  %v4174_v15 = vmul.f32 %v7464_v20, %v3858_v16  ;;  %v3862_v35 = vadd.f32 %v3861_v1, %v3739_v28  ;;  %v3741_v36 = vadd.f32 %v3740_v18, %v7445_v56 }
 0x271   : > { %v4267_v54 = vadd.f32 %v7460_v3, %v4173_v0  ;;  %v3742_v13 = vpop.f32.mrf.mxu0 }
 0x272   : > { %v3865_v22 = vpop.f32.mrf.mxu1  ;;  %v5135_v55 = vpack.c.bf16 %v4336_v12, %v4335_v4  ;;  %v4268_v29 = vadd.f32 %v7468_v59, %v4174_v15  ;;  %v4177_v50 = vmul.f32 %v7457_v52, %v3862_v35  ;;  %v3864_v63 = vadd.f32 %v3863_v57, %v3741_v36 }
 0x273   : > { %v4339_v33 = vmax.f32 %v4267_v54, 0.0  ;;  %v3743_v24 = vadd.f32 %v3742_v13, %v7449_v39  ;;  %v3744_v43 = vpop.f32.mrf.mxu0 }
 0x274   : > { %4594 = vst [vmem:[%s7165_s9 + $0xe8] sm:$0xff] %v5135_v55  ;;  %v4340_v42 = vmax.f32 %v4268_v29, 0.0  ;;  %v4271_v49 = vadd.f32 %v7460_v3, %v4177_v50  ;;  %v4178_v56 = vmul.f32 %v7464_v20, %v3864_v63  ;;  %v3745_v30 = vadd.f32 %v3744_v43, %v7453_v11  ;;  %v3867_v10 = vpop.f32.mrf.mxu1 }
 0x275   : > { %v3866_v2 = vadd.f32 %v3865_v22, %v3743_v24 }
 0x276   : > { %v5137_v23 = vpack.c.bf16 %v4340_v42, %v4339_v33  ;;  %v4272_v9 = vadd.f32 %v7468_v59, %v4178_v56  ;;  %v3868_v7 = vadd.f32 %v3867_v10, %v3745_v30  ;;  %v4343_v39 = vmax.f32 %v4271_v49, 0.0 }
 0x277   : > { %v4181_v41 = vmul.f32 %v7457_v52, %v3866_v2 }
 0x278   : > { %4596 = vst [vmem:[%s7165_s9 + $0xf8] sm:$0xff] %v5137_v23  ;;  %v4344_v44 = vmax.f32 %v4272_v9, 0.0  ;;  %v4182_v25 = vmul.f32 %v7464_v20, %v3868_v7 }
 0x279   : > { %v4275_v46 = vadd.f32 %v7460_v3, %v4181_v41 }
 0x27a   : > { %v5139_v26 = vpack.c.bf16 %v4344_v44, %v4343_v39  ;;  %v4276_v27 = vadd.f32 %v7468_v59, %v4182_v25 }
 0x27b   : > { %v4347_v11 = vmax.f32 %v4275_v46, 0.0 }
 0x27c   : > { %4598 = vst [vmem:[%s7165_s9 + $0x108] sm:$0xff] %v5139_v26  ;;  %v4348_v14 = vmax.f32 %v4276_v27, 0.0 }
 0x27e   : > { %v5141_v40 = vpack.c.bf16 %v4348_v14, %v4347_v11 }
 0x280   : > { %4600 = vst [vmem:[%s7165_s9 + $0x118] sm:$0xff] %v5141_v40 }
 0x281 PF: > { %s14_s17 = sadd.s32 1, %s5813_s17   ;;  %s7607_s15 = smov %s5809_s16 }
 0x282   : > { %p11_p5 = scmp.ge.s32.totalorder %s14_s17, 4   ;;  %s7608_s16 = smov %s7610_s18 }
 0x284   :  { %13 = sbr.rel (!%p11_p5) target bundleno = 2 (0x2), region = 77 }

// kernel: fer_cnn_forward.17
= control target key start
LH: loop header
LB: loop body
LE: loop exit
PB: predicated region body
PF: predicated region fallthrough
CT: control target
= control target key end

     0   :  { %s2265_s15 = smov 0   ;;  %s2267_s16 = smov 0   ;;  %s2623_s0 = inlined_call_operand.vmem [shape: bf16[80,4608], index: 0, kind: input, shape index: {}]   ;;  %s2624_s1 = inlined_call_operand.vmem [shape: bf16[4608,512], index: 1, kind: input, shape index: {}]   ;;  %s2625_s2 = inlined_call_operand.vmem [shape: f32[1,512], index: 2, kind: input, shape index: {}]   ;;  %s2626_s3 = inlined_call_operand.vmem [shape: f32[1,512], index: 3, kind: input, shape index: {}]   ;;  %s2627_s4 = inlined_call_operand.vmem [shape: bf16[80,512], index: 4, kind: output, shape index: {}]  }
   0x1   :  { %s2269_s17 = smov 0   ;;  %s2271_s18 = smov 0  }
   0x2   :  { %s2273_s19 = smov 0   ;;  %s2275_s20 = smov 0  }
   0x3   :  { %s2277_s21 = smov 0  }
   0x4 LB: > { %s23_s22 = sadd.s32 1, %s2229_s19  ;;  %s26_s23 = sadd.s32 1, %s2233_s20  ;;  %s2237_s21 = sphi %s2277_s21, %s14_s21   ;;  %s2233_s20 = sphi %s2275_s20, %s2633_s20   ;;  %s2229_s19 = sphi %s2273_s19, %s2632_s19   ;;  %s2225_s18 = sphi %s2271_s18, %s2631_s18   ;;  %s2221_s17 = sphi %s2269_s17, %s2630_s17   ;;  %s2217_s16 = sphi %s2267_s16, %s2629_s16   ;;  %s2213_s15 = sphi %s2265_s15, %s2628_s15  }
   0x5   : > { %p24_p0 = scmp.ge.s32.totalorder %s23_s22, 9  ;;  %p42_p1 = scmp.ne.s32.totalorder %s2217_s16, %s2213_s15 }
   0x6   : > { %p43_p2 = scmp.eq.s32.totalorder %s2237_s21, 0  ;;  %s35_s27 = sadd.s32 1, %s2217_s16 }
   0x7   : > { %s2635_s22 = smov (%p24_p0, %s23_s22), 0  ;;  %s2637_s23 = smov (!%p24_p0, %s26_s23), %s2233_s20 }
   0x8   : > { %p44_p3 = por %p43_p2, %p42_p1  ;;  %p28_p4 = scmp.ge.s32.totalorder %s2637_s23, 2 }
   0x9   : > { %s31_s24 = ssub.s32 %s2229_s19, %s2635_s22  ;;  %p1739_p6 = scmp.ge.s32.totalorder %s2237_s21, 18 }
   0xa   : > { %s2639_s23 = smov (%p28_p4, %s2637_s23), 0 }
   0xb   : > { %s30_s25 = ssub.s32 %s2233_s20, %s2639_s23  ;;  %168 = sbr.rel (%p1739_p6) target bundleno = 29 (0x1d), region = 24 }
   0xc   : > { %s32_s26 = sor.u32 %s31_s24, %s30_s25 }
   0xd   : > { %p33_p5 = scmp.eq.s32.totalorder %s32_s26, 0 }
   0xf   : > { %s2316_s28 = scalar_select %p33_p5, %s2217_s16, %s35_s27  }
  0x10   : > { %171 = sbr.rel (!%p44_p3) target bundleno = 29 (0x1d), region = 28  ;;  %s173_s29 = sand.u32 (%p44_p3), 1, %s2217_s16  }
  0x11   : > { %s1914_s30 = smul.u32 (%p44_p3), 80, %s173_s29  ;;  %s1740_s5 = sshll.u32 (%p44_p3), %s2229_s19, 2 }
  0x12   : > { %s1917_s6 = smul.u32 (%p44_p3), 180, %s2233_s20 }
  0x13   : > { %s175_s12 = scalar_lea.vmem (%p44_p3), [#allocation3], %s1914_s30 }
  0x14   : > { %s179_s7 = sadd.s32 (%p44_p3), %s1917_s6, %s1740_s5 }
  0x15   : > { %s1741_s8 = sshll.u32 %s179_s7, 2 }
  0x16   : > { %s181_s11 = scalar_lea.vmem %s2623_s0, %s1741_s8 }
  0x17   : > { %v194_v0 = vld [vmem:[%s181_s11] sm:$0xff]  ;;  %v196_v1 = vld [vmem:[%s181_s11 + $0x8] sm:$0xff]  ;;  %v198_v2 = vld [vmem:[%s181_s11 + $0x90] sm:$0xff] }
  0x18   : > { %195 = vst [vmem:[%s175_s12] sm:$0xff] %v194_v0  ;;  %197 = vst [vmem:[%s175_s12 + $0x8] sm:$0xff] %v196_v1  ;;  %v200_v3 = vld [vmem:[%s181_s11 + $0x98] sm:$0xff]  ;;  %v202_v4 = vld [vmem:[%s181_s11 + $0x120] sm:$0xff] }
  0x19   : > { %199 = vst [vmem:[%s175_s12 + $0x10] sm:$0xff] %v198_v2  ;;  %v204_v5 = vld [vmem:[%s181_s11 + $0x128] sm:$0xff]  ;;  %201 = vst [vmem:[%s175_s12 + $0x18] sm:$0xff] %v200_v3  ;;  %v206_v6 = vld [vmem:[%s181_s11 + $0x1b0] sm:$0xff] }
  0x1a   : > { %203 = vst [vmem:[%s175_s12 + $0x20] sm:$0xff] %v202_v4  ;;  %205 = vst [vmem:[%s175_s12 + $0x28] sm:$0xff] %v204_v5  ;;  %v208_v7 = vld [vmem:[%s181_s11 + $0x1b8] sm:$0xff]  ;;  %v210_v8 = vld [vmem:[%s181_s11 + $0x240] sm:$0xff] }
  0x1b   : > { %207 = vst [vmem:[%s175_s12 + $0x30] sm:$0xff] %v206_v6  ;;  %209 = vst [vmem:[%s175_s12 + $0x38] sm:$0xff] %v208_v7  ;;  %v212_v9 = vld [vmem:[%s181_s11 + $0x248] sm:$0xff] }
  0x1c   : > { %211 = vst [vmem:[%s175_s12 + $0x40] sm:$0xff] %v210_v8  ;;  %213 = vst [vmem:[%s175_s12 + $0x48] sm:$0xff] %v212_v9 }
  0x1d PF: > { %p1742_p7 = scmp.ge.s32.totalorder %s2237_s21, 1  ;;  %p228_p8 = scmp.lt.s32.totalorder %s2237_s21, 19 }
  0x1f   : > { %p229_p9 = pnand %p1742_p7, %p228_p8 }
  0x20   : > { %s235_s13 = sand.u32 (!%p229_p9), 1, %s2213_s15   ;;  %s1743_s14 = sshll.u32 (!%p229_p9), %s2221_s17, 6 }
  0x21   : > { %232 = sbr.rel (%p229_p9) target bundleno = 432 (0x1b0), region = 55  ;;  %p270_p10 = scmp.lt.s32.totalorder (!%p229_p9), %s1743_s14, 575 }
  0x22   : > { %s1916_s24 = smul.u32 (!%p229_p9), 80, %s235_s13  ;;  %p1748_p12 = scmp.ne.s32.totalorder (!%p229_p9), %s2221_s17, 0 }
  0x23   : > { %s276_s25 = smul.u32 (!%p229_p9), 5, %s2225_s18 }
  0x24   : > { %s2340_s15 = scalar_lea.vmem (!%p229_p9), [#allocation3], %s1916_s24 }
  0x25   : > { %p277_p11 = scmp.lt.s32.totalorder (!%p229_p9), %s276_s25, 9 }
  0x26   : > { %s2641_s14 = smov (!%p270_p10, %s1743_s14), 575  ;;  %286 = sbr.rel (%p1748_p12) target bundleno = 54 (0x36), region = 63 }
  0x27   : > { %s1902_s26 = sshll.u32 %s2641_s14, 4  ;;  %s2643_s25 = smov (!%p277_p11, %s276_s25), 9 }
  0x28   : > { %s2333_s30 = scalar_lea.vmem %s2624_s1, %s1902_s26  ;;  %s1903_s5 = sshll.u32 %s2643_s25, 4 }
  0x29   : > { %s2338_s8 = scalar_lea.vmem %s2627_s4, %s1903_s5 }
  0x2b   : > { %v2239_v10 = vmov 0.0  }
  0x2c   : > { %287 = vst [vmem:[#allocation2] sm:$0xff] %v2239_v10  ;;  %288 = vst [vmem:[#allocation2 + $0x38] sm:$0xff] %v2239_v10 }
  0x2d   : > { %289 = vst [vmem:[#allocation2 + $0x50] sm:$0xff] %v2239_v10  ;;  %290 = vst [vmem:[#allocation2 + $0x18] sm:$0xff] %v2239_v10 }
  0x2e   : > { %291 = vst [vmem:[#allocation2 + $0x30] sm:$0xff] %v2239_v10  ;;  %292 = vst [vmem:[#allocation2 + $0x68] sm:$0xff] %v2239_v10 }
  0x2f   : > { %293 = vst [vmem:[#allocation2 + $0x78] sm:$0xff] %v2239_v10  ;;  %294 = vst [vmem:[#allocation2 + $0x80] sm:$0xff] %v2239_v10 }
  0x30   : > { %295 = vst [vmem:[#allocation2 + $0x8] sm:$0xff] %v2239_v10  ;;  %296 = vst [vmem:[#allocation2 + $0x88] sm:$0xff] %v2239_v10 }
  0x31   : > { %297 = vst [vmem:[#allocation2 + $0x28] sm:$0xff] %v2239_v10  ;;  %298 = vst [vmem:[#allocation2 + $0x40] sm:$0xff] %v2239_v10 }
  0x32   : > { %299 = vst [vmem:[#allocation2 + $0x58] sm:$0xff] %v2239_v10  ;;  %300 = vst [vmem:[#allocation2 + $0x10] sm:$0xff] %v2239_v10 }
  0x33   : > { %301 = vst [vmem:[#allocation2 + $0x98] sm:$0xff] %v2239_v10  ;;  %302 = vst [vmem:[#allocation2 + $0x60] sm:$0xff] %v2239_v10 }
  0x34   : > { %303 = vst [vmem:[#allocation2 + $0x20] sm:$0xff] %v2239_v10  ;;  %304 = vst [vmem:[#allocation2 + $0x48] sm:$0xff] %v2239_v10 }
  0x35   : > { %305 = vst [vmem:[#allocation2 + $0x70] sm:$0xff] %v2239_v10  ;;  %306 = vst [vmem:[#allocation2 + $0x90] sm:$0xff] %v2239_v10 }
  0x36 PF: > { %v1975_v11 = vld [vmem:[%s2333_s30 + $0xe4] ss:$16 sps:$4 sm:$0xff]   ;;  %v1979_v13 = vld [vmem:[%s2333_s30 + $0xe0] ss:$16 sps:$4 sm:$0xff]   ;;  %v2397_v62 = vld [vmem:[%s2340_s15 + $0xc] ss:$16 sps:$4 sm:$0xff]  }
  0x37   : > { %v1977_v12 = vld [vmem:[%s2333_s30 + $0x2e4] ss:$16 sps:$4 sm:$0xff]   ;;  %1159 = vmatprep.subr.bf16.mxu0 %v1975_v11  ;;  %v1980_v14 = vld [vmem:[%s2333_s30 + $0x2e0] ss:$16 sps:$4 sm:$0xff]   ;;  %1252 = vmatprep.mubr.bf16.mxu1 %v2397_v62  ;;  %p1889_p13 = scmp.ne.s32.totalorder %s2221_s17, 8 }
  0x38   : > { %1220 = vmatprep.subr.bf16.mxu1 %v1977_v12  ;;  %v1981_v15 = vld [vmem:[%s2333_s30 + $0xc4] ss:$16 sps:$4 sm:$0xff]   ;;  %1160 = vmatpush1.bf16.msra.mxu0 %v1979_v13  ;;  %v1985_v17 = vld [vmem:[%s2333_s30 + $0xc0] ss:$16 sps:$4 sm:$0xff]   ;;  %v2079_v13 = vld [vmem:[%s2333_s30 + $0xec] ss:$16 sps:$4 sm:$0xff]  }
  0x39   : > { %1221 = vmatpush1.bf16.msra.mxu1 %v1980_v14  ;;  %v1983_v16 = vld [vmem:[%s2333_s30 + $0x2c4] ss:$16 sps:$4 sm:$0xff]   ;;  %1161 = vmatprep.subr.bf16.mxu0 %v1981_v15  ;;  %v1986_v18 = vld [vmem:[%s2333_s30 + $0x2c0] ss:$16 sps:$4 sm:$0xff]   ;;  %v2082_v14 = vld [vmem:[%s2333_s30 + $0x2ec] ss:$16 sps:$4 sm:$0xff]  }
  0x3a   : > { %1222 = vmatprep.subr.bf16.mxu1 %v1983_v16  ;;  %v1987_v19 = vld [vmem:[%s2333_s30 + $0xa4] ss:$16 sps:$4 sm:$0xff]   ;;  %v1991_v21 = vld [vmem:[%s2333_s30 + $0xa0] ss:$16 sps:$4 sm:$0xff]   ;;  %v2421_v16 = vld [vmem:[%s2340_s15 + $0x8] ss:$16 sps:$4 sm:$0xff]  }
  0x3b   : > { %v1989_v20 = vld [vmem:[%s2333_s30 + $0x2a4] ss:$16 sps:$4 sm:$0xff]   ;;  %v1992_v22 = vld [vmem:[%s2333_s30 + $0x2a0] ss:$16 sps:$4 sm:$0xff]  }
  0x3c   : > { %1162 = vmatpush1.bf16.msra.mxu0 %v1985_v17  ;;  %v1993_v23 = vld [vmem:[%s2333_s30 + $0x84] ss:$16 sps:$4 sm:$0xff]   ;;  %v1997_v25 = vld [vmem:[%s2333_s30 + $0x80] ss:$16 sps:$4 sm:$0xff]   ;;  %v2077_v17 = vld [vmem:[%s2333_s30 + $0xe8] ss:$16 sps:$4 sm:$0xff]  }
  0x3d   : > { %1223 = vmatpush1.bf16.msra.mxu1 %v1986_v18  ;;  %1163 = vmatprep.subr.bf16.mxu0 %v1987_v19  ;;  %v1995_v24 = vld [vmem:[%s2333_s30 + $0x284] ss:$16 sps:$4 sm:$0xff]   ;;  %v1998_v26 = vld [vmem:[%s2333_s30 + $0x280] ss:$16 sps:$4 sm:$0xff]   ;;  %v2080_v18 = vld [vmem:[%s2333_s30 + $0x2e8] ss:$16 sps:$4 sm:$0xff]  }
  0x3e   : > { %1224 = vmatprep.subr.bf16.mxu1 %v1989_v20  ;;  %v1999_v27 = vld [vmem:[%s2333_s30 + $0x64] ss:$16 sps:$4 sm:$0xff]   ;;  %v2003_v29 = vld [vmem:[%s2333_s30 + $0x60] ss:$16 sps:$4 sm:$0xff]   ;;  %v2085_v19 = vld [vmem:[%s2333_s30 + $0xcc] ss:$16 sps:$4 sm:$0xff]  }
  0x3f   : > { %v2001_v28 = vld [vmem:[%s2333_s30 + $0x264] ss:$16 sps:$4 sm:$0xff]   ;;  %v2004_v30 = vld [vmem:[%s2333_s30 + $0x260] ss:$16 sps:$4 sm:$0xff]   ;;  %v2088_v20 = vld [vmem:[%s2333_s30 + $0x2cc] ss:$16 sps:$4 sm:$0xff]  }
  0x40   : > { %1164 = vmatpush1.bf16.msra.mxu0 %v1991_v21  ;;  %v2005_v31 = vld [vmem:[%s2333_s30 + $0x44] ss:$16 sps:$4 sm:$0xff]   ;;  %v2009_v33 = vld [vmem:[%s2333_s30 + $0x40] ss:$16 sps:$4 sm:$0xff]   ;;  %v2083_v21 = vld [vmem:[%s2333_s30 + $0xc8] ss:$16 sps:$4 sm:$0xff]  }
  0x41   : > { %1225 = vmatpush1.bf16.msra.mxu1 %v1992_v22  ;;  %1165 = vmatprep.subr.bf16.mxu0 %v1993_v23  ;;  %v2007_v32 = vld [vmem:[%s2333_s30 + $0x244] ss:$16 sps:$4 sm:$0xff]   ;;  %v2010_v34 = vld [vmem:[%s2333_s30 + $0x240] ss:$16 sps:$4 sm:$0xff]   ;;  %v2086_v22 = vld [vmem:[%s2333_s30 + $0x2c8] ss:$16 sps:$4 sm:$0xff]  }
  0x42   : > { %1226 = vmatprep.subr.bf16.mxu1 %v1995_v24  ;;  %v2011_v35 = vld [vmem:[%s2333_s30 + $0x24] ss:$16 sps:$4 sm:$0xff]   ;;  %v2015_v37 = vld [vmem:[%s2333_s30 + $0x20] ss:$16 sps:$4 sm:$0xff]   ;;  %v2091_v23 = vld [vmem:[%s2333_s30 + $0xac] ss:$16 sps:$4 sm:$0xff]  }
  0x43   : > { %v2013_v36 = vld [vmem:[%s2333_s30 + $0x224] ss:$16 sps:$4 sm:$0xff]   ;;  %v2016_v38 = vld [vmem:[%s2333_s30 + $0x220] ss:$16 sps:$4 sm:$0xff]   ;;  %v2094_v24 = vld [vmem:[%s2333_s30 + $0x2ac] ss:$16 sps:$4 sm:$0xff]  }
  0x44   : > { %1166 = vmatpush1.bf16.msra.mxu0 %v1997_v25  ;;  %v2017_v39 = vld [vmem:[%s2333_s30 + $0x4] ss:$16 sps:$4 sm:$0xff]   ;;  %v2021_v41 = vld [vmem:[%s2333_s30] ss:$16 sps:$4 sm:$0xff]   ;;  %v2089_v25 = vld [vmem:[%s2333_s30 + $0xa8] ss:$16 sps:$4 sm:$0xff]  }
  0x45   : > { %1227 = vmatpush1.bf16.msra.mxu1 %v1998_v26  ;;  %1167 = vmatprep.subr.bf16.mxu0 %v1999_v27  ;;  %v2019_v40 = vld [vmem:[%s2333_s30 + $0x204] ss:$16 sps:$4 sm:$0xff]   ;;  %v2022_v42 = vld [vmem:[%s2333_s30 + $0x200] ss:$16 sps:$4 sm:$0xff]   ;;  %v2092_v26 = vld [vmem:[%s2333_s30 + $0x2a8] ss:$16 sps:$4 sm:$0xff]  }
  0x46   : > { %1228 = vmatprep.subr.bf16.mxu1 %v2001_v28  ;;  %v2023_v43 = vld [vmem:[%s2333_s30 + $0x1e4] ss:$16 sps:$4 sm:$0xff]   ;;  %v2027_v45 = vld [vmem:[%s2333_s30 + $0x1e0] ss:$16 sps:$4 sm:$0xff]   ;;  %v2097_v27 = vld [vmem:[%s2333_s30 + $0x8c] ss:$16 sps:$4 sm:$0xff]  }
  0x47   : > { %v2025_v44 = vld [vmem:[%s2333_s30 + $0x3e4] ss:$16 sps:$4 sm:$0xff]   ;;  %v2028_v46 = vld [vmem:[%s2333_s30 + $0x3e0] ss:$16 sps:$4 sm:$0xff]   ;;  %v2100_v28 = vld [vmem:[%s2333_s30 + $0x28c] ss:$16 sps:$4 sm:$0xff]  }
  0x48   : > { %1168 = vmatpush1.bf16.msra.mxu0 %v2003_v29  ;;  %v2029_v47 = vld [vmem:[%s2333_s30 + $0x1c4] ss:$16 sps:$4 sm:$0xff]   ;;  %v2033_v49 = vld [vmem:[%s2333_s30 + $0x1c0] ss:$16 sps:$4 sm:$0xff]   ;;  %v2095_v29 = vld [vmem:[%s2333_s30 + $0x88] ss:$16 sps:$4 sm:$0xff]  }
  0x49   : > { %1229 = vmatpush1.bf16.msra.mxu1 %v2004_v30  ;;  %1169 = vmatprep.subr.bf16.mxu0 %v2005_v31  ;;  %v2031_v48 = vld [vmem:[%s2333_s30 + $0x3c4] ss:$16 sps:$4 sm:$0xff]   ;;  %v2034_v50 = vld [vmem:[%s2333_s30 + $0x3c0] ss:$16 sps:$4 sm:$0xff]   ;;  %v2098_v30 = vld [vmem:[%s2333_s30 + $0x288] ss:$16 sps:$4 sm:$0xff]  }
  0x4a   : > { %1230 = vmatprep.subr.bf16.mxu1 %v2007_v32  ;;  %v2035_v51 = vld [vmem:[%s2333_s30 + $0x1a4] ss:$16 sps:$4 sm:$0xff]   ;;  %v2039_v53 = vld [vmem:[%s2333_s30 + $0x1a0] ss:$16 sps:$4 sm:$0xff]   ;;  %v2103_v31 = vld [vmem:[%s2333_s30 + $0x6c] ss:$16 sps:$4 sm:$0xff]  }
  0x4b   : > { %v2037_v52 = vld [vmem:[%s2333_s30 + $0x3a4] ss:$16 sps:$4 sm:$0xff]   ;;  %v2040_v54 = vld [vmem:[%s2333_s30 + $0x3a0] ss:$16 sps:$4 sm:$0xff]   ;;  %v2106_v32 = vld [vmem:[%s2333_s30 + $0x26c] ss:$16 sps:$4 sm:$0xff]  }
  0x4c   : > { %1170 = vmatpush1.bf16.msra.mxu0 %v2009_v33  ;;  %v2041_v55 = vld [vmem:[%s2333_s30 + $0x184] ss:$16 sps:$4 sm:$0xff]   ;;  %v2045_v57 = vld [vmem:[%s2333_s30 + $0x180] ss:$16 sps:$4 sm:$0xff]  }
  0x4d   : > { %1231 = vmatpush1.bf16.msra.mxu1 %v2010_v34  ;;  %1171 = vmatprep.subr.bf16.mxu0 %v2011_v35  ;;  %v2043_v56 = vld [vmem:[%s2333_s30 + $0x384] ss:$16 sps:$4 sm:$0xff]   ;;  %v2046_v58 = vld [vmem:[%s2333_s30 + $0x380] ss:$16 sps:$4 sm:$0xff]   ;;  %v2445_v34 = vld [vmem:[%s2340_s15 + $0x2c] ss:$16 sps:$4 sm:$0xff]  }
  0x4e   : > { %1232 = vmatprep.subr.bf16.mxu1 %v2013_v36  ;;  %v2047_v59 = vld [vmem:[%s2333_s30 + $0x164] ss:$16 sps:$4 sm:$0xff]   ;;  %v2051_v63 = vld [vmem:[%s2333_s30 + $0x160] ss:$16 sps:$4 sm:$0xff]   ;;  %v2451_v36 = vld [vmem:[%s2340_s15 + $0x28] ss:$16 sps:$4 sm:$0xff]  }
  0x4f   : > { %v2393_v60 = vld [vmem:[%s2340_s15 + $0x4] ss:$16 sps:$4 sm:$0xff]   ;;  %v2052_v0 = vld [vmem:[%s2333_s30 + $0x360] ss:$16 sps:$4 sm:$0xff]  }
  0x50   : > { %1172 = vmatpush1.bf16.msra.mxu0 %v2015_v37  ;;  %v2049_v61 = vld [vmem:[%s2333_s30 + $0x364] ss:$16 sps:$4 sm:$0xff]   ;;  %1191 = vmatprep.mubr.bf16.mxu0 %v2393_v60  ;;  %v2057_v3 = vld [vmem:[%s2333_s30 + $0x140] ss:$16 sps:$4 sm:$0xff]   ;;  %v2101_v37 = vld [vmem:[%s2333_s30 + $0x68] ss:$16 sps:$4 sm:$0xff]  }
  0x51   : > { %1233 = vmatpush1.bf16.msra.mxu1 %v2016_v38  ;;  %1173 = vmatprep.subr.bf16.mxu0 %v2017_v39  ;;  %v2053_v1 = vld [vmem:[%s2333_s30 + $0x144] ss:$16 sps:$4 sm:$0xff]   ;;  %v2058_v4 = vld [vmem:[%s2333_s30 + $0x340] ss:$16 sps:$4 sm:$0xff]   ;;  %v2104_v38 = vld [vmem:[%s2333_s30 + $0x268] ss:$16 sps:$4 sm:$0xff]  }
  0x52   : > { %1234 = vmatprep.subr.bf16.mxu1 %v2019_v40  ;;  %v2055_v2 = vld [vmem:[%s2333_s30 + $0x344] ss:$16 sps:$4 sm:$0xff]   ;;  %v2063_v7 = vld [vmem:[%s2333_s30 + $0x120] ss:$16 sps:$4 sm:$0xff]   ;;  %v2109_v39 = vld [vmem:[%s2333_s30 + $0x4c] ss:$16 sps:$4 sm:$0xff]  }
  0x53   : > { %v2059_v5 = vld [vmem:[%s2333_s30 + $0x124] ss:$16 sps:$4 sm:$0xff]   ;;  %v2064_v8 = vld [vmem:[%s2333_s30 + $0x320] ss:$16 sps:$4 sm:$0xff]   ;;  %v2112_v40 = vld [vmem:[%s2333_s30 + $0x24c] ss:$16 sps:$4 sm:$0xff]  }
  0x54   : > { %1174 = vmatpush1.bf16.msra.mxu0 %v2021_v41  ;;  %v2061_v6 = vld [vmem:[%s2333_s30 + $0x324] ss:$16 sps:$4 sm:$0xff]   ;;  %v2069_v11 = vld [vmem:[%s2333_s30 + $0x100] ss:$16 sps:$4 sm:$0xff]  }
  0x55   : > { %1235 = vmatpush1.bf16.msra.mxu1 %v2022_v42  ;;  %1175 = vmatprep.subr.bf16.mxu0 %v2023_v43  ;;  %v2065_v9 = vld [vmem:[%s2333_s30 + $0x104] ss:$16 sps:$4 sm:$0xff]   ;;  %v2070_v12 = vld [vmem:[%s2333_s30 + $0x300] ss:$16 sps:$4 sm:$0xff]   ;;  %v336_v43 = vld [vmem:[%s2340_s15 + $0x48] sm:$0xff] }
  0x56   : > { %1236 = vmatprep.subr.bf16.mxu1 %v2025_v44  ;;  %v2067_v10 = vld [vmem:[%s2333_s30 + $0x304] ss:$16 sps:$4 sm:$0xff]   ;;  %v2418_v15 = vld [vmem:[%s2340_s15] ss:$16 sps:$4 sm:$0xff]  }
  0x57   : > { %v2442_v33 = vld [vmem:[%s2340_s15 + $0x24] ss:$16 sps:$4 sm:$0xff]   ;;  %v2448_v35 = vld [vmem:[%s2340_s15 + $0x20] ss:$16 sps:$4 sm:$0xff]  }
  0x58   : > { %1176 = vmatpush2.bf16.msra.mxu0 %v2027_v45  ;;  %v335_v41 = vld [vmem:[%s2340_s15 + $0x40] sm:$0xff]  ;;  %v2107_v45 = vld [vmem:[%s2333_s30 + $0x48] ss:$16 sps:$4 sm:$0xff]  }
  0x59   : > { %1237 = vmatpush2.bf16.msra.mxu1 %v2028_v46  ;;  %1177 = vmatprep.subr.bf16.mxu0 %v2029_v47  ;;  %v2462_v42 = vcombine.high %v335_v41, %v335_v41  ;;  %v2465_v44 = vcombine.low %v335_v41, %v335_v41  ;;  %v2110_v46 = vld [vmem:[%s2333_s30 + $0x248] ss:$16 sps:$4 sm:$0xff]   ;;  %v2469_v47 = vcombine.high %v336_v43, %v336_v43 }
  0x5a   : > { %1238 = vmatprep.subr.bf16.mxu1 %v2031_v48  ;;  %v2471_v48 = vcombine.low %v336_v43, %v336_v43 }
  0x5c   : > { %1178 = vmatpush2.bf16.msra.mxu0 %v2033_v49  ;;  %v2115_v49 = vld [vmem:[%s2333_s30 + $0x2c] ss:$16 sps:$4 sm:$0xff]  }
  0x5d   : > { %1239 = vmatpush2.bf16.msra.mxu1 %v2034_v50  ;;  %1179 = vmatprep.subr.bf16.mxu0 %v2035_v51  ;;  %v2118_v50 = vld [vmem:[%s2333_s30 + $0x22c] ss:$16 sps:$4 sm:$0xff]   ;;  %v2113_v51 = vld [vmem:[%s2333_s30 + $0x28] ss:$16 sps:$4 sm:$0xff]  }
  0x5e   : > { %1240 = vmatprep.subr.bf16.mxu1 %v2037_v52  ;;  %v2116_v52 = vld [vmem:[%s2333_s30 + $0x228] ss:$16 sps:$4 sm:$0xff]  }
  0x60   : > { %1180 = vmatpush2.bf16.msra.mxu0 %v2039_v53  ;;  %v2121_v53 = vld [vmem:[%s2333_s30 + $0xc] ss:$16 sps:$4 sm:$0xff]  }
  0x61   : > { %1241 = vmatpush2.bf16.msra.mxu1 %v2040_v54  ;;  %1181 = vmatprep.subr.bf16.mxu0 %v2041_v55  ;;  %v2124_v54 = vld [vmem:[%s2333_s30 + $0x20c] ss:$16 sps:$4 sm:$0xff]   ;;  %v2119_v55 = vld [vmem:[%s2333_s30 + $0x8] ss:$16 sps:$4 sm:$0xff]  }
  0x62   : > { %1242 = vmatprep.subr.bf16.mxu1 %v2043_v56  ;;  %v2122_v56 = vld [vmem:[%s2333_s30 + $0x208] ss:$16 sps:$4 sm:$0xff]  }
  0x64   : > { %1182 = vmatpush2.bf16.msra.mxu0 %v2045_v57  ;;  %v2127_v57 = vld [vmem:[%s2333_s30 + $0x1ec] ss:$16 sps:$4 sm:$0xff]  }
  0x65   : > { %1243 = vmatpush2.bf16.msra.mxu1 %v2046_v58  ;;  %1183 = vmatprep.subr.bf16.mxu0 %v2047_v59  ;;  %v2130_v58 = vld [vmem:[%s2333_s30 + $0x3ec] ss:$16 sps:$4 sm:$0xff]   ;;  %v2125_v59 = vld [vmem:[%s2333_s30 + $0x1e8] ss:$16 sps:$4 sm:$0xff]  }
  0x66   : > { %1244 = vmatprep.subr.bf16.mxu1 %v2049_v61  ;;  %v2133_v61 = vld [vmem:[%s2333_s30 + $0x1cc] ss:$16 sps:$4 sm:$0xff]  }
  0x68   : > { %1184 = vmatpush2.bf16.msra.mxu0 %v2051_v63  ;;  %v2131_v63 = vld [vmem:[%s2333_s30 + $0x1c8] ss:$16 sps:$4 sm:$0xff]  }
  0x69   : > { %1245 = vmatpush2.bf16.msra.mxu1 %v2052_v0  ;;  %1185 = vmatprep.subr.bf16.mxu0 %v2053_v1  ;;  %v2134_v0 = vld [vmem:[%s2333_s30 + $0x3c8] ss:$16 sps:$4 sm:$0xff]   ;;  %v2139_v1 = vld [vmem:[%s2333_s30 + $0x1ac] ss:$16 sps:$4 sm:$0xff]  }
  0x6a   : > { %1246 = vmatprep.subr.bf16.mxu1 %v2055_v2  ;;  %v2142_v2 = vld [vmem:[%s2333_s30 + $0x3ac] ss:$16 sps:$4 sm:$0xff]  }
  0x6c   : > { %1186 = vmatpush2.bf16.msra.mxu0 %v2057_v3  ;;  %v2137_v3 = vld [vmem:[%s2333_s30 + $0x1a8] ss:$16 sps:$4 sm:$0xff]  }
  0x6d   : > { %1247 = vmatpush2.bf16.msra.mxu1 %v2058_v4  ;;  %1187 = vmatprep.subr.bf16.mxu0 %v2059_v5  ;;  %v2140_v4 = vld [vmem:[%s2333_s30 + $0x3a8] ss:$16 sps:$4 sm:$0xff]   ;;  %v2151_v5 = vld [vmem:[%s2333_s30 + $0x18c] ss:$16 sps:$4 sm:$0xff]  }
  0x6e   : > { %1248 = vmatprep.subr.bf16.mxu1 %v2061_v6  ;;  %v2154_v6 = vld [vmem:[%s2333_s30 + $0x38c] ss:$16 sps:$4 sm:$0xff]  }
  0x70   : > { %1188 = vmatpush2.bf16.msra.mxu0 %v2063_v7  ;;  %v2149_v7 = vld [vmem:[%s2333_s30 + $0x188] ss:$16 sps:$4 sm:$0xff]  }
  0x71   : > { %1249 = vmatpush2.bf16.msra.mxu1 %v2064_v8  ;;  %1189 = vmatprep.subr.bf16.mxu0 %v2065_v9  ;;  %v2152_v8 = vld [vmem:[%s2333_s30 + $0x388] ss:$16 sps:$4 sm:$0xff]   ;;  %v2157_v9 = vld [vmem:[%s2333_s30 + $0x16c] ss:$16 sps:$4 sm:$0xff]  }
  0x72   : > { %1250 = vmatprep.subr.bf16.mxu1 %v2067_v10  ;;  %v2160_v10 = vld [vmem:[%s2333_s30 + $0x36c] ss:$16 sps:$4 sm:$0xff]  }
  0x74   : > { %1190 = vmatpush2.bf16.msra.mxu0 %v2069_v11  ;;  %v2155_v11 = vld [vmem:[%s2333_s30 + $0x168] ss:$16 sps:$4 sm:$0xff]  }
  0x75   : > { %1251 = vmatpush2.bf16.msra.mxu1 %v2070_v12  ;;  %1281 = vmatprep.subr.bf16.mxu0 %v2079_v13  ;;  %v2158_v12 = vld [vmem:[%s2333_s30 + $0x368] ss:$16 sps:$4 sm:$0xff]   ;;  %v2167_v13 = vld [vmem:[%s2333_s30 + $0x14c] ss:$16 sps:$4 sm:$0xff]  }
  0x76   : > { %1342 = vmatprep.subr.bf16.mxu1 %v2082_v14  ;;  %v2170_v14 = vld [vmem:[%s2333_s30 + $0x34c] ss:$16 sps:$4 sm:$0xff]  }
  0x77   : > { %1192 = vmatmul.mubr.bf16.vlgmr.msra.gmra.mxu0 %v2418_v15 }
  0x78   : > { %1253 = vmatmul.mubr.bf16.vlgmr.msra.gmra.mxu1 %v2421_v16  ;;  %1282 = vmatpush1.bf16.msra.mxu0 %v2077_v17  ;;  %v2165_v17 = vld [vmem:[%s2333_s30 + $0x148] ss:$16 sps:$4 sm:$0xff]  }
  0x79   : > { %1343 = vmatpush1.bf16.msra.mxu1 %v2080_v18  ;;  %1283 = vmatprep.subr.bf16.mxu0 %v2085_v19  ;;  %v2168_v18 = vld [vmem:[%s2333_s30 + $0x348] ss:$16 sps:$4 sm:$0xff]   ;;  %v2173_v19 = vld [vmem:[%s2333_s30 + $0x12c] ss:$16 sps:$4 sm:$0xff]  }
  0x7a   : > { %1344 = vmatprep.subr.bf16.mxu1 %v2088_v20  ;;  %1201 = vmatprep.mubr.bf16.mxu0 %v2442_v33  ;;  %v2176_v20 = vld [vmem:[%s2333_s30 + $0x32c] ss:$16 sps:$4 sm:$0xff]  }
  0x7b   : > { %1262 = vmatprep.mubr.bf16.mxu1 %v2445_v34 }
  0x7c   : > { %1284 = vmatpush1.bf16.msra.mxu0 %v2083_v21  ;;  %v2171_v21 = vld [vmem:[%s2333_s30 + $0x128] ss:$16 sps:$4 sm:$0xff]  }
  0x7d   : > { %1345 = vmatpush1.bf16.msra.mxu1 %v2086_v22  ;;  %1285 = vmatprep.subr.bf16.mxu0 %v2091_v23  ;;  %v2174_v22 = vld [vmem:[%s2333_s30 + $0x328] ss:$16 sps:$4 sm:$0xff]   ;;  %v2179_v23 = vld [vmem:[%s2333_s30 + $0x10c] ss:$16 sps:$4 sm:$0xff]  }
  0x7e   : > { %1346 = vmatprep.subr.bf16.mxu1 %v2094_v24  ;;  %v2182_v24 = vld [vmem:[%s2333_s30 + $0x30c] ss:$16 sps:$4 sm:$0xff]  }
  0x7f   : > { %1202 = vmatmul.mubr.bf16.gmra.mxu0 %v2448_v35 }
  0x80   : > { %1286 = vmatpush1.bf16.msra.mxu0 %v2089_v25  ;;  %1263 = vmatmul.mubr.bf16.gmra.mxu1 %v2451_v36  ;;  %v2177_v25 = vld [vmem:[%s2333_s30 + $0x108] ss:$16 sps:$4 sm:$0xff]  }
  0x81   : > { %1347 = vmatpush1.bf16.msra.mxu1 %v2092_v26  ;;  %1287 = vmatprep.subr.bf16.mxu0 %v2097_v27  ;;  %v2180_v26 = vld [vmem:[%s2333_s30 + $0x308] ss:$16 sps:$4 sm:$0xff]  }
  0x82   : > { %1348 = vmatprep.subr.bf16.mxu1 %v2100_v28  ;;  %1211 = vmatprep.mubr.bf16.mxu0 %v2462_v42 }
  0x83   : > { %1272 = vmatprep.mubr.bf16.mxu1 %v2469_v47 }
  0x84   : > { %1288 = vmatpush1.bf16.msra.mxu0 %v2095_v29 }
  0x85   : > { %1349 = vmatpush1.bf16.msra.mxu1 %v2098_v30  ;;  %1289 = vmatprep.subr.bf16.mxu0 %v2103_v31  ;;  %v308_v30 = vld [vmem:[#allocation2 + $0x38] sm:$0xff] }
  0x86   : > { %1350 = vmatprep.subr.bf16.mxu1 %v2106_v32 }
  0x87   : > { %1212 = vmatmul.mubr.bf16.gmra.mxu0 %v2465_v44 }
  0x88   : > { %1290 = vmatpush1.bf16.msra.mxu0 %v2101_v37  ;;  %1273 = vmatmul.mubr.bf16.gmra.mxu1 %v2471_v48 }
  0x89   : > { %1351 = vmatpush1.bf16.msra.mxu1 %v2104_v38  ;;  %1291 = vmatprep.subr.bf16.mxu0 %v2109_v39 }
  0x8a   : > { %1352 = vmatprep.subr.bf16.mxu1 %v2112_v40  ;;  %1313 = vmatprep.mubr.bf16.mxu0 %v2393_v60  ;;  %v2128_v60 = vld [vmem:[%s2333_s30 + $0x3e8] ss:$16 sps:$4 sm:$0xff]  }
  0x8b   : > { %1374 = vmatprep.mubr.bf16.mxu1 %v2397_v62  ;;  %v2136_v62 = vld [vmem:[%s2333_s30 + $0x3cc] ss:$16 sps:$4 sm:$0xff]  }
  0x8c   : > { %1292 = vmatpush1.bf16.msra.mxu0 %v2107_v45  ;;  %v312_v40 = vld [vmem:[#allocation2 + $0x68] sm:$0xff] }
  0x8d   : > { %1353 = vmatpush1.bf16.msra.mxu1 %v2110_v46  ;;  %1293 = vmatprep.subr.bf16.mxu0 %v2115_v49  ;;  %v315_v46 = vld [vmem:[#allocation2 + $0x8] sm:$0xff] }
  0x8e   : > { %1354 = vmatprep.subr.bf16.mxu1 %v2118_v50  ;;  %v316_v50 = vld [vmem:[#allocation2 + $0x88] sm:$0xff] }
  0x90   : > { %1294 = vmatpush1.bf16.msra.mxu0 %v2113_v51 }
  0x91   : > { %1355 = vmatpush1.bf16.msra.mxu1 %v2116_v52  ;;  %1295 = vmatprep.subr.bf16.mxu0 %v2121_v53 }
  0x92   : > { %1356 = vmatprep.subr.bf16.mxu1 %v2124_v54 }
  0x94   : > { %1296 = vmatpush1.bf16.msra.mxu0 %v2119_v55  ;;  %v319_v55 = vld [vmem:[#allocation2 + $0x58] sm:$0xff] }
  0x95   : > { %1357 = vmatpush1.bf16.msra.mxu1 %v2122_v56  ;;  %1297 = vmatprep.subr.bf16.mxu0 %v2127_v57 }
  0x96   : > { %1358 = vmatprep.subr.bf16.mxu1 %v2130_v58 }
  0x98   : > { %1298 = vmatpush2.bf16.msra.mxu0 %v2125_v59 }
  0x99   : > { %1359 = vmatpush2.bf16.msra.mxu1 %v2128_v60  ;;  %1299 = vmatprep.subr.bf16.mxu0 %v2133_v61  ;;  %v320_v60 = vld [vmem:[#allocation2 + $0x10] sm:$0xff] }
  0x9a   : > { %1360 = vmatprep.subr.bf16.mxu1 %v2136_v62 }
  0x9c   : > { %1300 = vmatpush2.bf16.msra.mxu0 %v2131_v63 }
  0x9d   : > { %1361 = vmatpush2.bf16.msra.mxu1 %v2134_v0  ;;  %1301 = vmatprep.subr.bf16.mxu0 %v2139_v1  ;;  %v323_v1 = vld [vmem:[#allocation2 + $0x20] sm:$0xff] }
  0x9e   : > { %1362 = vmatprep.subr.bf16.mxu1 %v2142_v2 }
  0xa0   : > { %1302 = vmatpush2.bf16.msra.mxu0 %v2137_v3 }
  0xa1   : > { %1363 = vmatpush2.bf16.msra.mxu1 %v2140_v4  ;;  %1303 = vmatprep.subr.bf16.mxu0 %v2151_v5 }
  0xa2   : > { %1364 = vmatprep.subr.bf16.mxu1 %v2154_v6  ;;  %v324_v6 = vld [vmem:[#allocation2 + $0x48] sm:$0xff] }
  0xa4   : > { %1304 = vmatpush2.bf16.msra.mxu0 %v2149_v7 }
  0xa5   : > { %1365 = vmatpush2.bf16.msra.mxu1 %v2152_v8  ;;  %1305 = vmatprep.subr.bf16.mxu0 %v2157_v9 }
  0xa6   : > { %1366 = vmatprep.subr.bf16.mxu1 %v2160_v10 }
  0xa8   : > { %1306 = vmatpush2.bf16.msra.mxu0 %v2155_v11 }
  0xa9   : > { %1367 = vmatpush2.bf16.msra.mxu1 %v2158_v12  ;;  %1307 = vmatprep.subr.bf16.mxu0 %v2167_v13 }
  0xaa   : > { %1368 = vmatprep.subr.bf16.mxu1 %v2170_v14 }
  0xac   : > { %1308 = vmatpush2.bf16.msra.mxu0 %v2165_v17 }
  0xad   : > { %1369 = vmatpush2.bf16.msra.mxu1 %v2168_v18  ;;  %1309 = vmatprep.subr.bf16.mxu0 %v2173_v19  ;;  %v309_v18 = vld [vmem:[#allocation2 + $0x50] sm:$0xff] }
  0xae   : > { %1370 = vmatprep.subr.bf16.mxu1 %v2176_v20 }
  0xb0   : > { %1310 = vmatpush2.bf16.msra.mxu0 %v2171_v21 }
  0xb1   : > { %1371 = vmatpush2.bf16.msra.mxu1 %v2174_v22  ;;  %1311 = vmatprep.subr.bf16.mxu0 %v2179_v23  ;;  %v310_v22 = vld [vmem:[#allocation2 + $0x18] sm:$0xff] }
  0xb2   : > { %1372 = vmatprep.subr.bf16.mxu1 %v2182_v24 }
  0xb4   : > { %1312 = vmatpush2.bf16.msra.mxu0 %v2177_v25 }
  0xb5   : > { %1373 = vmatpush2.bf16.msra.mxu1 %v2180_v26 }
  0xb7   : > { %1314 = vmatmul.mubr.bf16.vlgmr.msra.gmra.mxu0 %v2418_v15  ;;  %v307_v15 = vld [vmem:[#allocation2] sm:$0xff] }
  0xb8   : > { %1375 = vmatmul.mubr.bf16.vlgmr.msra.gmra.mxu1 %v2421_v16  ;;  %1323 = vmatprep.mubr.bf16.mxu0 %v2442_v33 }
  0xb9   : > { %1384 = vmatprep.mubr.bf16.mxu1 %v2445_v34 }
  0xbf   : > { %1324 = vmatmul.mubr.bf16.gmra.mxu0 %v2448_v35  ;;  %v311_v35 = vld [vmem:[#allocation2 + $0x30] sm:$0xff] }
  0xc0   : > { %1385 = vmatmul.mubr.bf16.gmra.mxu1 %v2451_v36  ;;  %1333 = vmatprep.mubr.bf16.mxu0 %v2462_v42 }
  0xc1   : > { %1394 = vmatprep.mubr.bf16.mxu1 %v2469_v47 }
  0xc7   : > { %1334 = vmatmul.mubr.bf16.gmra.mxu0 %v2465_v44 }
  0xc8   : > { %1395 = vmatmul.mubr.bf16.gmra.mxu1 %v2471_v48 }
 0x137   : > { %v1193_v27 = vpop.f32.mrf.mxu0 }
 0x138   : > { %v1254_v28 = vpop.f32.mrf.mxu1 }
 0x139   : > { %v1255_v16 = vadd.f32 %v1254_v28, %v1193_v27  ;;  %v1195_v29 = vpop.f32.mrf.mxu0  ;;  %v313_v27 = vld [vmem:[#allocation2 + $0x78] sm:$0xff] }
 0x13a   : > { %v1256_v31 = vpop.f32.mrf.mxu1 }
 0x13b   : > { %v1403_v32 = vadd.f32 %v1255_v16, %v307_v15  ;;  %v1257_v33 = vadd.f32 %v1256_v31, %v1195_v29  ;;  %v1197_v34 = vpop.f32.mrf.mxu0 }
 0x13c   : > { %v1258_v36 = vpop.f32.mrf.mxu1 }
 0x13d   : > { %1423 = vst [vmem:[#allocation2] sm:$0xff] %v1403_v32  ;;  %v1404_v37 = vadd.f32 %v1257_v33, %v308_v30  ;;  %v1259_v38 = vadd.f32 %v1258_v36, %v1197_v34  ;;  %v1199_v39 = vpop.f32.mrf.mxu0  ;;  %v314_v30 = vld [vmem:[#allocation2 + $0x80] sm:$0xff] }
 0x13e   : > { %v1260_v41 = vpop.f32.mrf.mxu1 }
 0x13f   : > { %1424 = vst [vmem:[#allocation2 + $0x38] sm:$0xff] %v1404_v37  ;;  %v1407_v42 = vadd.f32 %v1259_v38, %v311_v35  ;;  %v1261_v43 = vadd.f32 %v1260_v41, %v1199_v39  ;;  %v1203_v45 = vpop.f32.mrf.mxu0  ;;  %v317_v35 = vld [vmem:[#allocation2 + $0x28] sm:$0xff] }
 0x140   : > { %v1264_v47 = vpop.f32.mrf.mxu1 }
 0x141   : > { %1427 = vst [vmem:[#allocation2 + $0x30] sm:$0xff] %v1407_v42  ;;  %v1408_v44 = vadd.f32 %v1261_v43, %v312_v40  ;;  %v1265_v48 = vadd.f32 %v1264_v47, %v1203_v45  ;;  %v1205_v49 = vpop.f32.mrf.mxu0  ;;  %v318_v40 = vld [vmem:[#allocation2 + $0x40] sm:$0xff]  ;;  %v321_v45 = vld [vmem:[#allocation2 + $0x98] sm:$0xff] }
 0x142   : > { %v1266_v51 = vpop.f32.mrf.mxu1 }
 0x143   : > { %1428 = vst [vmem:[#allocation2 + $0x68] sm:$0xff] %v1408_v44  ;;  %v1411_v52 = vadd.f32 %v1265_v48, %v315_v46  ;;  %v1267_v53 = vadd.f32 %v1266_v51, %v1205_v49  ;;  %v1207_v54 = vpop.f32.mrf.mxu0 }
 0x144   : > { %v1268_v56 = vpop.f32.mrf.mxu1 }
 0x145   : > { %1431 = vst [vmem:[#allocation2 + $0x8] sm:$0xff] %v1411_v52  ;;  %v1412_v57 = vadd.f32 %v1267_v53, %v316_v50  ;;  %v1269_v58 = vadd.f32 %v1268_v56, %v1207_v54  ;;  %v1209_v59 = vpop.f32.mrf.mxu0  ;;  %v322_v50 = vld [vmem:[#allocation2 + $0x60] sm:$0xff] }
 0x146   : > { %v1270_v61 = vpop.f32.mrf.mxu1 }
 0x147   : > { %1432 = vst [vmem:[#allocation2 + $0x88] sm:$0xff] %v1412_v57  ;;  %v1415_v62 = vadd.f32 %v1269_v58, %v319_v55  ;;  %v1271_v63 = vadd.f32 %v1270_v61, %v1209_v59  ;;  %v1213_v0 = vpop.f32.mrf.mxu0  ;;  %v325_v55 = vld [vmem:[#allocation2 + $0x70] sm:$0xff] }
 0x148   : > { %v1274_v2 = vpop.f32.mrf.mxu1 }
 0x149   : > { %1435 = vst [vmem:[#allocation2 + $0x58] sm:$0xff] %v1415_v62  ;;  %v1416_v3 = vadd.f32 %v1271_v63, %v320_v60  ;;  %v1275_v4 = vadd.f32 %v1274_v2, %v1213_v0  ;;  %v1215_v5 = vpop.f32.mrf.mxu0  ;;  %v326_v60 = vld [vmem:[#allocation2 + $0x90] sm:$0xff] }
 0x14a   : > { %v1276_v7 = vpop.f32.mrf.mxu1 }
 0x14b   : > { %1436 = vst [vmem:[#allocation2 + $0x10] sm:$0xff] %v1416_v3  ;;  %v1419_v8 = vadd.f32 %v1275_v4, %v323_v1  ;;  %v1277_v9 = vadd.f32 %v1276_v7, %v1215_v5  ;;  %v1217_v10 = vpop.f32.mrf.mxu0 }
 0x14c   : > { %v1278_v11 = vpop.f32.mrf.mxu1 }
 0x14d   : > { %1439 = vst [vmem:[#allocation2 + $0x20] sm:$0xff] %v1419_v8  ;;  %v1420_v12 = vadd.f32 %v1277_v9, %v324_v6  ;;  %v1218_v13 = vpop.f32.mrf.mxu0 }
 0x14e   : > { %v1279_v14 = vpop.f32.mrf.mxu1 }
 0x14f   : > { %1440 = vst [vmem:[#allocation2 + $0x48] sm:$0xff] %v1420_v12 }
 0x177   : > { %v1315_v17 = vpop.f32.mrf.mxu0 }
 0x178   : > { %v1376_v19 = vpop.f32.mrf.mxu1 }
 0x179   : > { %v1377_v20 = vadd.f32 %v1376_v19, %v1315_v17  ;;  %v1317_v21 = vpop.f32.mrf.mxu0 }
 0x17a   : > { %v1378_v23 = vpop.f32.mrf.mxu1 }
 0x17b   : > { %v1405_v24 = vadd.f32 %v1377_v20, %v309_v18  ;;  %v1379_v25 = vadd.f32 %v1378_v23, %v1317_v21  ;;  %v1319_v26 = vpop.f32.mrf.mxu0 }
 0x17c   : > { %v1380_v15 = vpop.f32.mrf.mxu1 }
 0x17d   : > { %1425 = vst [vmem:[#allocation2 + $0x50] sm:$0xff] %v1405_v24  ;;  %v1406_v28 = vadd.f32 %v1379_v25, %v310_v22  ;;  %v1381_v16 = vadd.f32 %v1380_v15, %v1319_v26  ;;  %v1321_v29 = vpop.f32.mrf.mxu0 }
 0x17e   : > { %v1382_v31 = vpop.f32.mrf.mxu1 }
 0x17f   : > { %1426 = vst [vmem:[#allocation2 + $0x18] sm:$0xff] %v1406_v28  ;;  %v1409_v32 = vadd.f32 %v1381_v16, %v313_v27  ;;  %v1383_v33 = vadd.f32 %v1382_v31, %v1321_v29  ;;  %v1325_v34 = vpop.f32.mrf.mxu0 }
 0x180   : > { %v1386_v36 = vpop.f32.mrf.mxu1 }
 0x181   : > { %1429 = vst [vmem:[#allocation2 + $0x78] sm:$0xff] %v1409_v32  ;;  %v1410_v37 = vadd.f32 %v1383_v33, %v314_v30  ;;  %v1387_v38 = vadd.f32 %v1386_v36, %v1325_v34  ;;  %v1327_v39 = vpop.f32.mrf.mxu0 }
 0x182   : > { %v1388_v41 = vpop.f32.mrf.mxu1 }
 0x183   : > { %1430 = vst [vmem:[#allocation2 + $0x80] sm:$0xff] %v1410_v37  ;;  %v1413_v42 = vadd.f32 %v1387_v38, %v317_v35  ;;  %v1389_v43 = vadd.f32 %v1388_v41, %v1327_v39  ;;  %v1329_v44 = vpop.f32.mrf.mxu0 }
 0x184   : > { %v1390_v46 = vpop.f32.mrf.mxu1 }
 0x185   : > { %1433 = vst [vmem:[#allocation2 + $0x28] sm:$0xff] %v1413_v42  ;;  %v1414_v47 = vadd.f32 %v1389_v43, %v318_v40  ;;  %v1391_v48 = vadd.f32 %v1390_v46, %v1329_v44  ;;  %v1331_v49 = vpop.f32.mrf.mxu0 }
 0x186   : > { %v1392_v51 = vpop.f32.mrf.mxu1 }
 0x187   : > { %1434 = vst [vmem:[#allocation2 + $0x40] sm:$0xff] %v1414_v47  ;;  %v1417_v52 = vadd.f32 %v1391_v48, %v321_v45  ;;  %v1393_v53 = vadd.f32 %v1392_v51, %v1331_v49  ;;  %v1335_v54 = vpop.f32.mrf.mxu0 }
 0x188   : > { %v1396_v56 = vpop.f32.mrf.mxu1 }
 0x189   : > { %1437 = vst [vmem:[#allocation2 + $0x98] sm:$0xff] %v1417_v52  ;;  %v1418_v57 = vadd.f32 %v1393_v53, %v322_v50  ;;  %v1397_v58 = vadd.f32 %v1396_v56, %v1335_v54  ;;  %v1337_v59 = vpop.f32.mrf.mxu0 }
 0x18a   : > { %v1398_v61 = vpop.f32.mrf.mxu1 }
 0x18b   : > { %1438 = vst [vmem:[#allocation2 + $0x60] sm:$0xff] %v1418_v57  ;;  %v1421_v62 = vadd.f32 %v1397_v58, %v325_v55  ;;  %v1399_v63 = vadd.f32 %v1398_v61, %v1337_v59  ;;  %v1339_v0 = vpop.f32.mrf.mxu0  ;;  %1446 = sbr.rel (%p1889_p13) target bundleno = 432 (0x1b0), region = 67 }
 0x18c   : > { %v1400_v1 = vpop.f32.mrf.mxu1 }
 0x18d   : > { %1441 = vst [vmem:[#allocation2 + $0x70] sm:$0xff] %v1421_v62  ;;  %v1422_v2 = vadd.f32 %v1399_v63, %v326_v60  ;;  %v1340_v3 = vpop.f32.mrf.mxu0 }
 0x18e   : > { %v1401_v4 = vpop.f32.mrf.mxu1 }
 0x18f   : > { %1442 = vst [vmem:[#allocation2 + $0x90] sm:$0xff] %v1422_v2 }
 0x190   : > { %v1469_v5 = vlaneseq  ;;  %v1467_v7 = vld [vmem:[%s2625_s2] sm:$0xf]  ;;  %v1448_v10 = vld [vmem:[#allocation2 + $0x38] sm:$0xff]  ;;  %v1449_v17 = vld [vmem:[#allocation2 + $0x50] sm:$0xff] }
 0x191   : > { %v1509_v8 = vld [vmem:[%s2626_s3] sm:$0xf]  ;;  %v1451_v18 = vld [vmem:[#allocation2 + $0x30] sm:$0xff]  ;;  %v1452_v19 = vld [vmem:[#allocation2 + $0x68] sm:$0xff] }
 0x192   : > { %v1470_v6 = vshrl.u32 %v1469_v5, 7  ;;  %v1447_v9 = vld [vmem:[#allocation2] sm:$0xff]  ;;  %v1450_v24 = vld [vmem:[#allocation2 + $0x18] sm:$0xff]  ;;  %v1455_v45 = vld [vmem:[#allocation2 + $0x8] sm:$0xff] }
 0x193   : > { %v1453_v25 = vld [vmem:[#allocation2 + $0x78] sm:$0xff]  ;;  %v1454_v26 = vld [vmem:[#allocation2 + $0x80] sm:$0xff]  ;;  %v1456_v46 = vld [vmem:[#allocation2 + $0x88] sm:$0xff] }
 0x194   : > { %v1471_v11 = vsub.s32 0, %v1470_v6  ;;  %v1475_v12 = vsub.s32 1, %v1470_v6  ;;  %v1479_v13 = vsub.s32 2, %v1470_v6  ;;  %v1483_v14 = vsub.s32 3, %v1470_v6  ;;  %v1457_v51 = vld [vmem:[#allocation2 + $0x28] sm:$0xff]  ;;  %v1458_v52 = vld [vmem:[#allocation2 + $0x40] sm:$0xff] }
 0x195   : > { %v1459_v57 = vld [vmem:[#allocation2 + $0x58] sm:$0xff]  ;;  %v1460_v58 = vld [vmem:[#allocation2 + $0x10] sm:$0xff]  ;;  %v1462_v0 = vld [vmem:[#allocation2 + $0x60] sm:$0xff] }
 0x196   : > { %v2536_v20 = vrot.slane %v1467_v7, %v1471_v11  ;;  %v2538_v21 = vrot.slane %v1467_v7, %v1475_v12  ;;  %v2540_v22 = vrot.slane %v1509_v8, %v1471_v11  ;;  %v2542_v23 = vrot.slane %v1509_v8, %v1475_v12  ;;  %v1461_v63 = vld [vmem:[#allocation2 + $0x98] sm:$0xff] }
 0x197   : > { %v2544_v27 = vrot.slane %v1467_v7, %v1479_v13  ;;  %v2546_v15 = vrot.slane %v1467_v7, %v1483_v14  ;;  %v2548_v28 = vrot.slane %v1509_v8, %v1479_v13  ;;  %v2550_v16 = vrot.slane %v1509_v8, %v1483_v14  ;;  %v1463_v13 = vld [vmem:[#allocation2 + $0x20] sm:$0xff] }
 0x198   : > { %v1489_v29 = vmul.f32 %v2536_v20, %v1447_v9  ;;  %v1490_v30 = vmul.f32 %v2538_v21, %v1448_v10  ;;  %v1493_v31 = vmul.f32 %v2536_v20, %v1451_v18  ;;  %v1494_v32 = vmul.f32 %v2538_v21, %v1452_v19 }
 0x199   : > { %v1491_v33 = vmul.f32 %v2544_v27, %v1449_v17  ;;  %v1492_v34 = vmul.f32 %v2546_v15, %v1450_v24  ;;  %v1495_v35 = vmul.f32 %v2544_v27, %v1453_v25  ;;  %v1496_v36 = vmul.f32 %v2546_v15, %v1454_v26  ;;  %v1464_v24 = vld [vmem:[#allocation2 + $0x48] sm:$0xff] }
 0x19a   : > { %v1531_v37 = vadd.f32 %v2540_v22, %v1489_v29  ;;  %v1532_v38 = vadd.f32 %v2542_v23, %v1490_v30  ;;  %v1535_v39 = vadd.f32 %v2540_v22, %v1493_v31  ;;  %v1536_v40 = vadd.f32 %v2542_v23, %v1494_v32  ;;  %v1465_v31 = vld [vmem:[#allocation2 + $0x70] sm:$0xff] }
 0x19b   : > { %v1533_v41 = vadd.f32 %v2548_v28, %v1491_v33  ;;  %v1534_v42 = vadd.f32 %v2550_v16, %v1492_v34  ;;  %v1537_v43 = vadd.f32 %v2548_v28, %v1495_v35  ;;  %v1538_v44 = vadd.f32 %v2550_v16, %v1496_v36  ;;  %v1466_v32 = vld [vmem:[#allocation2 + $0x90] sm:$0xff] }
 0x19c   : > { %v1551_v47 = vmax.f32 %v1531_v37, 0.0  ;;  %v1552_v48 = vmax.f32 %v1532_v38, 0.0  ;;  %v1555_v49 = vmax.f32 %v1535_v39, 0.0  ;;  %v1556_v50 = vmax.f32 %v1536_v40, 0.0 }
 0x19d   : > { %v1553_v53 = vmax.f32 %v1533_v41, 0.0  ;;  %v1554_v54 = vmax.f32 %v1534_v42, 0.0  ;;  %v1557_v55 = vmax.f32 %v1537_v43, 0.0  ;;  %v1558_v56 = vmax.f32 %v1538_v44, 0.0 }
 0x19e   : > { %v1904_v59 = vpack.c.bf16 %v1552_v48, %v1551_v47  ;;  %v1906_v60 = vpack.c.bf16 %v1556_v50, %v1555_v49  ;;  %v1497_v61 = vmul.f32 %v2536_v20, %v1455_v45  ;;  %v1498_v62 = vmul.f32 %v2538_v21, %v1456_v46 }
 0x19f   : > { %v1905_v1 = vpack.c.bf16 %v1554_v54, %v1553_v53  ;;  %v1907_v2 = vpack.c.bf16 %v1558_v56, %v1557_v55  ;;  %v1499_v3 = vmul.f32 %v2544_v27, %v1457_v51  ;;  %v1500_v4 = vmul.f32 %v2546_v15, %v1458_v52 }
 0x1a0   : > { %1635 = vst [vmem:[%s2338_s8] sm:$0xff] %v1904_v59  ;;  %1637 = vst [vmem:[%s2338_s8 + $0x10] sm:$0xff] %v1906_v60  ;;  %v1539_v5 = vadd.f32 %v2540_v22, %v1497_v61  ;;  %v1540_v6 = vadd.f32 %v2542_v23, %v1498_v62  ;;  %v1501_v7 = vmul.f32 %v2536_v20, %v1459_v57 }
 0x1a1   : > { %v1502_v8 = vmul.f32 %v2538_v21, %v1460_v58  ;;  %1636 = vst [vmem:[%s2338_s8 + $0x8] sm:$0xff] %v1905_v1  ;;  %1638 = vst [vmem:[%s2338_s8 + $0x18] sm:$0xff] %v1907_v2  ;;  %v1541_v9 = vadd.f32 %v2548_v28, %v1499_v3  ;;  %v1542_v10 = vadd.f32 %v2550_v16, %v1500_v4 }
 0x1a2   : > { %v1503_v11 = vmul.f32 %v2544_v27, %v1461_v63  ;;  %v1504_v12 = vmul.f32 %v2546_v15, %v1462_v0  ;;  %v1559_v14 = vmax.f32 %v1539_v5, 0.0  ;;  %v1560_v17 = vmax.f32 %v1540_v6, 0.0 }
 0x1a3   : > { %v1543_v18 = vadd.f32 %v2540_v22, %v1501_v7  ;;  %v1544_v19 = vadd.f32 %v2542_v23, %v1502_v8  ;;  %v1561_v25 = vmax.f32 %v1541_v9, 0.0  ;;  %v1562_v26 = vmax.f32 %v1542_v10, 0.0 }
 0x1a4   : > { %v1545_v29 = vadd.f32 %v2548_v28, %v1503_v11  ;;  %v1546_v30 = vadd.f32 %v2550_v16, %v1504_v12  ;;  %v1908_v33 = vpack.c.bf16 %v1560_v17, %v1559_v14  ;;  %v1505_v36 = vmul.f32 %v2536_v20, %v1463_v13 }
 0x1a5   : > { %v1563_v34 = vmax.f32 %v1543_v18, 0.0  ;;  %v1564_v35 = vmax.f32 %v1544_v19, 0.0  ;;  %v1909_v37 = vpack.c.bf16 %v1562_v26, %v1561_v25  ;;  %v1506_v40 = vmul.f32 %v2538_v21, %v1464_v24 }
 0x1a6   : > { %v1565_v38 = vmax.f32 %v1545_v29, 0.0  ;;  %v1566_v39 = vmax.f32 %v1546_v30, 0.0  ;;  %1639 = vst [vmem:[%s2338_s8 + $0x20] sm:$0xff] %v1908_v33  ;;  %v1547_v42 = vadd.f32 %v2540_v22, %v1505_v36  ;;  %v1507_v43 = vmul.f32 %v2544_v27, %v1465_v31 }
 0x1a7   : > { %v1910_v41 = vpack.c.bf16 %v1564_v35, %v1563_v34  ;;  %v1508_v44 = vmul.f32 %v2546_v15, %v1466_v32  ;;  %1640 = vst [vmem:[%s2338_s8 + $0x28] sm:$0xff] %v1909_v37  ;;  %v1548_v20 = vadd.f32 %v2542_v23, %v1506_v40 }
 0x1a8   : > { %v1911_v45 = vpack.c.bf16 %v1566_v39, %v1565_v38  ;;  %v1567_v46 = vmax.f32 %v1547_v42, 0.0  ;;  %v1549_v47 = vadd.f32 %v2548_v28, %v1507_v43 }
 0x1a9   : > { %1641 = vst [vmem:[%s2338_s8 + $0x30] sm:$0xff] %v1910_v41  ;;  %v1550_v21 = vadd.f32 %v2550_v16, %v1508_v44  ;;  %v1568_v48 = vmax.f32 %v1548_v20, 0.0 }
 0x1aa   : > { %1642 = vst [vmem:[%s2338_s8 + $0x38] sm:$0xff] %v1911_v45  ;;  %v1569_v49 = vmax.f32 %v1549_v47, 0.0 }
 0x1ab   : > { %v1570_v22 = vmax.f32 %v1550_v21, 0.0  ;;  %v1912_v50 = vpack.c.bf16 %v1568_v48, %v1567_v46 }
 0x1ad   : > { %v1913_v51 = vpack.c.bf16 %v1570_v22, %v1569_v49  ;;  %1643 = vst [vmem:[%s2338_s8 + $0x40] sm:$0xff] %v1912_v50 }
 0x1af   : > { %1644 = vst [vmem:[%s2338_s8 + $0x48] sm:$0xff] %v1913_v51 }
 0x1b0 PF: > { %s14_s21 = sadd.s32 1, %s2237_s21   ;;  %s2628_s15 = smov %s2217_s16 }
 0x1b1   : > { %p11_p0 = scmp.ge.s32.totalorder %s14_s21, 20   ;;  %s2629_s16 = smov %s2316_s28 }
 0x1b2   : > { %s2630_s17 = smov %s2229_s19  ;;  %s2631_s18 = smov %s2233_s20 }
 0x1b3   : > { %s2632_s19 = smov %s2635_s22  ;;  %s2633_s20 = smov %s2639_s23 }
 0x1b4   :  { %13 = sbr.rel (!%p11_p0) target bundleno = 4 (0x4), region = 105 }

// kernel: fer_cnn_forward.18
= control target key start
LH: loop header
LB: loop body
LE: loop exit
PB: predicated region body
PF: predicated region fallthrough
CT: control target
= control target key end

     0   :  { %vm136_vm0 = vcmask 1041408   ;;  %vm137_vm1 = vsmask.f32 1280  ;;  %vm139_vm3 = vcmask 1043458   ;;  %vm140_vm4 = vsmask.f32 3328  ;;  %s344_s0 = inlined_call_operand.vmem [shape: bf16[6,2,3,1024], index: 0, kind: input, shape index: {}, may-alias: {0,1}]   ;;  %s345_s1 = inlined_call_operand.vmem [shape: bf16[6,2,3,1024], index: 1, kind: input, shape index: {}, may-alias: {0,1}]   ;;  %s346_s2 = inlined_call_operand.vmem [shape: bf16[6,3,512], index: 2, kind: output, shape index: {}]  }
   0x1   :  { %v21_v0 = vld [vmem:[%s344_s0] sm:$0xff]  ;;  %v23_v1 = vld [vmem:[%s344_s0 + $0x8] sm:$0xff]  ;;  %v181_v2 = vld [vmem:[%s345_s1 + $0x10] sm:$0xff]  ;;  %vm143_vm5 = vcmask 1045508   ;;  %vm144_vm7 = vsmask.f32 5376 }
   0x2   :  { %v182_v3 = vld [vmem:[%s345_s1 + $0x18] sm:$0xff]  ;;  %v118_v4 = vmax.bf16 %v181_v2, %v21_v0  ;;  %vm220_vm2 = vmand %vm136_vm0, %vm137_vm1  ;;  %v25_v8 = vld [vmem:[%s344_s0 + $0x20] sm:$0xff]  ;;  %vm147_vm9 = vcmask 1047558   ;;  %vm148_vm10 = vsmask.f32 7424 }
   0x3   :  { %v119_v6 = vmax.bf16 %v182_v3, %v23_v1  ;;  %vm224_vm6 = vmand %vm139_vm3, %vm140_vm4  ;;  %v151_v9 = vld [vmem:[%s346_s2] sm:$0xff]  ;;  %v27_v10 = vld [vmem:[%s344_s0 + $0x28] sm:$0xff] }
   0x4   :  { %vm142_vm8 = vmor %vm224_vm6, %vm220_vm2  ;;  %v183_v11 = vld [vmem:[%s345_s1 + $0x30] sm:$0xff]  ;;  %v184_v13 = vld [vmem:[%s345_s1 + $0x38] sm:$0xff] }
   0x5   :  { %v130_v12 = vmax.bf16 %v119_v6, %v118_v4  ;;  %vm145_vm11 = vmand %vm143_vm5, %vm144_vm7  ;;  %v120_v14 = vmax.bf16 %v183_v11, %v25_v8  ;;  %v154_v15 = vld [vmem:[%s346_s2 + $0x8] sm:$0xff]  ;;  %v121_v16 = vmax.bf16 %v184_v13, %v27_v10  ;;  %v29_v17 = vld [vmem:[%s344_s0 + $0x40] sm:$0xff] }
   0x6   :  { %vm146_vm12 = vmor %vm145_vm11, %vm142_vm8  ;;  %v31_v18 = vld [vmem:[%s344_s0 + $0x48] sm:$0xff]  ;;  %v185_v19 = vld [vmem:[%s345_s1 + $0x50] sm:$0xff] }
   0x7   :  { %vm149_vm13 = vmand %vm147_vm9, %vm148_vm10  ;;  %v186_v20 = vld [vmem:[%s345_s1 + $0x58] sm:$0xff]  ;;  %v131_v22 = vmax.bf16 %v121_v16, %v120_v14  ;;  %v122_v23 = vmax.bf16 %v185_v19, %v29_v17  ;;  %v157_v25 = vld [vmem:[%s346_s2 + $0x10] sm:$0xff] }
   0x8   :  { %vm262_vm14 = vmor %vm149_vm13, %vm146_vm12  ;;  %v123_v24 = vmax.bf16 %v186_v20, %v31_v18  ;;  %v33_v26 = vld [vmem:[%s344_s0 + $0x60] sm:$0xff]  ;;  %v35_v28 = vld [vmem:[%s344_s0 + $0x68] sm:$0xff] }
   0x9   :  { %v152_v27 = vsel %vm262_vm14, %v130_v12, %v151_v9  ;;  %v187_v29 = vld [vmem:[%s345_s1 + $0x70] sm:$0xff]  ;;  %v188_v30 = vld [vmem:[%s345_s1 + $0x78] sm:$0xff]  ;;  %v155_v31 = vsel %vm262_vm14, %v131_v22, %v154_v15  ;;  %v37_v35 = vld [vmem:[%s344_s0 + $0x80] sm:$0xff] }
   0xa   :  { %153 = vst [vmem:[%s346_s2] sm:$0xff] %v152_v27  ;;  %v132_v32 = vmax.bf16 %v123_v24, %v122_v23  ;;  %v124_v33 = vmax.bf16 %v187_v29, %v33_v26  ;;  %v125_v34 = vmax.bf16 %v188_v30, %v35_v28  ;;  %v39_v36 = vld [vmem:[%s344_s0 + $0x88] sm:$0xff]  ;;  %156 = vst [vmem:[%s346_s2 + $0x8] sm:$0xff] %v155_v31  ;;  %v160_v37 = vld [vmem:[%s346_s2 + $0x18] sm:$0xff] }
   0xb   :  { %v189_v38 = vld [vmem:[%s345_s1 + $0x90] sm:$0xff]  ;;  %v190_v39 = vld [vmem:[%s345_s1 + $0x98] sm:$0xff]  ;;  %v41_v44 = vld [vmem:[%s344_s0 + $0xa0] sm:$0xff] }
   0xc   :  { %v158_v40 = vsel %vm262_vm14, %v132_v32, %v157_v25  ;;  %v133_v41 = vmax.bf16 %v125_v34, %v124_v33  ;;  %v126_v42 = vmax.bf16 %v189_v38, %v37_v35  ;;  %v127_v43 = vmax.bf16 %v190_v39, %v39_v36  ;;  %v43_v45 = vld [vmem:[%s344_s0 + $0xa8] sm:$0xff]  ;;  %v191_v46 = vld [vmem:[%s345_s1 + $0xb0] sm:$0xff]  ;;  %v163_v47 = vld [vmem:[%s346_s2 + $0x20] sm:$0xff] }
   0xd   :  { %159 = vst [vmem:[%s346_s2 + $0x10] sm:$0xff] %v158_v40  ;;  %v192_v48 = vld [vmem:[%s345_s1 + $0xb8] sm:$0xff]  ;;  %v128_v49 = vmax.bf16 %v191_v46, %v41_v44  ;;  %v166_v53 = vld [vmem:[%s346_s2 + $0x28] sm:$0xff] }
   0xe   :  { %v161_v50 = vsel %vm262_vm14, %v133_v41, %v160_v37  ;;  %v134_v51 = vmax.bf16 %v127_v43, %v126_v42  ;;  %v129_v52 = vmax.bf16 %v192_v48, %v43_v45 }
   0xf   :  { %162 = vst [vmem:[%s346_s2 + $0x18] sm:$0xff] %v161_v50 }
  0x10   :  { %v164_v54 = vsel %vm262_vm14, %v134_v51, %v163_v47  ;;  %v135_v55 = vmax.bf16 %v129_v52, %v128_v49 }
  0x11   :  { %165 = vst [vmem:[%s346_s2 + $0x20] sm:$0xff] %v164_v54 }
  0x12   :  { %v167_v56 = vsel %vm262_vm14, %v135_v55, %v166_v53 }
  0x13   :  { %168 = vst [vmem:[%s346_s2 + $0x28] sm:$0xff] %v167_v56 }

// kernel: fer_cnn_forward.19
= control target key start
LH: loop header
LB: loop body
LE: loop exit
PB: predicated region body
PF: predicated region fallthrough
CT: control target
= control target key end

     0   :  { %s1129_s15 = smov 0   ;;  %s1131_s16 = smov 0   ;;  %s1247_s0 = inlined_call_operand.vmem [shape: bf16[8,4608], index: 0, kind: input, shape index: {}]   ;;  %s1248_s1 = inlined_call_operand.vmem [shape: bf16[4608,256], index: 1, kind: input, shape index: {}]   ;;  %s1249_s2 = inlined_call_operand.vmem [shape: f32[1,256], index: 2, kind: input, shape index: {}]   ;;  %s1250_s3 = inlined_call_operand.vmem [shape: f32[1,256], index: 3, kind: input, shape index: {}]   ;;  %s1251_s4 = inlined_call_operand.vmem [shape: bf16[8,256], index: 4, kind: output, shape index: {}]  }
   0x1   :  { %s1133_s17 = smov 0  }
   0x2 LB: > { %s23_s18 = sadd.s32 1, %s1097_s16  ;;  %p872_p0 = scmp.ge.s32.totalorder %s1101_s17, 1  ;;  %s1101_s17 = sphi %s1133_s17, %s14_s17   ;;  %s1097_s16 = sphi %s1131_s16, %s1253_s16   ;;  %s1093_s15 = sphi %s1129_s15, %s1252_s15  }
   0x3   : > { %p24_p1 = scmp.ge.s32.totalorder %s23_s18, 9  ;;  %p193_p2 = scmp.lt.s32.totalorder %s1101_s17, 10 }
   0x5   : > { %s1255_s18 = smov (%p24_p1, %s23_s18), 0  ;;  %p194_p3 = pnand %p872_p0, %p193_p2 }
   0x6   : > { %s873_s19 = sshll.u32 (!%p194_p3), %s1093_s15, 2  ;;  %s875_s20 = sshll.u32 (!%p194_p3), %s1093_s15, 6 }
   0x7   : > { %197 = sbr.rel (%p194_p3) target bundleno = 305 (0x131), region = 36  ;;  %p232_p4 = scmp.lt.s32.totalorder (!%p194_p3), %s873_s19, 35 }
   0x8   : > { %p240_p5 = scmp.lt.s32.totalorder (!%p194_p3), %s875_s20, 575  ;;  %p878_p6 = scmp.ne.s32.totalorder (!%p194_p3), %s1093_s15, 0 }
   0xc   : > { %s1257_s19 = smov (!%p232_p4, %s873_s19), 35  ;;  %s1259_s20 = smov (!%p240_p5, %s875_s20), 575 }
   0xd   : > { %s874_s21 = sshll.u32 %s1257_s19, 2  ;;  %s952_s25 = sshll.u32 %s1259_s20, 3 }
   0xe   : > { %s1154_s24 = scalar_lea.vmem %s1247_s0, %s874_s21  ;;  %s1159_s28 = scalar_lea.vmem %s1248_s1, %s952_s25 }
   0xf   : > { %254 = sbr.rel (%p878_p6) target bundleno = 22 (0x16), region = 40 }
  0x14   : > { %v1103_v0 = vmov 0.0  }
  0x15   : > { %255 = vst [vmem:[#allocation2] sm:$0xff] %v1103_v0  ;;  %256 = vst [vmem:[#allocation2 + $0x8] sm:$0xff] %v1103_v0 }
  0x16 PF: > { %v979_v1 = vld [vmem:[%s1159_s28 + $0x74] ss:$8 sps:$4 sm:$0xff]   ;;  %v983_v3 = vld [vmem:[%s1159_s28 + $0x70] ss:$8 sps:$4 sm:$0xff]   ;;  %v985_v5 = vld [vmem:[%s1159_s28 + $0x64] ss:$8 sps:$4 sm:$0xff]  }
  0x17   : > { %v981_v2 = vld [vmem:[%s1159_s28 + $0x174] ss:$8 sps:$4 sm:$0xff]   ;;  %659 = vmatprep.subr.bf16.mxu0 %v979_v1  ;;  %v984_v4 = vld [vmem:[%s1159_s28 + $0x170] ss:$8 sps:$4 sm:$0xff]   ;;  %v987_v6 = vld [vmem:[%s1159_s28 + $0x164] ss:$8 sps:$4 sm:$0xff]  }
  0x18   : > { %700 = vmatprep.subr.bf16.mxu1 %v981_v2  ;;  %660 = vmatpush1.bf16.msra.mxu0 %v983_v3  ;;  %v989_v7 = vld [vmem:[%s1159_s28 + $0x60] ss:$8 sps:$4 sm:$0xff]   ;;  %v991_v9 = vld [vmem:[%s1159_s28 + $0x54] ss:$8 sps:$4 sm:$0xff]   ;;  %v995_v11 = vld [vmem:[%s1159_s28 + $0x50] ss:$8 sps:$4 sm:$0xff]  }
  0x19   : > { %701 = vmatpush1.bf16.msra.mxu1 %v984_v4  ;;  %661 = vmatprep.subr.bf16.mxu0 %v985_v5  ;;  %v990_v8 = vld [vmem:[%s1159_s28 + $0x160] ss:$8 sps:$4 sm:$0xff]   ;;  %v993_v10 = vld [vmem:[%s1159_s28 + $0x154] ss:$8 sps:$4 sm:$0xff]   ;;  %v996_v12 = vld [vmem:[%s1159_s28 + $0x150] ss:$8 sps:$4 sm:$0xff]  }
  0x1a   : > { %702 = vmatprep.subr.bf16.mxu1 %v987_v6  ;;  %v997_v13 = vld [vmem:[%s1159_s28 + $0x44] ss:$8 sps:$4 sm:$0xff]   ;;  %v1001_v15 = vld [vmem:[%s1159_s28 + $0x40] ss:$8 sps:$4 sm:$0xff]   ;;  %v1003_v17 = vld [vmem:[%s1159_s28 + $0x34] ss:$8 sps:$4 sm:$0xff]  }
  0x1b   : > { %v999_v14 = vld [vmem:[%s1159_s28 + $0x144] ss:$8 sps:$4 sm:$0xff]   ;;  %v1002_v16 = vld [vmem:[%s1159_s28 + $0x140] ss:$8 sps:$4 sm:$0xff]   ;;  %v1005_v18 = vld [vmem:[%s1159_s28 + $0x134] ss:$8 sps:$4 sm:$0xff]  }
  0x1c   : > { %662 = vmatpush1.bf16.msra.mxu0 %v989_v7  ;;  %v1007_v19 = vld [vmem:[%s1159_s28 + $0x30] ss:$8 sps:$4 sm:$0xff]   ;;  %v1009_v21 = vld [vmem:[%s1159_s28 + $0x24] ss:$8 sps:$4 sm:$0xff]   ;;  %v1013_v23 = vld [vmem:[%s1159_s28 + $0x20] ss:$8 sps:$4 sm:$0xff]  }
  0x1d   : > { %703 = vmatpush1.bf16.msra.mxu1 %v990_v8  ;;  %663 = vmatprep.subr.bf16.mxu0 %v991_v9  ;;  %v1008_v20 = vld [vmem:[%s1159_s28 + $0x130] ss:$8 sps:$4 sm:$0xff]   ;;  %v1011_v22 = vld [vmem:[%s1159_s28 + $0x124] ss:$8 sps:$4 sm:$0xff]   ;;  %v1014_v24 = vld [vmem:[%s1159_s28 + $0x120] ss:$8 sps:$4 sm:$0xff]  }
  0x1e   : > { %704 = vmatprep.subr.bf16.mxu1 %v993_v10  ;;  %v1015_v25 = vld [vmem:[%s1159_s28 + $0x14] ss:$8 sps:$4 sm:$0xff]   ;;  %v1019_v27 = vld [vmem:[%s1159_s28 + $0x10] ss:$8 sps:$4 sm:$0xff]   ;;  %v1021_v29 = vld [vmem:[%s1159_s28 + $0x4] ss:$8 sps:$4 sm:$0xff]  }
  0x1f   : > { %v1017_v26 = vld [vmem:[%s1159_s28 + $0x114] ss:$8 sps:$4 sm:$0xff]   ;;  %v1020_v28 = vld [vmem:[%s1159_s28 + $0x110] ss:$8 sps:$4 sm:$0xff]   ;;  %v1023_v30 = vld [vmem:[%s1159_s28 + $0x104] ss:$8 sps:$4 sm:$0xff]  }
  0x20   : > { %664 = vmatpush1.bf16.msra.mxu0 %v995_v11  ;;  %v1025_v31 = vld [vmem:[%s1159_s28] ss:$8 sps:$4 sm:$0xff]   ;;  %v1027_v33 = vld [vmem:[%s1159_s28 + $0xf4] ss:$8 sps:$4 sm:$0xff]   ;;  %v1031_v35 = vld [vmem:[%s1159_s28 + $0xf0] ss:$8 sps:$4 sm:$0xff]  }
  0x21   : > { %705 = vmatpush1.bf16.msra.mxu1 %v996_v12  ;;  %665 = vmatprep.subr.bf16.mxu0 %v997_v13  ;;  %v1026_v32 = vld [vmem:[%s1159_s28 + $0x100] ss:$8 sps:$4 sm:$0xff]   ;;  %v1029_v34 = vld [vmem:[%s1159_s28 + $0x1f4] ss:$8 sps:$4 sm:$0xff]   ;;  %v1032_v36 = vld [vmem:[%s1159_s28 + $0x1f0] ss:$8 sps:$4 sm:$0xff]  }
  0x22   : > { %706 = vmatprep.subr.bf16.mxu1 %v999_v14  ;;  %v1033_v37 = vld [vmem:[%s1159_s28 + $0xe4] ss:$8 sps:$4 sm:$0xff]   ;;  %v1037_v39 = vld [vmem:[%s1159_s28 + $0xe0] ss:$8 sps:$4 sm:$0xff]   ;;  %v1039_v41 = vld [vmem:[%s1159_s28 + $0xd4] ss:$8 sps:$4 sm:$0xff]  }
  0x23   : > { %v1035_v38 = vld [vmem:[%s1159_s28 + $0x1e4] ss:$8 sps:$4 sm:$0xff]   ;;  %v1038_v40 = vld [vmem:[%s1159_s28 + $0x1e0] ss:$8 sps:$4 sm:$0xff]   ;;  %v1041_v42 = vld [vmem:[%s1159_s28 + $0x1d4] ss:$8 sps:$4 sm:$0xff]  }
  0x24   : > { %666 = vmatpush1.bf16.msra.mxu0 %v1001_v15  ;;  %v1043_v43 = vld [vmem:[%s1159_s28 + $0xd0] ss:$8 sps:$4 sm:$0xff]   ;;  %v1045_v45 = vld [vmem:[%s1159_s28 + $0xc4] ss:$8 sps:$4 sm:$0xff]   ;;  %v1049_v50 = vld [vmem:[%s1159_s28 + $0xc0] ss:$8 sps:$4 sm:$0xff]  }
  0x25   : > { %707 = vmatpush1.bf16.msra.mxu1 %v1002_v16  ;;  %667 = vmatprep.subr.bf16.mxu0 %v1003_v17  ;;  %v1044_v44 = vld [vmem:[%s1159_s28 + $0x1d0] ss:$8 sps:$4 sm:$0xff]   ;;  %v1047_v46 = vld [vmem:[%s1159_s28 + $0x1c4] ss:$8 sps:$4 sm:$0xff]   ;;  %v1050_v51 = vld [vmem:[%s1159_s28 + $0x1c0] ss:$8 sps:$4 sm:$0xff]  }
  0x26   : > { %708 = vmatprep.subr.bf16.mxu1 %v1005_v18  ;;  %v259_v47 = vld [vmem:[%s1154_s24] sm:$0xff]  ;;  %v260_v49 = vld [vmem:[%s1154_s24 + $0x8] sm:$0xff]  ;;  %v1051_v53 = vld [vmem:[%s1159_s28 + $0xb4] ss:$8 sps:$4 sm:$0xff]   ;;  %p947_p7 = scmp.ne.s32.totalorder %s1093_s15, 8 }
  0x27   : > { %v880_v48 = vcombine.high %v259_v47, %v259_v47  ;;  %v882_v52 = vcombine.high %v260_v49, %v260_v49  ;;  %v1053_v54 = vld [vmem:[%s1159_s28 + $0x1b4] ss:$8 sps:$4 sm:$0xff]   ;;  %v1055_v55 = vld [vmem:[%s1159_s28 + $0xb0] ss:$8 sps:$4 sm:$0xff]   ;;  %v1057_v57 = vld [vmem:[%s1159_s28 + $0xa4] ss:$8 sps:$4 sm:$0xff]   ;;  %v879_v5 = vcombine.low %v259_v47, %v259_v47  ;;  %v881_v6 = vcombine.low %v260_v49, %v260_v49 }
  0x28   : > { %668 = vmatpush1.bf16.msra.mxu0 %v1007_v19  ;;  %v1056_v56 = vld [vmem:[%s1159_s28 + $0x1b0] ss:$8 sps:$4 sm:$0xff]   ;;  %v1059_v58 = vld [vmem:[%s1159_s28 + $0x1a4] ss:$8 sps:$4 sm:$0xff]   ;;  %v1061_v59 = vld [vmem:[%s1159_s28 + $0xa0] ss:$8 sps:$4 sm:$0xff]  }
  0x29   : > { %709 = vmatpush1.bf16.msra.mxu1 %v1008_v20  ;;  %669 = vmatprep.subr.bf16.mxu0 %v1009_v21  ;;  %v1062_v60 = vld [vmem:[%s1159_s28 + $0x1a0] ss:$8 sps:$4 sm:$0xff]   ;;  %v1063_v61 = vld [vmem:[%s1159_s28 + $0x94] ss:$8 sps:$4 sm:$0xff]   ;;  %v1067_v63 = vld [vmem:[%s1159_s28 + $0x90] ss:$8 sps:$4 sm:$0xff]  }
  0x2a   : > { %710 = vmatprep.subr.bf16.mxu1 %v1011_v22  ;;  %691 = vmatprep.mubr.bf16.mxu0 %v880_v48  ;;  %v1065_v62 = vld [vmem:[%s1159_s28 + $0x194] ss:$8 sps:$4 sm:$0xff]   ;;  %v1068_v0 = vld [vmem:[%s1159_s28 + $0x190] ss:$8 sps:$4 sm:$0xff]   ;;  %v1069_v1 = vld [vmem:[%s1159_s28 + $0x84] ss:$8 sps:$4 sm:$0xff]  }
  0x2b   : > { %732 = vmatprep.mubr.bf16.mxu1 %v882_v52  ;;  %v1071_v2 = vld [vmem:[%s1159_s28 + $0x184] ss:$8 sps:$4 sm:$0xff]   ;;  %v1073_v3 = vld [vmem:[%s1159_s28 + $0x80] ss:$8 sps:$4 sm:$0xff]  }
  0x2c   : > { %670 = vmatpush1.bf16.msra.mxu0 %v1013_v23  ;;  %v1074_v4 = vld [vmem:[%s1159_s28 + $0x180] ss:$8 sps:$4 sm:$0xff]  }
  0x2d   : > { %711 = vmatpush1.bf16.msra.mxu1 %v1014_v24  ;;  %671 = vmatprep.subr.bf16.mxu0 %v1015_v25  ;;  %v257_v8 = vld [vmem:[#allocation2] sm:$0xff]  ;;  %v258_v12 = vld [vmem:[#allocation2 + $0x8] sm:$0xff] }
  0x2e   : > { %712 = vmatprep.subr.bf16.mxu1 %v1017_v26 }
  0x30   : > { %672 = vmatpush1.bf16.msra.mxu0 %v1019_v27 }
  0x31   : > { %713 = vmatpush1.bf16.msra.mxu1 %v1020_v28  ;;  %673 = vmatprep.subr.bf16.mxu0 %v1021_v29 }
  0x32   : > { %714 = vmatprep.subr.bf16.mxu1 %v1023_v30 }
  0x34   : > { %674 = vmatpush1.bf16.msra.mxu0 %v1025_v31 }
  0x35   : > { %715 = vmatpush1.bf16.msra.mxu1 %v1026_v32  ;;  %675 = vmatprep.subr.bf16.mxu0 %v1027_v33 }
  0x36   : > { %716 = vmatprep.subr.bf16.mxu1 %v1029_v34 }
  0x38   : > { %676 = vmatpush2.bf16.msra.mxu0 %v1031_v35 }
  0x39   : > { %717 = vmatpush2.bf16.msra.mxu1 %v1032_v36  ;;  %677 = vmatprep.subr.bf16.mxu0 %v1033_v37 }
  0x3a   : > { %718 = vmatprep.subr.bf16.mxu1 %v1035_v38 }
  0x3c   : > { %678 = vmatpush2.bf16.msra.mxu0 %v1037_v39 }
  0x3d   : > { %719 = vmatpush2.bf16.msra.mxu1 %v1038_v40  ;;  %679 = vmatprep.subr.bf16.mxu0 %v1039_v41 }
  0x3e   : > { %720 = vmatprep.subr.bf16.mxu1 %v1041_v42 }
  0x40   : > { %680 = vmatpush2.bf16.msra.mxu0 %v1043_v43 }
  0x41   : > { %721 = vmatpush2.bf16.msra.mxu1 %v1044_v44  ;;  %681 = vmatprep.subr.bf16.mxu0 %v1045_v45 }
  0x42   : > { %722 = vmatprep.subr.bf16.mxu1 %v1047_v46 }
  0x44   : > { %682 = vmatpush2.bf16.msra.mxu0 %v1049_v50 }
  0x45   : > { %723 = vmatpush2.bf16.msra.mxu1 %v1050_v51  ;;  %683 = vmatprep.subr.bf16.mxu0 %v1051_v53 }
  0x46   : > { %724 = vmatprep.subr.bf16.mxu1 %v1053_v54 }
  0x48   : > { %684 = vmatpush2.bf16.msra.mxu0 %v1055_v55 }
  0x49   : > { %725 = vmatpush2.bf16.msra.mxu1 %v1056_v56  ;;  %685 = vmatprep.subr.bf16.mxu0 %v1057_v57 }
  0x4a   : > { %726 = vmatprep.subr.bf16.mxu1 %v1059_v58 }
  0x4c   : > { %686 = vmatpush2.bf16.msra.mxu0 %v1061_v59 }
  0x4d   : > { %727 = vmatpush2.bf16.msra.mxu1 %v1062_v60  ;;  %687 = vmatprep.subr.bf16.mxu0 %v1063_v61 }
  0x4e   : > { %728 = vmatprep.subr.bf16.mxu1 %v1065_v62 }
  0x50   : > { %688 = vmatpush2.bf16.msra.mxu0 %v1067_v63 }
  0x51   : > { %729 = vmatpush2.bf16.msra.mxu1 %v1068_v0  ;;  %689 = vmatprep.subr.bf16.mxu0 %v1069_v1 }
  0x52   : > { %730 = vmatprep.subr.bf16.mxu1 %v1071_v2 }
  0x54   : > { %690 = vmatpush2.bf16.msra.mxu0 %v1073_v3 }
  0x55   : > { %731 = vmatpush2.bf16.msra.mxu1 %v1074_v4 }
  0x57   : > { %692 = vmatmul.mubr.bf16.vlgmr.msra.gmra.mxu0 %v879_v5 }
  0x58   : > { %733 = vmatmul.mubr.bf16.vlgmr.msra.gmra.mxu1 %v881_v6 }
 0x117   : > { %v693_v7 = vpop.f32.mrf.mxu0 }
 0x118   : > { %v734_v9 = vpop.f32.mrf.mxu1 }
 0x119   : > { %v735_v10 = vadd.f32 %v734_v9, %v693_v7  ;;  %v695_v11 = vpop.f32.mrf.mxu0 }
 0x11a   : > { %v736_v13 = vpop.f32.mrf.mxu1 }
 0x11b   : > { %v741_v14 = vadd.f32 %v735_v10, %v257_v8  ;;  %v737_v15 = vadd.f32 %v736_v13, %v695_v11  ;;  %v697_v16 = vpop.f32.mrf.mxu0  ;;  %748 = sbr.rel (%p947_p7) target bundleno = 305 (0x131), region = 44 }
 0x11c   : > { %v738_v17 = vpop.f32.mrf.mxu1 }
 0x11d   : > { %743 = vst [vmem:[#allocation2] sm:$0xff] %v741_v14  ;;  %v742_v18 = vadd.f32 %v737_v15, %v258_v12  ;;  %v698_v19 = vpop.f32.mrf.mxu0 }
 0x11e   : > { %v739_v20 = vpop.f32.mrf.mxu1 }
 0x11f   : > { %744 = vst [vmem:[#allocation2 + $0x8] sm:$0xff] %v742_v18 }
 0x120   : > { %v753_v21 = vlaneseq  ;;  %v751_v23 = vld [vmem:[%s1249_s2] sm:$0x3] }
 0x121   : > { %v765_v24 = vld [vmem:[%s1250_s3] sm:$0x3] }
 0x122   : > { %v754_v22 = vshrl.u32 %v753_v21, 7 }
 0x124   : > { %v755_v25 = vsub.s32 0, %v754_v22  ;;  %v759_v26 = vsub.s32 1, %v754_v22  ;;  %v749_v27 = vld [vmem:[#allocation2] sm:$0xff] }
 0x126   : > { %v750_v28 = vld [vmem:[#allocation2 + $0x8] sm:$0xff]  ;;  %v756_v29 = vrot.slane %v751_v23, %v755_v25  ;;  %v760_v30 = vrot.slane %v751_v23, %v759_v26  ;;  %v770_v31 = vrot.slane %v765_v24, %v755_v25  ;;  %v774_v32 = vrot.slane %v765_v24, %v759_v26 }
 0x128   : > { %v763_v33 = vmul.f32 %v756_v29, %v749_v27  ;;  %v764_v34 = vmul.f32 %v760_v30, %v750_v28 }
 0x12a   : > { %v777_v35 = vadd.f32 %v770_v31, %v763_v33  ;;  %v778_v36 = vadd.f32 %v774_v32, %v764_v34 }
 0x12c   : > { %v779_v37 = vmax.f32 %v777_v35, 0.0  ;;  %v780_v38 = vmax.f32 %v778_v36, 0.0 }
 0x12e   : > { %v953_v39 = vpack.c.bf16 %v780_v38, %v779_v37 }
 0x130   : > { %789 = vst [vmem:[%s1251_s4] sm:$0xff] %v953_v39 }
 0x131 PF: > { %s14_s17 = sadd.s32 1, %s1101_s17   ;;  %s1252_s15 = smov %s1097_s16 }
 0x132   : > { %p11_p8 = scmp.ge.s32.totalorder %s14_s17, 11   ;;  %s1253_s16 = smov %s1255_s18 }
 0x134   :  { %13 = sbr.rel (!%p11_p8) target bundleno = 2 (0x2), region = 77 }

// kernel: fer_cnn_forward.20
= control target key start
LH: loop header
LB: loop body
LE: loop exit
PB: predicated region body
PF: predicated region fallthrough
CT: control target
= control target key end

     0   :  { %s996_s1 = inlined_call_operand.vmem [shape: bf16[256,512], index: 1, kind: input, shape index: {}]   ;;  %s997_s0 = inlined_call_operand.vmem [shape: bf16[8,256], index: 0, kind: input, shape index: {}]   ;;  %s998_s2 = inlined_call_operand.vmem [shape: f32[1,512], index: 2, kind: input, shape index: {}]   ;;  %s999_s3 = inlined_call_operand.vmem [shape: f32[1,512], index: 3, kind: input, shape index: {}]   ;;  %s1000_s4 = inlined_call_operand.vmem [shape: bf16[8,512], index: 4, kind: output, shape index: {}]  }
   0x1   :  { %v666_v0 = vld [vmem:[%s996_s1 + $0xe4] ss:$16 sps:$4 sm:$0xff]   ;;  %v668_v1 = vld [vmem:[%s996_s1 + $0xec] ss:$16 sps:$4 sm:$0xff]   ;;  %v670_v2 = vld [vmem:[%s996_s1 + $0xe0] ss:$16 sps:$4 sm:$0xff]  }
   0x2   :  { %421 = vmatprep.subr.bf16.mxu0 %v666_v0  ;;  %v671_v3 = vld [vmem:[%s996_s1 + $0xe8] ss:$16 sps:$4 sm:$0xff]   ;;  %462 = vmatprep.subr.bf16.mxu1 %v668_v1  ;;  %v672_v4 = vld [vmem:[%s996_s1 + $0xc4] ss:$16 sps:$4 sm:$0xff]   ;;  %v674_v5 = vld [vmem:[%s996_s1 + $0xcc] ss:$16 sps:$4 sm:$0xff]  }
   0x3   :  { %422 = vmatpush1.bf16.msra.mxu0 %v670_v2  ;;  %463 = vmatpush1.bf16.msra.mxu1 %v671_v3  ;;  %v676_v6 = vld [vmem:[%s996_s1 + $0xc0] ss:$16 sps:$4 sm:$0xff]   ;;  %v677_v7 = vld [vmem:[%s996_s1 + $0xc8] ss:$16 sps:$4 sm:$0xff]   ;;  %v678_v8 = vld [vmem:[%s996_s1 + $0xa4] ss:$16 sps:$4 sm:$0xff]   ;;  %v520_v3 = vlaneseq }
   0x4   :  { %423 = vmatprep.subr.bf16.mxu0 %v672_v4  ;;  %464 = vmatprep.subr.bf16.mxu1 %v674_v5  ;;  %v680_v9 = vld [vmem:[%s996_s1 + $0xac] ss:$16 sps:$4 sm:$0xff]   ;;  %v682_v10 = vld [vmem:[%s996_s1 + $0xa0] ss:$16 sps:$4 sm:$0xff]   ;;  %v683_v11 = vld [vmem:[%s996_s1 + $0xa8] ss:$16 sps:$4 sm:$0xff]  }
   0x5   :  { %v684_v12 = vld [vmem:[%s996_s1 + $0x84] ss:$16 sps:$4 sm:$0xff]   ;;  %v686_v13 = vld [vmem:[%s996_s1 + $0x8c] ss:$16 sps:$4 sm:$0xff]   ;;  %v688_v14 = vld [vmem:[%s996_s1 + $0x80] ss:$16 sps:$4 sm:$0xff]  }
   0x6   :  { %v689_v15 = vld [vmem:[%s996_s1 + $0x88] ss:$16 sps:$4 sm:$0xff]   ;;  %v690_v16 = vld [vmem:[%s996_s1 + $0x64] ss:$16 sps:$4 sm:$0xff]   ;;  %v692_v17 = vld [vmem:[%s996_s1 + $0x6c] ss:$16 sps:$4 sm:$0xff]  }
   0x7   :  { %424 = vmatpush1.bf16.msra.mxu0 %v676_v6  ;;  %465 = vmatpush1.bf16.msra.mxu1 %v677_v7  ;;  %v694_v18 = vld [vmem:[%s996_s1 + $0x60] ss:$16 sps:$4 sm:$0xff]   ;;  %v695_v19 = vld [vmem:[%s996_s1 + $0x68] ss:$16 sps:$4 sm:$0xff]   ;;  %v696_v20 = vld [vmem:[%s996_s1 + $0x44] ss:$16 sps:$4 sm:$0xff]  }
   0x8   :  { %425 = vmatprep.subr.bf16.mxu0 %v678_v8  ;;  %466 = vmatprep.subr.bf16.mxu1 %v680_v9  ;;  %v698_v21 = vld [vmem:[%s996_s1 + $0x4c] ss:$16 sps:$4 sm:$0xff]   ;;  %v700_v22 = vld [vmem:[%s996_s1 + $0x40] ss:$16 sps:$4 sm:$0xff]   ;;  %v701_v23 = vld [vmem:[%s996_s1 + $0x48] ss:$16 sps:$4 sm:$0xff]  }
   0x9   :  { %v702_v24 = vld [vmem:[%s996_s1 + $0x24] ss:$16 sps:$4 sm:$0xff]   ;;  %v704_v25 = vld [vmem:[%s996_s1 + $0x2c] ss:$16 sps:$4 sm:$0xff]   ;;  %v706_v26 = vld [vmem:[%s996_s1 + $0x20] ss:$16 sps:$4 sm:$0xff]  }
   0xa   :  { %v707_v27 = vld [vmem:[%s996_s1 + $0x28] ss:$16 sps:$4 sm:$0xff]   ;;  %v708_v28 = vld [vmem:[%s996_s1 + $0x4] ss:$16 sps:$4 sm:$0xff]   ;;  %v710_v29 = vld [vmem:[%s996_s1 + $0xc] ss:$16 sps:$4 sm:$0xff]  }
   0xb   :  { %426 = vmatpush1.bf16.msra.mxu0 %v682_v10  ;;  %467 = vmatpush1.bf16.msra.mxu1 %v683_v11  ;;  %v712_v30 = vld [vmem:[%s996_s1] ss:$16 sps:$4 sm:$0xff]   ;;  %v713_v31 = vld [vmem:[%s996_s1 + $0x8] ss:$16 sps:$4 sm:$0xff]   ;;  %v714_v32 = vld [vmem:[%s996_s1 + $0x1e4] ss:$16 sps:$4 sm:$0xff]  }
   0xc   :  { %427 = vmatprep.subr.bf16.mxu0 %v684_v12  ;;  %468 = vmatprep.subr.bf16.mxu1 %v686_v13  ;;  %v716_v33 = vld [vmem:[%s996_s1 + $0x1ec] ss:$16 sps:$4 sm:$0xff]   ;;  %v718_v34 = vld [vmem:[%s996_s1 + $0x1e0] ss:$16 sps:$4 sm:$0xff]   ;;  %v719_v35 = vld [vmem:[%s996_s1 + $0x1e8] ss:$16 sps:$4 sm:$0xff]  }
   0xd   :  { %v720_v36 = vld [vmem:[%s996_s1 + $0x1c4] ss:$16 sps:$4 sm:$0xff]   ;;  %v722_v37 = vld [vmem:[%s996_s1 + $0x1cc] ss:$16 sps:$4 sm:$0xff]   ;;  %v724_v38 = vld [vmem:[%s996_s1 + $0x1c0] ss:$16 sps:$4 sm:$0xff]  }
   0xe   :  { %v725_v39 = vld [vmem:[%s996_s1 + $0x1c8] ss:$16 sps:$4 sm:$0xff]   ;;  %v726_v40 = vld [vmem:[%s996_s1 + $0x1a4] ss:$16 sps:$4 sm:$0xff]   ;;  %v728_v41 = vld [vmem:[%s996_s1 + $0x1ac] ss:$16 sps:$4 sm:$0xff]  }
   0xf   :  { %428 = vmatpush1.bf16.msra.mxu0 %v688_v14  ;;  %469 = vmatpush1.bf16.msra.mxu1 %v689_v15  ;;  %v730_v42 = vld [vmem:[%s996_s1 + $0x1a0] ss:$16 sps:$4 sm:$0xff]   ;;  %v731_v43 = vld [vmem:[%s996_s1 + $0x1a8] ss:$16 sps:$4 sm:$0xff]   ;;  %v732_v44 = vld [vmem:[%s996_s1 + $0x184] ss:$16 sps:$4 sm:$0xff]  }
  0x10   :  { %429 = vmatprep.subr.bf16.mxu0 %v690_v16  ;;  %470 = vmatprep.subr.bf16.mxu1 %v692_v17  ;;  %v734_v45 = vld [vmem:[%s996_s1 + $0x18c] ss:$16 sps:$4 sm:$0xff]   ;;  %v29_v46 = vld [vmem:[%s997_s0] sm:$0xff]  ;;  %v737_v49 = vld [vmem:[%s996_s1 + $0x188] ss:$16 sps:$4 sm:$0xff]   ;;  %v521_v4 = vshrl.u32 %v520_v3, 7 }
  0x11   :  { %v597_v47 = vcombine.high %v29_v46, %v29_v46  ;;  %v736_v48 = vld [vmem:[%s996_s1 + $0x180] ss:$16 sps:$4 sm:$0xff]   ;;  %v738_v50 = vld [vmem:[%s996_s1 + $0x164] ss:$16 sps:$4 sm:$0xff]   ;;  %v740_v51 = vld [vmem:[%s996_s1 + $0x16c] ss:$16 sps:$4 sm:$0xff]   ;;  %v596_v2 = vcombine.low %v29_v46, %v29_v46 }
  0x12   :  { %v742_v52 = vld [vmem:[%s996_s1 + $0x160] ss:$16 sps:$4 sm:$0xff]   ;;  %v743_v53 = vld [vmem:[%s996_s1 + $0x168] ss:$16 sps:$4 sm:$0xff]   ;;  %v744_v54 = vld [vmem:[%s996_s1 + $0x144] ss:$16 sps:$4 sm:$0xff]  }
  0x13   :  { %430 = vmatpush1.bf16.msra.mxu0 %v694_v18  ;;  %471 = vmatpush1.bf16.msra.mxu1 %v695_v19  ;;  %v746_v55 = vld [vmem:[%s996_s1 + $0x14c] ss:$16 sps:$4 sm:$0xff]   ;;  %v748_v56 = vld [vmem:[%s996_s1 + $0x140] ss:$16 sps:$4 sm:$0xff]   ;;  %v749_v57 = vld [vmem:[%s996_s1 + $0x148] ss:$16 sps:$4 sm:$0xff]  }
  0x14   :  { %431 = vmatprep.subr.bf16.mxu0 %v696_v20  ;;  %472 = vmatprep.subr.bf16.mxu1 %v698_v21  ;;  %v750_v58 = vld [vmem:[%s996_s1 + $0x124] ss:$16 sps:$4 sm:$0xff]   ;;  %v752_v59 = vld [vmem:[%s996_s1 + $0x12c] ss:$16 sps:$4 sm:$0xff]   ;;  %v754_v60 = vld [vmem:[%s996_s1 + $0x120] ss:$16 sps:$4 sm:$0xff]  }
  0x15   :  { %453 = vmatprep.mubr.bf16.mxu0 %v597_v47  ;;  %494 = vmatprep.mubr.bf16.mxu1 %v597_v47  ;;  %v755_v61 = vld [vmem:[%s996_s1 + $0x128] ss:$16 sps:$4 sm:$0xff]   ;;  %v756_v62 = vld [vmem:[%s996_s1 + $0x104] ss:$16 sps:$4 sm:$0xff]   ;;  %v758_v63 = vld [vmem:[%s996_s1 + $0x10c] ss:$16 sps:$4 sm:$0xff]  }
  0x16   :  { %v760_v0 = vld [vmem:[%s996_s1 + $0x100] ss:$16 sps:$4 sm:$0xff]   ;;  %v761_v1 = vld [vmem:[%s996_s1 + $0x108] ss:$16 sps:$4 sm:$0xff]   ;;  %v522_v5 = vsub.s32 0, %v521_v4  ;;  %v530_v6 = vsub.s32 2, %v521_v4 }
  0x17   :  { %432 = vmatpush1.bf16.msra.mxu0 %v700_v22  ;;  %473 = vmatpush1.bf16.msra.mxu1 %v701_v23  ;;  %v518_v7 = vld [vmem:[%s998_s2] sm:$0xf]  ;;  %v526_v8 = vsub.s32 1, %v521_v4  ;;  %v534_v9 = vsub.s32 3, %v521_v4 }
  0x18   :  { %433 = vmatprep.subr.bf16.mxu0 %v702_v24  ;;  %474 = vmatprep.subr.bf16.mxu1 %v704_v25  ;;  %v544_v10 = vld [vmem:[%s999_s3] sm:$0xf]  ;;  %v523_v11 = vrot.slane %v518_v7, %v522_v5  ;;  %v531_v12 = vrot.slane %v518_v7, %v530_v6 }
  0x19   :  { %v549_v13 = vrot.slane %v544_v10, %v522_v5  ;;  %v557_v14 = vrot.slane %v544_v10, %v530_v6  ;;  %v527_v15 = vrot.slane %v518_v7, %v526_v8  ;;  %v535_v16 = vrot.slane %v518_v7, %v534_v9 }
  0x1a   :  { %v553_v21 = vrot.slane %v544_v10, %v526_v8  ;;  %v561_v22 = vrot.slane %v544_v10, %v534_v9 }
  0x1b   :  { %434 = vmatpush1.bf16.msra.mxu0 %v706_v26  ;;  %475 = vmatpush1.bf16.msra.mxu1 %v707_v27 }
  0x1c   :  { %435 = vmatprep.subr.bf16.mxu0 %v708_v28  ;;  %476 = vmatprep.subr.bf16.mxu1 %v710_v29 }
  0x1f   :  { %436 = vmatpush1.bf16.msra.mxu0 %v712_v30  ;;  %477 = vmatpush1.bf16.msra.mxu1 %v713_v31 }
  0x20   :  { %437 = vmatprep.subr.bf16.mxu0 %v714_v32  ;;  %478 = vmatprep.subr.bf16.mxu1 %v716_v33 }
  0x23   :  { %438 = vmatpush2.bf16.msra.mxu0 %v718_v34  ;;  %479 = vmatpush2.bf16.msra.mxu1 %v719_v35 }
  0x24   :  { %439 = vmatprep.subr.bf16.mxu0 %v720_v36  ;;  %480 = vmatprep.subr.bf16.mxu1 %v722_v37 }
  0x27   :  { %440 = vmatpush2.bf16.msra.mxu0 %v724_v38  ;;  %481 = vmatpush2.bf16.msra.mxu1 %v725_v39 }
  0x28   :  { %441 = vmatprep.subr.bf16.mxu0 %v726_v40  ;;  %482 = vmatprep.subr.bf16.mxu1 %v728_v41 }
  0x2b   :  { %442 = vmatpush2.bf16.msra.mxu0 %v730_v42  ;;  %483 = vmatpush2.bf16.msra.mxu1 %v731_v43 }
  0x2c   :  { %443 = vmatprep.subr.bf16.mxu0 %v732_v44  ;;  %484 = vmatprep.subr.bf16.mxu1 %v734_v45 }
  0x2f   :  { %444 = vmatpush2.bf16.msra.mxu0 %v736_v48  ;;  %485 = vmatpush2.bf16.msra.mxu1 %v737_v49 }
  0x30   :  { %445 = vmatprep.subr.bf16.mxu0 %v738_v50  ;;  %486 = vmatprep.subr.bf16.mxu1 %v740_v51 }
  0x33   :  { %446 = vmatpush2.bf16.msra.mxu0 %v742_v52  ;;  %487 = vmatpush2.bf16.msra.mxu1 %v743_v53 }
  0x34   :  { %447 = vmatprep.subr.bf16.mxu0 %v744_v54  ;;  %488 = vmatprep.subr.bf16.mxu1 %v746_v55 }
  0x37   :  { %448 = vmatpush2.bf16.msra.mxu0 %v748_v56  ;;  %489 = vmatpush2.bf16.msra.mxu1 %v749_v57 }
  0x38   :  { %449 = vmatprep.subr.bf16.mxu0 %v750_v58  ;;  %490 = vmatprep.subr.bf16.mxu1 %v752_v59 }
  0x3b   :  { %450 = vmatpush2.bf16.msra.mxu0 %v754_v60  ;;  %491 = vmatpush2.bf16.msra.mxu1 %v755_v61 }
  0x3c   :  { %451 = vmatprep.subr.bf16.mxu0 %v756_v62  ;;  %492 = vmatprep.subr.bf16.mxu1 %v758_v63 }
  0x3f   :  { %452 = vmatpush2.bf16.msra.mxu0 %v760_v0  ;;  %493 = vmatpush2.bf16.msra.mxu1 %v761_v1 }
  0x42   :  { %454 = vmatmul.mubr.bf16.vlgmr.msra.gmra.mxu0 %v596_v2  ;;  %495 = vmatmul.mubr.bf16.vlgmr.msra.gmra.mxu1 %v596_v2 }
 0x102   :  { %v455_v17 = vpop.f32.mrf.mxu0  ;;  %v496_v18 = vpop.f32.mrf.mxu1 }
 0x103   :  { %v540_v19 = vmul.f32 %v523_v11, %v455_v17  ;;  %v542_v20 = vmul.f32 %v531_v12, %v496_v18 }
 0x104   :  { %v457_v23 = vpop.f32.mrf.mxu0  ;;  %v498_v24 = vpop.f32.mrf.mxu1 }
 0x105   :  { %v566_v25 = vadd.f32 %v549_v13, %v540_v19  ;;  %v568_v26 = vadd.f32 %v557_v14, %v542_v20  ;;  %v541_v27 = vmul.f32 %v527_v15, %v457_v23  ;;  %v543_v28 = vmul.f32 %v535_v16, %v498_v24 }
 0x106   :  { %v459_v29 = vpop.f32.mrf.mxu0  ;;  %v500_v30 = vpop.f32.mrf.mxu1 }
 0x107   :  { %v567_v31 = vadd.f32 %v553_v21, %v541_v27  ;;  %v569_v32 = vadd.f32 %v561_v22, %v543_v28  ;;  %v570_v35 = vmax.f32 %v566_v25, 0.0  ;;  %v572_v36 = vmax.f32 %v568_v26, 0.0 }
 0x108   :  { %v460_v33 = vpop.f32.mrf.mxu0  ;;  %v501_v34 = vpop.f32.mrf.mxu1 }
 0x109   :  { %v571_v37 = vmax.f32 %v567_v31, 0.0  ;;  %v573_v38 = vmax.f32 %v569_v32, 0.0 }
 0x10b   :  { %v664_v39 = vpack.c.bf16 %v571_v37, %v570_v35  ;;  %v665_v40 = vpack.c.bf16 %v573_v38, %v572_v36 }
 0x10d   :  { %590 = vst [vmem:[%s1000_s4] sm:$0xff] %v664_v39  ;;  %591 = vst [vmem:[%s1000_s4 + $0x8] sm:$0xff] %v665_v40 }

// kernel: fer_cnn_forward.21
= control target key start
LH: loop header
LB: loop body
LE: loop exit
PB: predicated region body
PF: predicated region fallthrough
CT: control target
= control target key end

     0   :  { %s657_s1 = inlined_call_operand.vmem [shape: bf16[512,128], index: 1, kind: input, shape index: {}]   ;;  %s658_s0 = inlined_call_operand.vmem [shape: bf16[8,512], index: 0, kind: input, shape index: {}]   ;;  %s659_s2 = inlined_call_operand.vmem [shape: f32[1,128], index: 2, kind: input, shape index: {}]   ;;  %s660_s3 = inlined_call_operand.vmem [shape: f32[1,128], index: 3, kind: input, shape index: {}]   ;;  %s661_s4 = inlined_call_operand.vmem [shape: f32[8,128], index: 4, kind: output, shape index: {}]  }
   0x1   :  { %v485_v0 = vld [vmem:[%s657_s1 + $0x78] sm:$0xff]   ;;  %v489_v4 = vld [vmem:[%s657_s1 + $0x70] sm:$0xff]   ;;  %v493_v8 = vld [vmem:[%s657_s1 + $0x68] sm:$0xff]  }
   0x2   :  { %v486_v1 = vld [vmem:[%s657_s1 + $0xf8] sm:$0xff]   ;;  %441 = vmatprep.subr.bf16.mxu0 %v485_v0  ;;  %v490_v5 = vld [vmem:[%s657_s1 + $0xf0] sm:$0xff]   ;;  %v494_v9 = vld [vmem:[%s657_s1 + $0xe8] sm:$0xff]  }
   0x3   :  { %v487_v2 = vld [vmem:[%s657_s1 + $0x38] sm:$0xff]   ;;  %463 = vmatprep.subr.bf16.mxu1 %v486_v1  ;;  %v491_v6 = vld [vmem:[%s657_s1 + $0x30] sm:$0xff]   ;;  %v495_v10 = vld [vmem:[%s657_s1 + $0x28] sm:$0xff]  }
   0x4   :  { %v488_v3 = vld [vmem:[%s657_s1 + $0xb8] sm:$0xff]   ;;  %442 = vmatpush3.bf16.msra.mxu0 %v487_v2  ;;  %v492_v7 = vld [vmem:[%s657_s1 + $0xb0] sm:$0xff]   ;;  %v496_v11 = vld [vmem:[%s657_s1 + $0xa8] sm:$0xff]  }
   0x5   :  { %464 = vmatpush3.bf16.msra.mxu1 %v488_v3  ;;  %443 = vmatprep.subr.bf16.mxu0 %v489_v4  ;;  %v497_v12 = vld [vmem:[%s657_s1 + $0x60] sm:$0xff]   ;;  %v501_v16 = vld [vmem:[%s657_s1 + $0x58] sm:$0xff]   ;;  %v505_v20 = vld [vmem:[%s657_s1 + $0x50] sm:$0xff]  }
   0x6   :  { %465 = vmatprep.subr.bf16.mxu1 %v490_v5  ;;  %v498_v13 = vld [vmem:[%s657_s1 + $0xe0] sm:$0xff]   ;;  %v502_v17 = vld [vmem:[%s657_s1 + $0xd8] sm:$0xff]   ;;  %v506_v21 = vld [vmem:[%s657_s1 + $0xd0] sm:$0xff]  }
   0x7   :  { %v499_v14 = vld [vmem:[%s657_s1 + $0x20] sm:$0xff]   ;;  %v503_v18 = vld [vmem:[%s657_s1 + $0x18] sm:$0xff]   ;;  %v507_v22 = vld [vmem:[%s657_s1 + $0x10] sm:$0xff]  }
   0x8   :  { %444 = vmatpush3.bf16.msra.mxu0 %v491_v6  ;;  %v500_v15 = vld [vmem:[%s657_s1 + $0xa0] sm:$0xff]   ;;  %v504_v19 = vld [vmem:[%s657_s1 + $0x98] sm:$0xff]   ;;  %v508_v23 = vld [vmem:[%s657_s1 + $0x90] sm:$0xff]  }
   0x9   :  { %466 = vmatpush3.bf16.msra.mxu1 %v492_v7  ;;  %445 = vmatprep.subr.bf16.mxu0 %v493_v8  ;;  %v509_v24 = vld [vmem:[%s657_s1 + $0x48] sm:$0xff]   ;;  %v513_v28 = vld [vmem:[%s657_s1 + $0x40] sm:$0xff]  }
   0xa   :  { %467 = vmatprep.subr.bf16.mxu1 %v494_v9  ;;  %v510_v25 = vld [vmem:[%s657_s1 + $0xc8] sm:$0xff]   ;;  %v514_v29 = vld [vmem:[%s657_s1 + $0xc0] sm:$0xff]  }
   0xb   :  { %v511_v26 = vld [vmem:[%s657_s1 + $0x8] sm:$0xff]   ;;  %v515_v30 = vld [vmem:[%s657_s1] sm:$0xff]  }
   0xc   :  { %446 = vmatpush3.bf16.msra.mxu0 %v495_v10  ;;  %v512_v27 = vld [vmem:[%s657_s1 + $0x88] sm:$0xff]   ;;  %v516_v31 = vld [vmem:[%s657_s1 + $0x80] sm:$0xff]  }
   0xd   :  { %468 = vmatpush3.bf16.msra.mxu1 %v496_v11  ;;  %447 = vmatprep.subr.bf16.mxu0 %v497_v12  ;;  %v24_v32 = vld [vmem:[%s658_s0] sm:$0xff]  ;;  %v25_v33 = vld [vmem:[%s658_s0 + $0x8] sm:$0xff] }
   0xe   :  { %469 = vmatprep.subr.bf16.mxu1 %v498_v13  ;;  %v403_v34 = vcombine.low %v24_v32, %v24_v32  ;;  %v404_v35 = vcombine.high %v24_v32, %v24_v32  ;;  %v405_v36 = vcombine.low %v25_v33, %v25_v33  ;;  %v406_v37 = vcombine.high %v25_v33, %v25_v33  ;;  %v439_v44 = vld [vmem:[%s659_s2] ss:$0 sm:$0xff] }
   0xf   :  { %v440_v48 = vld [vmem:[%s660_s3] ss:$0 sm:$0xff] }
  0x10   :  { %448 = vmatpush3.bf16.msra.mxu0 %v499_v14  ;;  %328 = vmatprep.mubr.bf16.mxu0 %v404_v35 }
  0x11   :  { %470 = vmatpush3.bf16.msra.mxu1 %v500_v15  ;;  %449 = vmatprep.subr.bf16.mxu0 %v501_v16 }
  0x12   :  { %471 = vmatprep.subr.bf16.mxu1 %v502_v17  ;;  %368 = vmatprep.mubr.bf16.mxu1 %v406_v37 }
  0x14   :  { %450 = vmatpush3.bf16.msra.mxu0 %v503_v18 }
  0x15   :  { %472 = vmatpush3.bf16.msra.mxu1 %v504_v19  ;;  %451 = vmatprep.subr.bf16.mxu0 %v505_v20 }
  0x16   :  { %473 = vmatprep.subr.bf16.mxu1 %v506_v21 }
  0x18   :  { %452 = vmatpush3.bf16.msra.mxu0 %v507_v22 }
  0x19   :  { %474 = vmatpush3.bf16.msra.mxu1 %v508_v23  ;;  %453 = vmatprep.subr.bf16.mxu0 %v509_v24 }
  0x1a   :  { %475 = vmatprep.subr.bf16.mxu1 %v510_v25 }
  0x1c   :  { %454 = vmatpush3.bf16.msra.mxu0 %v511_v26 }
  0x1d   :  { %476 = vmatpush3.bf16.msra.mxu1 %v512_v27  ;;  %455 = vmatprep.subr.bf16.mxu0 %v513_v28 }
  0x1e   :  { %477 = vmatprep.subr.bf16.mxu1 %v514_v29 }
  0x20   :  { %456 = vmatpush3.bf16.msra.mxu0 %v515_v30 }
  0x21   :  { %478 = vmatpush3.bf16.msra.mxu1 %v516_v31 }
  0x23   :  { %329 = vmatmul.mubr.bf16.vlgmr.msra.gmra.mxu0 %v403_v34 }
  0x24   :  { %369 = vmatmul.mubr.bf16.vlgmr.msra.gmra.mxu1 %v405_v36 }
  0xe3   :  { %v457_v38 = vpop.f32.mrf.mxu0 }
  0xe4   :  { %v479_v39 = vpop.f32.mrf.mxu1 }
  0xe5   :  { %v458_v40 = vpop.f32.mrf.mxu0 }
  0xe6   :  { %v480_v41 = vpop.f32.mrf.mxu1  ;;  %v459_v42 = vadd.f32 %v458_v40, %v457_v38 }
  0xe7   :  { %v481_v43 = vadd.f32 %v480_v41, %v479_v39  ;;  %v460_v45 = vpop.f32.mrf.mxu0 }
  0xe8   :  { %v482_v46 = vpop.f32.mrf.mxu1 }
  0xe9   :  { %v371_v47 = vadd.f32 %v481_v43, %v459_v42  ;;  %v461_v49 = vpop.f32.mrf.mxu0 }
  0xea   :  { %v483_v50 = vpop.f32.mrf.mxu1 }
  0xeb   :  { %v389_v51 = vmul.f32 %v439_v44, %v371_v47 }
  0xed   :  { %v397_v52 = vadd.f32 %v440_v48, %v389_v51 }
  0xef   :  { %398 = vst [vmem:[%s661_s4] sm:$0xff] %v397_v52 }

</bundles_post_ra>
